<compile_context>
chip_gen: v6e
topology: v6e:2x2x1
jax: 0.10.0
libtpu: 0.0.40
codegen_flags: <defaults>
</compile_context>

<pallas_src>
import functools
import numpy as np
import jax
import jax.numpy as jnp
from jax.experimental import pallas as pl
from jax.experimental.pallas import tpu as pltpu

HP = jax.lax.Precision.HIGHEST      # reference-side precision only


# ---------------------------------------------------------------------------
# in-kernel math helpers (elementwise / row reductions only)
# ---------------------------------------------------------------------------
def _layer_norm(x, g, b, eps=1e-5):
    mu = jnp.mean(x, axis=-1, keepdims=True)
    xc = x - mu
    var = jnp.mean(xc * xc, axis=-1, keepdims=True)
    return xc * jax.lax.rsqrt(var + np.float32(eps)) * g + b


def _gelu_exact(x):
    # exact GELU = 0.5*x*(1+erf(x/sqrt(2))); erf via Abramowitz & Stegun 7.1.26.
    z = x * np.float32(0.7071067811865476)
    s = jnp.where(z >= 0.0, np.float32(1.0), np.float32(-1.0))
    a = jnp.abs(z)
    t = 1.0 / (1.0 + np.float32(0.3275911) * a)
    poly = t * (np.float32(0.254829592)
            + t * (np.float32(-0.284496736)
            + t * (np.float32(1.421413741)
            + t * (np.float32(-1.453152027)
            + t * np.float32(1.061405429)))))
    erf = s * (1.0 - poly * jnp.exp(-a * a))
    return 0.5 * x * (1.0 + erf)


# ---------------------------------------------------------------------------
# the kernel: one RoPETransformerBlock forward for a block of `bblk` batches.
# ---------------------------------------------------------------------------
def _block_kernel(
    x_ref, cos_ref, sin_ref, rrot_ref, ssum_ref, expand_ref, collapse_ref,
    ln1g_ref, ln1b_ref, wq_ref, wk_ref, wv_ref, bq_ref, bk_ref, bv_ref,
    wo_ref, bo_ref, ln2g_ref, ln2b_ref, wm1_ref, bm1_ref, wm2_ref, bm2_ref,
    o_ref, vbuf,
    *, num_heads, head_dim, seq_len, bblk):
    H, hd, T = num_heads, head_dim, seq_len
    R = bblk * T
    scale = np.float32(hd ** -0.5)
    cdtype = wq_ref.dtype              # bf16 or f32 compute dtype for weight matmuls

    def wdot(a, w_ref, b_ref):         # weight matmul with f32 accumulation
        return (jnp.dot(a.astype(cdtype), w_ref[...],
                        preferred_element_type=jnp.float32) + b_ref[...])

    x = x_ref[...]                                                    # (R, D) f32

    # ---------------- attention sub-block ----------------
    h1 = _layer_norm(x, ln1g_ref[...], ln1b_ref[...])
    q = wdot(h1, wq_ref, bq_ref)       # de-interleaved per-head feature order
    k = wdot(h1, wk_ref, bk_ref)
    v = wdot(h1, wv_ref, bv_ref)

    # RoPE: q <- q*cos + rotate_half(q)*sin.  rotate_half is a signed permutation,
    # applied as one shared (D, D) matmul on the otherwise-idle MXU.
    cosm, sinm, rrot = cos_ref[...], sin_ref[...], rrot_ref[...]
    q = q * cosm + jnp.dot(q, rrot, preferred_element_type=jnp.float32) * sinm
    k = k * cosm + jnp.dot(k, rrot, preferred_element_type=jnp.float32) * sinm

    # Per-timestep attention over heads (this module's q @ k^T mixes heads, not time);
    # all contractions are MXU matmuls against small 0/1 selection matrices.
    ssum, expand, collapse = ssum_ref[...], expand_ref[...], collapse_ref[...]
    for h in range(H):
        q_h = q[:, h * hd:(h + 1) * hd]                               # (R, hd)
        q_rep = jnp.concatenate([q_h] * H, axis=1)                    # (R, D)
        s = jnp.dot(q_rep * k, ssum,
                    preferred_element_type=jnp.float32) * scale       # (R, H) scores
        m = jnp.max(s, axis=-1, keepdims=True)
        e = jnp.exp(s - m)
        aw = e * pl.reciprocal(jnp.sum(e, axis=-1, keepdims=True), approx=True)
        awx = jnp.dot(aw, expand, preferred_element_type=jnp.float32)    # (R, D)
        out_h = jnp.dot(awx * v, collapse,
                        preferred_element_type=jnp.float32)              # (R, hd)
        # stash head-h rows in (batch, head, time) row order for the scramble below
        for b in range(bblk):
            vbuf[pl.ds(b * H * T + h * T, T), :] = out_h[b * T:(b + 1) * T, :]

    # out.transpose(1,2).reshape(B,T,D): with vbuf rows ordered (b, h_old, t_old),
    # output row r / lane-block h_new reads vbuf row H*r + h_new, i.e. one stride-H
    # sublane gather per lane block -- no dense TxT selection matmuls.
    y = jnp.concatenate(
        [vbuf[pl.ds(h, R, stride=H), :] for h in range(H)], axis=1)   # (R, D)
    x = x + wdot(y, wo_ref, bo_ref)

    # ---------------- MLP sub-block ----------------
    h2 = _layer_norm(x, ln2g_ref[...], ln2b_ref[...])
    u = _gelu_exact(wdot(h2, wm1_ref, bm1_ref))
    x = x + wdot(u, wm2_ref, bm2_ref)
    # TODO(synk): nn.Dropout is the identity in eval mode; train-mode dropout not implemented.

    o_ref[...] = x


# ---------------------------------------------------------------------------
# host-side wrapper: parameter folding, constant tables, pallas_call plumbing.
# ---------------------------------------------------------------------------
def pallas_forward(x, params, num_heads, *, param_dtype=jnp.bfloat16, block_rows=256):
    """RoPETransformerBlock forward via Pallas.  block_rows is the target number of
    packed rows (bblk*T) per grid step: ~256 saturates the v6e/v7x MXU, ~128 on v5e."""
    x = jnp.asarray(x, jnp.float32)
    B, T, D = x.shape
    H = num_heads
    hd = D // H
    hd2 = hd // 2

    bblk = max(1, min(B, block_rows // T))
    while B % bblk:
        bblk -= 1
    R = bblk * T

    # --- RoPE tables in de-interleaved order, one row per packed row (t = r % T) ---
    pos = np.arange(T, dtype=np.float32)[:, None]
    dim_idx = np.arange(0, hd, 2, dtype=np.float32)
    freqs = 1.0 / 10000.0 ** (dim_idx / hd)
    phase = pos * freqs                                               # (T, hd2)
    cos_h = np.concatenate([np.cos(phase), np.cos(phase)], axis=1)    # (T, hd)
    sin_h = np.concatenate([np.sin(phase), np.sin(phase)], axis=1)
    cosR = np.tile(np.tile(cos_h, (1, H)), (bblk, 1)).astype(np.float32)   # (R, D)
    sinR = np.tile(np.tile(sin_h, (1, H)), (bblk, 1)).astype(np.float32)

    # de-interleave permutation (even features first, per head), folded into Wq/Wk
    perm = np.zeros(D, np.int64)
    for h in range(H):
        for p in range(hd):
            perm[h * hd + p] = h * hd + (2 * p if p < hd2 else 2 * (p - hd2) + 1)

    # rotate-half as a shared signed permutation matrix (exact)
    rrot = np.zeros((D, D), np.float32)
    for h in range(H):
        for p in range(hd):
            if p < hd2:
                rrot[h * hd + p + hd2, h * hd + p] = -1.0
            else:
                rrot[h * hd + p - hd2, h * hd + p] = 1.0

    # head-structured 0/1 matrices for score / weighted-V matmuls
    ssum = np.zeros((D, H), np.float32)        # sum head-g lane block -> column g
    expand = np.zeros((H, D), np.float32)      # broadcast column g -> head-g block
    collapse = np.zeros((D, hd), np.float32)   # sum over heads into hd lanes
    for g in range(H):
        for p in range(hd):
            ssum[g * hd + p, g] = 1.0
            expand[g, g * hd + p] = 1.0
            collapse[g * hd + p, p] = 1.0

    wqkv = np.asarray(params["w_qkv"], np.float32)
    bqkv = np.asarray(params["b_qkv"], np.float32)
    wq = wqkv[:, 0 * D:1 * D][:, perm]; bq = bqkv[0 * D:1 * D][perm]
    wk = wqkv[:, 1 * D:2 * D][:, perm]; bk = bqkv[1 * D:2 * D][perm]
    wv = wqkv[:, 2 * D:3 * D];          bv = bqkv[2 * D:3 * D]

    f32 = jnp.float32
    args = [
        x.reshape(B * T, D),
        jnp.asarray(cosR), jnp.asarray(sinR), jnp.asarray(rrot),
        jnp.asarray(ssum), jnp.asarray(expand), jnp.asarray(collapse),
        params["ln1_g"].astype(f32)[None, :], params["ln1_b"].astype(f32)[None, :],
        jnp.asarray(wq, param_dtype), jnp.asarray(wk, param_dtype),
        jnp.asarray(wv, param_dtype),
        jnp.asarray(bq[None, :]), jnp.asarray(bk[None, :]), jnp.asarray(bv[None, :]),
        params["w_o"].astype(param_dtype), params["b_o"].astype(f32)[None, :],
        params["ln2_g"].astype(f32)[None, :], params["ln2_b"].astype(f32)[None, :],
        params["w_m1"].astype(param_dtype), params["b_m1"].astype(f32)[None, :],
        params["w_m2"].astype(param_dtype), params["b_m2"].astype(f32)[None, :],
    ]

    def full_spec(shape):
        nd = len(shape)
        return pl.BlockSpec(shape, lambda i, _nd=nd: (0,) * _nd)

    in_specs = [pl.BlockSpec((R, D), lambda i: (i, 0))]
    in_specs += [full_spec(tuple(a.shape)) for a in args[1:]]

    kernel = functools.partial(_block_kernel, num_heads=H, head_dim=hd,
                               seq_len=T, bblk=bblk)
    out = pl.pallas_call(
        kernel,
        out_shape=jax.ShapeDtypeStruct((B * T, D), jnp.float32),
        grid_spec=pltpu.PrefetchScalarGridSpec(
            num_scalar_prefetch=0,
            grid=(B // bblk,),
            in_specs=in_specs,
            out_specs=pl.BlockSpec((R, D), lambda i: (i, 0)),
            scratch_shapes=[pltpu.VMEM((H * R, hd), jnp.float32)]),
        compiler_params=pltpu.CompilerParams(dimension_semantics=("parallel",)),
    )(*args)
    return out.reshape(B, T, D)


# ---------------------------------------------------------------------------
# pure-JAX reference mirroring the PyTorch forward op-by-op
# ---------------------------------------------------------------------------
def ref_forward(x, params, num_heads):
    B, T, D = x.shape
    hd = D // num_heads
    pos = jnp.arange(T, dtype=jnp.float32)[:, None]
    dim_idx = jnp.arange(0, hd, 2, dtype=jnp.float32)
    freqs = 1.0 / (10000.0 ** (dim_idx / hd))
    phase = pos * freqs
    sin = jnp.sin(phase)[None, :, None, :]
    cos = jnp.cos(phase)[None, :, None, :]

    def rope(t):
        x1, x2 = t[..., 0::2], t[..., 1::2]
        return jnp.concatenate([x1 * cos - x2 * sin, x1 * sin + x2 * cos], axis=-1)

    def ln(t, g, b):
        mu = jnp.mean(t, axis=-1, keepdims=True)
        v = jnp.mean((t - mu) ** 2, axis=-1, keepdims=True)
        return (t - mu) / jnp.sqrt(v + 1e-5) * g + b

    h = x
    xn = ln(h, params["ln1_g"], params["ln1_b"])
    qkv = (jnp.dot(xn, params["w_qkv"], precision=HP) + params["b_qkv"]
           ).reshape(B, T, 3, num_heads, hd)
    q, k, v = qkv[:, :, 0], qkv[:, :, 1], qkv[:, :, 2]
    q, k = rope(q), rope(k)
    scores = jnp.einsum("bthd,btgd->bthg", q, k, precision=HP) * (hd ** -0.5)
    aw = jax.nn.softmax(scores, axis=-1)
    o = jnp.einsum("bthg,btgd->bthd", aw, v, precision=HP)
    o = jnp.transpose(o, (0, 2, 1, 3)).reshape(B, T, D)
    h = h + jnp.dot(o, params["w_o"], precision=HP) + params["b_o"]
    xn2 = ln(h, params["ln2_g"], params["ln2_b"])
    u = jax.nn.gelu(jnp.dot(xn2, params["w_m1"], precision=HP) + params["b_m1"],
                    approximate=False)
    return h + jnp.dot(u, params["w_m2"], precision=HP) + params["b_m2"]


def init_params(key, d_model, num_heads):
    ks = jax.random.split(key, 8)

    def dense(k, fin, fout):
        kw, kb = jax.random.split(k)
        w = jax.random.normal(kw, (fin, fout), jnp.float32) / np.sqrt(fin)
        b = 0.02 * jax.random.normal(kb, (fout,), jnp.float32)
        return w, b

    w_qkv, b_qkv = dense(ks[0], d_model, 3 * d_model)
    w_o, b_o = dense(ks[1], d_model, d_model)
    w_m1, b_m1 = dense(ks[2], d_model, 4 * d_model)
    w_m2, b_m2 = dense(ks[3], 4 * d_model, d_model)
    return dict(
        w_qkv=w_qkv, b_qkv=b_qkv, w_o=w_o, b_o=b_o,
        w_m1=w_m1, b_m1=b_m1, w_m2=w_m2, b_m2=b_m2,
        ln1_g=1.0 + 0.05 * jax.random.normal(ks[4], (d_model,), jnp.float32),
        ln1_b=0.05 * jax.random.normal(ks[5], (d_model,), jnp.float32),
        ln2_g=1.0 + 0.05 * jax.random.normal(ks[6], (d_model,), jnp.float32),
        ln2_b=0.05 * jax.random.normal(ks[7], (d_model,), jnp.float32))


def _check(out, ref, atol, rtol, name):
    out = np.asarray(out)
    ref = np.asarray(ref)
    if not np.allclose(out, ref, atol=atol, rtol=rtol):
        diff = float(np.max(np.abs(out - ref)))
        raise AssertionError(f"{name} Pallas kernel mismatch vs reference "
                             f"(max abs diff {diff})")


if __name__ == "__main__":
    B, T, D, H = 32, 8, 32, 4            # batch, seq, d_model, heads (head_dim = 8)

    key = jax.random.PRNGKey(0)
    kp, kx = jax.random.split(key)
    params = init_params(kp, D, H)
    x = jax.random.normal(kx, (B, T, D), jnp.float32)

    ref = jax.block_until_ready(ref_forward(x, params, H))

    # block_rows=128 keeps 2 grid steps on this tiny demo (so both v7x TensorCores get
    # work) while still packing 16 batch elements (128 rows) into every matmul.
    out_f32 = jax.block_until_ready(
        pallas_forward(x, params, H, param_dtype=jnp.float32, block_rows=128))
    _check(out_f32, ref, atol=1e-2, rtol=1e-2, name="f32")

    out_bf16 = jax.block_until_ready(
        pallas_forward(x, params, H, param_dtype=jnp.bfloat16, block_rows=128))
    _check(out_bf16, ref, atol=5e-2, rtol=5e-2, name="bf16")

    print("KERNEL_OK")
</pallas_src>

<mosaic_0001>
module attributes {stable_mosaic.version = 11 : i64} {
  func.func @_block_kernel(%arg0: i32, %arg1: memref<128x32xf32, #tpu.memory_space<vmem>>, %arg2: memref<128x32xf32, #tpu.memory_space<vmem>>, %arg3: memref<128x32xf32, #tpu.memory_space<vmem>>, %arg4: memref<32x32xf32, #tpu.memory_space<vmem>>, %arg5: memref<32x4xf32, #tpu.memory_space<vmem>>, %arg6: memref<4x32xf32, #tpu.memory_space<vmem>>, %arg7: memref<32x8xf32, #tpu.memory_space<vmem>>, %arg8: memref<1x32xf32, #tpu.memory_space<vmem>>, %arg9: memref<1x32xf32, #tpu.memory_space<vmem>>, %arg10: memref<32x32xf32, #tpu.memory_space<vmem>>, %arg11: memref<32x32xf32, #tpu.memory_space<vmem>>, %arg12: memref<32x32xf32, #tpu.memory_space<vmem>>, %arg13: memref<1x32xf32, #tpu.memory_space<vmem>>, %arg14: memref<1x32xf32, #tpu.memory_space<vmem>>, %arg15: memref<1x32xf32, #tpu.memory_space<vmem>>, %arg16: memref<32x32xf32, #tpu.memory_space<vmem>>, %arg17: memref<1x32xf32, #tpu.memory_space<vmem>>, %arg18: memref<1x32xf32, #tpu.memory_space<vmem>>, %arg19: memref<1x32xf32, #tpu.memory_space<vmem>>, %arg20: memref<32x128xf32, #tpu.memory_space<vmem>>, %arg21: memref<1x128xf32, #tpu.memory_space<vmem>>, %arg22: memref<128x32xf32, #tpu.memory_space<vmem>>, %arg23: memref<1x32xf32, #tpu.memory_space<vmem>>, %arg24: memref<128x32xf32, #tpu.memory_space<vmem>>, %arg25: memref<512x8xf32, #tpu.memory_space<vmem>>) attributes {dimension_semantics = [#tpu.dimension_semantics<parallel>], iteration_bounds = array<i64: 2>, scalar_prefetch = 0 : i64, scratch_operands = 1 : i64, tpu.core_type = #tpu.core_type<tc>, window_params = [{transform_indices = @transform_0, window_bounds = array<i64: 128, 32>}, {pipeline_mode = #tpu.pipeline_mode<synchronous>, transform_indices = @transform_1, window_bounds = array<i64: 128, 32>}, {pipeline_mode = #tpu.pipeline_mode<synchronous>, transform_indices = @transform_2, window_bounds = array<i64: 128, 32>}, {pipeline_mode = #tpu.pipeline_mode<synchronous>, transform_indices = @transform_3, window_bounds = array<i64: 32, 32>}, {pipeline_mode = #tpu.pipeline_mode<synchronous>, transform_indices = @transform_4, window_bounds = array<i64: 32, 4>}, {pipeline_mode = #tpu.pipeline_mode<synchronous>, transform_indices = @transform_5, window_bounds = array<i64: 4, 32>}, {pipeline_mode = #tpu.pipeline_mode<synchronous>, transform_indices = @transform_6, window_bounds = array<i64: 32, 8>}, {pipeline_mode = #tpu.pipeline_mode<synchronous>, transform_indices = @transform_7, window_bounds = array<i64: 1, 32>}, {pipeline_mode = #tpu.pipeline_mode<synchronous>, transform_indices = @transform_8, window_bounds = array<i64: 1, 32>}, {pipeline_mode = #tpu.pipeline_mode<synchronous>, transform_indices = @transform_9, window_bounds = array<i64: 32, 32>}, {pipeline_mode = #tpu.pipeline_mode<synchronous>, transform_indices = @transform_10, window_bounds = array<i64: 32, 32>}, {pipeline_mode = #tpu.pipeline_mode<synchronous>, transform_indices = @transform_11, window_bounds = array<i64: 32, 32>}, {pipeline_mode = #tpu.pipeline_mode<synchronous>, transform_indices = @transform_12, window_bounds = array<i64: 1, 32>}, {pipeline_mode = #tpu.pipeline_mode<synchronous>, transform_indices = @transform_13, window_bounds = array<i64: 1, 32>}, {pipeline_mode = #tpu.pipeline_mode<synchronous>, transform_indices = @transform_14, window_bounds = array<i64: 1, 32>}, {pipeline_mode = #tpu.pipeline_mode<synchronous>, transform_indices = @transform_15, window_bounds = array<i64: 32, 32>}, {pipeline_mode = #tpu.pipeline_mode<synchronous>, transform_indices = @transform_16, window_bounds = array<i64: 1, 32>}, {pipeline_mode = #tpu.pipeline_mode<synchronous>, transform_indices = @transform_17, window_bounds = array<i64: 1, 32>}, {pipeline_mode = #tpu.pipeline_mode<synchronous>, transform_indices = @transform_18, window_bounds = array<i64: 1, 32>}, {pipeline_mode = #tpu.pipeline_mode<synchronous>, transform_indices = @transform_19, window_bounds = array<i64: 32, 128>}, {pipeline_mode = #tpu.pipeline_mode<synchronous>, transform_indices = @transform_20, window_bounds = array<i64: 1, 128>}, {pipeline_mode = #tpu.pipeline_mode<synchronous>, transform_indices = @transform_21, window_bounds = array<i64: 128, 32>}, {pipeline_mode = #tpu.pipeline_mode<synchronous>, transform_indices = @transform_22, window_bounds = array<i64: 1, 32>}, {transform_indices = @transform_23, window_bounds = array<i64: 128, 32>}]} {
    %c0 = arith.constant 0 : index
    %c0_0 = arith.constant 0 : index
    %0 = vector.load %arg1[%c0, %c0_0] : memref<128x32xf32, #tpu.memory_space<vmem>>, vector<128x32xf32>
    %c0_1 = arith.constant 0 : index
    %c0_2 = arith.constant 0 : index
    %1 = vector.load %arg8[%c0_1, %c0_2] : memref<1x32xf32, #tpu.memory_space<vmem>>, vector<1x32xf32>
    %c0_3 = arith.constant 0 : index
    %c0_4 = arith.constant 0 : index
    %2 = vector.load %arg9[%c0_3, %c0_4] : memref<1x32xf32, #tpu.memory_space<vmem>>, vector<1x32xf32>
    %cst = arith.constant dense<0.000000e+00> : vector<128xf32>
    %3 = vector.multi_reduction <add>, %0, %cst [1] : vector<128x32xf32> to vector<128xf32>
    %4 = vector.shape_cast %3 : vector<128xf32> to vector<128x1xf32>
    %cst_5 = arith.constant 3.200000e+01 : f32
    %5 = vector.broadcast %cst_5 : f32 to vector<128x1xf32>
    %6 = arith.divf %4, %5 : vector<128x1xf32>
    %7 = vector.broadcast %6 : vector<128x1xf32> to vector<128x32xf32>
    %8 = arith.subf %0, %7 : vector<128x32xf32>
    %9 = arith.mulf %8, %8 : vector<128x32xf32>
    %cst_6 = arith.constant dense<0.000000e+00> : vector<128xf32>
    %10 = vector.multi_reduction <add>, %9, %cst_6 [1] : vector<128x32xf32> to vector<128xf32>
    %11 = vector.shape_cast %10 : vector<128xf32> to vector<128x1xf32>
    %cst_7 = arith.constant 3.200000e+01 : f32
    %12 = vector.broadcast %cst_7 : f32 to vector<128x1xf32>
    %13 = arith.divf %11, %12 : vector<128x1xf32>
    %cst_8 = arith.constant 9.99999974E-6 : f32
    %14 = vector.broadcast %cst_8 : f32 to vector<128x1xf32>
    %15 = arith.addf %13, %14 : vector<128x1xf32>
    %16 = math.rsqrt %15 : vector<128x1xf32>
    %17 = vector.broadcast %16 : vector<128x1xf32> to vector<128x32xf32>
    %18 = arith.mulf %8, %17 : vector<128x32xf32>
    %19 = vector.broadcast %1 : vector<1x32xf32> to vector<128x32xf32>
    %20 = arith.mulf %18, %19 : vector<128x32xf32>
    %21 = vector.broadcast %2 : vector<1x32xf32> to vector<128x32xf32>
    %22 = arith.addf %20, %21 : vector<128x32xf32>
    %c0_9 = arith.constant 0 : index
    %c0_10 = arith.constant 0 : index
    %23 = vector.load %arg10[%c0_9, %c0_10] : memref<32x32xf32, #tpu.memory_space<vmem>>, vector<32x32xf32>
    %cst_11 = arith.constant dense<0.000000e+00> : vector<128x32xf32>
    %24 = tpu.matmul %22, %23, %cst_11 {dimension_numbers = #tpu.dot_dimension_numbers<[1], [0], [0], [1], [0, 0, 1, 1], [], []>} : vector<128x32xf32>, vector<32x32xf32>, vector<128x32xf32> -> vector<128x32xf32>
    %c0_12 = arith.constant 0 : index
    %c0_13 = arith.constant 0 : index
    %25 = vector.load %arg13[%c0_12, %c0_13] : memref<1x32xf32, #tpu.memory_space<vmem>>, vector<1x32xf32>
    %26 = vector.broadcast %25 : vector<1x32xf32> to vector<128x32xf32>
    %27 = arith.addf %24, %26 : vector<128x32xf32>
    %c0_14 = arith.constant 0 : index
    %c0_15 = arith.constant 0 : index
    %28 = vector.load %arg11[%c0_14, %c0_15] : memref<32x32xf32, #tpu.memory_space<vmem>>, vector<32x32xf32>
    %cst_16 = arith.constant dense<0.000000e+00> : vector<128x32xf32>
    %29 = tpu.matmul %22, %28, %cst_16 {dimension_numbers = #tpu.dot_dimension_numbers<[1], [0], [0], [1], [0, 0, 1, 1], [], []>} : vector<128x32xf32>, vector<32x32xf32>, vector<128x32xf32> -> vector<128x32xf32>
    %c0_17 = arith.constant 0 : index
    %c0_18 = arith.constant 0 : index
    %30 = vector.load %arg14[%c0_17, %c0_18] : memref<1x32xf32, #tpu.memory_space<vmem>>, vector<1x32xf32>
    %31 = vector.broadcast %30 : vector<1x32xf32> to vector<128x32xf32>
    %32 = arith.addf %29, %31 : vector<128x32xf32>
    %c0_19 = arith.constant 0 : index
    %c0_20 = arith.constant 0 : index
    %33 = vector.load %arg12[%c0_19, %c0_20] : memref<32x32xf32, #tpu.memory_space<vmem>>, vector<32x32xf32>
    %cst_21 = arith.constant dense<0.000000e+00> : vector<128x32xf32>
    %34 = tpu.matmul %22, %33, %cst_21 {dimension_numbers = #tpu.dot_dimension_numbers<[1], [0], [0], [1], [0, 0, 1, 1], [], []>} : vector<128x32xf32>, vector<32x32xf32>, vector<128x32xf32> -> vector<128x32xf32>
    %c0_22 = arith.constant 0 : index
    %c0_23 = arith.constant 0 : index
    %35 = vector.load %arg15[%c0_22, %c0_23] : memref<1x32xf32, #tpu.memory_space<vmem>>, vector<1x32xf32>
    %36 = vector.broadcast %35 : vector<1x32xf32> to vector<128x32xf32>
    %37 = arith.addf %34, %36 : vector<128x32xf32>
    %c0_24 = arith.constant 0 : index
    %c0_25 = arith.constant 0 : index
    %38 = vector.load %arg2[%c0_24, %c0_25] : memref<128x32xf32, #tpu.memory_space<vmem>>, vector<128x32xf32>
    %c0_26 = arith.constant 0 : index
    %c0_27 = arith.constant 0 : index
    %39 = vector.load %arg3[%c0_26, %c0_27] : memref<128x32xf32, #tpu.memory_space<vmem>>, vector<128x32xf32>
    %c0_28 = arith.constant 0 : index
    %c0_29 = arith.constant 0 : index
    %40 = vector.load %arg4[%c0_28, %c0_29] : memref<32x32xf32, #tpu.memory_space<vmem>>, vector<32x32xf32>
    %41 = arith.mulf %27, %38 : vector<128x32xf32>
    %cst_30 = arith.constant dense<0.000000e+00> : vector<128x32xf32>
    %42 = tpu.matmul %27, %40, %cst_30 {dimension_numbers = #tpu.dot_dimension_numbers<[1], [0], [0], [1], [0, 0, 1, 1], [], []>} : vector<128x32xf32>, vector<32x32xf32>, vector<128x32xf32> -> vector<128x32xf32>
    %43 = arith.mulf %42, %39 : vector<128x32xf32>
    %44 = arith.addf %41, %43 : vector<128x32xf32>
    %45 = arith.mulf %32, %38 : vector<128x32xf32>
    %cst_31 = arith.constant dense<0.000000e+00> : vector<128x32xf32>
    %46 = tpu.matmul %32, %40, %cst_31 {dimension_numbers = #tpu.dot_dimension_numbers<[1], [0], [0], [1], [0, 0, 1, 1], [], []>} : vector<128x32xf32>, vector<32x32xf32>, vector<128x32xf32> -> vector<128x32xf32>
    %47 = arith.mulf %46, %39 : vector<128x32xf32>
    %48 = arith.addf %45, %47 : vector<128x32xf32>
    %c0_32 = arith.constant 0 : index
    %c0_33 = arith.constant 0 : index
    %49 = vector.load %arg5[%c0_32, %c0_33] : memref<32x4xf32, #tpu.memory_space<vmem>>, vector<32x4xf32>
    %c0_34 = arith.constant 0 : index
    %c0_35 = arith.constant 0 : index
    %50 = vector.load %arg6[%c0_34, %c0_35] : memref<4x32xf32, #tpu.memory_space<vmem>>, vector<4x32xf32>
    %c0_36 = arith.constant 0 : index
    %c0_37 = arith.constant 0 : index
    %51 = vector.load %arg7[%c0_36, %c0_37] : memref<32x8xf32, #tpu.memory_space<vmem>>, vector<32x8xf32>
    %52 = vector.extract_strided_slice %44 {offsets = [0, 0], sizes = [128, 8], strides = [1, 1]} : vector<128x32xf32> to vector<128x8xf32>
    %53 = tpu.concatenate %52, %52, %52, %52 in 1 : vector<128x8xf32>, vector<128x8xf32>, vector<128x8xf32>, vector<128x8xf32> -> vector<128x32xf32>
    %54 = arith.mulf %53, %48 : vector<128x32xf32>
    %cst_38 = arith.constant dense<0.000000e+00> : vector<128x4xf32>
    %55 = tpu.matmul %54, %49, %cst_38 {dimension_numbers = #tpu.dot_dimension_numbers<[1], [0], [0], [1], [0, 0, 1, 1], [], []>} : vector<128x32xf32>, vector<32x4xf32>, vector<128x4xf32> -> vector<128x4xf32>
    %cst_39 = arith.constant 0.353553385 : f32
    %56 = vector.broadcast %cst_39 : f32 to vector<128x4xf32>
    %57 = arith.mulf %55, %56 : vector<128x4xf32>
    %cst_40 = arith.constant dense<0xFF800000> : vector<128xf32>
    %58 = vector.multi_reduction <maximumf>, %57, %cst_40 [1] : vector<128x4xf32> to vector<128xf32>
    %59 = vector.shape_cast %58 : vector<128xf32> to vector<128x1xf32>
    %60 = vector.broadcast %59 : vector<128x1xf32> to vector<128x4xf32>
    %61 = arith.subf %57, %60 : vector<128x4xf32>
    %62 = math.exp %61 : vector<128x4xf32>
    %cst_41 = arith.constant dense<0.000000e+00> : vector<128xf32>
    %63 = vector.multi_reduction <add>, %62, %cst_41 [1] : vector<128x4xf32> to vector<128xf32>
    %64 = vector.shape_cast %63 : vector<128xf32> to vector<128x1xf32>
    %65 = tpu.reciprocal %64 {approx = true} : vector<128x1xf32> -> vector<128x1xf32>
    %66 = vector.broadcast %65 : vector<128x1xf32> to vector<128x4xf32>
    %67 = arith.mulf %62, %66 : vector<128x4xf32>
    %cst_42 = arith.constant dense<0.000000e+00> : vector<128x32xf32>
    %68 = tpu.matmul %67, %50, %cst_42 {dimension_numbers = #tpu.dot_dimension_numbers<[1], [0], [0], [1], [0, 0, 1, 1], [], []>} : vector<128x4xf32>, vector<4x32xf32>, vector<128x32xf32> -> vector<128x32xf32>
    %69 = arith.mulf %68, %37 : vector<128x32xf32>
    %cst_43 = arith.constant dense<0.000000e+00> : vector<128x8xf32>
    %70 = tpu.matmul %69, %51, %cst_43 {dimension_numbers = #tpu.dot_dimension_numbers<[1], [0], [0], [1], [0, 0, 1, 1], [], []>} : vector<128x32xf32>, vector<32x8xf32>, vector<128x8xf32> -> vector<128x8xf32>
    %71 = vector.extract_strided_slice %70 {offsets = [0, 0], sizes = [8, 8], strides = [1, 1]} : vector<128x8xf32> to vector<8x8xf32>
    %c0_44 = arith.constant 0 : index
    %c0_45 = arith.constant 0 : index
    %72 = vector.load %arg25[%c0_44, %c0_45] : memref<512x8xf32, #tpu.memory_space<vmem>>, vector<8x8xf32>
    tpu.vector_store %arg25[%c0_44, %c0_45], %71 {strides = array<i32>} : memref<512x8xf32, #tpu.memory_space<vmem>>, vector<8x8xf32>,
    %73 = vector.extract_strided_slice %70 {offsets = [8, 0], sizes = [8, 8], strides = [1, 1]} : vector<128x8xf32> to vector<8x8xf32>
    %c32 = arith.constant 32 : index
    %c0_46 = arith.constant 0 : index
    %74 = vector.load %arg25[%c32, %c0_46] : memref<512x8xf32, #tpu.memory_space<vmem>>, vector<8x8xf32>
    tpu.vector_store %arg25[%c32, %c0_46], %73 {strides = array<i32>} : memref<512x8xf32, #tpu.memory_space<vmem>>, vector<8x8xf32>,
    %75 = vector.extract_strided_slice %70 {offsets = [16, 0], sizes = [8, 8], strides = [1, 1]} : vector<128x8xf32> to vector<8x8xf32>
    %c64 = arith.constant 64 : index
    %c0_47 = arith.constant 0 : index
    %76 = vector.load %arg25[%c64, %c0_47] : memref<512x8xf32, #tpu.memory_space<vmem>>, vector<8x8xf32>
    tpu.vector_store %arg25[%c64, %c0_47], %75 {strides = array<i32>} : memref<512x8xf32, #tpu.memory_space<vmem>>, vector<8x8xf32>,
    %77 = vector.extract_strided_slice %70 {offsets = [24, 0], sizes = [8, 8], strides = [1, 1]} : vector<128x8xf32> to vector<8x8xf32>
    %c96 = arith.constant 96 : index
    %c0_48 = arith.constant 0 : index
    %78 = vector.load %arg25[%c96, %c0_48] : memref<512x8xf32, #tpu.memory_space<vmem>>, vector<8x8xf32>
    tpu.vector_store %arg25[%c96, %c0_48], %77 {strides = array<i32>} : memref<512x8xf32, #tpu.memory_space<vmem>>, vector<8x8xf32>,
    %79 = vector.extract_strided_slice %70 {offsets = [32, 0], sizes = [8, 8], strides = [1, 1]} : vector<128x8xf32> to vector<8x8xf32>
    %c128 = arith.constant 128 : index
    %c0_49 = arith.constant 0 : index
    %80 = vector.load %arg25[%c128, %c0_49] : memref<512x8xf32, #tpu.memory_space<vmem>>, vector<8x8xf32>
    tpu.vector_store %arg25[%c128, %c0_49], %79 {strides = array<i32>} : memref<512x8xf32, #tpu.memory_space<vmem>>, vector<8x8xf32>,
    %81 = vector.extract_strided_slice %70 {offsets = [40, 0], sizes = [8, 8], strides = [1, 1]} : vector<128x8xf32> to vector<8x8xf32>
    %c160 = arith.constant 160 : index
    %c0_50 = arith.constant 0 : index
    %82 = vector.load %arg25[%c160, %c0_50] : memref<512x8xf32, #tpu.memory_space<vmem>>, vector<8x8xf32>
    tpu.vector_store %arg25[%c160, %c0_50], %81 {strides = array<i32>} : memref<512x8xf32, #tpu.memory_space<vmem>>, vector<8x8xf32>,
    %83 = vector.extract_strided_slice %70 {offsets = [48, 0], sizes = [8, 8], strides = [1, 1]} : vector<128x8xf32> to vector<8x8xf32>
    %c192 = arith.constant 192 : index
    %c0_51 = arith.constant 0 : index
    %84 = vector.load %arg25[%c192, %c0_51] : memref<512x8xf32, #tpu.memory_space<vmem>>, vector<8x8xf32>
    tpu.vector_store %arg25[%c192, %c0_51], %83 {strides = array<i32>} : memref<512x8xf32, #tpu.memory_space<vmem>>, vector<8x8xf32>,
    %85 = vector.extract_strided_slice %70 {offsets = [56, 0], sizes = [8, 8], strides = [1, 1]} : vector<128x8xf32> to vector<8x8xf32>
    %c224 = arith.constant 224 : index
    %c0_52 = arith.constant 0 : index
    %86 = vector.load %arg25[%c224, %c0_52] : memref<512x8xf32, #tpu.memory_space<vmem>>, vector<8x8xf32>
    tpu.vector_store %arg25[%c224, %c0_52], %85 {strides = array<i32>} : memref<512x8xf32, #tpu.memory_space<vmem>>, vector<8x8xf32>,
    %87 = vector.extract_strided_slice %70 {offsets = [64, 0], sizes = [8, 8], strides = [1, 1]} : vector<128x8xf32> to vector<8x8xf32>
    %c256 = arith.constant 256 : index
    %c0_53 = arith.constant 0 : index
    %88 = vector.load %arg25[%c256, %c0_53] : memref<512x8xf32, #tpu.memory_space<vmem>>, vector<8x8xf32>
    tpu.vector_store %arg25[%c256, %c0_53], %87 {strides = array<i32>} : memref<512x8xf32, #tpu.memory_space<vmem>>, vector<8x8xf32>,
    %89 = vector.extract_strided_slice %70 {offsets = [72, 0], sizes = [8, 8], strides = [1, 1]} : vector<128x8xf32> to vector<8x8xf32>
    %c288 = arith.constant 288 : index
    %c0_54 = arith.constant 0 : index
    %90 = vector.load %arg25[%c288, %c0_54] : memref<512x8xf32, #tpu.memory_space<vmem>>, vector<8x8xf32>
    tpu.vector_store %arg25[%c288, %c0_54], %89 {strides = array<i32>} : memref<512x8xf32, #tpu.memory_space<vmem>>, vector<8x8xf32>,
    %91 = vector.extract_strided_slice %70 {offsets = [80, 0], sizes = [8, 8], strides = [1, 1]} : vector<128x8xf32> to vector<8x8xf32>
    %c320 = arith.constant 320 : index
    %c0_55 = arith.constant 0 : index
    %92 = vector.load %arg25[%c320, %c0_55] : memref<512x8xf32, #tpu.memory_space<vmem>>, vector<8x8xf32>
    tpu.vector_store %arg25[%c320, %c0_55], %91 {strides = array<i32>} : memref<512x8xf32, #tpu.memory_space<vmem>>, vector<8x8xf32>,
    %93 = vector.extract_strided_slice %70 {offsets = [88, 0], sizes = [8, 8], strides = [1, 1]} : vector<128x8xf32> to vector<8x8xf32>
    %c352 = arith.constant 352 : index
    %c0_56 = arith.constant 0 : index
    %94 = vector.load %arg25[%c352, %c0_56] : memref<512x8xf32, #tpu.memory_space<vmem>>, vector<8x8xf32>
    tpu.vector_store %arg25[%c352, %c0_56], %93 {strides = array<i32>} : memref<512x8xf32, #tpu.memory_space<vmem>>, vector<8x8xf32>,
    %95 = vector.extract_strided_slice %70 {offsets = [96, 0], sizes = [8, 8], strides = [1, 1]} : vector<128x8xf32> to vector<8x8xf32>
    %c384 = arith.constant 384 : index
    %c0_57 = arith.constant 0 : index
    %96 = vector.load %arg25[%c384, %c0_57] : memref<512x8xf32, #tpu.memory_space<vmem>>, vector<8x8xf32>
    tpu.vector_store %arg25[%c384, %c0_57], %95 {strides = array<i32>} : memref<512x8xf32, #tpu.memory_space<vmem>>, vector<8x8xf32>,
    %97 = vector.extract_strided_slice %70 {offsets = [104, 0], sizes = [8, 8], strides = [1, 1]} : vector<128x8xf32> to vector<8x8xf32>
    %c416 = arith.constant 416 : index
    %c0_58 = arith.constant 0 : index
    %98 = vector.load %arg25[%c416, %c0_58] : memref<512x8xf32, #tpu.memory_space<vmem>>, vector<8x8xf32>
    tpu.vector_store %arg25[%c416, %c0_58], %97 {strides = array<i32>} : memref<512x8xf32, #tpu.memory_space<vmem>>, vector<8x8xf32>,
    %99 = vector.extract_strided_slice %70 {offsets = [112, 0], sizes = [8, 8], strides = [1, 1]} : vector<128x8xf32> to vector<8x8xf32>
    %c448 = arith.constant 448 : index
    %c0_59 = arith.constant 0 : index
    %100 = vector.load %arg25[%c448, %c0_59] : memref<512x8xf32, #tpu.memory_space<vmem>>, vector<8x8xf32>
    tpu.vector_store %arg25[%c448, %c0_59], %99 {strides = array<i32>} : memref<512x8xf32, #tpu.memory_space<vmem>>, vector<8x8xf32>,
    %101 = vector.extract_strided_slice %70 {offsets = [120, 0], sizes = [8, 8], strides = [1, 1]} : vector<128x8xf32> to vector<8x8xf32>
    %c480 = arith.constant 480 : index
    %c0_60 = arith.constant 0 : index
    %102 = vector.load %arg25[%c480, %c0_60] : memref<512x8xf32, #tpu.memory_space<vmem>>, vector<8x8xf32>
    tpu.vector_store %arg25[%c480, %c0_60], %101 {strides = array<i32>} : memref<512x8xf32, #tpu.memory_space<vmem>>, vector<8x8xf32>,
    %103 = vector.extract_strided_slice %44 {offsets = [0, 8], sizes = [128, 8], strides = [1, 1]} : vector<128x32xf32> to vector<128x8xf32>
    %104 = tpu.concatenate %103, %103, %103, %103 in 1 : vector<128x8xf32>, vector<128x8xf32>, vector<128x8xf32>, vector<128x8xf32> -> vector<128x32xf32>
    %105 = arith.mulf %104, %48 : vector<128x32xf32>
    %cst_61 = arith.constant dense<0.000000e+00> : vector<128x4xf32>
    %106 = tpu.matmul %105, %49, %cst_61 {dimension_numbers = #tpu.dot_dimension_numbers<[1], [0], [0], [1], [0, 0, 1, 1], [], []>} : vector<128x32xf32>, vector<32x4xf32>, vector<128x4xf32> -> vector<128x4xf32>
    %cst_62 = arith.constant 0.353553385 : f32
    %107 = vector.broadcast %cst_62 : f32 to vector<128x4xf32>
    %108 = arith.mulf %106, %107 : vector<128x4xf32>
    %cst_63 = arith.constant dense<0xFF800000> : vector<128xf32>
    %109 = vector.multi_reduction <maximumf>, %108, %cst_63 [1] : vector<128x4xf32> to vector<128xf32>
    %110 = vector.shape_cast %109 : vector<128xf32> to vector<128x1xf32>
    %111 = vector.broadcast %110 : vector<128x1xf32> to vector<128x4xf32>
    %112 = arith.subf %108, %111 : vector<128x4xf32>
    %113 = math.exp %112 : vector<128x4xf32>
    %cst_64 = arith.constant dense<0.000000e+00> : vector<128xf32>
    %114 = vector.multi_reduction <add>, %113, %cst_64 [1] : vector<128x4xf32> to vector<128xf32>
    %115 = vector.shape_cast %114 : vector<128xf32> to vector<128x1xf32>
    %116 = tpu.reciprocal %115 {approx = true} : vector<128x1xf32> -> vector<128x1xf32>
    %117 = vector.broadcast %116 : vector<128x1xf32> to vector<128x4xf32>
    %118 = arith.mulf %113, %117 : vector<128x4xf32>
    %cst_65 = arith.constant dense<0.000000e+00> : vector<128x32xf32>
    %119 = tpu.matmul %118, %50, %cst_65 {dimension_numbers = #tpu.dot_dimension_numbers<[1], [0], [0], [1], [0, 0, 1, 1], [], []>} : vector<128x4xf32>, vector<4x32xf32>, vector<128x32xf32> -> vector<128x32xf32>
    %120 = arith.mulf %119, %37 : vector<128x32xf32>
    %cst_66 = arith.constant dense<0.000000e+00> : vector<128x8xf32>
    %121 = tpu.matmul %120, %51, %cst_66 {dimension_numbers = #tpu.dot_dimension_numbers<[1], [0], [0], [1], [0, 0, 1, 1], [], []>} : vector<128x32xf32>, vector<32x8xf32>, vector<128x8xf32> -> vector<128x8xf32>
    %122 = vector.extract_strided_slice %121 {offsets = [0, 0], sizes = [8, 8], strides = [1, 1]} : vector<128x8xf32> to vector<8x8xf32>
    %c8 = arith.constant 8 : index
    %c0_67 = arith.constant 0 : index
    %123 = vector.load %arg25[%c8, %c0_67] : memref<512x8xf32, #tpu.memory_space<vmem>>, vector<8x8xf32>
    tpu.vector_store %arg25[%c8, %c0_67], %122 {strides = array<i32>} : memref<512x8xf32, #tpu.memory_space<vmem>>, vector<8x8xf32>,
    %124 = vector.extract_strided_slice %121 {offsets = [8, 0], sizes = [8, 8], strides = [1, 1]} : vector<128x8xf32> to vector<8x8xf32>
    %c40 = arith.constant 40 : index
    %c0_68 = arith.constant 0 : index
    %125 = vector.load %arg25[%c40, %c0_68] : memref<512x8xf32, #tpu.memory_space<vmem>>, vector<8x8xf32>
    tpu.vector_store %arg25[%c40, %c0_68], %124 {strides = array<i32>} : memref<512x8xf32, #tpu.memory_space<vmem>>, vector<8x8xf32>,
    %126 = vector.extract_strided_slice %121 {offsets = [16, 0], sizes = [8, 8], strides = [1, 1]} : vector<128x8xf32> to vector<8x8xf32>
    %c72 = arith.constant 72 : index
    %c0_69 = arith.constant 0 : index
    %127 = vector.load %arg25[%c72, %c0_69] : memref<512x8xf32, #tpu.memory_space<vmem>>, vector<8x8xf32>
    tpu.vector_store %arg25[%c72, %c0_69], %126 {strides = array<i32>} : memref<512x8xf32, #tpu.memory_space<vmem>>, vector<8x8xf32>,
    %128 = vector.extract_strided_slice %121 {offsets = [24, 0], sizes = [8, 8], strides = [1, 1]} : vector<128x8xf32> to vector<8x8xf32>
    %c104 = arith.constant 104 : index
    %c0_70 = arith.constant 0 : index
    %129 = vector.load %arg25[%c104, %c0_70] : memref<512x8xf32, #tpu.memory_space<vmem>>, vector<8x8xf32>
    tpu.vector_store %arg25[%c104, %c0_70], %128 {strides = array<i32>} : memref<512x8xf32, #tpu.memory_space<vmem>>, vector<8x8xf32>,
    %130 = vector.extract_strided_slice %121 {offsets = [32, 0], sizes = [8, 8], strides = [1, 1]} : vector<128x8xf32> to vector<8x8xf32>
    %c136 = arith.constant 136 : index
    %c0_71 = arith.constant 0 : index
    %131 = vector.load %arg25[%c136, %c0_71] : memref<512x8xf32, #tpu.memory_space<vmem>>, vector<8x8xf32>
    tpu.vector_store %arg25[%c136, %c0_71], %130 {strides = array<i32>} : memref<512x8xf32, #tpu.memory_space<vmem>>, vector<8x8xf32>,
    %132 = vector.extract_strided_slice %121 {offsets = [40, 0], sizes = [8, 8], strides = [1, 1]} : vector<128x8xf32> to vector<8x8xf32>
    %c168 = arith.constant 168 : index
    %c0_72 = arith.constant 0 : index
    %133 = vector.load %arg25[%c168, %c0_72] : memref<512x8xf32, #tpu.memory_space<vmem>>, vector<8x8xf32>
    tpu.vector_store %arg25[%c168, %c0_72], %132 {strides = array<i32>} : memref<512x8xf32, #tpu.memory_space<vmem>>, vector<8x8xf32>,
    %134 = vector.extract_strided_slice %121 {offsets = [48, 0], sizes = [8, 8], strides = [1, 1]} : vector<128x8xf32> to vector<8x8xf32>
    %c200 = arith.constant 200 : index
    %c0_73 = arith.constant 0 : index
    %135 = vector.load %arg25[%c200, %c0_73] : memref<512x8xf32, #tpu.memory_space<vmem>>, vector<8x8xf32>
    tpu.vector_store %arg25[%c200, %c0_73], %134 {strides = array<i32>} : memref<512x8xf32, #tpu.memory_space<vmem>>, vector<8x8xf32>,
    %136 = vector.extract_strided_slice %121 {offsets = [56, 0], sizes = [8, 8], strides = [1, 1]} : vector<128x8xf32> to vector<8x8xf32>
    %c232 = arith.constant 232 : index
    %c0_74 = arith.constant 0 : index
    %137 = vector.load %arg25[%c232, %c0_74] : memref<512x8xf32, #tpu.memory_space<vmem>>, vector<8x8xf32>
    tpu.vector_store %arg25[%c232, %c0_74], %136 {strides = array<i32>} : memref<512x8xf32, #tpu.memory_space<vmem>>, vector<8x8xf32>,
    %138 = vector.extract_strided_slice %121 {offsets = [64, 0], sizes = [8, 8], strides = [1, 1]} : vector<128x8xf32> to vector<8x8xf32>
    %c264 = arith.constant 264 : index
    %c0_75 = arith.constant 0 : index
    %139 = vector.load %arg25[%c264, %c0_75] : memref<512x8xf32, #tpu.memory_space<vmem>>, vector<8x8xf32>
    tpu.vector_store %arg25[%c264, %c0_75], %138 {strides = array<i32>} : memref<512x8xf32, #tpu.memory_space<vmem>>, vector<8x8xf32>,
    %140 = vector.extract_strided_slice %121 {offsets = [72, 0], sizes = [8, 8], strides = [1, 1]} : vector<128x8xf32> to vector<8x8xf32>
    %c296 = arith.constant 296 : index
    %c0_76 = arith.constant 0 : index
    %141 = vector.load %arg25[%c296, %c0_76] : memref<512x8xf32, #tpu.memory_space<vmem>>, vector<8x8xf32>
    tpu.vector_store %arg25[%c296, %c0_76], %140 {strides = array<i32>} : memref<512x8xf32, #tpu.memory_space<vmem>>, vector<8x8xf32>,
    %142 = vector.extract_strided_slice %121 {offsets = [80, 0], sizes = [8, 8], strides = [1, 1]} : vector<128x8xf32> to vector<8x8xf32>
    %c328 = arith.constant 328 : index
    %c0_77 = arith.constant 0 : index
    %143 = vector.load %arg25[%c328, %c0_77] : memref<512x8xf32, #tpu.memory_space<vmem>>, vector<8x8xf32>
    tpu.vector_store %arg25[%c328, %c0_77], %142 {strides = array<i32>} : memref<512x8xf32, #tpu.memory_space<vmem>>, vector<8x8xf32>,
    %144 = vector.extract_strided_slice %121 {offsets = [88, 0], sizes = [8, 8], strides = [1, 1]} : vector<128x8xf32> to vector<8x8xf32>
    %c360 = arith.constant 360 : index
    %c0_78 = arith.constant 0 : index
    %145 = vector.load %arg25[%c360, %c0_78] : memref<512x8xf32, #tpu.memory_space<vmem>>, vector<8x8xf32>
    tpu.vector_store %arg25[%c360, %c0_78], %144 {strides = array<i32>} : memref<512x8xf32, #tpu.memory_space<vmem>>, vector<8x8xf32>,
    %146 = vector.extract_strided_slice %121 {offsets = [96, 0], sizes = [8, 8], strides = [1, 1]} : vector<128x8xf32> to vector<8x8xf32>
    %c392 = arith.constant 392 : index
    %c0_79 = arith.constant 0 : index
    %147 = vector.load %arg25[%c392, %c0_79] : memref<512x8xf32, #tpu.memory_space<vmem>>, vector<8x8xf32>
    tpu.vector_store %arg25[%c392, %c0_79], %146 {strides = array<i32>} : memref<512x8xf32, #tpu.memory_space<vmem>>, vector<8x8xf32>,
    %148 = vector.extract_strided_slice %121 {offsets = [104, 0], sizes = [8, 8], strides = [1, 1]} : vector<128x8xf32> to vector<8x8xf32>
    %c424 = arith.constant 424 : index
    %c0_80 = arith.constant 0 : index
    %149 = vector.load %arg25[%c424, %c0_80] : memref<512x8xf32, #tpu.memory_space<vmem>>, vector<8x8xf32>
    tpu.vector_store %arg25[%c424, %c0_80], %148 {strides = array<i32>} : memref<512x8xf32, #tpu.memory_space<vmem>>, vector<8x8xf32>,
    %150 = vector.extract_strided_slice %121 {offsets = [112, 0], sizes = [8, 8], strides = [1, 1]} : vector<128x8xf32> to vector<8x8xf32>
    %c456 = arith.constant 456 : index
    %c0_81 = arith.constant 0 : index
    %151 = vector.load %arg25[%c456, %c0_81] : memref<512x8xf32, #tpu.memory_space<vmem>>, vector<8x8xf32>
    tpu.vector_store %arg25[%c456, %c0_81], %150 {strides = array<i32>} : memref<512x8xf32, #tpu.memory_space<vmem>>, vector<8x8xf32>,
    %152 = vector.extract_strided_slice %121 {offsets = [120, 0], sizes = [8, 8], strides = [1, 1]} : vector<128x8xf32> to vector<8x8xf32>
    %c488 = arith.constant 488 : index
    %c0_82 = arith.constant 0 : index
    %153 = vector.load %arg25[%c488, %c0_82] : memref<512x8xf32, #tpu.memory_space<vmem>>, vector<8x8xf32>
    tpu.vector_store %arg25[%c488, %c0_82], %152 {strides = array<i32>} : memref<512x8xf32, #tpu.memory_space<vmem>>, vector<8x8xf32>,
    %154 = vector.extract_strided_slice %44 {offsets = [0, 16], sizes = [128, 8], strides = [1, 1]} : vector<128x32xf32> to vector<128x8xf32>
    %155 = tpu.concatenate %154, %154, %154, %154 in 1 : vector<128x8xf32>, vector<128x8xf32>, vector<128x8xf32>, vector<128x8xf32> -> vector<128x32xf32>
    %156 = arith.mulf %155, %48 : vector<128x32xf32>
    %cst_83 = arith.constant dense<0.000000e+00> : vector<128x4xf32>
    %157 = tpu.matmul %156, %49, %cst_83 {dimension_numbers = #tpu.dot_dimension_numbers<[1], [0], [0], [1], [0, 0, 1, 1], [], []>} : vector<128x32xf32>, vector<32x4xf32>, vector<128x4xf32> -> vector<128x4xf32>
    %cst_84 = arith.constant 0.353553385 : f32
    %158 = vector.broadcast %cst_84 : f32 to vector<128x4xf32>
    %159 = arith.mulf %157, %158 : vector<128x4xf32>
    %cst_85 = arith.constant dense<0xFF800000> : vector<128xf32>
    %160 = vector.multi_reduction <maximumf>, %159, %cst_85 [1] : vector<128x4xf32> to vector<128xf32>
    %161 = vector.shape_cast %160 : vector<128xf32> to vector<128x1xf32>
    %162 = vector.broadcast %161 : vector<128x1xf32> to vector<128x4xf32>
    %163 = arith.subf %159, %162 : vector<128x4xf32>
    %164 = math.exp %163 : vector<128x4xf32>
    %cst_86 = arith.constant dense<0.000000e+00> : vector<128xf32>
    %165 = vector.multi_reduction <add>, %164, %cst_86 [1] : vector<128x4xf32> to vector<128xf32>
    %166 = vector.shape_cast %165 : vector<128xf32> to vector<128x1xf32>
    %167 = tpu.reciprocal %166 {approx = true} : vector<128x1xf32> -> vector<128x1xf32>
    %168 = vector.broadcast %167 : vector<128x1xf32> to vector<128x4xf32>
    %169 = arith.mulf %164, %168 : vector<128x4xf32>
    %cst_87 = arith.constant dense<0.000000e+00> : vector<128x32xf32>
    %170 = tpu.matmul %169, %50, %cst_87 {dimension_numbers = #tpu.dot_dimension_numbers<[1], [0], [0], [1], [0, 0, 1, 1], [], []>} : vector<128x4xf32>, vector<4x32xf32>, vector<128x32xf32> -> vector<128x32xf32>
    %171 = arith.mulf %170, %37 : vector<128x32xf32>
    %cst_88 = arith.constant dense<0.000000e+00> : vector<128x8xf32>
    %172 = tpu.matmul %171, %51, %cst_88 {dimension_numbers = #tpu.dot_dimension_numbers<[1], [0], [0], [1], [0, 0, 1, 1], [], []>} : vector<128x32xf32>, vector<32x8xf32>, vector<128x8xf32> -> vector<128x8xf32>
    %173 = vector.extract_strided_slice %172 {offsets = [0, 0], sizes = [8, 8], strides = [1, 1]} : vector<128x8xf32> to vector<8x8xf32>
    %c16 = arith.constant 16 : index
    %c0_89 = arith.constant 0 : index
    %174 = vector.load %arg25[%c16, %c0_89] : memref<512x8xf32, #tpu.memory_space<vmem>>, vector<8x8xf32>
    tpu.vector_store %arg25[%c16, %c0_89], %173 {strides = array<i32>} : memref<512x8xf32, #tpu.memory_space<vmem>>, vector<8x8xf32>,
    %175 = vector.extract_strided_slice %172 {offsets = [8, 0], sizes = [8, 8], strides = [1, 1]} : vector<128x8xf32> to vector<8x8xf32>
    %c48 = arith.constant 48 : index
    %c0_90 = arith.constant 0 : index
    %176 = vector.load %arg25[%c48, %c0_90] : memref<512x8xf32, #tpu.memory_space<vmem>>, vector<8x8xf32>
    tpu.vector_store %arg25[%c48, %c0_90], %175 {strides = array<i32>} : memref<512x8xf32, #tpu.memory_space<vmem>>, vector<8x8xf32>,
    %177 = vector.extract_strided_slice %172 {offsets = [16, 0], sizes = [8, 8], strides = [1, 1]} : vector<128x8xf32> to vector<8x8xf32>
    %c80 = arith.constant 80 : index
    %c0_91 = arith.constant 0 : index
    %178 = vector.load %arg25[%c80, %c0_91] : memref<512x8xf32, #tpu.memory_space<vmem>>, vector<8x8xf32>
    tpu.vector_store %arg25[%c80, %c0_91], %177 {strides = array<i32>} : memref<512x8xf32, #tpu.memory_space<vmem>>, vector<8x8xf32>,
    %179 = vector.extract_strided_slice %172 {offsets = [24, 0], sizes = [8, 8], strides = [1, 1]} : vector<128x8xf32> to vector<8x8xf32>
    %c112 = arith.constant 112 : index
    %c0_92 = arith.constant 0 : index
    %180 = vector.load %arg25[%c112, %c0_92] : memref<512x8xf32, #tpu.memory_space<vmem>>, vector<8x8xf32>
    tpu.vector_store %arg25[%c112, %c0_92], %179 {strides = array<i32>} : memref<512x8xf32, #tpu.memory_space<vmem>>, vector<8x8xf32>,
    %181 = vector.extract_strided_slice %172 {offsets = [32, 0], sizes = [8, 8], strides = [1, 1]} : vector<128x8xf32> to vector<8x8xf32>
    %c144 = arith.constant 144 : index
    %c0_93 = arith.constant 0 : index
    %182 = vector.load %arg25[%c144, %c0_93] : memref<512x8xf32, #tpu.memory_space<vmem>>, vector<8x8xf32>
    tpu.vector_store %arg25[%c144, %c0_93], %181 {strides = array<i32>} : memref<512x8xf32, #tpu.memory_space<vmem>>, vector<8x8xf32>,
    %183 = vector.extract_strided_slice %172 {offsets = [40, 0], sizes = [8, 8], strides = [1, 1]} : vector<128x8xf32> to vector<8x8xf32>
    %c176 = arith.constant 176 : index
    %c0_94 = arith.constant 0 : index
    %184 = vector.load %arg25[%c176, %c0_94] : memref<512x8xf32, #tpu.memory_space<vmem>>, vector<8x8xf32>
    tpu.vector_store %arg25[%c176, %c0_94], %183 {strides = array<i32>} : memref<512x8xf32, #tpu.memory_space<vmem>>, vector<8x8xf32>,
    %185 = vector.extract_strided_slice %172 {offsets = [48, 0], sizes = [8, 8], strides = [1, 1]} : vector<128x8xf32> to vector<8x8xf32>
    %c208 = arith.constant 208 : index
    %c0_95 = arith.constant 0 : index
    %186 = vector.load %arg25[%c208, %c0_95] : memref<512x8xf32, #tpu.memory_space<vmem>>, vector<8x8xf32>
    tpu.vector_store %arg25[%c208, %c0_95], %185 {strides = array<i32>} : memref<512x8xf32, #tpu.memory_space<vmem>>, vector<8x8xf32>,
    %187 = vector.extract_strided_slice %172 {offsets = [56, 0], sizes = [8, 8], strides = [1, 1]} : vector<128x8xf32> to vector<8x8xf32>
    %c240 = arith.constant 240 : index
    %c0_96 = arith.constant 0 : index
    %188 = vector.load %arg25[%c240, %c0_96] : memref<512x8xf32, #tpu.memory_space<vmem>>, vector<8x8xf32>
    tpu.vector_store %arg25[%c240, %c0_96], %187 {strides = array<i32>} : memref<512x8xf32, #tpu.memory_space<vmem>>, vector<8x8xf32>,
    %189 = vector.extract_strided_slice %172 {offsets = [64, 0], sizes = [8, 8], strides = [1, 1]} : vector<128x8xf32> to vector<8x8xf32>
    %c272 = arith.constant 272 : index
    %c0_97 = arith.constant 0 : index
    %190 = vector.load %arg25[%c272, %c0_97] : memref<512x8xf32, #tpu.memory_space<vmem>>, vector<8x8xf32>
    tpu.vector_store %arg25[%c272, %c0_97], %189 {strides = array<i32>} : memref<512x8xf32, #tpu.memory_space<vmem>>, vector<8x8xf32>,
    %191 = vector.extract_strided_slice %172 {offsets = [72, 0], sizes = [8, 8], strides = [1, 1]} : vector<128x8xf32> to vector<8x8xf32>
    %c304 = arith.constant 304 : index
    %c0_98 = arith.constant 0 : index
    %192 = vector.load %arg25[%c304, %c0_98] : memref<512x8xf32, #tpu.memory_space<vmem>>, vector<8x8xf32>
    tpu.vector_store %arg25[%c304, %c0_98], %191 {strides = array<i32>} : memref<512x8xf32, #tpu.memory_space<vmem>>, vector<8x8xf32>,
    %193 = vector.extract_strided_slice %172 {offsets = [80, 0], sizes = [8, 8], strides = [1, 1]} : vector<128x8xf32> to vector<8x8xf32>
    %c336 = arith.constant 336 : index
    %c0_99 = arith.constant 0 : index
    %194 = vector.load %arg25[%c336, %c0_99] : memref<512x8xf32, #tpu.memory_space<vmem>>, vector<8x8xf32>
    tpu.vector_store %arg25[%c336, %c0_99], %193 {strides = array<i32>} : memref<512x8xf32, #tpu.memory_space<vmem>>, vector<8x8xf32>,
    %195 = vector.extract_strided_slice %172 {offsets = [88, 0], sizes = [8, 8], strides = [1, 1]} : vector<128x8xf32> to vector<8x8xf32>
    %c368 = arith.constant 368 : index
    %c0_100 = arith.constant 0 : index
    %196 = vector.load %arg25[%c368, %c0_100] : memref<512x8xf32, #tpu.memory_space<vmem>>, vector<8x8xf32>
    tpu.vector_store %arg25[%c368, %c0_100], %195 {strides = array<i32>} : memref<512x8xf32, #tpu.memory_space<vmem>>, vector<8x8xf32>,
    %197 = vector.extract_strided_slice %172 {offsets = [96, 0], sizes = [8, 8], strides = [1, 1]} : vector<128x8xf32> to vector<8x8xf32>
    %c400 = arith.constant 400 : index
    %c0_101 = arith.constant 0 : index
    %198 = vector.load %arg25[%c400, %c0_101] : memref<512x8xf32, #tpu.memory_space<vmem>>, vector<8x8xf32>
    tpu.vector_store %arg25[%c400, %c0_101], %197 {strides = array<i32>} : memref<512x8xf32, #tpu.memory_space<vmem>>, vector<8x8xf32>,
    %199 = vector.extract_strided_slice %172 {offsets = [104, 0], sizes = [8, 8], strides = [1, 1]} : vector<128x8xf32> to vector<8x8xf32>
    %c432 = arith.constant 432 : index
    %c0_102 = arith.constant 0 : index
    %200 = vector.load %arg25[%c432, %c0_102] : memref<512x8xf32, #tpu.memory_space<vmem>>, vector<8x8xf32>
    tpu.vector_store %arg25[%c432, %c0_102], %199 {strides = array<i32>} : memref<512x8xf32, #tpu.memory_space<vmem>>, vector<8x8xf32>,
    %201 = vector.extract_strided_slice %172 {offsets = [112, 0], sizes = [8, 8], strides = [1, 1]} : vector<128x8xf32> to vector<8x8xf32>
    %c464 = arith.constant 464 : index
    %c0_103 = arith.constant 0 : index
    %202 = vector.load %arg25[%c464, %c0_103] : memref<512x8xf32, #tpu.memory_space<vmem>>, vector<8x8xf32>
    tpu.vector_store %arg25[%c464, %c0_103], %201 {strides = array<i32>} : memref<512x8xf32, #tpu.memory_space<vmem>>, vector<8x8xf32>,
    %203 = vector.extract_strided_slice %172 {offsets = [120, 0], sizes = [8, 8], strides = [1, 1]} : vector<128x8xf32> to vector<8x8xf32>
    %c496 = arith.constant 496 : index
    %c0_104 = arith.constant 0 : index
    %204 = vector.load %arg25[%c496, %c0_104] : memref<512x8xf32, #tpu.memory_space<vmem>>, vector<8x8xf32>
    tpu.vector_store %arg25[%c496, %c0_104], %203 {strides = array<i32>} : memref<512x8xf32, #tpu.memory_space<vmem>>, vector<8x8xf32>,
    %205 = vector.extract_strided_slice %44 {offsets = [0, 24], sizes = [128, 8], strides = [1, 1]} : vector<128x32xf32> to vector<128x8xf32>
    %206 = tpu.concatenate %205, %205, %205, %205 in 1 : vector<128x8xf32>, vector<128x8xf32>, vector<128x8xf32>, vector<128x8xf32> -> vector<128x32xf32>
    %207 = arith.mulf %206, %48 : vector<128x32xf32>
    %cst_105 = arith.constant dense<0.000000e+00> : vector<128x4xf32>
    %208 = tpu.matmul %207, %49, %cst_105 {dimension_numbers = #tpu.dot_dimension_numbers<[1], [0], [0], [1], [0, 0, 1, 1], [], []>} : vector<128x32xf32>, vector<32x4xf32>, vector<128x4xf32> -> vector<128x4xf32>
    %cst_106 = arith.constant 0.353553385 : f32
    %209 = vector.broadcast %cst_106 : f32 to vector<128x4xf32>
    %210 = arith.mulf %208, %209 : vector<128x4xf32>
    %cst_107 = arith.constant dense<0xFF800000> : vector<128xf32>
    %211 = vector.multi_reduction <maximumf>, %210, %cst_107 [1] : vector<128x4xf32> to vector<128xf32>
    %212 = vector.shape_cast %211 : vector<128xf32> to vector<128x1xf32>
    %213 = vector.broadcast %212 : vector<128x1xf32> to vector<128x4xf32>
    %214 = arith.subf %210, %213 : vector<128x4xf32>
    %215 = math.exp %214 : vector<128x4xf32>
    %cst_108 = arith.constant dense<0.000000e+00> : vector<128xf32>
    %216 = vector.multi_reduction <add>, %215, %cst_108 [1] : vector<128x4xf32> to vector<128xf32>
    %217 = vector.shape_cast %216 : vector<128xf32> to vector<128x1xf32>
    %218 = tpu.reciprocal %217 {approx = true} : vector<128x1xf32> -> vector<128x1xf32>
    %219 = vector.broadcast %218 : vector<128x1xf32> to vector<128x4xf32>
    %220 = arith.mulf %215, %219 : vector<128x4xf32>
    %cst_109 = arith.constant dense<0.000000e+00> : vector<128x32xf32>
    %221 = tpu.matmul %220, %50, %cst_109 {dimension_numbers = #tpu.dot_dimension_numbers<[1], [0], [0], [1], [0, 0, 1, 1], [], []>} : vector<128x4xf32>, vector<4x32xf32>, vector<128x32xf32> -> vector<128x32xf32>
    %222 = arith.mulf %221, %37 : vector<128x32xf32>
    %cst_110 = arith.constant dense<0.000000e+00> : vector<128x8xf32>
    %223 = tpu.matmul %222, %51, %cst_110 {dimension_numbers = #tpu.dot_dimension_numbers<[1], [0], [0], [1], [0, 0, 1, 1], [], []>} : vector<128x32xf32>, vector<32x8xf32>, vector<128x8xf32> -> vector<128x8xf32>
    %224 = vector.extract_strided_slice %223 {offsets = [0, 0], sizes = [8, 8], strides = [1, 1]} : vector<128x8xf32> to vector<8x8xf32>
    %c24 = arith.constant 24 : index
    %c0_111 = arith.constant 0 : index
    %225 = vector.load %arg25[%c24, %c0_111] : memref<512x8xf32, #tpu.memory_space<vmem>>, vector<8x8xf32>
    tpu.vector_store %arg25[%c24, %c0_111], %224 {strides = array<i32>} : memref<512x8xf32, #tpu.memory_space<vmem>>, vector<8x8xf32>,
    %226 = vector.extract_strided_slice %223 {offsets = [8, 0], sizes = [8, 8], strides = [1, 1]} : vector<128x8xf32> to vector<8x8xf32>
    %c56 = arith.constant 56 : index
    %c0_112 = arith.constant 0 : index
    %227 = vector.load %arg25[%c56, %c0_112] : memref<512x8xf32, #tpu.memory_space<vmem>>, vector<8x8xf32>
    tpu.vector_store %arg25[%c56, %c0_112], %226 {strides = array<i32>} : memref<512x8xf32, #tpu.memory_space<vmem>>, vector<8x8xf32>,
    %228 = vector.extract_strided_slice %223 {offsets = [16, 0], sizes = [8, 8], strides = [1, 1]} : vector<128x8xf32> to vector<8x8xf32>
    %c88 = arith.constant 88 : index
    %c0_113 = arith.constant 0 : index
    %229 = vector.load %arg25[%c88, %c0_113] : memref<512x8xf32, #tpu.memory_space<vmem>>, vector<8x8xf32>
    tpu.vector_store %arg25[%c88, %c0_113], %228 {strides = array<i32>} : memref<512x8xf32, #tpu.memory_space<vmem>>, vector<8x8xf32>,
    %230 = vector.extract_strided_slice %223 {offsets = [24, 0], sizes = [8, 8], strides = [1, 1]} : vector<128x8xf32> to vector<8x8xf32>
    %c120 = arith.constant 120 : index
    %c0_114 = arith.constant 0 : index
    %231 = vector.load %arg25[%c120, %c0_114] : memref<512x8xf32, #tpu.memory_space<vmem>>, vector<8x8xf32>
    tpu.vector_store %arg25[%c120, %c0_114], %230 {strides = array<i32>} : memref<512x8xf32, #tpu.memory_space<vmem>>, vector<8x8xf32>,
    %232 = vector.extract_strided_slice %223 {offsets = [32, 0], sizes = [8, 8], strides = [1, 1]} : vector<128x8xf32> to vector<8x8xf32>
    %c152 = arith.constant 152 : index
    %c0_115 = arith.constant 0 : index
    %233 = vector.load %arg25[%c152, %c0_115] : memref<512x8xf32, #tpu.memory_space<vmem>>, vector<8x8xf32>
    tpu.vector_store %arg25[%c152, %c0_115], %232 {strides = array<i32>} : memref<512x8xf32, #tpu.memory_space<vmem>>, vector<8x8xf32>,
    %234 = vector.extract_strided_slice %223 {offsets = [40, 0], sizes = [8, 8], strides = [1, 1]} : vector<128x8xf32> to vector<8x8xf32>
    %c184 = arith.constant 184 : index
    %c0_116 = arith.constant 0 : index
    %235 = vector.load %arg25[%c184, %c0_116] : memref<512x8xf32, #tpu.memory_space<vmem>>, vector<8x8xf32>
    tpu.vector_store %arg25[%c184, %c0_116], %234 {strides = array<i32>} : memref<512x8xf32, #tpu.memory_space<vmem>>, vector<8x8xf32>,
    %236 = vector.extract_strided_slice %223 {offsets = [48, 0], sizes = [8, 8], strides = [1, 1]} : vector<128x8xf32> to vector<8x8xf32>
    %c216 = arith.constant 216 : index
    %c0_117 = arith.constant 0 : index
    %237 = vector.load %arg25[%c216, %c0_117] : memref<512x8xf32, #tpu.memory_space<vmem>>, vector<8x8xf32>
    tpu.vector_store %arg25[%c216, %c0_117], %236 {strides = array<i32>} : memref<512x8xf32, #tpu.memory_space<vmem>>, vector<8x8xf32>,
    %238 = vector.extract_strided_slice %223 {offsets = [56, 0], sizes = [8, 8], strides = [1, 1]} : vector<128x8xf32> to vector<8x8xf32>
    %c248 = arith.constant 248 : index
    %c0_118 = arith.constant 0 : index
    %239 = vector.load %arg25[%c248, %c0_118] : memref<512x8xf32, #tpu.memory_space<vmem>>, vector<8x8xf32>
    tpu.vector_store %arg25[%c248, %c0_118], %238 {strides = array<i32>} : memref<512x8xf32, #tpu.memory_space<vmem>>, vector<8x8xf32>,
    %240 = vector.extract_strided_slice %223 {offsets = [64, 0], sizes = [8, 8], strides = [1, 1]} : vector<128x8xf32> to vector<8x8xf32>
    %c280 = arith.constant 280 : index
    %c0_119 = arith.constant 0 : index
    %241 = vector.load %arg25[%c280, %c0_119] : memref<512x8xf32, #tpu.memory_space<vmem>>, vector<8x8xf32>
    tpu.vector_store %arg25[%c280, %c0_119], %240 {strides = array<i32>} : memref<512x8xf32, #tpu.memory_space<vmem>>, vector<8x8xf32>,
    %242 = vector.extract_strided_slice %223 {offsets = [72, 0], sizes = [8, 8], strides = [1, 1]} : vector<128x8xf32> to vector<8x8xf32>
    %c312 = arith.constant 312 : index
    %c0_120 = arith.constant 0 : index
    %243 = vector.load %arg25[%c312, %c0_120] : memref<512x8xf32, #tpu.memory_space<vmem>>, vector<8x8xf32>
    tpu.vector_store %arg25[%c312, %c0_120], %242 {strides = array<i32>} : memref<512x8xf32, #tpu.memory_space<vmem>>, vector<8x8xf32>,
    %244 = vector.extract_strided_slice %223 {offsets = [80, 0], sizes = [8, 8], strides = [1, 1]} : vector<128x8xf32> to vector<8x8xf32>
    %c344 = arith.constant 344 : index
    %c0_121 = arith.constant 0 : index
    %245 = vector.load %arg25[%c344, %c0_121] : memref<512x8xf32, #tpu.memory_space<vmem>>, vector<8x8xf32>
    tpu.vector_store %arg25[%c344, %c0_121], %244 {strides = array<i32>} : memref<512x8xf32, #tpu.memory_space<vmem>>, vector<8x8xf32>,
    %246 = vector.extract_strided_slice %223 {offsets = [88, 0], sizes = [8, 8], strides = [1, 1]} : vector<128x8xf32> to vector<8x8xf32>
    %c376 = arith.constant 376 : index
    %c0_122 = arith.constant 0 : index
    %247 = vector.load %arg25[%c376, %c0_122] : memref<512x8xf32, #tpu.memory_space<vmem>>, vector<8x8xf32>
    tpu.vector_store %arg25[%c376, %c0_122], %246 {strides = array<i32>} : memref<512x8xf32, #tpu.memory_space<vmem>>, vector<8x8xf32>,
    %248 = vector.extract_strided_slice %223 {offsets = [96, 0], sizes = [8, 8], strides = [1, 1]} : vector<128x8xf32> to vector<8x8xf32>
    %c408 = arith.constant 408 : index
    %c0_123 = arith.constant 0 : index
    %249 = vector.load %arg25[%c408, %c0_123] : memref<512x8xf32, #tpu.memory_space<vmem>>, vector<8x8xf32>
    tpu.vector_store %arg25[%c408, %c0_123], %248 {strides = array<i32>} : memref<512x8xf32, #tpu.memory_space<vmem>>, vector<8x8xf32>,
    %250 = vector.extract_strided_slice %223 {offsets = [104, 0], sizes = [8, 8], strides = [1, 1]} : vector<128x8xf32> to vector<8x8xf32>
    %c440 = arith.constant 440 : index
    %c0_124 = arith.constant 0 : index
    %251 = vector.load %arg25[%c440, %c0_124] : memref<512x8xf32, #tpu.memory_space<vmem>>, vector<8x8xf32>
    tpu.vector_store %arg25[%c440, %c0_124], %250 {strides = array<i32>} : memref<512x8xf32, #tpu.memory_space<vmem>>, vector<8x8xf32>,
    %252 = vector.extract_strided_slice %223 {offsets = [112, 0], sizes = [8, 8], strides = [1, 1]} : vector<128x8xf32> to vector<8x8xf32>
    %c472 = arith.constant 472 : index
    %c0_125 = arith.constant 0 : index
    %253 = vector.load %arg25[%c472, %c0_125] : memref<512x8xf32, #tpu.memory_space<vmem>>, vector<8x8xf32>
    tpu.vector_store %arg25[%c472, %c0_125], %252 {strides = array<i32>} : memref<512x8xf32, #tpu.memory_space<vmem>>, vector<8x8xf32>,
    %254 = vector.extract_strided_slice %223 {offsets = [120, 0], sizes = [8, 8], strides = [1, 1]} : vector<128x8xf32> to vector<8x8xf32>
    %c504 = arith.constant 504 : index
    %c0_126 = arith.constant 0 : index
    %255 = vector.load %arg25[%c504, %c0_126] : memref<512x8xf32, #tpu.memory_space<vmem>>, vector<8x8xf32>
    tpu.vector_store %arg25[%c504, %c0_126], %254 {strides = array<i32>} : memref<512x8xf32, #tpu.memory_space<vmem>>, vector<8x8xf32>,
    %c0_127 = arith.constant 0 : index
    %c0_128 = arith.constant 0 : index
    %256 = tpu.strided_load %arg25[%c0_127, %c0_128] {strides = array<i32: 4, 1>} : memref<512x8xf32, #tpu.memory_space<vmem>>, vector<128x8xf32>
    %c1 = arith.constant 1 : index
    %c0_129 = arith.constant 0 : index
    %257 = tpu.strided_load %arg25[%c1, %c0_129] {strides = array<i32: 4, 1>} : memref<512x8xf32, #tpu.memory_space<vmem>>, vector<128x8xf32>
    %c2 = arith.constant 2 : index
    %c0_130 = arith.constant 0 : index
    %258 = tpu.strided_load %arg25[%c2, %c0_130] {strides = array<i32: 4, 1>} : memref<512x8xf32, #tpu.memory_space<vmem>>, vector<128x8xf32>
    %c3 = arith.constant 3 : index
    %c0_131 = arith.constant 0 : index
    %259 = tpu.strided_load %arg25[%c3, %c0_131] {strides = array<i32: 4, 1>} : memref<512x8xf32, #tpu.memory_space<vmem>>, vector<128x8xf32>
    %260 = tpu.concatenate %256, %257, %258, %259 in 1 : vector<128x8xf32>, vector<128x8xf32>, vector<128x8xf32>, vector<128x8xf32> -> vector<128x32xf32>
    %c0_132 = arith.constant 0 : index
    %c0_133 = arith.constant 0 : index
    %261 = vector.load %arg16[%c0_132, %c0_133] : memref<32x32xf32, #tpu.memory_space<vmem>>, vector<32x32xf32>
    %cst_134 = arith.constant dense<0.000000e+00> : vector<128x32xf32>
    %262 = tpu.matmul %260, %261, %cst_134 {dimension_numbers = #tpu.dot_dimension_numbers<[1], [0], [0], [1], [0, 0, 1, 1], [], []>} : vector<128x32xf32>, vector<32x32xf32>, vector<128x32xf32> -> vector<128x32xf32>
    %c0_135 = arith.constant 0 : index
    %c0_136 = arith.constant 0 : index
    %263 = vector.load %arg17[%c0_135, %c0_136] : memref<1x32xf32, #tpu.memory_space<vmem>>, vector<1x32xf32>
    %264 = vector.broadcast %263 : vector<1x32xf32> to vector<128x32xf32>
    %265 = arith.addf %262, %264 : vector<128x32xf32>
    %266 = arith.addf %0, %265 : vector<128x32xf32>
    %c0_137 = arith.constant 0 : index
    %c0_138 = arith.constant 0 : index
    %267 = vector.load %arg18[%c0_137, %c0_138] : memref<1x32xf32, #tpu.memory_space<vmem>>, vector<1x32xf32>
    %c0_139 = arith.constant 0 : index
    %c0_140 = arith.constant 0 : index
    %268 = vector.load %arg19[%c0_139, %c0_140] : memref<1x32xf32, #tpu.memory_space<vmem>>, vector<1x32xf32>
    %cst_141 = arith.constant dense<0.000000e+00> : vector<128xf32>
    %269 = vector.multi_reduction <add>, %266, %cst_141 [1] : vector<128x32xf32> to vector<128xf32>
    %270 = vector.shape_cast %269 : vector<128xf32> to vector<128x1xf32>
    %cst_142 = arith.constant 3.200000e+01 : f32
    %271 = vector.broadcast %cst_142 : f32 to vector<128x1xf32>
    %272 = arith.divf %270, %271 : vector<128x1xf32>
    %273 = vector.broadcast %272 : vector<128x1xf32> to vector<128x32xf32>
    %274 = arith.subf %266, %273 : vector<128x32xf32>
    %275 = arith.mulf %274, %274 : vector<128x32xf32>
    %cst_143 = arith.constant dense<0.000000e+00> : vector<128xf32>
    %276 = vector.multi_reduction <add>, %275, %cst_143 [1] : vector<128x32xf32> to vector<128xf32>
    %277 = vector.shape_cast %276 : vector<128xf32> to vector<128x1xf32>
    %cst_144 = arith.constant 3.200000e+01 : f32
    %278 = vector.broadcast %cst_144 : f32 to vector<128x1xf32>
    %279 = arith.divf %277, %278 : vector<128x1xf32>
    %cst_145 = arith.constant 9.99999974E-6 : f32
    %280 = vector.broadcast %cst_145 : f32 to vector<128x1xf32>
    %281 = arith.addf %279, %280 : vector<128x1xf32>
    %282 = math.rsqrt %281 : vector<128x1xf32>
    %283 = vector.broadcast %282 : vector<128x1xf32> to vector<128x32xf32>
    %284 = arith.mulf %274, %283 : vector<128x32xf32>
    %285 = vector.broadcast %267 : vector<1x32xf32> to vector<128x32xf32>
    %286 = arith.mulf %284, %285 : vector<128x32xf32>
    %287 = vector.broadcast %268 : vector<1x32xf32> to vector<128x32xf32>
    %288 = arith.addf %286, %287 : vector<128x32xf32>
    %c0_146 = arith.constant 0 : index
    %c0_147 = arith.constant 0 : index
    %289 = vector.load %arg20[%c0_146, %c0_147] : memref<32x128xf32, #tpu.memory_space<vmem>>, vector<32x128xf32>
    %cst_148 = arith.constant dense<0.000000e+00> : vector<128x128xf32>
    %290 = tpu.matmul %288, %289, %cst_148 {dimension_numbers = #tpu.dot_dimension_numbers<[1], [0], [0], [1], [0, 0, 1, 1], [], []>} : vector<128x32xf32>, vector<32x128xf32>, vector<128x128xf32> -> vector<128x128xf32>
    %c0_149 = arith.constant 0 : index
    %c0_150 = arith.constant 0 : index
    %291 = vector.load %arg21[%c0_149, %c0_150] : memref<1x128xf32, #tpu.memory_space<vmem>>, vector<1x128xf32>
    %292 = vector.broadcast %291 : vector<1x128xf32> to vector<128x128xf32>
    %293 = arith.addf %290, %292 : vector<128x128xf32>
    %cst_151 = arith.constant 0.707106769 : f32
    %294 = vector.broadcast %cst_151 : f32 to vector<128x128xf32>
    %295 = arith.mulf %293, %294 : vector<128x128xf32>
    %cst_152 = arith.constant 0.000000e+00 : f32
    %296 = vector.broadcast %cst_152 : f32 to vector<128x128xf32>
    %297 = arith.cmpf oge, %295, %296 : vector<128x128xf32>
    %cst_153 = arith.constant 1.000000e+00 : f32
    %cst_154 = arith.constant -1.000000e+00 : f32
    %298 = vector.broadcast %cst_153 : f32 to vector<128x128xf32>
    %299 = vector.broadcast %cst_154 : f32 to vector<128x128xf32>
    %300 = arith.select %297, %298, %299 : vector<128x128xi1>, vector<128x128xf32>
    %301 = math.absf %295 : vector<128x128xf32>
    %cst_155 = arith.constant 0.327591091 : f32
    %302 = vector.broadcast %cst_155 : f32 to vector<128x128xf32>
    %303 = arith.mulf %302, %301 : vector<128x128xf32>
    %cst_156 = arith.constant 1.000000e+00 : f32
    %304 = vector.broadcast %cst_156 : f32 to vector<128x128xf32>
    %305 = arith.addf %304, %303 : vector<128x128xf32>
    %cst_157 = arith.constant 1.000000e+00 : f32
    %306 = vector.broadcast %cst_157 : f32 to vector<128x128xf32>
    %307 = arith.divf %306, %305 : vector<128x128xf32>
    %cst_158 = arith.constant 1.06140542 : f32
    %308 = vector.broadcast %cst_158 : f32 to vector<128x128xf32>
    %309 = arith.mulf %307, %308 : vector<128x128xf32>
    %cst_159 = arith.constant -1.45315206 : f32
    %310 = vector.broadcast %cst_159 : f32 to vector<128x128xf32>
    %311 = arith.addf %310, %309 : vector<128x128xf32>
    %312 = arith.mulf %307, %311 : vector<128x128xf32>
    %cst_160 = arith.constant 1.42141378 : f32
    %313 = vector.broadcast %cst_160 : f32 to vector<128x128xf32>
    %314 = arith.addf %313, %312 : vector<128x128xf32>
    %315 = arith.mulf %307, %314 : vector<128x128xf32>
    %cst_161 = arith.constant -0.284496725 : f32
    %316 = vector.broadcast %cst_161 : f32 to vector<128x128xf32>
    %317 = arith.addf %316, %315 : vector<128x128xf32>
    %318 = arith.mulf %307, %317 : vector<128x128xf32>
    %cst_162 = arith.constant 0.254829586 : f32
    %319 = vector.broadcast %cst_162 : f32 to vector<128x128xf32>
    %320 = arith.addf %319, %318 : vector<128x128xf32>
    %321 = arith.mulf %307, %320 : vector<128x128xf32>
    %cst_163 = arith.constant 0.000000e+00 : f32
    %322 = vector.broadcast %cst_163 : f32 to vector<128x128xf32>
    %323 = arith.subf %322, %301 : vector<128x128xf32>
    %324 = arith.mulf %323, %301 : vector<128x128xf32>
    %325 = math.exp %324 : vector<128x128xf32>
    %326 = arith.mulf %321, %325 : vector<128x128xf32>
    %cst_164 = arith.constant 1.000000e+00 : f32
    %327 = vector.broadcast %cst_164 : f32 to vector<128x128xf32>
    %328 = arith.subf %327, %326 : vector<128x128xf32>
    %329 = arith.mulf %300, %328 : vector<128x128xf32>
    %cst_165 = arith.constant 5.000000e-01 : f32
    %330 = vector.broadcast %cst_165 : f32 to vector<128x128xf32>
    %331 = arith.mulf %330, %293 : vector<128x128xf32>
    %cst_166 = arith.constant 1.000000e+00 : f32
    %332 = vector.broadcast %cst_166 : f32 to vector<128x128xf32>
    %333 = arith.addf %332, %329 : vector<128x128xf32>
    %334 = arith.mulf %331, %333 : vector<128x128xf32>
    %c0_167 = arith.constant 0 : index
    %c0_168 = arith.constant 0 : index
    %335 = vector.load %arg22[%c0_167, %c0_168] : memref<128x32xf32, #tpu.memory_space<vmem>>, vector<128x32xf32>
    %cst_169 = arith.constant dense<0.000000e+00> : vector<128x32xf32>
    %336 = tpu.matmul %334, %335, %cst_169 {dimension_numbers = #tpu.dot_dimension_numbers<[1], [0], [0], [1], [0, 0, 1, 1], [], []>} : vector<128x128xf32>, vector<128x32xf32>, vector<128x32xf32> -> vector<128x32xf32>
    %c0_170 = arith.constant 0 : index
    %c0_171 = arith.constant 0 : index
    %337 = vector.load %arg23[%c0_170, %c0_171] : memref<1x32xf32, #tpu.memory_space<vmem>>, vector<1x32xf32>
    %338 = vector.broadcast %337 : vector<1x32xf32> to vector<128x32xf32>
    %339 = arith.addf %336, %338 : vector<128x32xf32>
    %340 = arith.addf %266, %339 : vector<128x32xf32>
    %c0_172 = arith.constant 0 : index
    %c0_173 = arith.constant 0 : index
    %341 = vector.load %arg24[%c0_172, %c0_173] : memref<128x32xf32, #tpu.memory_space<vmem>>, vector<128x32xf32>
    tpu.vector_store %arg24[%c0_172, %c0_173], %340 {strides = array<i32>} : memref<128x32xf32, #tpu.memory_space<vmem>>, vector<128x32xf32>,
    return
  }
  func.func @transform_0(%arg0: i32) -> (i32, i32) {
    %c0_i32 = arith.constant 0 : i32
    %c0_i32_0 = arith.constant 0 : i32
    return %arg0, %c0_i32 : i32, i32
  }
  func.func @transform_1(%arg0: i32) -> (i32, i32) {
    %c0_i32 = arith.constant 0 : i32
    %c0_i32_0 = arith.constant 0 : i32
    %c0_i32_1 = arith.constant 0 : i32
    return %c0_i32, %c0_i32_0 : i32, i32
  }
  func.func @transform_2(%arg0: i32) -> (i32, i32) {
    %c0_i32 = arith.constant 0 : i32
    %c0_i32_0 = arith.constant 0 : i32
    %c0_i32_1 = arith.constant 0 : i32
    return %c0_i32, %c0_i32_0 : i32, i32
  }
  func.func @transform_3(%arg0: i32) -> (i32, i32) {
    %c0_i32 = arith.constant 0 : i32
    %c0_i32_0 = arith.constant 0 : i32
    %c0_i32_1 = arith.constant 0 : i32
    return %c0_i32, %c0_i32_0 : i32, i32
  }
  func.func @transform_4(%arg0: i32) -> (i32, i32) {
    %c0_i32 = arith.constant 0 : i32
    %c0_i32_0 = arith.constant 0 : i32
    %c0_i32_1 = arith.constant 0 : i32
    return %c0_i32, %c0_i32_0 : i32, i32
  }
  func.func @transform_5(%arg0: i32) -> (i32, i32) {
    %c0_i32 = arith.constant 0 : i32
    %c0_i32_0 = arith.constant 0 : i32
    %c0_i32_1 = arith.constant 0 : i32
    return %c0_i32, %c0_i32_0 : i32, i32
  }
  func.func @transform_6(%arg0: i32) -> (i32, i32) {
    %c0_i32 = arith.constant 0 : i32
    %c0_i32_0 = arith.constant 0 : i32
    %c0_i32_1 = arith.constant 0 : i32
    return %c0_i32, %c0_i32_0 : i32, i32
  }
  func.func @transform_7(%arg0: i32) -> (i32, i32) {
    %c0_i32 = arith.constant 0 : i32
    %c0_i32_0 = arith.constant 0 : i32
    %c0_i32_1 = arith.constant 0 : i32
    return %c0_i32, %c0_i32_0 : i32, i32
  }
  func.func @transform_8(%arg0: i32) -> (i32, i32) {
    %c0_i32 = arith.constant 0 : i32
    %c0_i32_0 = arith.constant 0 : i32
    %c0_i32_1 = arith.constant 0 : i32
    return %c0_i32, %c0_i32_0 : i32, i32
  }
  func.func @transform_9(%arg0: i32) -> (i32, i32) {
    %c0_i32 = arith.constant 0 : i32
    %c0_i32_0 = arith.constant 0 : i32
    %c0_i32_1 = arith.constant 0 : i32
    return %c0_i32, %c0_i32_0 : i32, i32
  }
  func.func @transform_10(%arg0: i32) -> (i32, i32) {
    %c0_i32 = arith.constant 0 : i32
    %c0_i32_0 = arith.constant 0 : i32
    %c0_i32_1 = arith.constant 0 : i32
    return %c0_i32, %c0_i32_0 : i32, i32
  }
  func.func @transform_11(%arg0: i32) -> (i32, i32) {
    %c0_i32 = arith.constant 0 : i32
    %c0_i32_0 = arith.constant 0 : i32
    %c0_i32_1 = arith.constant 0 : i32
    return %c0_i32, %c0_i32_0 : i32, i32
  }
  func.func @transform_12(%arg0: i32) -> (i32, i32) {
    %c0_i32 = arith.constant 0 : i32
    %c0_i32_0 = arith.constant 0 : i32
    %c0_i32_1 = arith.constant 0 : i32
    return %c0_i32, %c0_i32_0 : i32, i32
  }
  func.func @transform_13(%arg0: i32) -> (i32, i32) {
    %c0_i32 = arith.constant 0 : i32
    %c0_i32_0 = arith.constant 0 : i32
    %c0_i32_1 = arith.constant 0 : i32
    return %c0_i32, %c0_i32_0 : i32, i32
  }
  func.func @transform_14(%arg0: i32) -> (i32, i32) {
    %c0_i32 = arith.constant 0 : i32
    %c0_i32_0 = arith.constant 0 : i32
    %c0_i32_1 = arith.constant 0 : i32
    return %c0_i32, %c0_i32_0 : i32, i32
  }
  func.func @transform_15(%arg0: i32) -> (i32, i32) {
    %c0_i32 = arith.constant 0 : i32
    %c0_i32_0 = arith.constant 0 : i32
    %c0_i32_1 = arith.constant 0 : i32
    return %c0_i32, %c0_i32_0 : i32, i32
  }
  func.func @transform_16(%arg0: i32) -> (i32, i32) {
    %c0_i32 = arith.constant 0 : i32
    %c0_i32_0 = arith.constant 0 : i32
    %c0_i32_1 = arith.constant 0 : i32
    return %c0_i32, %c0_i32_0 : i32, i32
  }
  func.func @transform_17(%arg0: i32) -> (i32, i32) {
    %c0_i32 = arith.constant 0 : i32
    %c0_i32_0 = arith.constant 0 : i32
    %c0_i32_1 = arith.constant 0 : i32
    return %c0_i32, %c0_i32_0 : i32, i32
  }
  func.func @transform_18(%arg0: i32) -> (i32, i32) {
    %c0_i32 = arith.constant 0 : i32
    %c0_i32_0 = arith.constant 0 : i32
    %c0_i32_1 = arith.constant 0 : i32
    return %c0_i32, %c0_i32_0 : i32, i32
  }
  func.func @transform_19(%arg0: i32) -> (i32, i32) {
    %c0_i32 = arith.constant 0 : i32
    %c0_i32_0 = arith.constant 0 : i32
    %c0_i32_1 = arith.constant 0 : i32
    return %c0_i32, %c0_i32_0 : i32, i32
  }
  func.func @transform_20(%arg0: i32) -> (i32, i32) {
    %c0_i32 = arith.constant 0 : i32
    %c0_i32_0 = arith.constant 0 : i32
    %c0_i32_1 = arith.constant 0 : i32
    return %c0_i32, %c0_i32_0 : i32, i32
  }
  func.func @transform_21(%arg0: i32) -> (i32, i32) {
    %c0_i32 = arith.constant 0 : i32
    %c0_i32_0 = arith.constant 0 : i32
    %c0_i32_1 = arith.constant 0 : i32
    return %c0_i32, %c0_i32_0 : i32, i32
  }
  func.func @transform_22(%arg0: i32) -> (i32, i32) {
    %c0_i32 = arith.constant 0 : i32
    %c0_i32_0 = arith.constant 0 : i32
    %c0_i32_1 = arith.constant 0 : i32
    return %c0_i32, %c0_i32_0 : i32, i32
  }
  func.func @transform_23(%arg0: i32) -> (i32, i32) {
    %c0_i32 = arith.constant 0 : i32
    %c0_i32_0 = arith.constant 0 : i32
    return %arg0, %c0_i32 : i32, i32
  }
}

</mosaic_0001>

<bundles_post_ra>
// kernel: tpu_custom_call.1
= control target key start
LH: loop header
LB: loop body
LE: loop exit
PB: predicated region body
PF: predicated region fallthrough
CT: control target
= control target key end

     0   :  { %s13195_s0 = inlined_call_operand.vmem [shape: f32[256,32], index: 0, kind: input, shape index: {}]   ;;  %s13196_s1 = inlined_call_operand.vmem [shape: f32[128,32], index: 1, kind: input, shape index: {}]   ;;  %s13197_s2 = inlined_call_operand.vmem [shape: f32[128,32], index: 2, kind: input, shape index: {}]   ;;  %s13198_s3 = inlined_call_operand.vmem [shape: f32[32,32], index: 3, kind: input, shape index: {}]   ;;  %s13199_s4 = inlined_call_operand.vmem [shape: f32[32,4], index: 4, kind: input, shape index: {}]   ;;  %s13200_s5 = inlined_call_operand.vmem [shape: f32[4,32], index: 5, kind: input, shape index: {}]   ;;  %s13201_s6 = inlined_call_operand.vmem [shape: f32[32,8], index: 6, kind: input, shape index: {}]   ;;  %s13202_s7 = inlined_call_operand.vmem [shape: f32[1,32], index: 7, kind: input, shape index: {}]   ;;  %s13203_s8 = inlined_call_operand.vmem [shape: f32[1,32], index: 8, kind: input, shape index: {}]   ;;  %s13204_s9 = inlined_call_operand.vmem [shape: f32[32,32], index: 9, kind: input, shape index: {}]   ;;  %s13205_s10 = inlined_call_operand.vmem [shape: f32[32,32], index: 10, kind: input, shape index: {}]   ;;  %s13206_s11 = inlined_call_operand.vmem [shape: f32[32,32], index: 11, kind: input, shape index: {}]   ;;  %s13207_s12 = inlined_call_operand.vmem [shape: f32[1,32], index: 12, kind: input, shape index: {}]   ;;  %s13208_s13 = inlined_call_operand.vmem [shape: f32[1,32], index: 13, kind: input, shape index: {}]   ;;  %s13209_s14 = inlined_call_operand.vmem [shape: f32[1,32], index: 14, kind: input, shape index: {}]   ;;  %s13210_s15 = inlined_call_operand.vmem [shape: f32[32,32], index: 15, kind: input, shape index: {}]   ;;  %s13211_s16 = inlined_call_operand.vmem [shape: f32[1,32], index: 16, kind: input, shape index: {}]   ;;  %s13212_s17 = inlined_call_operand.vmem [shape: f32[1,32], index: 17, kind: input, shape index: {}]   ;;  %s13213_s18 = inlined_call_operand.vmem [shape: f32[1,32], index: 18, kind: input, shape index: {}]   ;;  %s13214_s19 = inlined_call_operand.vmem [shape: f32[32,128], index: 19, kind: input, shape index: {}]   ;;  %s13215_s20 = inlined_call_operand.vmem [shape: f32[1,128], index: 20, kind: input, shape index: {}]   ;;  %s13216_s21 = inlined_call_operand.vmem [shape: f32[128,32], index: 21, kind: input, shape index: {}]   ;;  %s13217_s22 = inlined_call_operand.vmem [shape: f32[1,32], index: 22, kind: input, shape index: {}]   ;;  %s13218_s23 = inlined_call_operand.vmem [shape: f32[256,32], index: 23, kind: output, shape index: {}]  }
   0x1   :  { %13368 = sst [smem:[#allocation62_spill]] %s13195_s0 }
   0x2   :  { %13369 = sst [smem:[#allocation63_spill]] %s13196_s1 }
   0x3   :  { %13370 = sst [smem:[#allocation64_spill]] %s13197_s2 }
   0x4   :  { %13371 = sst [smem:[#allocation65_spill]] %s13198_s3 }
   0x5   :  { %13372 = sst [smem:[#allocation66_spill]] %s13199_s4  ;;  %s9477_s4 = smov 0  }
   0x6   :  { %13373 = sst [smem:[#allocation67_spill]] %s13200_s5 }
   0x7   :  { %13374 = sst [smem:[#allocation68_spill]] %s13201_s6 }
   0x8   :  { %13375 = sst [smem:[#allocation69_spill]] %s13202_s7 }
   0x9 LB: > { %s7542_s30 = sadd.s32 4294967295, %s9348_s4   ;;  %p7546_p0 = scmp.ge.s32.totalorder %s9348_s4, 1  ;;  %s9348_s4 = sphi %s9477_s4, %s33_s4  }
   0xa   : > { %p638_p1 = scmp.lt.s32.totalorder %s9348_s4, 3 }
   0xc   : > { %p639_p2 = pnand %p7546_p0, %p638_p1 }
   0xe   : > { %642 = sbr.rel (%p639_p2) target bundleno = 4632 (0x1218), region = 112 }
  0x13   : > { %s7547_s24 = sshll.u32 %s7542_s30, 4  ;;  %vm732_vm0 = vcmask 261120   ;;  %s13376_s26 = sld [smem:[#allocation62_spill]]  ;;  %vm2189_vm1 = vcmask 64512   ;;  %vm2206_vm2 = vcmask 130048   ;;  %vm2223_vm3 = vcmask 195584  }
  0x14   : > { %p703_p3 = scmp.lt.s32.totalorder %s7547_s24, 31  ;;  %s13377_s1 = sld [smem:[#allocation65_spill]]  ;;  %vm2465_vm4 = vcmask 31744   ;;  %vm2690_vm5 = vcmask 1043456  }
  0x15   : > { %s13378_s27 = sld [smem:[#allocation69_spill]]  ;;  %s13281_s28 = smov 8  }
  0x16   : > { %s13648_s24 = smov (!%p703_p3, %s7547_s24), 31  ;;  %s13379_s6 = sld [smem:[#allocation63_spill]] }
  0x17   : > { %s13276_s25 = sshll.u32 %s13648_s24, 3  ;;  %s13397_s0 = sld [smem:[#allocation66_spill]] }
  0x18   : > { %s13279_s30 = smov 16   ;;  %s13277_s7 = smov 24  }
  0x19   : > { %s9493_s2 = scalar_lea.vmem %s13376_s26, %s13276_s25  ;;  %s13435_s5 = sld [smem:[#allocation67_spill]] }
  0x1a   : > { %v714_v0 = vld [vmem:[%s9493_s2] sm:$0xff]  ;;  %v716_v1 = vld [vmem:[%s9493_s2 + $0x10] sm:$0xff]  ;;  %v715_v2 = vld [vmem:[%s9493_s2 + $0x8] sm:$0xff]  ;;  %s9353_s26 = smov 120   ;;  %s13437_s25 = sld [smem:[#allocation68_spill]] }
  0x1b   : > { %v733_v3 = vsel %vm732_vm0, %v714_v0, 0.0  ;;  %v739_v4 = vsel %vm732_vm0, %v716_v1, 0.0  ;;  %v717_v5 = vld [vmem:[%s9493_s2 + $0x18] sm:$0xff]  ;;  %v736_v6 = vsel %vm732_vm0, %v715_v2, 0.0  ;;  %v718_v8 = vld [vmem:[%s9493_s2 + $0x20] sm:$0xff]  ;;  %v719_v9 = vld [vmem:[%s9493_s2 + $0x28] sm:$0xff] }
  0x1c   : > { %734 = vadd.xlane.f32.xlu0 %v733_v3  ;;  %740 = vadd.xlane.f32.xlu1 %v739_v4  ;;  %v742_v7 = vsel %vm732_vm0, %v717_v5, 0.0  ;;  %v745_v10 = vsel %vm732_vm0, %v718_v8, 0.0  ;;  %v748_v11 = vsel %vm732_vm0, %v719_v9, 0.0  ;;  %v9508_v12 = vld [vmem:[%s9493_s2 + $0x30] sm:$0xff]  ;;  %v9511_v13 = vld [vmem:[%s9493_s2 + $0x38] sm:$0xff]  ;;  %v9518_v16 = vld [vmem:[%s9493_s2 + $0x40] sm:$0xff] }
  0x1d   : > { %v751_v14 = vsel %vm732_vm0, %v9508_v12, 0.0  ;;  %v754_v15 = vsel %vm732_vm0, %v9511_v13, 0.0  ;;  %v9521_v17 = vld [vmem:[%s9493_s2 + $0x48] sm:$0xff]  ;;  %v757_v18 = vsel %vm732_vm0, %v9518_v16, 0.0  ;;  %v9528_v20 = vld [vmem:[%s9493_s2 + $0x50] sm:$0xff]  ;;  %v9531_v21 = vld [vmem:[%s9493_s2 + $0x58] sm:$0xff] }
  0x1e   : > { %v760_v19 = vsel %vm732_vm0, %v9521_v17, 0.0  ;;  %v763_v22 = vsel %vm732_vm0, %v9528_v20, 0.0  ;;  %v766_v23 = vsel %vm732_vm0, %v9531_v21, 0.0  ;;  %v9538_v24 = vld [vmem:[%s9493_s2 + $0x60] sm:$0xff]  ;;  %v9541_v25 = vld [vmem:[%s9493_s2 + $0x68] sm:$0xff]  ;;  %v9548_v28 = vld [vmem:[%s9493_s2 + $0x70] sm:$0xff] }
  0x1f   : > { %v769_v26 = vsel %vm732_vm0, %v9538_v24, 0.0  ;;  %v772_v27 = vsel %vm732_vm0, %v9541_v25, 0.0  ;;  %v9551_v29 = vld [vmem:[%s9493_s2 + $0x78] sm:$0xff]  ;;  %v775_v30 = vsel %vm732_vm0, %v9548_v28, 0.0  ;;  %s9354_s29 = smov 112   ;;  %s9355_s3 = smov 104  }
  0x20   : > { %737 = vadd.xlane.f32.xlu0 %v736_v6  ;;  %743 = vadd.xlane.f32.xlu1 %v742_v7  ;;  %v778_v31 = vsel %vm732_vm0, %v9551_v29, 0.0 }
  0x24   : > { %746 = vadd.xlane.f32.xlu0 %v745_v10  ;;  %749 = vadd.xlane.f32.xlu1 %v748_v11 }
  0x28   : > { %752 = vadd.xlane.f32.xlu0 %v751_v14  ;;  %755 = vadd.xlane.f32.xlu1 %v754_v15 }
  0x2c   : > { %758 = vadd.xlane.f32.xlu0 %v757_v18  ;;  %761 = vadd.xlane.f32.xlu1 %v760_v19 }
  0x30   : > { %764 = vadd.xlane.f32.xlu0 %v763_v22  ;;  %767 = vadd.xlane.f32.xlu1 %v766_v23 }
  0x34   : > { %770 = vadd.xlane.f32.xlu0 %v769_v26  ;;  %773 = vadd.xlane.f32.xlu1 %v772_v27 }
  0x38   : > { %776 = vadd.xlane.f32.xlu0 %v775_v30  ;;  %779 = vadd.xlane.f32.xlu1 %v778_v31 }
  0xa5   : > { %v735_v32 = vpop.xlane.xlu0 %734  ;;  %v741_v33 = vpop.xlane.xlu1 %740 }
  0xa6   : > { %v782_v34 = vmul.f32 0.03125, %v735_v32  ;;  %v784_v35 = vmul.f32 0.03125, %v741_v33 }
  0xa8   : > { %v9557_v36 = vsub.f32 %v714_v0, %v782_v34  ;;  %v9559_v37 = vsub.f32 %v716_v1, %v784_v35 }
  0xa9   : > { %v738_v38 = vpop.xlane.xlu0 %737  ;;  %v744_v39 = vpop.xlane.xlu1 %743 }
  0xaa   : > { %v783_v40 = vmul.f32 0.03125, %v738_v38  ;;  %v785_v41 = vmul.f32 0.03125, %v744_v39  ;;  %v814_v42 = vmul.f32 %v9557_v36, %v9557_v36  ;;  %v816_v43 = vmul.f32 %v9559_v37, %v9559_v37 }
  0xac   : > { %v9565_v44 = vsub.f32 %v715_v2, %v783_v40  ;;  %v9567_v45 = vsub.f32 %v717_v5, %v785_v41  ;;  %v830_v46 = vsel %vm732_vm0, %v814_v42, 0.0  ;;  %v836_v49 = vsel %vm732_vm0, %v816_v43, 0.0 }
  0xad   : > { %831 = vadd.xlane.f32.xlu0 %v830_v46  ;;  %v747_v47 = vpop.xlane.xlu0 %746  ;;  %v750_v48 = vpop.xlane.xlu1 %749 }
  0xae   : > { %v786_v50 = vmul.f32 0.03125, %v747_v47  ;;  %v787_v51 = vmul.f32 0.03125, %v750_v48  ;;  %v815_v52 = vmul.f32 %v9565_v44, %v9565_v44  ;;  %v817_v53 = vmul.f32 %v9567_v45, %v9567_v45 }
  0xb0   : > { %v9575_v54 = vsub.f32 %v718_v8, %v786_v50  ;;  %v9577_v55 = vsub.f32 %v719_v9, %v787_v51  ;;  %v833_v56 = vsel %vm732_vm0, %v815_v52, 0.0  ;;  %v839_v59 = vsel %vm732_vm0, %v817_v53, 0.0  ;;  %v1193_v53 = vld [vmem:[%s13205_s10 + $0x18] sm:$0xff] }
  0xb1   : > { %837 = vadd.xlane.f32.xlu0 %v836_v49  ;;  %834 = vadd.xlane.f32.xlu1 %v833_v56  ;;  %v753_v57 = vpop.xlane.xlu0 %752  ;;  %v756_v58 = vpop.xlane.xlu1 %755  ;;  %v988_v56 = vld [vmem:[%s13204_s9 + $0x10] sm:$0xff] }
  0xb2   : > { %v788_v60 = vmul.f32 0.03125, %v753_v57  ;;  %v789_v61 = vmul.f32 0.03125, %v756_v58  ;;  %v818_v62 = vmul.f32 %v9575_v54, %v9575_v54  ;;  %v819_v63 = vmul.f32 %v9577_v55, %v9577_v55  ;;  %8303 = vmatprep.subr.mxu1 %v1193_v53  ;;  %v1192_v57 = vld [vmem:[%s13205_s10 + $0x10] sm:$0xff]  ;;  %v987_v58 = vld [vmem:[%s13204_s9 + $0x8] sm:$0xff] }
  0xb3   : > { %8304 = vmatpush3.msra.mxu1 %v1193_v53 }
  0xb4   : > { %v9586_v0 = vsub.f32 %v9508_v12, %v788_v60  ;;  %v9589_v1 = vsub.f32 %v9511_v13, %v789_v61  ;;  %v842_v2 = vsel %vm732_vm0, %v818_v62, 0.0  ;;  %v845_v5 = vsel %vm732_vm0, %v819_v63, 0.0  ;;  %8305 = vmatprep.subr.mxu1 %v1192_v57  ;;  %v986_v60 = vld [vmem:[%s13204_s9] sm:$0xff]  ;;  %v9674_v62 = vld [vmem:[%s13206_s11 + $0x18] sm:$0xff] }
  0xb5   : > { %840 = vadd.xlane.f32.xlu1 %v839_v59  ;;  %843 = vadd.xlane.f32.xlu0 %v842_v2  ;;  %v759_v3 = vpop.xlane.xlu0 %758  ;;  %v762_v4 = vpop.xlane.xlu1 %761  ;;  %v1191_v59 = vld [vmem:[%s13205_s10 + $0x8] sm:$0xff]  ;;  %v1190_v61 = vld [vmem:[%s13205_s10] sm:$0xff]  ;;  %v9680_v63 = vld [vmem:[%s13377_s1 + $0x18] sm:$0xff] }
  0xb6   : > { %v790_v6 = vmul.f32 0.03125, %v759_v3  ;;  %v791_v7 = vmul.f32 0.03125, %v762_v4  ;;  %v820_v8 = vmul.f32 %v9586_v0, %v9586_v0  ;;  %v821_v9 = vmul.f32 %v9589_v1, %v9589_v1  ;;  %8306 = vmatpush3.msra.mxu1 %v1192_v57 }
  0xb7   : > { %8307 = vmatprep.subr.mxu1 %v1191_v59 }
  0xb8   : > { %v9598_v10 = vsub.f32 %v9518_v16, %v790_v6  ;;  %v9601_v11 = vsub.f32 %v9521_v17, %v791_v7  ;;  %v848_v12 = vsel %vm732_vm0, %v820_v8, 0.0  ;;  %v851_v15 = vsel %vm732_vm0, %v821_v9, 0.0  ;;  %8308 = vmatpush3.msra.mxu1 %v1191_v59 }
  0xb9   : > { %846 = vadd.xlane.f32.xlu1 %v845_v5  ;;  %849 = vadd.xlane.f32.xlu0 %v848_v12  ;;  %v765_v13 = vpop.xlane.xlu0 %764  ;;  %v768_v14 = vpop.xlane.xlu1 %767 }
  0xba   : > { %v792_v18 = vmul.f32 0.03125, %v765_v13  ;;  %v793_v19 = vmul.f32 0.03125, %v768_v14  ;;  %v822_v22 = vmul.f32 %v9598_v10, %v9598_v10  ;;  %v823_v16 = vmul.f32 %v9601_v11, %v9601_v11  ;;  %8309 = vmatprep.subr.mxu1 %v1190_v61 }
  0xbb   : > { %8310 = vmatpush3.msra.mxu1 %v1190_v61 }
  0xbc   : > { %v9610_v23 = vsub.f32 %v9528_v20, %v792_v18  ;;  %v9613_v17 = vsub.f32 %v9531_v21, %v793_v19  ;;  %v854_v26 = vsel %vm732_vm0, %v822_v22, 0.0  ;;  %v857_v31 = vsel %vm732_vm0, %v823_v16, 0.0  ;;  %8367 = vmatprep.subr.mxu1 %v9680_v63 }
  0xbd   : > { %852 = vadd.xlane.f32.xlu1 %v851_v15  ;;  %855 = vadd.xlane.f32.xlu0 %v854_v26  ;;  %v771_v27 = vpop.xlane.xlu0 %770  ;;  %v774_v30 = vpop.xlane.xlu1 %773 }
  0xbe   : > { %v794_v32 = vmul.f32 0.03125, %v771_v27  ;;  %v795_v33 = vmul.f32 0.03125, %v774_v30  ;;  %v824_v34 = vmul.f32 %v9610_v23, %v9610_v23  ;;  %v825_v20 = vmul.f32 %v9613_v17, %v9613_v17 }
  0xc0   : > { %v9622_v35 = vsub.f32 %v9538_v24, %v794_v32  ;;  %v9625_v21 = vsub.f32 %v9541_v25, %v795_v33  ;;  %v860_v38 = vsel %vm732_vm0, %v824_v34, 0.0  ;;  %v863_v41 = vsel %vm732_vm0, %v825_v20, 0.0 }
  0xc1   : > { %858 = vadd.xlane.f32.xlu1 %v857_v31  ;;  %861 = vadd.xlane.f32.xlu0 %v860_v38  ;;  %v777_v39 = vpop.xlane.xlu0 %776  ;;  %v780_v40 = vpop.xlane.xlu1 %779 }
  0xc2   : > { %v796_v42 = vmul.f32 0.03125, %v777_v39  ;;  %v797_v43 = vmul.f32 0.03125, %v780_v40  ;;  %v826_v46 = vmul.f32 %v9622_v35, %v9622_v35  ;;  %v827_v24 = vmul.f32 %v9625_v21, %v9625_v21  ;;  %v9686_v40 = vld [vmem:[%s13378_s27] ss:$0 sm:$0xff]  ;;  %s13395_s27 = sld [smem:[#allocation64_spill]] }
  0xc4   : > { %v9634_v47 = vsub.f32 %v9548_v28, %v796_v42  ;;  %v9637_v25 = vsub.f32 %v9551_v29, %v797_v43  ;;  %v866_v48 = vsel %vm732_vm0, %v826_v46, 0.0  ;;  %v869_v49 = vsel %vm732_vm0, %v827_v24, 0.0  ;;  %v989_v29 = vld [vmem:[%s13204_s9 + $0x18] sm:$0xff] }
  0xc5   : > { %864 = vadd.xlane.f32.xlu1 %v863_v41  ;;  %867 = vadd.xlane.f32.xlu0 %v866_v48  ;;  %v9692_v48 = vld [vmem:[%s13203_s8] ss:$0 sm:$0xff] }
  0xc6   : > { %v828_v50 = vmul.f32 %v9634_v47, %v9634_v47  ;;  %v829_v51 = vmul.f32 %v9637_v25, %v9637_v25  ;;  %8271 = vmatprep.subr.mxu0 %v989_v29 }
  0xc7   : > { %8272 = vmatpush3.msra.mxu0 %v989_v29 }
  0xc8   : > { %v872_v52 = vsel %vm732_vm0, %v828_v50, 0.0  ;;  %v875_v28 = vsel %vm732_vm0, %v829_v51, 0.0  ;;  %8273 = vmatprep.subr.mxu0 %v988_v56 }
  0xc9   : > { %870 = vadd.xlane.f32.xlu1 %v869_v49  ;;  %873 = vadd.xlane.f32.xlu0 %v872_v52 }
  0xca   : > { %8274 = vmatpush3.msra.mxu0 %v988_v56 }
  0xcb   : > { %8275 = vmatprep.subr.mxu0 %v987_v58 }
  0xcc   : > { %8276 = vmatpush3.msra.mxu0 %v987_v58 }
  0xcd   : > { %876 = vadd.xlane.f32.xlu1 %v875_v28  ;;  %8277 = vmatprep.subr.mxu0 %v986_v60 }
  0xce   : > { %8278 = vmatpush3.msra.mxu0 %v986_v60 }
  0xcf   : > { %8335 = vmatprep.subr.mxu0 %v9674_v62 }
 0x136   : > { %v832_v2 = vpop.xlane.xlu0 %831 }
 0x137   : > { %v878_v3 = vmul.f32 0.03125, %v832_v2 }
 0x139   : > { %v894_v4 = vadd.f32 1e-05, %v878_v3 }
 0x13a   : > { %v835_v5 = vpop.xlane.xlu1 %834  ;;  %v838_v6 = vpop.xlane.xlu0 %837 }
 0x13b   : > { %8926 = vrsqrt.f32 %v894_v4  ;;  %v879_v7 = vmul.f32 0.03125, %v835_v5  ;;  %v880_v8 = vmul.f32 0.03125, %v838_v6 }
 0x13d   : > { %v895_v9 = vadd.f32 1e-05, %v879_v7  ;;  %v896_v12 = vadd.f32 1e-05, %v880_v8 }
 0x13e   : > { %v841_v13 = vpop.xlane.xlu1 %840  ;;  %v844_v14 = vpop.xlane.xlu0 %843 }
 0x13f   : > { %8928 = vrsqrt.f32 %v895_v9  ;;  %v881_v15 = vmul.f32 0.03125, %v841_v13  ;;  %v882_v18 = vmul.f32 0.03125, %v844_v14 }
 0x140   : > { %8930 = vrsqrt.f32 %v896_v12 }
 0x141   : > { %v897_v19 = vadd.f32 1e-05, %v881_v15  ;;  %v898_v22 = vadd.f32 1e-05, %v882_v18 }
 0x142   : > { %v847_v16 = vpop.xlane.xlu1 %846  ;;  %v850_v26 = vpop.xlane.xlu0 %849 }
 0x143   : > { %8932 = vrsqrt.f32 %v897_v19  ;;  %v883_v27 = vmul.f32 0.03125, %v847_v16  ;;  %v884_v30 = vmul.f32 0.03125, %v850_v26  ;;  %v9725_v19 = vld [vmem:[%s13377_s1 + $0x10] sm:$0xff] }
 0x144   : > { %8934 = vrsqrt.f32 %v898_v22 }
 0x145   : > { %v899_v31 = vadd.f32 1e-05, %v883_v27  ;;  %v900_v32 = vadd.f32 1e-05, %v884_v30 }
 0x146   : > { %v853_v33 = vpop.xlane.xlu1 %852  ;;  %v856_v34 = vpop.xlane.xlu0 %855 }
 0x147   : > { %8936 = vrsqrt.f32 %v899_v31  ;;  %v885_v20 = vmul.f32 0.03125, %v853_v33  ;;  %v886_v38 = vmul.f32 0.03125, %v856_v34 }
 0x148   : > { %v8927_v39 = vpop.eup %8926  ;;  %8938 = vrsqrt.f32 %v900_v32 }
 0x149   : > { %v901_v41 = vadd.f32 1e-05, %v885_v20  ;;  %v902_v42 = vadd.f32 1e-05, %v886_v38  ;;  %v926_v43 = vmul.f32 %v8927_v39, %v9557_v36 }
 0x14a   : > { %v859_v46 = vpop.xlane.xlu1 %858  ;;  %v862_v24 = vpop.xlane.xlu0 %861 }
 0x14b   : > { %8940 = vrsqrt.f32 %v901_v41  ;;  %v887_v49 = vmul.f32 0.03125, %v859_v46  ;;  %v888_v50 = vmul.f32 0.03125, %v862_v24  ;;  %v948_v51 = vmul.f32 %v9686_v40, %v926_v43 }
 0x14c   : > { %v8929_v52 = vpop.eup %8928  ;;  %8942 = vrsqrt.f32 %v902_v42 }
 0x14d   : > { %v8931_v28 = vpop.eup %8930  ;;  %v903_v29 = vadd.f32 1e-05, %v887_v49  ;;  %v904_v53 = vadd.f32 1e-05, %v888_v50  ;;  %v9696_v56 = vadd.f32 %v9692_v48, %v948_v51  ;;  %v927_v36 = vmul.f32 %v8929_v52, %v9565_v44  ;;  %v1346_v50 = vld [vmem:[%s13206_s11] sm:$0xff] }
 0x14e   : > { %v865_v57 = vpop.xlane.xlu1 %864  ;;  %v868_v58 = vpop.xlane.xlu0 %867  ;;  %v928_v59 = vmul.f32 %v8931_v28, %v9559_v37 }
 0x14f   : > { %8944 = vrsqrt.f32 %v903_v29  ;;  %v889_v60 = vmul.f32 0.03125, %v865_v57  ;;  %v890_v61 = vmul.f32 0.03125, %v868_v58  ;;  %8279 = vmatprep.mubr.msk.f32.mxu0 %vm732_vm0, %v9696_v56  ;;  %8311 = vmatprep.mubr.msk.f32.mxu1 %vm732_vm0, %v9696_v56  ;;  %v949_v2 = vmul.f32 %v9686_v40, %v927_v36 }
 0x150   : > { %v8933_v3 = vpop.eup %8932  ;;  %8946 = vrsqrt.f32 %v904_v53  ;;  %v950_v4 = vmul.f32 %v9686_v40, %v928_v59 }
 0x151   : > { %v8935_v44 = vpop.eup %8934  ;;  %v905_v5 = vadd.f32 1e-05, %v889_v60  ;;  %v906_v6 = vadd.f32 1e-05, %v890_v61  ;;  %v9707_v37 = vadd.f32 %v9692_v48, %v949_v2  ;;  %v929_v7 = vmul.f32 %v8933_v3, %v9567_v45  ;;  %v1348_v45 = vld [vmem:[%s13206_s11 + $0x10] sm:$0xff] }
 0x152   : > { %v871_v8 = vpop.xlane.xlu1 %870  ;;  %v874_v9 = vpop.xlane.xlu0 %873  ;;  %v9711_v12 = vadd.f32 %v9692_v48, %v950_v4  ;;  %v930_v13 = vmul.f32 %v8935_v44, %v9575_v54 }
 0x153   : > { %8948 = vrsqrt.f32 %v905_v5  ;;  %v891_v14 = vmul.f32 0.03125, %v871_v8  ;;  %v892_v15 = vmul.f32 0.03125, %v874_v9  ;;  %8280 = vmatmul.mubr.msk.f32.vlgmr.msra.gmra.mxu0 %vm732_vm0, %v9707_v37  ;;  %8312 = vmatmul.mubr.msk.f32.vlgmr.msra.gmra.mxu1 %vm732_vm0, %v9707_v37  ;;  %v951_v18 = vmul.f32 %v9686_v40, %v929_v7 }
 0x154   : > { %v8937_v54 = vpop.eup %8936  ;;  %8950 = vrsqrt.f32 %v906_v6  ;;  %8282 = vmatprep.mubr.msk.f32.mxu0 %vm732_vm0, %v9711_v12  ;;  %8314 = vmatprep.mubr.msk.f32.mxu1 %vm732_vm0, %v9711_v12  ;;  %v952_v22 = vmul.f32 %v9686_v40, %v930_v13 }
 0x155   : > { %v8939_v16 = vpop.eup %8938  ;;  %v907_v26 = vadd.f32 1e-05, %v891_v14  ;;  %v908_v27 = vadd.f32 1e-05, %v892_v15  ;;  %v9733_v30 = vadd.f32 %v9692_v48, %v951_v18  ;;  %v931_v31 = vmul.f32 %v8937_v54, %v9577_v55  ;;  %8336 = vmatpush3.msra.mxu0 %v9674_v62  ;;  %8368 = vmatpush3.msra.mxu1 %v9680_v63  ;;  %v1347_v62 = vld [vmem:[%s13206_s11 + $0x8] sm:$0xff] }
 0x156   : > { %v877_v32 = vpop.xlane.xlu1 %876  ;;  %v9739_v33 = vadd.f32 %v9692_v48, %v952_v22  ;;  %v932_v34 = vmul.f32 %v8939_v16, %v9586_v0  ;;  %8337 = vmatprep.subr.mxu0 %v1348_v45  ;;  %8369 = vmatprep.subr.mxu1 %v9725_v19  ;;  %v9754_v0 = vld [vmem:[%s13377_s1 + $0x8] sm:$0xff] }
 0x157   : > { %8952 = vrsqrt.f32 %v907_v26  ;;  %v893_v20 = vmul.f32 0.03125, %v877_v32  ;;  %8283 = vmatmul.mubr.msk.f32.gmra.mxu0 %vm732_vm0, %v9733_v30  ;;  %8315 = vmatmul.mubr.msk.f32.gmra.mxu1 %vm732_vm0, %v9733_v30  ;;  %v953_v55 = vmul.f32 %v9686_v40, %v931_v31  ;;  %v9908_v31 = vld [vmem:[%s13379_s6 + $0x18] sm:$0xff] }
 0x158   : > { %v8941_v38 = vpop.eup %8940  ;;  %8954 = vrsqrt.f32 %v908_v27  ;;  %8285 = vmatprep.mubr.msk.f32.mxu0 %vm732_vm0, %v9739_v33  ;;  %8317 = vmatprep.mubr.msk.f32.mxu1 %vm732_vm0, %v9739_v33  ;;  %v954_v39 = vmul.f32 %v9686_v40, %v932_v34 }
 0x159   : > { %v8943_v41 = vpop.eup %8942  ;;  %v909_v42 = vadd.f32 1e-05, %v893_v20  ;;  %v9762_v43 = vadd.f32 %v9692_v48, %v953_v55  ;;  %v933_v46 = vmul.f32 %v8941_v38, %v9589_v1  ;;  %8338 = vmatpush3.msra.mxu0 %v1348_v45  ;;  %8370 = vmatpush3.msra.mxu1 %v9725_v19  ;;  %v9920_v55 = vld [vmem:[%s13379_s6 + $0x10] sm:$0xff] }
 0x15a   : > { %v9767_v24 = vadd.f32 %v9692_v48, %v954_v39  ;;  %v934_v49 = vmul.f32 %v8943_v41, %v9598_v10  ;;  %8339 = vmatprep.subr.mxu0 %v1347_v62  ;;  %8371 = vmatprep.subr.mxu1 %v9754_v0  ;;  %v9782_v10 = vld [vmem:[%s13377_s1] sm:$0xff] }
 0x15b   : > { %8956 = vrsqrt.f32 %v909_v42  ;;  %8286 = vmatmul.mubr.msk.f32.gmra.mxu0 %vm732_vm0, %v9762_v43  ;;  %8318 = vmatmul.mubr.msk.f32.gmra.mxu1 %vm732_vm0, %v9762_v43  ;;  %v955_v1 = vmul.f32 %v9686_v40, %v933_v46 }
 0x15c   : > { %v8945_v51 = vpop.eup %8944  ;;  %8288 = vmatprep.mubr.msk.f32.mxu0 %vm732_vm0, %v9767_v24  ;;  %8320 = vmatprep.mubr.msk.f32.mxu1 %vm732_vm0, %v9767_v24  ;;  %v956_v52 = vmul.f32 %v9686_v40, %v934_v49 }
 0x15d   : > { %v8947_v28 = vpop.eup %8946  ;;  %v9790_v29 = vadd.f32 %v9692_v48, %v955_v1  ;;  %v935_v53 = vmul.f32 %v8945_v51, %v9601_v11  ;;  %8340 = vmatpush3.msra.mxu0 %v1347_v62  ;;  %8372 = vmatpush3.msra.mxu1 %v9754_v0 }
 0x15e   : > { %v9795_v36 = vadd.f32 %v9692_v48, %v956_v52  ;;  %v936_v57 = vmul.f32 %v8947_v28, %v9610_v23  ;;  %8341 = vmatprep.subr.mxu0 %v1346_v50  ;;  %8373 = vmatprep.subr.mxu1 %v9782_v10 }
 0x15f   : > { %8289 = vmatmul.mubr.msk.f32.gmra.mxu0 %vm732_vm0, %v9790_v29  ;;  %8321 = vmatmul.mubr.msk.f32.gmra.mxu1 %vm732_vm0, %v9790_v29  ;;  %v957_v58 = vmul.f32 %v9686_v40, %v935_v53 }
 0x160   : > { %v8949_v11 = vpop.eup %8948  ;;  %8291 = vmatprep.mubr.msk.f32.mxu0 %vm732_vm0, %v9795_v36  ;;  %8323 = vmatprep.mubr.msk.f32.mxu1 %vm732_vm0, %v9795_v36  ;;  %v958_v23 = vmul.f32 %v9686_v40, %v936_v57 }
 0x161   : > { %v8951_v59 = vpop.eup %8950  ;;  %v979_v60 = vadd.f32 %v9692_v48, %v957_v58  ;;  %v937_v61 = vmul.f32 %v8949_v11, %v9613_v17  ;;  %8342 = vmatpush3.msra.mxu0 %v1346_v50  ;;  %8374 = vmatpush3.msra.mxu1 %v9782_v10  ;;  %v9950_v50 = vld [vmem:[%s13379_s6 + $0x20] sm:$0xff] }
 0x162   : > { %v980_v2 = vadd.f32 %v9692_v48, %v958_v23  ;;  %v938_v3 = vmul.f32 %v8951_v59, %v9622_v35  ;;  %8399 = vmatprep.subr.mxu0 %v9680_v63  ;;  %v9980_v59 = vld [vmem:[%s13379_s6 + $0x30] sm:$0xff] }
 0x163   : > { %8292 = vmatmul.mubr.msk.f32.gmra.mxu0 %vm732_vm0, %v979_v60  ;;  %8324 = vmatmul.mubr.msk.f32.gmra.mxu1 %vm732_vm0, %v979_v60  ;;  %v959_v4 = vmul.f32 %v9686_v40, %v937_v61 }
 0x164   : > { %v8953_v44 = vpop.eup %8952  ;;  %8294 = vmatprep.mubr.msk.f32.mxu0 %vm732_vm0, %v980_v2  ;;  %8326 = vmatprep.mubr.msk.f32.mxu1 %vm732_vm0, %v980_v2  ;;  %v960_v17 = vmul.f32 %v9686_v40, %v938_v3 }
 0x165   : > { %v8955_v5 = vpop.eup %8954  ;;  %v981_v6 = vadd.f32 %v9692_v48, %v959_v4  ;;  %v939_v35 = vmul.f32 %v8953_v44, %v9625_v21 }
 0x166   : > { %v982_v7 = vadd.f32 %v9692_v48, %v960_v17  ;;  %v940_v8 = vmul.f32 %v8955_v5, %v9634_v47  ;;  %v9998_v17 = vld [vmem:[%s13379_s6 + $0x48] sm:$0xff] }
 0x167   : > { %8295 = vmatmul.mubr.msk.f32.gmra.mxu0 %vm732_vm0, %v981_v6  ;;  %8327 = vmatmul.mubr.msk.f32.gmra.mxu1 %vm732_vm0, %v981_v6  ;;  %v961_v9 = vmul.f32 %v9686_v40, %v939_v35 }
 0x168   : > { %v8957_v13 = vpop.eup %8956  ;;  %8297 = vmatprep.mubr.msk.f32.mxu0 %vm732_vm0, %v982_v7  ;;  %8329 = vmatprep.mubr.msk.f32.mxu1 %vm732_vm0, %v982_v7  ;;  %v962_v14 = vmul.f32 %v9686_v40, %v940_v8  ;;  %v10010_v8 = vld [vmem:[%s13379_s6 + $0x40] sm:$0xff] }
 0x169   : > { %v983_v15 = vadd.f32 %v9692_v48, %v961_v9  ;;  %v941_v21 = vmul.f32 %v8957_v13, %v9637_v25  ;;  %v9877_v25 = vld [vmem:[%s13208_s13] ss:$0 sm:$0xff] }
 0x16a   : > { %v984_v18 = vadd.f32 %v9692_v48, %v962_v14 }
 0x16b   : > { %8298 = vmatmul.mubr.msk.f32.gmra.mxu0 %vm732_vm0, %v983_v15  ;;  %8330 = vmatmul.mubr.msk.f32.gmra.mxu1 %vm732_vm0, %v983_v15  ;;  %v963_v47 = vmul.f32 %v9686_v40, %v941_v21  ;;  %v9882_v40 = vld [vmem:[%s13379_s6 + $0x8] sm:$0xff] }
 0x16c   : > { %8300 = vmatprep.mubr.msk.f32.mxu0 %vm732_vm0, %v984_v18  ;;  %8332 = vmatprep.mubr.msk.f32.mxu1 %vm732_vm0, %v984_v18 }
 0x16d   : > { %v985_v45 = vadd.f32 %v9692_v48, %v963_v47  ;;  %v10028_v47 = vld [vmem:[%s13379_s6 + $0x58] sm:$0xff] }
 0x16f   : > { %8301 = vmatmul.mubr.msk.f32.gmra.mxu0 %vm732_vm0, %v985_v45  ;;  %8333 = vmatmul.mubr.msk.f32.gmra.mxu1 %vm732_vm0, %v985_v45 }
 0x170   : > { %8343 = vmatprep.mubr.msk.f32.mxu0 %vm732_vm0, %v9696_v56  ;;  %v9887_v56 = vld [vmem:[%s13207_s12] ss:$0 sm:$0xff] }
 0x173   : > { %8344 = vmatmul.mubr.msk.f32.vlgmr.msra.gmra.mxu0 %vm732_vm0, %v9707_v37 }
 0x174   : > { %8346 = vmatprep.mubr.msk.f32.mxu0 %vm732_vm0, %v9711_v12  ;;  %8400 = vmatpush3.msra.mxu0 %v9680_v63 }
 0x175   : > { %8401 = vmatprep.subr.mxu0 %v9725_v19 }
 0x176   : > { %8402 = vmatpush3.msra.mxu0 %v9725_v19  ;;  %v9893_v19 = vld [vmem:[%s13379_s6] sm:$0xff] }
 0x177   : > { %8347 = vmatmul.mubr.msk.f32.gmra.mxu0 %vm732_vm0, %v9733_v30  ;;  %8403 = vmatprep.subr.mxu0 %v9754_v0 }
 0x178   : > { %8349 = vmatprep.mubr.msk.f32.mxu0 %vm732_vm0, %v9739_v33  ;;  %8404 = vmatpush3.msra.mxu0 %v9754_v0 }
 0x179   : > { %8405 = vmatprep.subr.mxu0 %v9782_v10 }
 0x17a   : > { %8406 = vmatpush3.msra.mxu0 %v9782_v10 }
 0x17b   : > { %8350 = vmatmul.mubr.msk.f32.gmra.mxu0 %vm732_vm0, %v9762_v43  ;;  %v9938_v43 = vld [vmem:[%s13379_s6 + $0x28] sm:$0xff] }
 0x17c   : > { %8352 = vmatprep.mubr.msk.f32.mxu0 %vm732_vm0, %v9767_v24 }
 0x17f   : > { %8353 = vmatmul.mubr.msk.f32.gmra.mxu0 %vm732_vm0, %v9790_v29 }
 0x180   : > { %8355 = vmatprep.mubr.msk.f32.mxu0 %vm732_vm0, %v9795_v36  ;;  %v9968_v36 = vld [vmem:[%s13379_s6 + $0x38] sm:$0xff] }
 0x183   : > { %8356 = vmatmul.mubr.msk.f32.gmra.mxu0 %vm732_vm0, %v979_v60 }
 0x184   : > { %8358 = vmatprep.mubr.msk.f32.mxu0 %vm732_vm0, %v980_v2 }
 0x187   : > { %8359 = vmatmul.mubr.msk.f32.gmra.mxu0 %vm732_vm0, %v981_v6 }
 0x188   : > { %8361 = vmatprep.mubr.msk.f32.mxu0 %vm732_vm0, %v982_v7 }
 0x18b   : > { %8362 = vmatmul.mubr.msk.f32.gmra.mxu0 %vm732_vm0, %v983_v15 }
 0x18c   : > { %8364 = vmatprep.mubr.msk.f32.mxu0 %vm732_vm0, %v984_v18 }
 0x18f   : > { %8365 = vmatmul.mubr.msk.f32.gmra.mxu0 %vm732_vm0, %v985_v45 }
 0x213   : > { %v8281_v63 = vpop.f32.mrf.mxu0  ;;  %v8313_v48 = vpop.f32.mrf.mxu1 }
 0x214   : > { %v1273_v37 = vadd.f32 %v8313_v48, %v9877_v25  ;;  %v9903_v27 = vadd.f32 %v8281_v63, %v9887_v56 }
 0x215   : > { %v1111_v12 = vpop.f32.mrf.mxu0  ;;  %v1267_v54 = vpop.f32.mrf.mxu1 }
 0x216   : > { %v9896_v22 = vmul.f32 %v9882_v40, %v1273_v37  ;;  %v9899_v16 = vadd.f32 %v9887_v56, %v1111_v12  ;;  %v1268_v26 = vadd.f32 %v9877_v25, %v1267_v54  ;;  %v10040_v12 = vld [vmem:[%s13379_s6 + $0x50] sm:$0xff] }
 0x217   : > { %v8284_v30 = vpop.f32.mrf.mxu0  ;;  %v8316_v32 = vpop.f32.mrf.mxu1 }
 0x218   : > { %v9911_v33 = vmul.f32 %v9893_v19, %v1268_v26  ;;  %v1283_v34 = vadd.f32 %v8316_v32, %v9877_v25  ;;  %8375 = vmatprep.mubr.msk.f32.mxu1 %vm732_vm0, %v9899_v16  ;;  %8407 = vmatprep.mubr.msk.f32.mxu0 %vm732_vm0, %v1268_v26  ;;  %v9933_v41 = vadd.f32 %v8284_v30, %v9887_v56 }
 0x219   : > { %v1121_v20 = vpop.f32.mrf.mxu0  ;;  %v1277_v62 = vpop.f32.mrf.mxu1  ;;  %8376 = vmatmul.mubr.msk.f32.vlgmr.msra.gmra.mxu1 %vm732_vm0, %v9903_v27  ;;  %8408 = vmatmul.mubr.msk.f32.vlgmr.msra.gmra.mxu0 %vm732_vm0, %v1273_v37 }
 0x21a   : > { %v9925_v0 = vmul.f32 %v9908_v31, %v1283_v34  ;;  %v9928_v38 = vadd.f32 %v9887_v56, %v1121_v20  ;;  %v1278_v39 = vadd.f32 %v9877_v25, %v1277_v62  ;;  %v10058_v62 = vld [vmem:[%s13379_s6 + $0x68] sm:$0xff] }
 0x21b   : > { %v8287_v42 = vpop.f32.mrf.mxu0  ;;  %v8319_v46 = vpop.f32.mrf.mxu1 }
 0x21c   : > { %v9941_v24 = vmul.f32 %v9920_v55, %v1278_v39  ;;  %v1293_v49 = vadd.f32 %v8319_v46, %v9877_v25  ;;  %8378 = vmatprep.mubr.msk.f32.mxu1 %vm732_vm0, %v9928_v38  ;;  %8410 = vmatprep.mubr.msk.f32.mxu0 %vm732_vm0, %v1278_v39  ;;  %v9963_v29 = vadd.f32 %v8287_v42, %v9887_v56 }
 0x21d   : > { %v1131_v1 = vpop.f32.mrf.mxu0  ;;  %v1287_v10 = vpop.f32.mrf.mxu1  ;;  %8379 = vmatmul.mubr.msk.f32.gmra.mxu1 %vm732_vm0, %v9933_v41  ;;  %8411 = vmatmul.mubr.msk.f32.gmra.mxu0 %vm732_vm0, %v1283_v34 }
 0x21e   : > { %v9955_v51 = vmul.f32 %v9938_v43, %v1293_v49  ;;  %v9958_v52 = vadd.f32 %v9887_v56, %v1131_v1  ;;  %v1288_v28 = vadd.f32 %v9877_v25, %v1287_v10  ;;  %v10070_v1 = vld [vmem:[%s13379_s6 + $0x60] sm:$0xff] }
 0x21f   : > { %v8290_v53 = vpop.f32.mrf.mxu0  ;;  %v8322_v57 = vpop.f32.mrf.mxu1 }
 0x220   : > { %v9971_v58 = vmul.f32 %v9950_v50, %v1288_v28  ;;  %v1303_v11 = vadd.f32 %v8322_v57, %v9877_v25  ;;  %8381 = vmatprep.mubr.msk.f32.mxu1 %vm732_vm0, %v9958_v52  ;;  %8413 = vmatprep.mubr.msk.f32.mxu0 %vm732_vm0, %v1288_v28  ;;  %v9993_v4 = vadd.f32 %v8290_v53, %v9887_v56 }
 0x221   : > { %v1141_v23 = vpop.f32.mrf.mxu0  ;;  %v1297_v60 = vpop.f32.mrf.mxu1  ;;  %8382 = vmatmul.mubr.msk.f32.gmra.mxu1 %vm732_vm0, %v9963_v29  ;;  %8414 = vmatmul.mubr.msk.f32.gmra.mxu0 %vm732_vm0, %v1293_v49 }
 0x222   : > { %v9985_v61 = vmul.f32 %v9968_v36, %v1303_v11  ;;  %v9988_v2 = vadd.f32 %v9887_v56, %v1141_v23  ;;  %v1298_v3 = vadd.f32 %v9877_v25, %v1297_v60  ;;  %v10088_v60 = vld [vmem:[%s13379_s6 + $0x78] sm:$0xff] }
 0x223   : > { %v8293_v44 = vpop.f32.mrf.mxu0  ;;  %v8325_v5 = vpop.f32.mrf.mxu1 }
 0x224   : > { %v10001_v6 = vmul.f32 %v9980_v59, %v1298_v3  ;;  %v1313_v35 = vadd.f32 %v8325_v5, %v9877_v25  ;;  %8384 = vmatprep.mubr.msk.f32.mxu1 %vm732_vm0, %v9988_v2  ;;  %8416 = vmatprep.mubr.msk.f32.mxu0 %vm732_vm0, %v1298_v3  ;;  %v10023_v21 = vadd.f32 %v8293_v44, %v9887_v56 }
 0x225   : > { %v1151_v7 = vpop.f32.mrf.mxu0  ;;  %v1307_v9 = vpop.f32.mrf.mxu1  ;;  %8385 = vmatmul.mubr.msk.f32.gmra.mxu1 %vm732_vm0, %v9993_v4  ;;  %8417 = vmatmul.mubr.msk.f32.gmra.mxu0 %vm732_vm0, %v1303_v11 }
 0x226   : > { %v10015_v13 = vmul.f32 %v9998_v17, %v1313_v35  ;;  %v10018_v14 = vadd.f32 %v9887_v56, %v1151_v7  ;;  %v1308_v15 = vadd.f32 %v9877_v25, %v1307_v9  ;;  %v10100_v7 = vld [vmem:[%s13379_s6 + $0x70] sm:$0xff] }
 0x227   : > { %v8296_v18 = vpop.f32.mrf.mxu0  ;;  %v8328_v45 = vpop.f32.mrf.mxu1 }
 0x228   : > { %v10031_v63 = vmul.f32 %v10010_v8, %v1308_v15  ;;  %v1323_v48 = vadd.f32 %v8328_v45, %v9877_v25  ;;  %8387 = vmatprep.mubr.msk.f32.mxu1 %vm732_vm0, %v10018_v14  ;;  %8419 = vmatprep.mubr.msk.f32.mxu0 %vm732_vm0, %v1308_v15  ;;  %v10053_v34 = vadd.f32 %v8296_v18, %v9887_v56 }
 0x229   : > { %v1161_v37 = vpop.f32.mrf.mxu0  ;;  %v1317_v54 = vpop.f32.mrf.mxu1  ;;  %8388 = vmatmul.mubr.msk.f32.gmra.mxu1 %vm732_vm0, %v10023_v21  ;;  %8420 = vmatmul.mubr.msk.f32.gmra.mxu0 %vm732_vm0, %v1313_v35 }
 0x22a   : > { %v10045_v26 = vmul.f32 %v10028_v47, %v1323_v48  ;;  %v10048_v30 = vadd.f32 %v9887_v56, %v1161_v37  ;;  %v1318_v32 = vadd.f32 %v9877_v25, %v1317_v54 }
 0x22b   : > { %v8299_v20 = vpop.f32.mrf.mxu0  ;;  %v8331_v39 = vpop.f32.mrf.mxu1 }
 0x22c   : > { %v10061_v42 = vmul.f32 %v10040_v12, %v1318_v32  ;;  %v1333_v46 = vadd.f32 %v8331_v39, %v9877_v25  ;;  %8390 = vmatprep.mubr.msk.f32.mxu1 %vm732_vm0, %v10048_v30  ;;  %8422 = vmatprep.mubr.msk.f32.mxu0 %vm732_vm0, %v1318_v32  ;;  %v10083_v11 = vadd.f32 %v8299_v20, %v9887_v56 }
 0x22d   : > { %v1171_v49 = vpop.f32.mrf.mxu0  ;;  %v1327_v10 = vpop.f32.mrf.mxu1  ;;  %8391 = vmatmul.mubr.msk.f32.gmra.mxu1 %vm732_vm0, %v10053_v34  ;;  %8423 = vmatmul.mubr.msk.f32.gmra.mxu0 %vm732_vm0, %v1323_v48 }
 0x22e   : > { %v10075_v28 = vmul.f32 %v10058_v62, %v1333_v46  ;;  %v10078_v53 = vadd.f32 %v9887_v56, %v1171_v49  ;;  %v1328_v57 = vadd.f32 %v9877_v25, %v1327_v10 }
 0x22f   : > { %v8302_v23 = vpop.f32.mrf.mxu0  ;;  %v8334_v3 = vpop.f32.mrf.mxu1 }
 0x230   : > { %v10091_v44 = vmul.f32 %v10070_v1, %v1328_v57  ;;  %v1343_v5 = vadd.f32 %v8334_v3, %v9877_v25  ;;  %8393 = vmatprep.mubr.msk.f32.mxu1 %vm732_vm0, %v10078_v53  ;;  %8425 = vmatprep.mubr.msk.f32.mxu0 %vm732_vm0, %v1328_v57  ;;  %v10113_v48 = vadd.f32 %v8302_v23, %v9887_v56 }
 0x231   : > { %v1181_v35 = vpop.f32.mrf.mxu0  ;;  %v1337_v9 = vpop.f32.mrf.mxu1  ;;  %8394 = vmatmul.mubr.msk.f32.gmra.mxu1 %vm732_vm0, %v10083_v11  ;;  %8426 = vmatmul.mubr.msk.f32.gmra.mxu0 %vm732_vm0, %v1333_v46 }
 0x232   : > { %v10105_v15 = vmul.f32 %v10088_v60, %v1343_v5  ;;  %v10108_v18 = vadd.f32 %v9887_v56, %v1181_v35  ;;  %v1338_v45 = vadd.f32 %v9877_v25, %v1337_v9 }
 0x233   : > { %v10115_v37 = vpop.f32.mrf.mxu0 }
 0x234   : > { %13380 = vst [vmem:[#allocation3_spill] sm:$0xff] %v10115_v37  ;;  %v10118_v54 = vmul.f32 %v10100_v7, %v1338_v45  ;;  %8396 = vmatprep.mubr.msk.f32.mxu1 %vm732_vm0, %v10108_v18  ;;  %8428 = vmatprep.mubr.msk.f32.mxu0 %vm732_vm0, %v1338_v45 }
 0x235   : > { %v10123_v32 = vpop.f32.mrf.mxu0  ;;  %8397 = vmatmul.mubr.msk.f32.gmra.mxu1 %vm732_vm0, %v10113_v48  ;;  %8429 = vmatmul.mubr.msk.f32.gmra.mxu0 %vm732_vm0, %v1343_v5  ;;  %v7587_v5 = vld [vmem:[%s13209_s14] ss:$0 sm:$0xff] }
 0x236   : > { %13381 = vst [vmem:[#allocation4_spill] sm:$0xff] %v10123_v32 }
 0x237   : > { %v10128_v25 = vpop.f32.mrf.mxu0 }
 0x238   : > { %13382 = vst [vmem:[#allocation5_spill] sm:$0xff] %v10128_v25 }
 0x239   : > { %v10130_v56 = vpop.f32.mrf.mxu0 }
 0x23a   : > { %13383 = vst [vmem:[#allocation6_spill] sm:$0xff] %v10130_v56 }
 0x23b   : > { %v10132_v20 = vpop.f32.mrf.mxu0 }
 0x23c   : > { %13384 = vst [vmem:[#allocation7_spill] sm:$0xff] %v10132_v20 }
 0x23d   : > { %v10134_v39 = vpop.f32.mrf.mxu0 }
 0x23e   : > { %13385 = vst [vmem:[#allocation8_spill] sm:$0xff] %v10134_v39 }
 0x23f   : > { %v10136_v46 = vpop.f32.mrf.mxu0 }
 0x240   : > { %13386 = vst [vmem:[#allocation9_spill] sm:$0xff] %v10136_v46 }
 0x241   : > { %v10138_v49 = vpop.f32.mrf.mxu0 }
 0x242   : > { %13387 = vst [vmem:[#allocation10_spill] sm:$0xff] %v10138_v49 }
 0x243   : > { %v10140_v10 = vpop.f32.mrf.mxu0 }
 0x244   : > { %13388 = vst [vmem:[#allocation11_spill] sm:$0xff] %v10140_v10  ;;  %v1519_v10 = vld [vmem:[%s13395_s27 + $0x8] sm:$0xff] }
 0x245   : > { %v10142_v57 = vpop.f32.mrf.mxu0 }
 0x246   : > { %13389 = vst [vmem:[#allocation12_spill] sm:$0xff] %v10142_v57 }
 0x247   : > { %v10144_v23 = vpop.f32.mrf.mxu0 }
 0x248   : > { %13390 = vst [vmem:[#allocation13_spill] sm:$0xff] %v10144_v23 }
 0x249   : > { %v10146_v3 = vpop.f32.mrf.mxu0 }
 0x24a   : > { %13391 = vst [vmem:[#allocation14_spill] sm:$0xff] %v10146_v3  ;;  %v1518_v3 = vld [vmem:[%s13395_s27] sm:$0xff] }
 0x24b   : > { %v8363_v35 = vpop.f32.mrf.mxu0 }
 0x24c   : > { %v10151_v9 = vadd.f32 %v8363_v35, %v7587_v5  ;;  %v1539_v35 = vmul.f32 %v9882_v40, %v9903_v27 }
 0x24d   : > { %v10153_v45 = vpop.f32.mrf.mxu0 }
 0x24e   : > { %13392 = vst [vmem:[#allocation15_spill] sm:$0xff] %v10151_v9  ;;  %13393 = vst [vmem:[#allocation16_spill] sm:$0xff] %v10153_v45  ;;  %v1538_v45 = vmul.f32 %v9893_v19, %v9899_v16  ;;  %v1520_v19 = vld [vmem:[%s13395_s27 + $0x10] sm:$0xff] }
 0x24f   : > { %v8366_v46 = vpop.f32.mrf.mxu0 }
 0x250   : > { %v10155_v20 = vadd.f32 %v8366_v46, %v7587_v5  ;;  %v10170_v46 = vld [vmem:[%s13397_s0 + $0x18] sm:$0xff]  ;;  %v2022_v5 = vld [vmem:[%s13397_s0 + $0x10] sm:$0xff] }
 0x251   : > { %v10160_v57 = vpop.f32.mrf.mxu0  ;;  %13398 = vst [vmem:[#allocation19_spill] sm:$0xff] %v10170_v46  ;;  %8431 = vmatprep.subr.mxu1 %v10170_v46 }
 0x252   : > { %13394 = vst [vmem:[#allocation17_spill] sm:$0xff] %v10155_v20  ;;  %13396 = vst [vmem:[#allocation18_spill] sm:$0xff] %v10160_v57  ;;  %8432 = vmatpush3.msra.mxu1 %v10170_v46 }
 0x253   : > { %8433 = vmatprep.subr.mxu1 %v2022_v5 }
 0x254   : > { %8434 = vmatpush3.msra.mxu1 %v2022_v5 }
 0x2d9   : > { %v8377_v23 = vpop.f32.mrf.mxu1  ;;  %v8409_v49 = vpop.f32.mrf.mxu0 }
 0x2da   : > { %v1748_v9 = vmul.f32 %v8377_v23, %v1519_v10  ;;  %v1989_v20 = vmul.f32 %v8409_v49, %v1519_v10  ;;  %v1521_v23 = vld [vmem:[%s13395_s27 + $0x18] sm:$0xff] }
 0x2db   : > { %v1668_v57 = vpop.f32.mrf.mxu1  ;;  %v1909_v27 = vpop.f32.mrf.mxu0 }
 0x2dc   : > { %v10178_v39 = vadd.f32 %v1748_v9, %v1539_v35  ;;  %v1747_v40 = vmul.f32 %v1668_v57, %v1518_v3  ;;  %v10185_v25 = vadd.f32 %v1989_v20, %v9896_v22  ;;  %v1988_v49 = vmul.f32 %v1909_v27, %v1518_v3  ;;  %v2021_v22 = vld [vmem:[%s13397_s0 + $0x8] sm:$0xff]  ;;  %v2020_v3 = vld [vmem:[%s13397_s0] sm:$0xff] }
 0x2dd   : > { %v8380_v10 = vpop.f32.mrf.mxu1  ;;  %v8412_v37 = vpop.f32.mrf.mxu0  ;;  %8435 = vmatprep.subr.mxu1 %v2021_v22 }
 0x2de   : > { %v10187_v56 = vadd.f32 %v1747_v40, %v1538_v45  ;;  %2047 = vrot.lane.b32.xlu1 %v10178_v39, %s13281_s28  ;;  %v10198_v16 = vadd.f32 %v1988_v49, %v9911_v33  ;;  %v1991_v20 = vmul.f32 %v8412_v37, %v1521_v23  ;;  %v10208_v45 = vld [vmem:[%s13395_s27 + $0x28] sm:$0xff]  ;;  %8436 = vmatpush3.msra.mxu1 %v2021_v22  ;;  %v1522_v40 = vld [vmem:[%s13395_s27 + $0x20] sm:$0xff] }
 0x2df   : > { %v1678_v57 = vpop.f32.mrf.mxu1  ;;  %v1919_v9 = vpop.f32.mrf.mxu0  ;;  %8437 = vmatprep.subr.mxu1 %v2020_v3 }
 0x2e0   : > { %2045 = vrot.lane.b32.xlu0 %v10187_v56, %s13281_s28  ;;  %v10211_v33 = vadd.f32 %v1991_v20, %v9925_v0  ;;  %v1990_v37 = vmul.f32 %v1919_v9, %v1520_v19  ;;  %v1749_v35 = vmul.f32 %v1678_v57, %v1520_v19  ;;  %8438 = vmatpush3.msra.mxu1 %v2020_v3  ;;  %v10229_v19 = vld [vmem:[%s13395_s27 + $0x38] sm:$0xff] }
 0x2e1   : > { %v8415_v5 = vpop.f32.mrf.mxu0  ;;  %v1540_v0 = vmul.f32 %v9920_v55, %v9928_v38  ;;  %v1524_v55 = vld [vmem:[%s13395_s27 + $0x30] sm:$0xff]  ;;  %v8383_v38 = vpop.f32.mrf.mxu1 }
 0x2e2   : > { %13399 = vst [vmem:[#allocation20_spill] sm:$0xff] %v10211_v33  ;;  %2095 = vrot.lane.b32.xlu1 %v10178_v39, %s13279_s30  ;;  %v10219_v27 = vadd.f32 %v1990_v37, %v9941_v24  ;;  %v1993_v49 = vmul.f32 %v8415_v5, %v10208_v45  ;;  %v1750_v5 = vmul.f32 %v8380_v10, %v1521_v23  ;;  %v1526_v23 = vld [vmem:[%s13395_s27 + $0x40] sm:$0xff] }
 0x2e3   : > { %v1929_v22 = vpop.f32.mrf.mxu0  ;;  %v10234_v57 = vadd.f32 %v1749_v35, %v1540_v0  ;;  %v10250_v35 = vld [vmem:[%s13395_s27 + $0x48] sm:$0xff]  ;;  %v1688_v10 = vpop.f32.mrf.mxu1 }
 0x2e4   : > { %2141 = vrot.lane.b32.xlu0 %v10187_v56, %s13277_s7  ;;  %v10232_v20 = vadd.f32 %v1993_v49, %v9955_v51  ;;  %v1992_v24 = vmul.f32 %v1929_v22, %v1522_v40  ;;  %v1751_v32 = vmul.f32 %v1688_v10, %v1522_v40  ;;  %v10296_v40 = vld [vmem:[%s13395_s27 + $0x68] sm:$0xff] }
 0x2e5   : > { %v8418_v3 = vpop.f32.mrf.mxu0 }
 0x2e6   : > { %13400 = vst [vmem:[#allocation21_spill] sm:$0xff] %v10232_v20  ;;  %2143 = vrot.lane.b32.xlu1 %v10178_v39, %s13277_s7  ;;  %v10242_v9 = vadd.f32 %v1992_v24, %v9971_v58  ;;  %v1995_v37 = vmul.f32 %v8418_v3, %v10229_v19  ;;  %v1541_v58 = vmul.f32 %v9908_v31, %v9933_v41  ;;  %v10273_v31 = vld [vmem:[%s13395_s27 + $0x58] sm:$0xff] }
 0x2e7   : > { %v1939_v51 = vpop.f32.mrf.mxu0 }
 0x2e8   : > { %13401 = vst [vmem:[#allocation22_spill] sm:$0xff] %v10242_v9  ;;  %2049 = vrot.lane.b32.xlu0 %v10234_v57, %s13281_s28  ;;  %v10253_v49 = vadd.f32 %v1995_v37, %v9985_v61  ;;  %v1994_v0 = vmul.f32 %v1939_v51, %v1524_v55  ;;  %v10266_v61 = vadd.f32 %v1750_v5, %v1541_v58  ;;  %v10283_v5 = vld [vmem:[%s13395_s27 + $0x50] sm:$0xff] }
 0x2e9   : > { %v8421_v22 = vpop.f32.mrf.mxu0 }
 0x2ea   : > { %13402 = vst [vmem:[#allocation23_spill] sm:$0xff] %v10253_v49  ;;  %2093 = vrot.lane.b32.xlu1 %v10187_v56, %s13279_s30  ;;  %v10263_v24 = vadd.f32 %v1994_v0, %v10001_v6  ;;  %v1997_v3 = vmul.f32 %v8421_v22, %v10250_v35 }
 0x2eb   : > { %v1949_v37 = vpop.f32.mrf.mxu0 }
 0x2ec   : > { %13403 = vst [vmem:[#allocation24_spill] sm:$0xff] %v10263_v24  ;;  %2097 = vrot.lane.b32.xlu0 %v10234_v57, %s13279_s30  ;;  %v10276_v41 = vadd.f32 %v1997_v3, %v10015_v13  ;;  %v1996_v51 = vmul.f32 %v1949_v37, %v1526_v23  ;;  %v1542_v13 = vmul.f32 %v9950_v50, %v9958_v52  ;;  %v10309_v50 = vld [vmem:[%s13395_s27 + $0x60] sm:$0xff]  ;;  %v8386_v52 = vpop.f32.mrf.mxu1 }
 0x2ed   : > { %v8424_v6 = vpop.f32.mrf.mxu0 }
 0x2ee   : > { %13404 = vst [vmem:[#allocation25_spill] sm:$0xff] %v10276_v41  ;;  %2051 = vrot.lane.b32.xlu1 %v10266_v61, %s13281_s28  ;;  %v10286_v0 = vadd.f32 %v1996_v51, %v10031_v63  ;;  %v1999_v58 = vmul.f32 %v8424_v6, %v10273_v31  ;;  %v10302_v3 = vadd.f32 %v1751_v32, %v1542_v13  ;;  %v10321_v32 = vld [vmem:[%s13395_s27 + $0x78] sm:$0xff] }
 0x2ef   : > { %v1959_v22 = vpop.f32.mrf.mxu0  ;;  %v1752_v6 = vmul.f32 %v8383_v38, %v10208_v45  ;;  %v10334_v45 = vld [vmem:[%s13395_s27 + $0x70] sm:$0xff]  ;;  %v1698_v38 = vpop.f32.mrf.mxu1 }
 0x2f0   : > { %13405 = vst [vmem:[#allocation26_spill] sm:$0xff] %v10286_v0  ;;  %2145 = vrot.lane.b32.xlu0 %v10234_v57, %s13277_s7  ;;  %v10299_v10 = vadd.f32 %v1999_v58, %v10045_v26  ;;  %v1998_v63 = vmul.f32 %v1959_v22, %v10283_v5  ;;  %v1753_v46 = vmul.f32 %v1698_v38, %v1524_v55 }
 0x2f1   : > { %v8427_v37 = vpop.f32.mrf.mxu0  ;;  %v1754_v55 = vmul.f32 %v8386_v52, %v10229_v19  ;;  %v1546_v19 = vmul.f32 %v10010_v8, %v10018_v14 }
 0x2f2   : > { %13406 = vst [vmem:[#allocation27_spill] sm:$0xff] %v10299_v10  ;;  %2099 = vrot.lane.b32.xlu1 %v10266_v61, %s13279_s30  ;;  %v10312_v51 = vadd.f32 %v1998_v63, %v10061_v42  ;;  %v2001_v26 = vmul.f32 %v8427_v37, %v10296_v40  ;;  %v1543_v42 = vmul.f32 %v9938_v43, %v9963_v29 }
 0x2f3   : > { %v1969_v58 = vpop.f32.mrf.mxu0 }
 0x2f4   : > { %13407 = vst [vmem:[#allocation28_spill] sm:$0xff] %v10312_v51  ;;  %2053 = vrot.lane.b32.xlu0 %v10302_v3, %s13281_s28  ;;  %v10324_v13 = vadd.f32 %v2001_v26, %v10075_v28  ;;  %v2000_v22 = vmul.f32 %v1969_v58, %v10309_v50  ;;  %v10340_v26 = vadd.f32 %v1752_v6, %v1543_v42 }
 0x2f5   : > { %v8430_v63 = vpop.f32.mrf.mxu0  ;;  %v1544_v6 = vmul.f32 %v9980_v59, %v9988_v2 }
 0x2f6   : > { %13408 = vst [vmem:[#allocation29_spill] sm:$0xff] %v10324_v13  ;;  %2147 = vrot.lane.b32.xlu1 %v10266_v61, %s13277_s7  ;;  %v10337_v37 = vadd.f32 %v2000_v22, %v10091_v44  ;;  %v2003_v28 = vmul.f32 %v8430_v63, %v10321_v32 }
 0x2f7   : > { %v1979_v58 = vpop.f32.mrf.mxu0  ;;  %v10357_v22 = vadd.f32 %v1753_v46, %v1544_v6 }
 0x2f8   : > { %13409 = vst [vmem:[#allocation30_spill] sm:$0xff] %v10337_v37  ;;  %2101 = vrot.lane.b32.xlu0 %v10302_v3, %s13279_s30  ;;  %v10345_v43 = vadd.f32 %v2003_v28, %v10105_v15  ;;  %v2002_v29 = vmul.f32 %v1979_v58, %v10334_v45  ;;  %v8389_v15 = vpop.f32.mrf.mxu1 }
 0x2f9   : > { %v1756_v52 = vmul.f32 %v8389_v15, %v10250_v35  ;;  %v1548_v35 = vmul.f32 %v10040_v12, %v10048_v30 }
 0x2fa   : > { %13410 = vst [vmem:[#allocation31_spill] sm:$0xff] %v10345_v43  ;;  %2055 = vrot.lane.b32.xlu1 %v10340_v26, %s13281_s28  ;;  %v10351_v44 = vadd.f32 %v2002_v29, %v10118_v54  ;;  %v1545_v54 = vmul.f32 %v9968_v36, %v9993_v4  ;;  %v1708_v59 = vpop.f32.mrf.mxu1 }
 0x2fb   : > { %v1755_v46 = vmul.f32 %v1708_v59, %v1526_v23  ;;  %v1547_v23 = vmul.f32 %v9998_v17, %v10023_v21 }
 0x2fc   : > { %13411 = vst [vmem:[#allocation32_spill] sm:$0xff] %v10351_v44  ;;  %2149 = vrot.lane.b32.xlu0 %v10302_v3, %s13277_s7  ;;  %v10368_v2 = vadd.f32 %v1754_v55, %v1545_v54  ;;  %v8392_v4 = vpop.f32.mrf.mxu1 }
 0x2fd   : > { %v10378_v36 = vadd.f32 %v1755_v46, %v1546_v19  ;;  %v10389_v14 = vadd.f32 %v1756_v52, %v1547_v23  ;;  %v1758_v63 = vmul.f32 %v8392_v4, %v10273_v31  ;;  %v1550_v31 = vmul.f32 %v10070_v1, %v10078_v53 }
 0x2fe   : > { %2103 = vrot.lane.b32.xlu1 %v10340_v26, %s13279_s30  ;;  %v1718_v8 = vpop.f32.mrf.mxu1 }
 0x2ff   : > { %v1757_v42 = vmul.f32 %v1718_v8, %v10283_v5  ;;  %v1549_v5 = vmul.f32 %v10028_v47, %v10053_v34 }
 0x300   : > { %2057 = vrot.lane.b32.xlu0 %v10357_v22, %s13281_s28  ;;  %v8395_v21 = vpop.f32.mrf.mxu1 }
 0x301   : > { %v10400_v17 = vadd.f32 %v1757_v42, %v1548_v35  ;;  %v10411_v30 = vadd.f32 %v1758_v63, %v1549_v5  ;;  %v1760_v28 = vmul.f32 %v8395_v21, %v10296_v40  ;;  %v1552_v40 = vmul.f32 %v10100_v7, %v10108_v18 }
 0x302   : > { %2151 = vrot.lane.b32.xlu1 %v10340_v26, %s13277_s7  ;;  %v1728_v12 = vpop.f32.mrf.mxu1 }
 0x303   : > { %v1759_v38 = vmul.f32 %v1728_v12, %v10309_v50  ;;  %v1551_v50 = vmul.f32 %v10058_v62, %v10083_v11 }
 0x304   : > { %2105 = vrot.lane.b32.xlu0 %v10357_v22, %s13279_s30  ;;  %v8398_v34 = vpop.f32.mrf.mxu1 }
 0x305   : > { %v10422_v47 = vadd.f32 %v1759_v38, %v1550_v31  ;;  %v10433_v53 = vadd.f32 %v1760_v28, %v1551_v50  ;;  %v1762_v11 = vmul.f32 %v8398_v34, %v10321_v32 }
 0x306   : > { %2059 = vrot.lane.b32.xlu1 %v10368_v2, %s13281_s28  ;;  %v1738_v1 = vpop.f32.mrf.mxu1 }
 0x307   : > { %v1761_v58 = vmul.f32 %v1738_v1, %v10334_v45  ;;  %v1553_v45 = vmul.f32 %v10088_v60, %v10113_v48 }
 0x308   : > { %2153 = vrot.lane.b32.xlu0 %v10357_v22, %s13277_s7 }
 0x309   : > { %v10444_v62 = vadd.f32 %v1761_v58, %v1552_v40  ;;  %v10455_v7 = vadd.f32 %v1762_v11, %v1553_v45 }
 0x30a   : > { %2107 = vrot.lane.b32.xlu1 %v10368_v2, %s13279_s30 }
 0x30b   : > { %13412 = vst [vmem:[#allocation33_spill] sm:$0xff] %v10455_v7 }
 0x30c   : > { %2061 = vrot.lane.b32.xlu0 %v10378_v36, %s13281_s28 }
 0x30e   : > { %2155 = vrot.lane.b32.xlu1 %v10368_v2, %s13277_s7 }
 0x310   : > { %2109 = vrot.lane.b32.xlu0 %v10378_v36, %s13279_s30 }
 0x312   : > { %2063 = vrot.lane.b32.xlu1 %v10389_v14, %s13281_s28 }
 0x314   : > { %2157 = vrot.lane.b32.xlu0 %v10378_v36, %s13277_s7 }
 0x316   : > { %2111 = vrot.lane.b32.xlu1 %v10389_v14, %s13279_s30 }
 0x318   : > { %2065 = vrot.lane.b32.xlu0 %v10400_v17, %s13281_s28 }
 0x31a   : > { %2159 = vrot.lane.b32.xlu1 %v10389_v14, %s13277_s7 }
 0x31c   : > { %2113 = vrot.lane.b32.xlu0 %v10400_v17, %s13279_s30 }
 0x31e   : > { %2067 = vrot.lane.b32.xlu1 %v10411_v30, %s13281_s28 }
 0x320   : > { %2161 = vrot.lane.b32.xlu0 %v10400_v17, %s13277_s7 }
 0x322   : > { %2115 = vrot.lane.b32.xlu1 %v10411_v30, %s13279_s30 }
 0x324   : > { %2069 = vrot.lane.b32.xlu0 %v10422_v47, %s13281_s28 }
 0x326   : > { %2163 = vrot.lane.b32.xlu1 %v10411_v30, %s13277_s7 }
 0x328   : > { %2117 = vrot.lane.b32.xlu0 %v10422_v47, %s13279_s30 }
 0x32a   : > { %2071 = vrot.lane.b32.xlu1 %v10433_v53, %s13281_s28 }
 0x32c   : > { %2165 = vrot.lane.b32.xlu0 %v10422_v47, %s13277_s7 }
 0x32e   : > { %2119 = vrot.lane.b32.xlu1 %v10433_v53, %s13279_s30 }
 0x330   : > { %2073 = vrot.lane.b32.xlu0 %v10444_v62, %s13281_s28 }
 0x332   : > { %2167 = vrot.lane.b32.xlu1 %v10433_v53, %s13277_s7 }
 0x334   : > { %2121 = vrot.lane.b32.xlu0 %v10444_v62, %s13279_s30 }
 0x336   : > { %2075 = vrot.lane.b32.xlu1 %v10455_v7, %s13281_s28 }
 0x338   : > { %2169 = vrot.lane.b32.xlu0 %v10444_v62, %s13277_s7 }
 0x33a   : > { %2123 = vrot.lane.b32.xlu1 %v10455_v7, %s13279_s30 }
 0x33e   : > { %2171 = vrot.lane.b32.xlu1 %v10455_v7, %s13277_s7 }
 0x350   : > { %v10467_v60 = vpop.permute.xlu1 %2047 }
 0x351   : > { %v2191_v15 = vsel %vm2189_vm1, %v10178_v39, %v10467_v60 }
 0x352   : > { %v10469_v18 = vpop.permute.xlu0 %2045 }
 0x353   : > { %v2190_v59 = vsel %vm2189_vm1, %v10187_v56, %v10469_v18 }
 0x354   : > { %v10471_v48 = vpop.permute.xlu1 %2095 }
 0x355   : > { %v2208_v55 = vsel %vm2206_vm2, %v2191_v15, %v10471_v48 }
 0x356   : > { %v2142_v32 = vpop.permute.xlu0 %2141 }
 0x358   : > { %v2144_v29 = vpop.permute.xlu1 %2143 }
 0x359   : > { %v2225_v46 = vsel %vm2223_vm3, %v2208_v55, %v2144_v29 }
 0x35a   : > { %v10473_v6 = vpop.permute.xlu0 %2049  ;;  %v2241_v8 = vmul.f32 %v2225_v46, %v10185_v25 }
 0x35b   : > { %13413 = vst [vmem:[#allocation34_spill] sm:$0xff] %v10473_v6  ;;  %v2192_v35 = vsel %vm2189_vm1, %v10234_v57, %v10473_v6 }
 0x35c   : > { %v10480_v54 = vpop.permute.xlu1 %2093 }
 0x35d   : > { %v2207_v19 = vsel %vm2206_vm2, %v2190_v59, %v10480_v54 }
 0x35e   : > { %v2224_v4 = vsel %vm2223_vm3, %v2207_v19, %v2142_v32  ;;  %v10489_v52 = vpop.permute.xlu0 %2097 }
 0x35f   : > { %v2240_v23 = vmul.f32 %v2224_v4, %v10198_v16  ;;  %v2209_v21 = vsel %vm2206_vm2, %v2192_v35, %v10489_v52 }
 0x360   : > { %v10493_v42 = vpop.permute.xlu1 %2051 }
 0x361   : > { %8439 = vmatprep.mubr.msk.f32.mxu1 %vm732_vm0, %v2240_v23  ;;  %v2193_v34 = vsel %vm2189_vm1, %v10266_v61, %v10493_v42 }
 0x362   : > { %v2146_v63 = vpop.permute.xlu0 %2145  ;;  %8440 = vmatmul.mubr.msk.f32.vlgmr.msra.gmra.mxu1 %vm732_vm0, %v2241_v8 }
 0x363   : > { %v2226_v5 = vsel %vm2223_vm3, %v2209_v21, %v2146_v63 }
 0x364   : > { %v2242_v12 = vmul.f32 %v2226_v5, %v10219_v27  ;;  %v10504_v38 = vpop.permute.xlu1 %2099 }
 0x365   : > { %v2210_v28 = vsel %vm2206_vm2, %v2193_v34, %v10504_v38 }
 0x366   : > { %v10506_v31 = vpop.permute.xlu0 %2053  ;;  %8442 = vmatprep.mubr.msk.f32.mxu1 %vm732_vm0, %v2242_v12 }
 0x367   : > { %v2194_v45 = vsel %vm2189_vm1, %v10302_v3, %v10506_v31 }
 0x368   : > { %v2148_v50 = vpop.permute.xlu1 %2147 }
 0x369   : > { %v2227_v1 = vsel %vm2223_vm3, %v2210_v28, %v2148_v50 }
 0x36a   : > { %v2243_v58 = vmul.f32 %v2227_v1, %v10211_v33  ;;  %v10516_v40 = vpop.permute.xlu0 %2101 }
 0x36b   : > { %v2211_v32 = vsel %vm2206_vm2, %v2194_v45, %v10516_v40 }
 0x36c   : > { %v10518_v11 = vpop.permute.xlu1 %2055  ;;  %8443 = vmatmul.mubr.msk.f32.gmra.mxu1 %vm732_vm0, %v2243_v58 }
 0x36d   : > { %13414 = vst [vmem:[#allocation35_spill] sm:$0xff] %v10518_v11  ;;  %v2195_v19 = vsel %vm2189_vm1, %v10340_v26, %v10518_v11 }
 0x36e   : > { %v2150_v29 = vpop.permute.xlu0 %2149 }
 0x36f   : > { %v2228_v15 = vsel %vm2223_vm3, %v2211_v32, %v2150_v29 }
 0x370   : > { %v2244_v55 = vmul.f32 %v2228_v15, %v10242_v9  ;;  %v10528_v59 = vpop.permute.xlu1 %2103 }
 0x371   : > { %v2212_v4 = vsel %vm2206_vm2, %v2195_v19, %v10528_v59 }
 0x372   : > { %v10530_v46 = vpop.permute.xlu0 %2057  ;;  %8445 = vmatprep.mubr.msk.f32.mxu1 %vm732_vm0, %v2244_v55 }
 0x373   : > { %13415 = vst [vmem:[#allocation36_spill] sm:$0xff] %v10530_v46  ;;  %v2196_v5 = vsel %vm2189_vm1, %v10357_v22, %v10530_v46 }
 0x374   : > { %v2152_v23 = vpop.permute.xlu1 %2151 }
 0x375   : > { %v2229_v8 = vsel %vm2223_vm3, %v2212_v4, %v2152_v23 }
 0x376   : > { %v2245_v35 = vmul.f32 %v2229_v8, %v10232_v20  ;;  %v10540_v21 = vpop.permute.xlu0 %2105 }
 0x377   : > { %13416 = vst [vmem:[#allocation37_spill] sm:$0xff] %v10540_v21  ;;  %v2213_v12 = vsel %vm2206_vm2, %v2196_v5, %v10540_v21 }
 0x378   : > { %v10542_v63 = vpop.permute.xlu1 %2059  ;;  %8446 = vmatmul.mubr.msk.f32.gmra.mxu1 %vm732_vm0, %v2245_v35 }
 0x379   : > { %13417 = vst [vmem:[#allocation38_spill] sm:$0xff] %v10542_v63  ;;  %v2197_v45 = vsel %vm2189_vm1, %v10368_v2, %v10542_v63 }
 0x37a   : > { %v2154_v34 = vpop.permute.xlu0 %2153 }
 0x37b   : > { %v2230_v28 = vsel %vm2223_vm3, %v2213_v12, %v2154_v34 }
 0x37c   : > { %v2246_v50 = vmul.f32 %v2230_v28, %v10263_v24  ;;  %v10552_v1 = vpop.permute.xlu1 %2107 }
 0x37d   : > { %13418 = vst [vmem:[#allocation39_spill] sm:$0xff] %v10552_v1  ;;  %v2214_v32 = vsel %vm2206_vm2, %v2197_v45, %v10552_v1 }
 0x37e   : > { %v10554_v58 = vpop.permute.xlu0 %2061  ;;  %8448 = vmatprep.mubr.msk.f32.mxu1 %vm732_vm0, %v2246_v50 }
 0x37f   : > { %13419 = vst [vmem:[#allocation40_spill] sm:$0xff] %v10554_v58  ;;  %v2198_v23 = vsel %vm2189_vm1, %v10378_v36, %v10554_v58 }
 0x380   : > { %v2156_v29 = vpop.permute.xlu1 %2155 }
 0x381   : > { %v2231_v15 = vsel %vm2223_vm3, %v2214_v32, %v2156_v29 }
 0x382   : > { %v2247_v55 = vmul.f32 %v2231_v15, %v10253_v49  ;;  %v10564_v19 = vpop.permute.xlu0 %2109 }
 0x383   : > { %13420 = vst [vmem:[#allocation41_spill] sm:$0xff] %v10564_v19  ;;  %v2215_v8 = vsel %vm2206_vm2, %v2198_v23, %v10564_v19 }
 0x384   : > { %v10566_v4 = vpop.permute.xlu1 %2063  ;;  %8449 = vmatmul.mubr.msk.f32.gmra.mxu1 %vm732_vm0, %v2247_v55 }
 0x385   : > { %13421 = vst [vmem:[#allocation42_spill] sm:$0xff] %v10566_v4  ;;  %v2199_v50 = vsel %vm2189_vm1, %v10389_v14, %v10566_v4 }
 0x386   : > { %v2158_v35 = vpop.permute.xlu0 %2157 }
 0x387   : > { %v2232_v5 = vsel %vm2223_vm3, %v2215_v8, %v2158_v35 }
 0x388   : > { %v2248_v12 = vmul.f32 %v2232_v5, %v10286_v0  ;;  %v10576_v34 = vpop.permute.xlu1 %2111 }
 0x389   : > { %13422 = vst [vmem:[#allocation43_spill] sm:$0xff] %v10576_v34  ;;  %v2216_v45 = vsel %vm2206_vm2, %v2199_v50, %v10576_v34 }
 0x38a   : > { %v10578_v28 = vpop.permute.xlu0 %2065  ;;  %8451 = vmatprep.mubr.msk.f32.mxu1 %vm732_vm0, %v2248_v12 }
 0x38b   : > { %13423 = vst [vmem:[#allocation44_spill] sm:$0xff] %v10578_v28  ;;  %v2200_v8 = vsel %vm2189_vm1, %v10400_v17, %v10578_v28 }
 0x38c   : > { %v2160_v32 = vpop.permute.xlu1 %2159 }
 0x38d   : > { %v2233_v29 = vsel %vm2223_vm3, %v2216_v45, %v2160_v32 }
 0x38e   : > { %v2249_v15 = vmul.f32 %v2233_v29, %v10276_v41  ;;  %v10588_v55 = vpop.permute.xlu0 %2113 }
 0x38f   : > { %13424 = vst [vmem:[#allocation45_spill] sm:$0xff] %v10588_v55  ;;  %v2217_v35 = vsel %vm2206_vm2, %v2200_v8, %v10588_v55 }
 0x390   : > { %v10590_v23 = vpop.permute.xlu1 %2067  ;;  %8452 = vmatmul.mubr.msk.f32.gmra.mxu1 %vm732_vm0, %v2249_v15 }
 0x391   : > { %13425 = vst [vmem:[#allocation46_spill] sm:$0xff] %v10590_v23  ;;  %v2201_v29 = vsel %vm2189_vm1, %v10411_v30, %v10590_v23 }
 0x392   : > { %v2162_v5 = vpop.permute.xlu0 %2161 }
 0x393   : > { %v2234_v12 = vsel %vm2223_vm3, %v2217_v35, %v2162_v5 }
 0x394   : > { %v2250_v50 = vmul.f32 %v2234_v12, %v10312_v51  ;;  %v10600_v45 = vpop.permute.xlu1 %2115 }
 0x395   : > { %13426 = vst [vmem:[#allocation47_spill] sm:$0xff] %v10600_v45  ;;  %v2218_v15 = vsel %vm2206_vm2, %v2201_v29, %v10600_v45 }
 0x396   : > { %v10602_v32 = vpop.permute.xlu0 %2069  ;;  %8454 = vmatprep.mubr.msk.f32.mxu1 %vm732_vm0, %v2250_v50 }
 0x397   : > { %13427 = vst [vmem:[#allocation48_spill] sm:$0xff] %v10602_v32  ;;  %v2202_v50 = vsel %vm2189_vm1, %v10422_v47, %v10602_v32 }
 0x398   : > { %v2164_v41 = vpop.permute.xlu1 %2163 }
 0x399   : > { %v2235_v8 = vsel %vm2223_vm3, %v2218_v15, %v2164_v41 }
 0x39a   : > { %v2251_v35 = vmul.f32 %v2235_v8, %v10299_v10  ;;  %v10612_v5 = vpop.permute.xlu0 %2117 }
 0x39b   : > { %13428 = vst [vmem:[#allocation49_spill] sm:$0xff] %v10612_v5  ;;  %v2219_v51 = vsel %vm2206_vm2, %v2202_v50, %v10612_v5 }
 0x39c   : > { %v10614_v12 = vpop.permute.xlu1 %2071  ;;  %8455 = vmatmul.mubr.msk.f32.gmra.mxu1 %vm732_vm0, %v2251_v35 }
 0x39d   : > { %13429 = vst [vmem:[#allocation50_spill] sm:$0xff] %v10614_v12  ;;  %v2203_v35 = vsel %vm2189_vm1, %v10433_v53, %v10614_v12 }
 0x39e   : > { %v2166_v55 = vpop.permute.xlu0 %2165 }
 0x39f   : > { %v2236_v29 = vsel %vm2223_vm3, %v2219_v51, %v2166_v55 }
 0x3a0   : > { %v2252_v41 = vmul.f32 %v2236_v29, %v10337_v37  ;;  %v10624_v15 = vpop.permute.xlu1 %2119 }
 0x3a1   : > { %13430 = vst [vmem:[#allocation51_spill] sm:$0xff] %v10624_v15  ;;  %v2220_v10 = vsel %vm2206_vm2, %v2203_v35, %v10624_v15 }
 0x3a2   : > { %8457 = vmatprep.mubr.msk.f32.mxu1 %vm732_vm0, %v2252_v41  ;;  %v10627_v8 = vpop.permute.xlu0 %2073 }
 0x3a3   : > { %13431 = vst [vmem:[#allocation52_spill] sm:$0xff] %v10627_v8  ;;  %v2204_v41 = vsel %vm2189_vm1, %v10444_v62, %v10627_v8 }
 0x3a4   : > { %v2168_v45 = vpop.permute.xlu1 %2167 }
 0x3a5   : > { %v2237_v50 = vsel %vm2223_vm3, %v2220_v10, %v2168_v45 }
 0x3a6   : > { %v2253_v51 = vmul.f32 %v2237_v50, %v10324_v13  ;;  %v10636_v55 = vpop.permute.xlu0 %2121 }
 0x3a7   : > { %13432 = vst [vmem:[#allocation53_spill] sm:$0xff] %v10636_v55  ;;  %v2221_v37 = vsel %vm2206_vm2, %v2204_v41, %v10636_v55 }
 0x3a8   : > { %8458 = vmatmul.mubr.msk.f32.gmra.mxu1 %vm732_vm0, %v2253_v51  ;;  %v10639_v29 = vpop.permute.xlu1 %2075 }
 0x3a9   : > { %13433 = vst [vmem:[#allocation54_spill] sm:$0xff] %v10639_v29  ;;  %v2205_v50 = vsel %vm2189_vm1, %v10455_v7, %v10639_v29 }
 0x3aa   : > { %v2170_v5 = vpop.permute.xlu0 %2169 }
 0x3ab   : > { %v2238_v35 = vsel %vm2223_vm3, %v2221_v37, %v2170_v5 }
 0x3ac   : > { %v2254_v10 = vmul.f32 %v2238_v35, %v10351_v44  ;;  %v10648_v45 = vpop.permute.xlu1 %2123 }
 0x3ad   : > { %13434 = vst [vmem:[#allocation55_spill] sm:$0xff] %v10648_v45  ;;  %v2222_v51 = vsel %vm2206_vm2, %v2205_v50, %v10648_v45 }
 0x3ae   : > { %8460 = vmatprep.mubr.msk.f32.mxu1 %vm732_vm0, %v2254_v10 }
 0x3b0   : > { %v2172_v13 = vpop.permute.xlu1 %2171 }
 0x3b1   : > { %v2239_v15 = vsel %vm2223_vm3, %v2222_v51, %v2172_v13 }
 0x3b2   : > { %v2255_v41 = vmul.f32 %v2239_v15, %v10345_v43 }
 0x3b4   : > { %8461 = vmatmul.mubr.msk.f32.gmra.mxu1 %vm732_vm0, %v2255_v41 }
 0x422   : > { %v8441_v37 = vpop.f32.mrf.mxu1 }
 0x423   : > { %v10659_v5 = vmul.f32 0.35355338, %v8441_v37 }
 0x424   : > { %v2370_v35 = vpop.f32.mrf.mxu1 }
 0x425   : > { %v10661_v10 = vmul.f32 0.35355338, %v2370_v35  ;;  %v2469_v44 = vsel %vm2465_vm4, %v10659_v5, -inf }
 0x426   : > { %2470 = vmax.xlane.f32.xlu1 %v2469_v44 }
 0x427   : > { %v2466_v50 = vsel %vm2465_vm4, %v10661_v10, -inf }
 0x428   : > { %2467 = vmax.xlane.f32.xlu0 %v2466_v50 }
 0x42c   : > { %v8444_v13 = vpop.f32.mrf.mxu1 }
 0x42d   : > { %v10667_v51 = vmul.f32 0.35355338, %v8444_v13 }
 0x42e   : > { %v2380_v15 = vpop.f32.mrf.mxu1 }
 0x42f   : > { %v10669_v41 = vmul.f32 0.35355338, %v2380_v15  ;;  %v2475_v37 = vsel %vm2465_vm4, %v10667_v51, -inf }
 0x430   : > { %2476 = vmax.xlane.f32.xlu0 %v2475_v37 }
 0x431   : > { %v2472_v35 = vsel %vm2465_vm4, %v10669_v41, -inf }
 0x434   : > { %2473 = vmax.xlane.f32.xlu0 %v2472_v35 }
 0x438   : > { %v8447_v43 = vpop.f32.mrf.mxu1 }
 0x439   : > { %v10675_v44 = vmul.f32 0.35355338, %v8447_v43 }
 0x43a   : > { %v2390_v45 = vpop.f32.mrf.mxu1 }
 0x43b   : > { %v10677_v55 = vmul.f32 0.35355338, %v2390_v45  ;;  %v2481_v50 = vsel %vm2465_vm4, %v10675_v44, -inf }
 0x43c   : > { %2482 = vmax.xlane.f32.xlu1 %v2481_v50 }
 0x43d   : > { %v2478_v13 = vsel %vm2465_vm4, %v10677_v55, -inf }
 0x43e   : > { %2479 = vmax.xlane.f32.xlu0 %v2478_v13 }
 0x444   : > { %v8450_v15 = vpop.f32.mrf.mxu1 }
 0x445   : > { %v10683_v37 = vmul.f32 0.35355338, %v8450_v15 }
 0x446   : > { %v2400_v29 = vpop.f32.mrf.mxu1 }
 0x447   : > { %v10685_v8 = vmul.f32 0.35355338, %v2400_v29  ;;  %v2487_v43 = vsel %vm2465_vm4, %v10683_v37, -inf }
 0x448   : > { %2488 = vmax.xlane.f32.xlu1 %v2487_v43 }
 0x449   : > { %v2484_v45 = vsel %vm2465_vm4, %v10685_v8, -inf }
 0x44a   : > { %2485 = vmax.xlane.f32.xlu0 %v2484_v45 }
 0x450   : > { %v8453_v35 = vpop.f32.mrf.mxu1 }
 0x451   : > { %v10691_v50 = vmul.f32 0.35355338, %v8453_v35 }
 0x452   : > { %v2410_v12 = vpop.f32.mrf.mxu1 }
 0x453   : > { %v10693_v32 = vmul.f32 0.35355338, %v2410_v12  ;;  %v2493_v13 = vsel %vm2465_vm4, %v10691_v50, -inf }
 0x454   : > { %2494 = vmax.xlane.f32.xlu1 %v2493_v13 }
 0x455   : > { %v2490_v29 = vsel %vm2465_vm4, %v10693_v32, -inf }
 0x456   : > { %2491 = vmax.xlane.f32.xlu0 %v2490_v29 }
 0x45c   : > { %v8456_v15 = vpop.f32.mrf.mxu1 }
 0x45d   : > { %v10699_v43 = vmul.f32 0.35355338, %v8456_v15 }
 0x45e   : > { %v2420_v23 = vpop.f32.mrf.mxu1 }
 0x45f   : > { %v10701_v34 = vmul.f32 0.35355338, %v2420_v23  ;;  %v2499_v45 = vsel %vm2465_vm4, %v10699_v43, -inf }
 0x460   : > { %2500 = vmax.xlane.f32.xlu1 %v2499_v45 }
 0x461   : > { %v2496_v12 = vsel %vm2465_vm4, %v10701_v34, -inf }
 0x462   : > { %2497 = vmax.xlane.f32.xlu0 %v2496_v12 }
 0x468   : > { %v8459_v35 = vpop.f32.mrf.mxu1 }
 0x469   : > { %v10707_v13 = vmul.f32 0.35355338, %v8459_v35 }
 0x46a   : > { %v2430_v0 = vpop.f32.mrf.mxu1 }
 0x46b   : > { %v10709_v49 = vmul.f32 0.35355338, %v2430_v0  ;;  %v2505_v29 = vsel %vm2465_vm4, %v10707_v13, -inf }
 0x46c   : > { %2506 = vmax.xlane.f32.xlu1 %v2505_v29 }
 0x46d   : > { %v2502_v23 = vsel %vm2465_vm4, %v10709_v49, -inf }
 0x46e   : > { %2503 = vmax.xlane.f32.xlu0 %v2502_v23 }
 0x474   : > { %v8462_v15 = vpop.f32.mrf.mxu1 }
 0x475   : > { %v10715_v45 = vmul.f32 0.35355338, %v8462_v15 }
 0x476   : > { %v2440_v28 = vpop.f32.mrf.mxu1 }
 0x477   : > { %v10717_v19 = vmul.f32 0.35355338, %v2440_v28  ;;  %v2511_v12 = vsel %vm2465_vm4, %v10715_v45, -inf }
 0x478   : > { %2512 = vmax.xlane.f32.xlu1 %v2511_v12 }
 0x479   : > { %v2508_v0 = vsel %vm2465_vm4, %v10717_v19, -inf }
 0x47a   : > { %2509 = vmax.xlane.f32.xlu0 %v2508_v0 }
 0x4af   : > { %v2471_v35 = vpop.xlane.xlu1 %2470 }
 0x4b0   : > { %v2515_v29 = vsub.f32 %v10659_v5, %v2471_v35 }
 0x4b1   : > { %v2468_v4 = vpop.xlane.xlu0 %2467 }
 0x4b2   : > { %v2532_v1 = vmul.f32 1.442695, %v2515_v29  ;;  %v2514_v23 = vsub.f32 %v10661_v10, %v2468_v4 }
 0x4b4   : > { %8958 = vpow2.f32 %v2532_v1  ;;  %v2530_v15 = vmul.f32 1.442695, %v2514_v23 }
 0x4b6   : > { %8960 = vpow2.f32 %v2530_v15 }
 0x4b9   : > { %v2477_v28 = vpop.xlane.xlu0 %2476 }
 0x4ba   : > { %v2517_v24 = vsub.f32 %v10667_v51, %v2477_v28 }
 0x4bc   : > { %v2536_v20 = vmul.f32 1.442695, %v2517_v24 }
 0x4bd   : > { %v2474_v58 = vpop.xlane.xlu0 %2473 }
 0x4be   : > { %8962 = vpow2.f32 %v2536_v20  ;;  %v2516_v12 = vsub.f32 %v10669_v41, %v2474_v58 }
 0x4c0   : > { %v2534_v21 = vmul.f32 1.442695, %v2516_v12 }
 0x4c1   : > { %v10727_v0 = vpop.eup %8958 }
 0x4c2   : > { %8964 = vpow2.f32 %v2534_v21  ;;  %v2565_v5 = vsel %vm2465_vm4, %v10727_v0, 0.0 }
 0x4c3   : > { %v10731_v35 = vpop.eup %8960  ;;  %2566 = vadd.xlane.f32.xlu1 %v2565_v5 }
 0x4c4   : > { %v2562_v1 = vsel %vm2465_vm4, %v10731_v35, 0.0 }
 0x4c5   : > { %v2483_v4 = vpop.xlane.xlu1 %2482  ;;  %2563 = vadd.xlane.f32.xlu0 %v2562_v1 }
 0x4c6   : > { %v2519_v24 = vsub.f32 %v10675_v44, %v2483_v4 }
 0x4c7   : > { %v2480_v20 = vpop.xlane.xlu0 %2479 }
 0x4c8   : > { %v2540_v10 = vmul.f32 1.442695, %v2519_v24  ;;  %v2518_v58 = vsub.f32 %v10677_v55, %v2480_v20 }
 0x4ca   : > { %8966 = vpow2.f32 %v2540_v10  ;;  %v2538_v51 = vmul.f32 1.442695, %v2518_v58  ;;  %v13436_v58 = vld [vmem:[#allocation19_spill] sm:$0xff] }
 0x4cb   : > { %v10737_v21 = vpop.eup %8962 }
 0x4cc   : > { %8968 = vpow2.f32 %v2538_v51  ;;  %v2571_v41 = vsel %vm2465_vm4, %v10737_v21, 0.0 }
 0x4cd   : > { %2572 = vadd.xlane.f32.xlu1 %v2571_v41 }
 0x4cf   : > { %v10741_v29 = vpop.eup %8964 }
 0x4d0   : > { %v2568_v23 = vsel %vm2465_vm4, %v10741_v29, 0.0 }
 0x4d1   : > { %v2489_v15 = vpop.xlane.xlu1 %2488  ;;  %2569 = vadd.xlane.f32.xlu0 %v2568_v23 }
 0x4d2   : > { %v2521_v44 = vsub.f32 %v10683_v37, %v2489_v15  ;;  %v10758_v37 = vld [vmem:[%s13435_s5] sm:$0xf] }
 0x4d3   : > { %v2486_v28 = vpop.xlane.xlu0 %2485  ;;  %8463 = vmatprep.subr.msk.mxu0 %vm2690_vm5, %v10758_v37 }
 0x4d4   : > { %v2544_v55 = vmul.f32 1.442695, %v2521_v44  ;;  %v2520_v12 = vsub.f32 %v10685_v8, %v2486_v28  ;;  %8464 = vmatpush3.msk.msra.mxu0 %vm2690_vm5, %v10758_v37 }
 0x4d5   : > { %8521 = vmatprep.subr.mxu0 %v13436_v58 }
 0x4d6   : > { %8970 = vpow2.f32 %v2544_v55  ;;  %v2542_v5 = vmul.f32 1.442695, %v2520_v12 }
 0x4d7   : > { %v10747_v1 = vpop.eup %8966 }
 0x4d8   : > { %8972 = vpow2.f32 %v2542_v5  ;;  %v2577_v4 = vsel %vm2465_vm4, %v10747_v1, 0.0 }
 0x4d9   : > { %v10751_v24 = vpop.eup %8968  ;;  %2578 = vadd.xlane.f32.xlu1 %v2577_v4 }
 0x4da   : > { %v2574_v20 = vsel %vm2465_vm4, %v10751_v24, 0.0 }
 0x4db   : > { %2575 = vadd.xlane.f32.xlu0 %v2574_v20 }
 0x4dd   : > { %v2495_v8 = vpop.xlane.xlu1 %2494 }
 0x4de   : > { %v2523_v10 = vsub.f32 %v10691_v50, %v2495_v8 }
 0x4df   : > { %v2492_v51 = vpop.xlane.xlu0 %2491 }
 0x4e0   : > { %v2548_v41 = vmul.f32 1.442695, %v2523_v10  ;;  %v2522_v23 = vsub.f32 %v10693_v32, %v2492_v51 }
 0x4e2   : > { %8974 = vpow2.f32 %v2548_v41  ;;  %v2546_v15 = vmul.f32 1.442695, %v2522_v23 }
 0x4e3   : > { %v10767_v44 = vpop.eup %8970 }
 0x4e4   : > { %8976 = vpow2.f32 %v2546_v15  ;;  %v2583_v28 = vsel %vm2465_vm4, %v10767_v44, 0.0 }
 0x4e5   : > { %v10771_v55 = vpop.eup %8972  ;;  %2584 = vadd.xlane.f32.xlu1 %v2583_v28 }
 0x4e6   : > { %v2580_v50 = vsel %vm2465_vm4, %v10771_v55, 0.0 }
 0x4e7   : > { %2581 = vadd.xlane.f32.xlu0 %v2580_v50 }
 0x4e9   : > { %v2501_v12 = vpop.xlane.xlu1 %2500 }
 0x4ea   : > { %v2525_v5 = vsub.f32 %v10699_v43, %v2501_v12 }
 0x4eb   : > { %v2498_v4 = vpop.xlane.xlu0 %2497 }
 0x4ec   : > { %v2552_v32 = vmul.f32 1.442695, %v2525_v5  ;;  %v2524_v20 = vsub.f32 %v10701_v34, %v2498_v4 }
 0x4ee   : > { %8978 = vpow2.f32 %v2552_v32  ;;  %v2550_v8 = vmul.f32 1.442695, %v2524_v20 }
 0x4ef   : > { %v10777_v10 = vpop.eup %8974 }
 0x4f0   : > { %8980 = vpow2.f32 %v2550_v8  ;;  %v2589_v58 = vsel %vm2465_vm4, %v10777_v10, 0.0 }
 0x4f1   : > { %v10781_v51 = vpop.eup %8976  ;;  %2590 = vadd.xlane.f32.xlu1 %v2589_v58 }
 0x4f2   : > { %v2586_v41 = vsel %vm2465_vm4, %v10781_v51, 0.0 }
 0x4f3   : > { %2587 = vadd.xlane.f32.xlu0 %v2586_v41 }
 0x4f5   : > { %v2507_v43 = vpop.xlane.xlu1 %2506 }
 0x4f6   : > { %v2527_v23 = vsub.f32 %v10707_v13, %v2507_v43 }
 0x4f7   : > { %v2504_v15 = vpop.xlane.xlu0 %2503 }
 0x4f8   : > { %v2556_v34 = vmul.f32 1.442695, %v2527_v23  ;;  %v2526_v28 = vsub.f32 %v10709_v49, %v2504_v15 }
 0x4fa   : > { %8982 = vpow2.f32 %v2556_v34  ;;  %v2554_v50 = vmul.f32 1.442695, %v2526_v28 }
 0x4fb   : > { %v10787_v12 = vpop.eup %8978 }
 0x4fc   : > { %8984 = vpow2.f32 %v2554_v50  ;;  %v2595_v5 = vsel %vm2465_vm4, %v10787_v12, 0.0 }
 0x4fd   : > { %v10791_v4 = vpop.eup %8980  ;;  %2596 = vadd.xlane.f32.xlu1 %v2595_v5 }
 0x4fe   : > { %v2592_v32 = vsel %vm2465_vm4, %v10791_v4, 0.0 }
 0x4ff   : > { %2593 = vadd.xlane.f32.xlu0 %v2592_v32 }
 0x501   : > { %v2513_v13 = vpop.xlane.xlu1 %2512 }
 0x502   : > { %v2529_v20 = vsub.f32 %v10715_v45, %v2513_v13  ;;  %v10832_v13 = vld [vmem:[%s13437_s25 + $0x18] sm:$0xff] }
 0x503   : > { %v2510_v8 = vpop.xlane.xlu0 %2509  ;;  %8489 = vmatprep.subr.mxu1 %v10832_v13 }
 0x504   : > { %v2560_v49 = vmul.f32 1.442695, %v2529_v20  ;;  %v2528_v58 = vsub.f32 %v10717_v19, %v2510_v8  ;;  %8490 = vmatpush3.msra.mxu1 %v10832_v13 }
 0x506   : > { %8986 = vpow2.f32 %v2560_v49  ;;  %v2558_v41 = vmul.f32 1.442695, %v2528_v58 }
 0x507   : > { %v10797_v43 = vpop.eup %8982 }
 0x508   : > { %8988 = vpow2.f32 %v2558_v41  ;;  %v2601_v23 = vsel %vm2465_vm4, %v10797_v43, 0.0 }
 0x509   : > { %v10801_v15 = vpop.eup %8984  ;;  %2602 = vadd.xlane.f32.xlu1 %v2601_v23 }
 0x50a   : > { %v2598_v34 = vsel %vm2465_vm4, %v10801_v15, 0.0 }
 0x50b   : > { %2599 = vadd.xlane.f32.xlu0 %v2598_v34  ;;  %v10843_v34 = vld [vmem:[%s13397_s0 + $0x18] sm:$0xff] }
 0x513   : > { %v10805_v45 = vpop.eup %8986 }
 0x514   : > { %v2607_v19 = vsel %vm2465_vm4, %v10805_v45, 0.0 }
 0x515   : > { %v10809_v28 = vpop.eup %8988  ;;  %2608 = vadd.xlane.f32.xlu1 %v2607_v19 }
 0x516   : > { %v2604_v50 = vsel %vm2465_vm4, %v10809_v28, 0.0 }
 0x517   : > { %2605 = vadd.xlane.f32.xlu0 %v2604_v50  ;;  %v10849_v50 = vld [vmem:[%s13397_s0 + $0x10] sm:$0xff] }
 0x526   : > { %3066 = vrot.lane.b32.xlu1 %v10178_v39, %s9353_s26 }
 0x52a   : > { %3068 = vrot.lane.b32.xlu1 %v10234_v57, %s9353_s26 }
 0x52d   : > { %3064 = vrot.lane.b32.xlu0 %v10187_v56, %s9353_s26 }
 0x52e   : > { %3070 = vrot.lane.b32.xlu1 %v10266_v61, %s9353_s26 }
 0x531   : > { %3072 = vrot.lane.b32.xlu0 %v10302_v3, %s9353_s26 }
 0x532   : > { %3074 = vrot.lane.b32.xlu1 %v10340_v26, %s9353_s26 }
 0x535   : > { %3076 = vrot.lane.b32.xlu0 %v10357_v22, %s9353_s26 }
 0x536   : > { %3078 = vrot.lane.b32.xlu1 %v10368_v2, %s9353_s26 }
 0x539   : > { %3080 = vrot.lane.b32.xlu0 %v10378_v36, %s9353_s26 }
 0x53a   : > { %3082 = vrot.lane.b32.xlu1 %v10389_v14, %s9353_s26 }
 0x53d   : > { %3084 = vrot.lane.b32.xlu0 %v10400_v17, %s9353_s26 }
 0x53e   : > { %3086 = vrot.lane.b32.xlu1 %v10411_v30, %s9353_s26 }
 0x541   : > { %3088 = vrot.lane.b32.xlu0 %v10422_v47, %s9353_s26 }
 0x542   : > { %3090 = vrot.lane.b32.xlu1 %v10433_v53, %s9353_s26 }
 0x545   : > { %3092 = vrot.lane.b32.xlu0 %v10444_v62, %s9353_s26 }
 0x546   : > { %3094 = vrot.lane.b32.xlu1 %v10455_v7, %s9353_s26  ;;  %s13621_s26 = smov 16  }
 0x54c   : > { %v2567_v5 = vpop.xlane.xlu1 %2566 }
 0x54d   : > { %8990 = vrcp.f32 %v2567_v5  ;;  %v10863_v5 = vld [vmem:[%s13397_s0] sm:$0xff] }
 0x54e   : > { %v2564_v32 = vpop.xlane.xlu0 %2563  ;;  %13438 = vst [vmem:[#allocation19_spill] sm:$0xff] %v10863_v5 }
 0x54f   : > { %8992 = vrcp.f32 %v2564_v32 }
 0x556   : > { %v2573_v20 = vpop.xlane.xlu1 %2572 }
 0x557   : > { %8994 = vrcp.f32 %v2573_v20 }
 0x55a   : > { %v2570_v8 = vpop.xlane.xlu0 %2569  ;;  %v8991_v49 = vpop.eup %8990 }
 0x55b   : > { %8996 = vrcp.f32 %v2570_v8  ;;  %v2627_v23 = vmul.f32 %v8991_v49, %v10727_v0 }
 0x55c   : > { %v8993_v58 = vpop.eup %8992 }
 0x55d   : > { %v2626_v41 = vmul.f32 %v8993_v58, %v10731_v35  ;;  %v10856_v35 = vld [vmem:[%s13397_s0 + $0x8] sm:$0xff] }
 0x55f   : > { %8465 = vmatprep.mubr.msk.f32.mxu0 %vm2465_vm4, %v2626_v41 }
 0x560   : > { %8466 = vmatmul.mubr.msk.f32.vlgmr.msra.gmra.mxu0 %vm2465_vm4, %v2627_v23 }
 0x561   : > { %8522 = vmatpush3.msra.mxu0 %v10843_v34 }
 0x562   : > { %v2579_v19 = vpop.xlane.xlu1 %2578  ;;  %8523 = vmatprep.subr.mxu0 %v10849_v50 }
 0x563   : > { %8524 = vmatpush3.msra.mxu0 %v10849_v50  ;;  %8998 = vrcp.f32 %v2579_v19 }
 0x564   : > { %v2576_v0 = vpop.xlane.xlu0 %2575  ;;  %8525 = vmatprep.subr.mxu0 %v10856_v35  ;;  %v8995_v32 = vpop.eup %8994 }
 0x565   : > { %9000 = vrcp.f32 %v2576_v0  ;;  %8526 = vmatpush3.msra.mxu0 %v10856_v35  ;;  %v2629_v49 = vmul.f32 %v8995_v32, %v10737_v21 }
 0x566   : > { %8527 = vmatprep.subr.mxu0 %v10863_v5 }
 0x567   : > { %8528 = vmatpush3.msra.mxu0 %v10863_v5 }
 0x568   : > { %v8997_v20 = vpop.eup %8996  ;;  %8579 = vmatprep.subr.mxu0 %v10832_v13 }
 0x569   : > { %v2628_v8 = vmul.f32 %v8997_v20, %v10741_v29 }
 0x56b   : > { %8468 = vmatprep.mubr.msk.f32.mxu0 %vm2465_vm4, %v2628_v8 }
 0x56c   : > { %8469 = vmatmul.mubr.msk.f32.gmra.mxu0 %vm2465_vm4, %v2629_v49 }
 0x56e   : > { %v2585_v58 = vpop.xlane.xlu1 %2584 }
 0x56f   : > { %9002 = vrcp.f32 %v2585_v58 }
 0x570   : > { %v2582_v41 = vpop.xlane.xlu0 %2581  ;;  %v8999_v23 = vpop.eup %8998 }
 0x571   : > { %9004 = vrcp.f32 %v2582_v41  ;;  %v2631_v5 = vmul.f32 %v8999_v23, %v10747_v1 }
 0x572   : > { %v9001_v19 = vpop.eup %9000 }
 0x573   : > { %v2630_v0 = vmul.f32 %v9001_v19, %v10751_v24 }
 0x575   : > { %8471 = vmatprep.mubr.msk.f32.mxu0 %vm2465_vm4, %v2630_v0 }
 0x576   : > { %8472 = vmatmul.mubr.msk.f32.gmra.mxu0 %vm2465_vm4, %v2631_v5 }
 0x57a   : > { %v2591_v29 = vpop.xlane.xlu1 %2590 }
 0x57b   : > { %9006 = vrcp.f32 %v2591_v29 }
 0x57c   : > { %v2588_v21 = vpop.xlane.xlu0 %2587  ;;  %v9003_v32 = vpop.eup %9002 }
 0x57d   : > { %9008 = vrcp.f32 %v2588_v21  ;;  %v2633_v49 = vmul.f32 %v9003_v32, %v10767_v44  ;;  %v10891_v32 = vld [vmem:[%s13437_s25 + $0x10] sm:$0xff] }
 0x57e   : > { %v9005_v20 = vpop.eup %9004  ;;  %8491 = vmatprep.subr.mxu1 %v10891_v32 }
 0x57f   : > { %v2632_v8 = vmul.f32 %v9005_v20, %v10771_v55  ;;  %8492 = vmatpush3.msra.mxu1 %v10891_v32 }
 0x581   : > { %8474 = vmatprep.mubr.msk.f32.mxu0 %vm2465_vm4, %v2632_v8 }
 0x582   : > { %8475 = vmatmul.mubr.msk.f32.gmra.mxu0 %vm2465_vm4, %v2633_v49 }
 0x586   : > { %v2597_v24 = vpop.xlane.xlu1 %2596 }
 0x587   : > { %9010 = vrcp.f32 %v2597_v24  ;;  %v10907_v24 = vld [vmem:[%s13437_s25] sm:$0xff] }
 0x588   : > { %v2594_v1 = vpop.xlane.xlu0 %2593  ;;  %v9007_v58 = vpop.eup %9006 }
 0x589   : > { %9012 = vrcp.f32 %v2594_v1  ;;  %v2635_v23 = vmul.f32 %v9007_v58, %v10777_v10 }
 0x58a   : > { %v9009_v5 = vpop.eup %9008 }
 0x58b   : > { %v2634_v41 = vmul.f32 %v9009_v5, %v10781_v51 }
 0x58d   : > { %8477 = vmatprep.mubr.msk.f32.mxu0 %vm2465_vm4, %v2634_v41 }
 0x58e   : > { %8478 = vmatmul.mubr.msk.f32.gmra.mxu0 %vm2465_vm4, %v2635_v23 }
 0x592   : > { %v2603_v55 = vpop.xlane.xlu1 %2602 }
 0x593   : > { %9014 = vrcp.f32 %v2603_v55 }
 0x594   : > { %v2600_v44 = vpop.xlane.xlu0 %2599  ;;  %v9011_v19 = vpop.eup %9010 }
 0x595   : > { %9016 = vrcp.f32 %v2600_v44  ;;  %v2637_v21 = vmul.f32 %v9011_v19, %v10787_v12  ;;  %v10900_v12 = vld [vmem:[%s13437_s25 + $0x8] sm:$0xff] }
 0x596   : > { %v9013_v0 = vpop.eup %9012  ;;  %8493 = vmatprep.subr.mxu1 %v10900_v12 }
 0x597   : > { %v2636_v29 = vmul.f32 %v9013_v0, %v10791_v4  ;;  %8494 = vmatpush3.msra.mxu1 %v10900_v12 }
 0x598   : > { %8495 = vmatprep.subr.mxu1 %v10907_v24 }
 0x599   : > { %8480 = vmatprep.mubr.msk.f32.mxu0 %vm2465_vm4, %v2636_v29  ;;  %8496 = vmatpush3.msra.mxu1 %v10907_v24 }
 0x59a   : > { %8481 = vmatmul.mubr.msk.f32.gmra.mxu0 %vm2465_vm4, %v2637_v21  ;;  %8553 = vmatprep.subr.msk.mxu1 %vm2690_vm5, %v10758_v37 }
 0x59e   : > { %v2609_v51 = vpop.xlane.xlu1 %2608 }
 0x59f   : > { %9018 = vrcp.f32 %v2609_v51 }
 0x5a0   : > { %v2606_v10 = vpop.xlane.xlu0 %2605  ;;  %v9015_v20 = vpop.eup %9014 }
 0x5a1   : > { %9020 = vrcp.f32 %v2606_v10  ;;  %v2639_v58 = vmul.f32 %v9015_v20, %v10797_v43 }
 0x5a2   : > { %v9017_v8 = vpop.eup %9016  ;;  %v10894_v4 = vpop.permute.xlu1 %3066 }
 0x5a3   : > { %v2638_v49 = vmul.f32 %v9017_v8, %v10801_v15  ;;  %v3113_v23 = vsel %vm2189_vm1, %v10894_v4, %v10178_v39 }
 0x5a4   : > { %v10909_v1 = vpop.permute.xlu0 %3064  ;;  %v3129_v21 = vsel %vm2206_vm2, %v3113_v23, %v10467_v60 }
 0x5a5   : > { %8483 = vmatprep.mubr.msk.f32.mxu0 %vm2465_vm4, %v2638_v49  ;;  %v3112_v15 = vsel %vm2189_vm1, %v10909_v1, %v10187_v56 }
 0x5a6   : > { %v10915_v5 = vpop.permute.xlu1 %3068  ;;  %8484 = vmatmul.mubr.msk.f32.gmra.mxu0 %vm2465_vm4, %v2639_v58  ;;  %v3128_v55 = vsel %vm2206_vm2, %v3112_v15, %v10469_v18 }
 0x5a7   : > { %v3114_v44 = vsel %vm2189_vm1, %v10915_v5, %v10234_v57  ;;  %v3144_v10 = vsel %vm2223_vm3, %v3128_v55, %v10480_v54  ;;  %v3145_v54 = vsel %vm2223_vm3, %v3129_v21, %v10471_v48 }
 0x5a8   : > { %v10924_v43 = vpop.permute.xlu0 %3072  ;;  %v3130_v20 = vsel %vm2206_vm2, %v3114_v44, %v10473_v6  ;;  %v3160_v55 = vmul.f32 %v3144_v10, %v10198_v16 }
 0x5a9   : > { %v3116_v58 = vsel %vm2189_vm1, %v10924_v43, %v10302_v3 }
 0x5aa   : > { %v10926_v41 = vpop.permute.xlu1 %3070 }
 0x5ab   : > { %v3115_v8 = vsel %vm2189_vm1, %v10926_v41, %v10266_v61 }
 0x5ac   : > { %v10936_v19 = vpop.permute.xlu0 %3076  ;;  %v9019_v0 = vpop.eup %9018  ;;  %v3131_v44 = vsel %vm2206_vm2, %v3115_v8, %v10493_v42 }
 0x5ad   : > { %13439 = vst [vmem:[#allocation56_spill] sm:$0xff] %v10936_v19  ;;  %v2641_v23 = vmul.f32 %v9019_v0, %v10805_v45  ;;  %v3132_v45 = vsel %vm2206_vm2, %v3116_v58, %v10506_v31  ;;  %v3161_v0 = vmul.f32 %v3145_v54, %v10185_v25 }
 0x5ae   : > { %v9021_v29 = vpop.eup %9020  ;;  %v10940_v51 = vpop.permute.xlu1 %3074 }
 0x5af   : > { %v2640_v49 = vmul.f32 %v9021_v29, %v10809_v28  ;;  %v3146_v28 = vsel %vm2223_vm3, %v3130_v20, %v10489_v52  ;;  %v3117_v48 = vsel %vm2189_vm1, %v10940_v51, %v10340_v26  ;;  %v3118_v29 = vsel %vm2189_vm1, %v10936_v19, %v10357_v22 }
 0x5b0   : > { %v10953_v15 = vpop.permute.xlu0 %3080  ;;  %v3162_v10 = vmul.f32 %v3146_v28, %v10219_v27  ;;  %v3147_v52 = vsel %vm2223_vm3, %v3131_v44, %v10504_v38  ;;  %v3133_v20 = vsel %vm2206_vm2, %v3117_v48, %v10518_v11  ;;  %v3134_v58 = vsel %vm2206_vm2, %v3118_v29, %v10530_v46  ;;  %v13446_v48 = vld [vmem:[#allocation40_spill] sm:$0xff] }
 0x5b1   : > { %13440 = vst [vmem:[#allocation57_spill] sm:$0xff] %v10953_v15  ;;  %8486 = vmatprep.mubr.msk.f32.mxu0 %vm2465_vm4, %v2640_v49  ;;  %v3148_v49 = vsel %vm2223_vm3, %v3132_v45, %v10516_v40  ;;  %v3120_v38 = vsel %vm2189_vm1, %v10953_v15, %v10378_v36  ;;  %v3163_v54 = vmul.f32 %v3147_v52, %v10211_v33 }
 0x5b2   : > { %v10962_v6 = vpop.permute.xlu1 %3078  ;;  %8487 = vmatmul.mubr.msk.f32.gmra.mxu0 %vm2465_vm4, %v2641_v23  ;;  %v3164_v40 = vmul.f32 %v3148_v49, %v10242_v9 }
 0x5b3   : > { %13441 = vst [vmem:[#allocation58_spill] sm:$0xff] %v10962_v6  ;;  %8529 = vmatprep.mubr.msk.f32.mxu0 %vm732_vm0, %v3160_v55  ;;  %v3119_v23 = vsel %vm2189_vm1, %v10962_v6, %v10368_v2  ;;  %v3149_v55 = vsel %vm2223_vm3, %v3133_v20, %v10528_v59  ;;  %v13449_v20 = vld [vmem:[#allocation24_spill] sm:$0xff] }
 0x5b4   : > { %v10977_v21 = vpop.permute.xlu0 %3084  ;;  %v3135_v44 = vsel %vm2206_vm2, %v3119_v23, %v10542_v63 }
 0x5b5   : > { %13442 = vst [vmem:[#allocation59_spill] sm:$0xff] %v10977_v21  ;;  %v3122_v29 = vsel %vm2189_vm1, %v10977_v21, %v10400_v17 }
 0x5b6   : > { %v10984_v8 = vpop.permute.xlu1 %3082  ;;  %8530 = vmatmul.mubr.msk.f32.vlgmr.msra.gmra.mxu0 %vm732_vm0, %v3161_v0  ;;  %v3136_v0 = vsel %vm2206_vm2, %v3120_v38, %v13446_v48  ;;  %v13451_v38 = vld [vmem:[#allocation42_spill] sm:$0xff] }
 0x5b7   : > { %13443 = vst [vmem:[#allocation60_spill] sm:$0xff] %v10984_v8  ;;  %8532 = vmatprep.mubr.msk.f32.mxu0 %vm732_vm0, %v3162_v10  ;;  %8580 = vmatpush3.msra.mxu0 %v10832_v13  ;;  %v13445_v13 = vld [vmem:[#allocation37_spill] sm:$0xff]  ;;  %v3121_v59 = vsel %vm2189_vm1, %v10984_v8, %v10389_v14 }
 0x5b8   : > { %8581 = vmatprep.subr.mxu0 %v10891_v32  ;;  %v3150_v45 = vsel %vm2223_vm3, %v3134_v58, %v13445_v13  ;;  %v13448_v10 = vld [vmem:[#allocation21_spill] sm:$0xff]  ;;  %v13450_v58 = vld [vmem:[#allocation39_spill] sm:$0xff] }
 0x5b9   : > { %8582 = vmatpush3.msra.mxu0 %v10891_v32  ;;  %v11018_v32 = vpop.permute.xlu0 %3088  ;;  %v3165_v52 = vmul.f32 %v3149_v55, %v13448_v10  ;;  %v3166_v49 = vmul.f32 %v3150_v45, %v13449_v20  ;;  %v3151_v23 = vsel %vm2223_vm3, %v3135_v44, %v13450_v58  ;;  %v13454_v55 = vld [vmem:[#allocation44_spill] sm:$0xff] }
 0x5ba   : > { %v11007_v28 = vpop.permute.xlu1 %3086  ;;  %8533 = vmatmul.mubr.msk.f32.gmra.mxu0 %vm732_vm0, %v3163_v54  ;;  %8583 = vmatprep.subr.mxu0 %v10900_v12  ;;  %13447 = vst [vmem:[#allocation37_spill] sm:$0xff] %v11018_v32  ;;  %v3137_v54 = vsel %vm2206_vm2, %v3121_v59, %v13451_v38  ;;  %v3138_v45 = vsel %vm2206_vm2, %v3122_v29, %v13454_v55  ;;  %v13455_v59 = vld [vmem:[#allocation23_spill] sm:$0xff]  ;;  %v13459_v29 = vld [vmem:[#allocation46_spill] sm:$0xff]  ;;  %v13461_v20 = vld [vmem:[#allocation48_spill] sm:$0xff] }
 0x5bb   : > { %13444 = vst [vmem:[#allocation61_spill] sm:$0xff] %v11007_v28  ;;  %8535 = vmatprep.mubr.msk.f32.mxu0 %vm732_vm0, %v3164_v40  ;;  %8584 = vmatpush3.msra.mxu0 %v10900_v12  ;;  %v13453_v12 = vld [vmem:[#allocation41_spill] sm:$0xff]  ;;  %v3124_v44 = vsel %vm2189_vm1, %v11018_v32, %v10422_v47  ;;  %v13458_v38 = vld [vmem:[#allocation43_spill] sm:$0xff] }
 0x5bc   : > { %8585 = vmatprep.subr.mxu0 %v10907_v24  ;;  %v3152_v13 = vsel %vm2223_vm3, %v3136_v0, %v13453_v12  ;;  %v13457_v0 = vld [vmem:[#allocation26_spill] sm:$0xff]  ;;  %v3153_v48 = vsel %vm2223_vm3, %v3137_v54, %v13458_v38  ;;  %v3140_v32 = vsel %vm2206_vm2, %v3124_v44, %v13461_v20 }
 0x5bd   : > { %8586 = vmatpush3.msra.mxu0 %v10907_v24  ;;  %v3123_v24 = vsel %vm2189_vm1, %v11007_v28, %v10411_v30  ;;  %v11050_v58 = vpop.permute.xlu0 %3092  ;;  %v3168_v12 = vmul.f32 %v3152_v13, %v13457_v0  ;;  %v13460_v28 = vld [vmem:[#allocation45_spill] sm:$0xff]  ;;  %v13466_v44 = vld [vmem:[#allocation50_spill] sm:$0xff]  ;;  %v13468_v0 = vld [vmem:[#allocation52_spill] sm:$0xff] }
 0x5be   : > { %v11033_v40 = vpop.permute.xlu1 %3090  ;;  %8536 = vmatmul.mubr.msk.f32.gmra.mxu0 %vm732_vm0, %v3165_v52  ;;  %8643 = vmatprep.subr.msk.mxu0 %vm2690_vm5, %v10758_v37  ;;  %v3167_v52 = vmul.f32 %v3151_v23, %v13455_v59  ;;  %13456 = vst [vmem:[#allocation41_spill] sm:$0xff] %v11050_v58  ;;  %v3139_v55 = vsel %vm2206_vm2, %v3123_v24, %v13459_v29  ;;  %v13463_v13 = vld [vmem:[#allocation25_spill] sm:$0xff] }
 0x5bf   : > { %13452 = vst [vmem:[#allocation39_spill] sm:$0xff] %v11033_v40  ;;  %8538 = vmatprep.mubr.msk.f32.mxu0 %vm732_vm0, %v3166_v49  ;;  %v3154_v49 = vsel %vm2223_vm3, %v3138_v45, %v13460_v28  ;;  %v3125_v23 = vsel %vm2189_vm1, %v11033_v40, %v10433_v53  ;;  %v3126_v38 = vsel %vm2189_vm1, %v11050_v58, %v10444_v62  ;;  %v13465_v28 = vld [vmem:[#allocation47_spill] sm:$0xff]  ;;  %v13467_v40 = vld [vmem:[#allocation49_spill] sm:$0xff] }
 0x5c0   : > { %v3169_v24 = vmul.f32 %v3153_v48, %v13463_v13  ;;  %v3155_v45 = vsel %vm2223_vm3, %v3139_v55, %v13465_v28  ;;  %v3141_v20 = vsel %vm2206_vm2, %v3125_v23, %v13466_v44  ;;  %v3142_v58 = vsel %vm2206_vm2, %v3126_v38, %v13468_v0  ;;  %v13470_v55 = vld [vmem:[#allocation30_spill] sm:$0xff]  ;;  %v13471_v13 = vld [vmem:[#allocation51_spill] sm:$0xff]  ;;  %v13474_v38 = vld [vmem:[#allocation29_spill] sm:$0xff] }
 0x5c1   : > { %v3157_v23 = vsel %vm2223_vm3, %v3141_v20, %v13471_v13  ;;  %v13477_v20 = vld [vmem:[#allocation31_spill] sm:$0xff] }
 0x5c2   : > { %8539 = vmatmul.mubr.msk.f32.gmra.mxu0 %vm732_vm0, %v3167_v52  ;;  %v11069_v54 = vpop.permute.xlu1 %3094  ;;  %v13464_v52 = vld [vmem:[#allocation28_spill] sm:$0xff]  ;;  %v3173_v0 = vmul.f32 %v3157_v23, %v13474_v38  ;;  %v13480_v23 = vld [vmem:[#allocation3_spill] sm:$0xff] }
 0x5c3   : > { %8541 = vmatprep.mubr.msk.f32.mxu0 %vm732_vm0, %v3168_v12  ;;  %13462 = vst [vmem:[#allocation43_spill] sm:$0xff] %v11069_v54  ;;  %v3170_v29 = vmul.f32 %v3154_v49, %v13464_v52  ;;  %v3156_v12 = vsel %vm2223_vm3, %v3140_v32, %v13467_v40  ;;  %v3127_v48 = vsel %vm2189_vm1, %v11069_v54, %v10455_v7  ;;  %v13469_v49 = vld [vmem:[#allocation27_spill] sm:$0xff]  ;;  %v13473_v32 = vld [vmem:[#allocation53_spill] sm:$0xff] }
 0x5c4   : > { %v3171_v52 = vmul.f32 %v3155_v45, %v13469_v49  ;;  %v3172_v28 = vmul.f32 %v3156_v12, %v13470_v55  ;;  %v3158_v40 = vsel %vm2223_vm3, %v3142_v58, %v13473_v32  ;;  %v13476_v45 = vld [vmem:[#allocation55_spill] sm:$0xff] }
 0x5c5   : > { %v9314_v58 = vld [vmem:[%s13209_s14] ss:$0 sm:$0xff] }
 0x5c6   : > { %8542 = vmatmul.mubr.msk.f32.gmra.mxu0 %vm732_vm0, %v3169_v24  ;;  %v13472_v24 = vld [vmem:[#allocation54_spill] sm:$0xff]  ;;  %v11111_v32 = vadd.f32 %v9314_v58, %v13480_v23 }
 0x5c7   : > { %8544 = vmatprep.mubr.msk.f32.mxu0 %vm732_vm0, %v3170_v29  ;;  %v3143_v44 = vsel %vm2206_vm2, %v3127_v48, %v13472_v24  ;;  %v13475_v29 = vld [vmem:[#allocation32_spill] sm:$0xff] }
 0x5c8   : > { %v3174_v54 = vmul.f32 %v3158_v40, %v13475_v29  ;;  %v3159_v12 = vsel %vm2223_vm3, %v3143_v44, %v13476_v45  ;;  %v13478_v48 = vld [vmem:[#allocation4_spill] sm:$0xff]  ;;  %13481 = vst [vmem:[#allocation47_spill] sm:$0xff] %v11111_v32  ;;  %v13482_v45 = vld [vmem:[#allocation6_spill] sm:$0xff] }
 0x5c9   : > { %v3175_v13 = vmul.f32 %v3159_v12, %v13477_v20  ;;  %v11121_v12 = vadd.f32 %v9314_v58, %v13482_v45 }
 0x5ca   : > { %8545 = vmatmul.mubr.msk.f32.gmra.mxu0 %vm732_vm0, %v3171_v52 }
 0x5cb   : > { %8547 = vmatprep.mubr.msk.f32.mxu0 %vm732_vm0, %v3172_v28  ;;  %v11108_v28 = vadd.f32 %v9314_v58, %v13478_v48  ;;  %13483 = vst [vmem:[#allocation49_spill] sm:$0xff] %v11121_v12 }
 0x5cd   : > { %13479 = vst [vmem:[#allocation45_spill] sm:$0xff] %v11108_v28 }
 0x5ce   : > { %8548 = vmatmul.mubr.msk.f32.gmra.mxu0 %vm732_vm0, %v3173_v0 }
 0x5cf   : > { %8550 = vmatprep.mubr.msk.f32.mxu0 %vm732_vm0, %v3174_v54 }
 0x5d2   : > { %8551 = vmatmul.mubr.msk.f32.gmra.mxu0 %vm732_vm0, %v3175_v13  ;;  %v13484_v13 = vld [vmem:[#allocation5_spill] sm:$0xff] }
 0x5d3   : > { %v11124_v48 = vadd.f32 %v9314_v58, %v13484_v13 }
 0x5d5   : > { %13485 = vst [vmem:[#allocation51_spill] sm:$0xff] %v11124_v48 }
 0x620   : > { %v8467_v52 = vpop.f32.mrf.mxu0 }
 0x621   : > { %v2840_v54 = vmul.f32 %v8467_v52, %v11111_v32  ;;  %v13488_v32 = vld [vmem:[#allocation7_spill] sm:$0xff] }
 0x622   : > { %v2760_v44 = vpop.f32.mrf.mxu0 }
 0x623   : > { %v2839_v0 = vmul.f32 %v2760_v44, %v11108_v28  ;;  %v11134_v28 = vadd.f32 %v9314_v58, %v13488_v32 }
 0x625   : > { %8497 = vmatprep.mubr.msk.f32.mxu1 %vm732_vm0, %v2839_v0  ;;  %13489 = vst [vmem:[#allocation55_spill] sm:$0xff] %v11134_v28 }
 0x626   : > { %8498 = vmatmul.mubr.msk.f32.vlgmr.msra.gmra.mxu1 %vm732_vm0, %v2840_v54 }
 0x627   : > { %8554 = vmatpush3.msk.msra.mxu1 %vm2690_vm5, %v10758_v37  ;;  %v13486_v37 = vld [vmem:[#allocation8_spill] sm:$0xff] }
 0x628   : > { %8611 = vmatprep.subr.mxu1 %v10843_v34  ;;  %v11131_v54 = vadd.f32 %v9314_v58, %v13486_v37 }
 0x62a   : > { %13487 = vst [vmem:[#allocation53_spill] sm:$0xff] %v11131_v54 }
 0x62c   : > { %v8470_v40 = vpop.f32.mrf.mxu0 }
 0x62d   : > { %v2842_v52 = vmul.f32 %v8470_v40, %v11124_v48 }
 0x62e   : > { %v2770_v23 = vpop.f32.mrf.mxu0 }
 0x62f   : > { %v2841_v44 = vmul.f32 %v2770_v23, %v11121_v12  ;;  %v13490_v23 = vld [vmem:[#allocation10_spill] sm:$0xff] }
 0x631   : > { %8500 = vmatprep.mubr.msk.f32.mxu1 %vm732_vm0, %v2841_v44  ;;  %v11141_v44 = vadd.f32 %v9314_v58, %v13490_v23 }
 0x632   : > { %8501 = vmatmul.mubr.msk.f32.gmra.mxu1 %vm732_vm0, %v2842_v52  ;;  %v13492_v52 = vld [vmem:[#allocation9_spill] sm:$0xff] }
 0x633   : > { %13491 = vst [vmem:[#allocation4_spill] sm:$0xff] %v11141_v44  ;;  %v11144_v48 = vadd.f32 %v9314_v58, %v13492_v52 }
 0x635   : > { %13493 = vst [vmem:[#allocation3_spill] sm:$0xff] %v11144_v48 }
 0x636   : > { %v8473_v0 = vpop.f32.mrf.mxu0 }
 0x637   : > { %v2844_v20 = vmul.f32 %v8473_v0, %v11134_v28 }
 0x638   : > { %v2780_v45 = vpop.f32.mrf.mxu0 }
 0x639   : > { %v2843_v13 = vmul.f32 %v2780_v45, %v11131_v54  ;;  %v13494_v45 = vld [vmem:[#allocation12_spill] sm:$0xff] }
 0x63b   : > { %8503 = vmatprep.mubr.msk.f32.mxu1 %vm732_vm0, %v2843_v13  ;;  %v11151_v13 = vadd.f32 %v9314_v58, %v13494_v45 }
 0x63c   : > { %8504 = vmatmul.mubr.msk.f32.gmra.mxu1 %vm732_vm0, %v2844_v20  ;;  %v13496_v20 = vld [vmem:[#allocation11_spill] sm:$0xff] }
 0x63d   : > { %13495 = vst [vmem:[#allocation6_spill] sm:$0xff] %v11151_v13  ;;  %v11154_v28 = vadd.f32 %v9314_v58, %v13496_v20 }
 0x63f   : > { %13497 = vst [vmem:[#allocation5_spill] sm:$0xff] %v11154_v28 }
 0x642   : > { %v8476_v40 = vpop.f32.mrf.mxu0 }
 0x643   : > { %v2846_v12 = vmul.f32 %v8476_v40, %v11144_v48 }
 0x644   : > { %v2790_v37 = vpop.f32.mrf.mxu0 }
 0x645   : > { %v2845_v32 = vmul.f32 %v2790_v37, %v11141_v44  ;;  %v13498_v37 = vld [vmem:[#allocation14_spill] sm:$0xff] }
 0x647   : > { %8506 = vmatprep.mubr.msk.f32.mxu1 %vm732_vm0, %v2845_v32  ;;  %v11161_v32 = vadd.f32 %v9314_v58, %v13498_v37 }
 0x648   : > { %8507 = vmatmul.mubr.msk.f32.gmra.mxu1 %vm732_vm0, %v2846_v12  ;;  %v13500_v12 = vld [vmem:[#allocation13_spill] sm:$0xff] }
 0x649   : > { %13499 = vst [vmem:[#allocation8_spill] sm:$0xff] %v11161_v32  ;;  %v11164_v48 = vadd.f32 %v9314_v58, %v13500_v12 }
 0x64b   : > { %13501 = vst [vmem:[#allocation7_spill] sm:$0xff] %v11164_v48 }
 0x64e   : > { %v8479_v0 = vpop.f32.mrf.mxu0 }
 0x64f   : > { %v2848_v54 = vmul.f32 %v8479_v0, %v11154_v28  ;;  %v13504_v28 = vld [vmem:[#allocation15_spill] sm:$0xff] }
 0x650   : > { %v2800_v23 = vpop.f32.mrf.mxu0 }
 0x651   : > { %v2847_v52 = vmul.f32 %v2800_v23, %v11151_v13  ;;  %v13502_v23 = vld [vmem:[#allocation16_spill] sm:$0xff] }
 0x653   : > { %8509 = vmatprep.mubr.msk.f32.mxu1 %vm732_vm0, %v2847_v52  ;;  %v11171_v52 = vadd.f32 %v9314_v58, %v13502_v23 }
 0x654   : > { %8510 = vmatmul.mubr.msk.f32.gmra.mxu1 %vm732_vm0, %v2848_v54 }
 0x655   : > { %13503 = vst [vmem:[#allocation10_spill] sm:$0xff] %v11171_v52 }
 0x65a   : > { %v8482_v40 = vpop.f32.mrf.mxu0 }
 0x65b   : > { %v2850_v44 = vmul.f32 %v8482_v40, %v11164_v48  ;;  %v13507_v48 = vld [vmem:[#allocation17_spill] sm:$0xff] }
 0x65c   : > { %v2810_v45 = vpop.f32.mrf.mxu0 }
 0x65d   : > { %v2849_v20 = vmul.f32 %v2810_v45, %v11161_v32  ;;  %v13505_v45 = vld [vmem:[#allocation18_spill] sm:$0xff] }
 0x65e   : > { %v11178_v40 = vadd.f32 %v9314_v58, %v13505_v45 }
 0x65f   : > { %8512 = vmatprep.mubr.msk.f32.mxu1 %vm732_vm0, %v2849_v20 }
 0x660   : > { %8513 = vmatmul.mubr.msk.f32.gmra.mxu1 %vm732_vm0, %v2850_v44  ;;  %13506 = vst [vmem:[#allocation9_spill] sm:$0xff] %v11178_v40 }
 0x666   : > { %v8485_v0 = vpop.f32.mrf.mxu0 }
 0x667   : > { %v2852_v13 = vmul.f32 %v8485_v0, %v13504_v28 }
 0x668   : > { %v2820_v54 = vpop.f32.mrf.mxu0 }
 0x669   : > { %v2851_v37 = vmul.f32 %v2820_v54, %v11171_v52 }
 0x66b   : > { %8515 = vmatprep.mubr.msk.f32.mxu1 %vm732_vm0, %v2851_v37 }
 0x66c   : > { %8516 = vmatmul.mubr.msk.f32.gmra.mxu1 %vm732_vm0, %v2852_v13 }
 0x672   : > { %v8488_v12 = vpop.f32.mrf.mxu0 }
 0x673   : > { %v2854_v32 = vmul.f32 %v8488_v12, %v13507_v48 }
 0x674   : > { %v2830_v20 = vpop.f32.mrf.mxu0 }
 0x675   : > { %v2853_v44 = vmul.f32 %v2830_v20, %v11178_v40 }
 0x676   : > { %v8531_v23 = vpop.f32.mrf.mxu0 }
 0x677   : > { %v11182_v29 = vmul.f32 0.35355338, %v8531_v23  ;;  %8518 = vmatprep.mubr.msk.f32.mxu1 %vm732_vm0, %v2853_v44 }
 0x678   : > { %8519 = vmatmul.mubr.msk.f32.gmra.mxu1 %vm732_vm0, %v2854_v32  ;;  %v3290_v0 = vpop.f32.mrf.mxu0 }
 0x679   : > { %v11186_v54 = vmul.f32 0.35355338, %v3290_v0  ;;  %v3388_v13 = vsel %vm2465_vm4, %v11182_v29, -inf }
 0x67a   : > { %3389 = vmax.xlane.f32.xlu1 %v3388_v13  ;;  %v8534_v58 = vpop.f32.mrf.mxu0 }
 0x67b   : > { %v11190_v37 = vmul.f32 0.35355338, %v8534_v58  ;;  %v3385_v12 = vsel %vm2465_vm4, %v11186_v54, -inf }
 0x67c   : > { %3386 = vmax.xlane.f32.xlu0 %v3385_v12  ;;  %v3300_v45 = vpop.f32.mrf.mxu0 }
 0x67d   : > { %v11194_v23 = vmul.f32 0.35355338, %v3300_v45  ;;  %v3394_v32 = vsel %vm2465_vm4, %v11190_v37, -inf }
 0x67e   : > { %v8537_v20 = vpop.f32.mrf.mxu0 }
 0x67f   : > { %v11196_v44 = vmul.f32 0.35355338, %v8537_v20  ;;  %v3391_v12 = vsel %vm2465_vm4, %v11194_v23, -inf }
 0x680   : > { %3395 = vmax.xlane.f32.xlu0 %v3394_v32  ;;  %v3310_v0 = vpop.f32.mrf.mxu0 }
 0x681   : > { %v3400_v13 = vsel %vm2465_vm4, %v11196_v44, -inf  ;;  %v11202_v48 = vmul.f32 0.35355338, %v3310_v0 }
 0x682   : > { %3401 = vmax.xlane.f32.xlu1 %v3400_v13  ;;  %v8540_v58 = vpop.f32.mrf.mxu0 }
 0x683   : > { %v11204_v40 = vmul.f32 0.35355338, %v8540_v58  ;;  %v3397_v0 = vsel %vm2465_vm4, %v11202_v48, -inf }
 0x684   : > { %3392 = vmax.xlane.f32.xlu0 %v3391_v12  ;;  %v3320_v45 = vpop.f32.mrf.mxu0 }
 0x685   : > { %v3406_v20 = vsel %vm2465_vm4, %v11204_v40, -inf  ;;  %v11210_v28 = vmul.f32 0.35355338, %v3320_v45 }
 0x686   : > { %3407 = vmax.xlane.f32.xlu1 %v3406_v20  ;;  %v8543_v32 = vpop.f32.mrf.mxu0 }
 0x687   : > { %v11212_v52 = vmul.f32 0.35355338, %v8543_v32  ;;  %v3403_v45 = vsel %vm2465_vm4, %v11210_v28, -inf }
 0x688   : > { %3398 = vmax.xlane.f32.xlu0 %v3397_v0  ;;  %v3330_v13 = vpop.f32.mrf.mxu0 }
 0x689   : > { %v3412_v58 = vsel %vm2465_vm4, %v11212_v52, -inf  ;;  %v11218_v24 = vmul.f32 0.35355338, %v3330_v13 }
 0x68a   : > { %3413 = vmax.xlane.f32.xlu1 %v3412_v58  ;;  %v8546_v12 = vpop.f32.mrf.mxu0 }
 0x68b   : > { %v11220_v38 = vmul.f32 0.35355338, %v8546_v12  ;;  %v3409_v13 = vsel %vm2465_vm4, %v11218_v24, -inf }
 0x68c   : > { %3404 = vmax.xlane.f32.xlu0 %v3403_v45  ;;  %v3340_v20 = vpop.f32.mrf.mxu0 }
 0x68d   : > { %v3418_v32 = vsel %vm2465_vm4, %v11220_v38, -inf  ;;  %v11226_v55 = vmul.f32 0.35355338, %v3340_v20 }
 0x68e   : > { %3419 = vmax.xlane.f32.xlu1 %v3418_v32  ;;  %v8549_v0 = vpop.f32.mrf.mxu0 }
 0x68f   : > { %v11228_v49 = vmul.f32 0.35355338, %v8549_v0  ;;  %v3415_v20 = vsel %vm2465_vm4, %v11226_v55, -inf }
 0x690   : > { %3410 = vmax.xlane.f32.xlu0 %v3409_v13  ;;  %v3350_v58 = vpop.f32.mrf.mxu0 }
 0x691   : > { %v3424_v12 = vsel %vm2465_vm4, %v11228_v49, -inf  ;;  %v11234_v59 = vmul.f32 0.35355338, %v3350_v58 }
 0x692   : > { %3425 = vmax.xlane.f32.xlu1 %v3424_v12  ;;  %v8552_v45 = vpop.f32.mrf.mxu0 }
 0x693   : > { %v11236_v63 = vmul.f32 0.35355338, %v8552_v45  ;;  %v3421_v10 = vsel %vm2465_vm4, %v11234_v59, -inf }
 0x694   : > { %3416 = vmax.xlane.f32.xlu0 %v3415_v20  ;;  %v3360_v32 = vpop.f32.mrf.mxu0 }
 0x695   : > { %v3430_v0 = vsel %vm2465_vm4, %v11236_v63, -inf  ;;  %v11242_v13 = vmul.f32 0.35355338, %v3360_v32 }
 0x696   : > { %3431 = vmax.xlane.f32.xlu1 %v3430_v0 }
 0x697   : > { %v3427_v58 = vsel %vm2465_vm4, %v11242_v13, -inf }
 0x698   : > { %3422 = vmax.xlane.f32.xlu0 %v3421_v10 }
 0x69c   : > { %3428 = vmax.xlane.f32.xlu0 %v3427_v58 }
 0x6e6   : > { %v8499_v12 = vpop.f32.mrf.mxu1 }
 0x6e7   : > { %3049 = vst.msk [vmem:[#allocation2 + $0x20] sm:$0xff] %vm2189_vm1, %v8499_v12 }
 0x6e8   : > { %v2969_v45 = vpop.f32.mrf.mxu1 }
 0x6e9   : > { %3048 = vst.msk [vmem:[#allocation2] sm:$0xff] %vm2189_vm1, %v2969_v45 }
 0x6f2   : > { %v8502_v20 = vpop.f32.mrf.mxu1 }
 0x6f3   : > { %3051 = vst.msk [vmem:[#allocation2 + $0x60] sm:$0xff] %vm2189_vm1, %v8502_v20 }
 0x6f4   : > { %v2979_v0 = vpop.f32.mrf.mxu1 }
 0x6f5   : > { %3050 = vst.msk [vmem:[#allocation2 + $0x40] sm:$0xff] %vm2189_vm1, %v2979_v0 }
 0x6fc   : > { %v8505_v32 = vpop.f32.mrf.mxu1 }
 0x6fd   : > { %3053 = vst.msk [vmem:[#allocation2 + $0xa0] sm:$0xff] %vm2189_vm1, %v8505_v32 }
 0x6fe   : > { %v2989_v10 = vpop.f32.mrf.mxu1 }
 0x6ff   : > { %3052 = vst.msk [vmem:[#allocation2 + $0x80] sm:$0xff] %vm2189_vm1, %v2989_v10 }
 0x703   : > { %v3390_v21 = vpop.xlane.xlu1 %3389 }
 0x704   : > { %v3434_v58 = vsub.f32 %v11182_v29, %v3390_v21 }
 0x705   : > { %v3387_v8 = vpop.xlane.xlu0 %3386 }
 0x706   : > { %v3451_v12 = vmul.f32 1.442695, %v3434_v58  ;;  %v3433_v46 = vsub.f32 %v11186_v54, %v3387_v8 }
 0x708   : > { %9022 = vpow2.f32 %v3451_v12  ;;  %v3449_v45 = vmul.f32 1.442695, %v3433_v46  ;;  %v8508_v9 = vpop.f32.mrf.mxu1 }
 0x709   : > { %3055 = vst.msk [vmem:[#allocation2 + $0xe0] sm:$0xff] %vm2189_vm1, %v8508_v9  ;;  %v3396_v20 = vpop.xlane.xlu0 %3395 }
 0x70a   : > { %9024 = vpow2.f32 %v3449_v45  ;;  %v3436_v0 = vsub.f32 %v11190_v37, %v3396_v20  ;;  %v2999_v32 = vpop.f32.mrf.mxu1 }
 0x70b   : > { %3054 = vst.msk [vmem:[#allocation2 + $0xc0] sm:$0xff] %vm2189_vm1, %v2999_v32  ;;  %v3402_v10 = vpop.xlane.xlu1 %3401 }
 0x70c   : > { %v3455_v11 = vmul.f32 1.442695, %v3436_v0  ;;  %v3438_v21 = vsub.f32 %v11196_v44, %v3402_v10 }
 0x70d   : > { %v3393_v29 = vpop.xlane.xlu0 %3392 }
 0x70e   : > { %9026 = vpow2.f32 %v3455_v11  ;;  %v3459_v58 = vmul.f32 1.442695, %v3438_v21  ;;  %v3435_v8 = vsub.f32 %v11194_v23, %v3393_v29 }
 0x70f   : > { %v3408_v46 = vpop.xlane.xlu1 %3407 }
 0x710   : > { %9028 = vpow2.f32 %v3459_v58  ;;  %v3453_v54 = vmul.f32 1.442695, %v3435_v8  ;;  %v3440_v9 = vsub.f32 %v11204_v40, %v3408_v46 }
 0x711   : > { %v3399_v12 = vpop.xlane.xlu0 %3398 }
 0x712   : > { %9030 = vpow2.f32 %v3453_v54  ;;  %v3463_v37 = vmul.f32 1.442695, %v3440_v9  ;;  %v3437_v45 = vsub.f32 %v11202_v48, %v3399_v12 }
 0x713   : > { %v3414_v20 = vpop.xlane.xlu1 %3413 }
 0x714   : > { %9032 = vpow2.f32 %v3463_v37  ;;  %v3457_v0 = vmul.f32 1.442695, %v3437_v45  ;;  %v3442_v44 = vsub.f32 %v11212_v52, %v3414_v20  ;;  %v8511_v32 = vpop.f32.mrf.mxu1 }
 0x715   : > { %v11264_v11 = vpop.eup %9022  ;;  %3057 = vst.msk [vmem:[#allocation2 + $0x120] sm:$0xff] %vm2189_vm1, %v8511_v32  ;;  %v3405_v23 = vpop.xlane.xlu0 %3404 }
 0x716   : > { %9034 = vpow2.f32 %v3457_v0  ;;  %v3467_v10 = vmul.f32 1.442695, %v3442_v44  ;;  %v3439_v40 = vsub.f32 %v11210_v28, %v3405_v23  ;;  %v3009_v21 = vpop.f32.mrf.mxu1  ;;  %v3484_v29 = vsel %vm2465_vm4, %v11264_v11, 0.0 }
 0x717   : > { %v11270_v48 = vpop.eup %9024  ;;  %3056 = vst.msk [vmem:[#allocation2 + $0x100] sm:$0xff] %vm2189_vm1, %v3009_v21  ;;  %v3420_v58 = vpop.xlane.xlu1 %3419  ;;  %3485 = vadd.xlane.f32.xlu1 %v3484_v29 }
 0x718   : > { %9036 = vpow2.f32 %v3467_v10  ;;  %v3461_v52 = vmul.f32 1.442695, %v3439_v40  ;;  %v3444_v8 = vsub.f32 %v11220_v38, %v3420_v58  ;;  %v3481_v46 = vsel %vm2465_vm4, %v11270_v48, 0.0 }
 0x719   : > { %3482 = vadd.xlane.f32.xlu0 %v3481_v46  ;;  %v3411_v54 = vpop.xlane.xlu0 %3410 }
 0x71a   : > { %9038 = vpow2.f32 %v3461_v52  ;;  %v3471_v28 = vmul.f32 1.442695, %v3444_v8  ;;  %v3441_v9 = vsub.f32 %v11218_v24, %v3411_v54 }
 0x71b   : > { %v11277_v12 = vpop.eup %9026  ;;  %v3426_v37 = vpop.xlane.xlu1 %3425 }
 0x71c   : > { %9040 = vpow2.f32 %v3471_v28  ;;  %v3465_v45 = vmul.f32 1.442695, %v3441_v9  ;;  %v3446_v20 = vsub.f32 %v11228_v49, %v3426_v37  ;;  %v3490_v0 = vsel %vm2465_vm4, %v11277_v12, 0.0 }
 0x71d   : > { %v11282_v38 = vpop.eup %9028  ;;  %3491 = vadd.xlane.f32.xlu1 %v3490_v0  ;;  %v3417_v44 = vpop.xlane.xlu0 %3416 }
 0x71e   : > { %9042 = vpow2.f32 %v3465_v45  ;;  %v3475_v32 = vmul.f32 1.442695, %v3446_v20  ;;  %v3443_v23 = vsub.f32 %v11226_v55, %v3417_v44  ;;  %v3496_v40 = vsel %vm2465_vm4, %v11282_v38, 0.0 }
 0x71f   : > { %v11285_v10 = vpop.eup %9030  ;;  %v3432_v24 = vpop.xlane.xlu1 %3431 }
 0x720   : > { %9044 = vpow2.f32 %v3475_v32  ;;  %v3469_v21 = vmul.f32 1.442695, %v3443_v23  ;;  %v3448_v49 = vsub.f32 %v11236_v63, %v3432_v24  ;;  %v8514_v29 = vpop.f32.mrf.mxu1  ;;  %v3487_v58 = vsel %vm2465_vm4, %v11285_v10, 0.0 }
 0x721   : > { %v11292_v52 = vpop.eup %9032  ;;  %3059 = vst.msk [vmem:[#allocation2 + $0x160] sm:$0xff] %vm2189_vm1, %v8514_v29  ;;  %3497 = vadd.xlane.f32.xlu1 %v3496_v40  ;;  %3488 = vadd.xlane.f32.xlu0 %v3487_v58  ;;  %v3423_v55 = vpop.xlane.xlu0 %3422 }
 0x722   : > { %9046 = vpow2.f32 %v3469_v21  ;;  %v3479_v8 = vmul.f32 1.442695, %v3448_v49  ;;  %v3445_v46 = vsub.f32 %v11234_v59, %v3423_v55  ;;  %v3019_v54 = vpop.f32.mrf.mxu1  ;;  %v3502_v9 = vsel %vm2465_vm4, %v11292_v52, 0.0 }
 0x723   : > { %v11296_v28 = vpop.eup %9034  ;;  %3058 = vst.msk [vmem:[#allocation2 + $0x140] sm:$0xff] %vm2189_vm1, %v3019_v54 }
 0x724   : > { %9048 = vpow2.f32 %v3479_v8  ;;  %v3473_v63 = vmul.f32 1.442695, %v3445_v46  ;;  %v3493_v37 = vsel %vm2465_vm4, %v11296_v28, 0.0 }
 0x725   : > { %v11303_v45 = vpop.eup %9036  ;;  %3503 = vadd.xlane.f32.xlu1 %v3502_v9  ;;  %3494 = vadd.xlane.f32.xlu0 %v3493_v37  ;;  %v3429_v20 = vpop.xlane.xlu0 %3428 }
 0x726   : > { %9050 = vpow2.f32 %v3473_v63  ;;  %v3447_v59 = vsub.f32 %v11242_v13, %v3429_v20  ;;  %v3508_v32 = vsel %vm2465_vm4, %v11303_v45, 0.0 }
 0x727   : > { %v11306_v0 = vpop.eup %9038 }
 0x728   : > { %v3477_v44 = vmul.f32 1.442695, %v3447_v59  ;;  %v3499_v23 = vsel %vm2465_vm4, %v11306_v0, 0.0 }
 0x729   : > { %v11312_v24 = vpop.eup %9040  ;;  %3509 = vadd.xlane.f32.xlu1 %v3508_v32  ;;  %3500 = vadd.xlane.f32.xlu0 %v3499_v23 }
 0x72a   : > { %9052 = vpow2.f32 %v3477_v44  ;;  %v3514_v13 = vsel %vm2465_vm4, %v11312_v24, 0.0 }
 0x72b   : > { %v11314_v40 = vpop.eup %9042 }
 0x72c   : > { %v8517_v21 = vpop.f32.mrf.mxu1  ;;  %v3505_v49 = vsel %vm2465_vm4, %v11314_v40, 0.0 }
 0x72d   : > { %v11320_v29 = vpop.eup %9044  ;;  %3061 = vst.msk [vmem:[#allocation2 + $0x1a0] sm:$0xff] %vm2189_vm1, %v8517_v21  ;;  %3515 = vadd.xlane.f32.xlu1 %v3514_v13  ;;  %3506 = vadd.xlane.f32.xlu0 %v3505_v49 }
 0x72e   : > { %v3029_v58 = vpop.f32.mrf.mxu1  ;;  %v3520_v8 = vsel %vm2465_vm4, %v11320_v29, 0.0 }
 0x72f   : > { %v11323_v55 = vpop.eup %9046  ;;  %3060 = vst.msk [vmem:[#allocation2 + $0x180] sm:$0xff] %vm2189_vm1, %v3029_v58 }
 0x730   : > { %v3511_v46 = vsel %vm2465_vm4, %v11323_v55, 0.0 }
 0x731   : > { %v11330_v54 = vpop.eup %9048  ;;  %3521 = vadd.xlane.f32.xlu1 %v3520_v8  ;;  %3512 = vadd.xlane.f32.xlu0 %v3511_v46 }
 0x732   : > { %v3526_v9 = vsel %vm2465_vm4, %v11330_v54, 0.0 }
 0x733   : > { %v11332_v63 = vpop.eup %9050 }
 0x734   : > { %v3517_v37 = vsel %vm2465_vm4, %v11332_v63, 0.0 }
 0x735   : > { %3527 = vadd.xlane.f32.xlu1 %v3526_v9  ;;  %3518 = vadd.xlane.f32.xlu0 %v3517_v37 }
 0x737   : > { %v11338_v20 = vpop.eup %9052 }
 0x738   : > { %v8520_v59 = vpop.f32.mrf.mxu1  ;;  %v3523_v44 = vsel %vm2465_vm4, %v11338_v20, 0.0 }
 0x739   : > { %3063 = vst.msk [vmem:[#allocation2 + $0x1e0] sm:$0xff] %vm2189_vm1, %v8520_v59  ;;  %3524 = vadd.xlane.f32.xlu0 %v3523_v44 }
 0x73a   : > { %v3039_v32 = vpop.f32.mrf.mxu1 }
 0x73b   : > { %3062 = vst.msk [vmem:[#allocation2 + $0x1c0] sm:$0xff] %vm2189_vm1, %v3039_v32 }
 0x746   : > { %3981 = vrot.lane.b32.xlu1 %v10178_v39, %s9354_s29 }
 0x74a   : > { %3983 = vrot.lane.b32.xlu1 %v10234_v57, %s9354_s29 }
 0x74e   : > { %3985 = vrot.lane.b32.xlu1 %v10266_v61, %s9354_s29 }
 0x74f   : > { %3979 = vrot.lane.b32.xlu0 %v10187_v56, %s9354_s29 }
 0x752   : > { %3989 = vrot.lane.b32.xlu1 %v10340_v26, %s9354_s29 }
 0x753   : > { %3987 = vrot.lane.b32.xlu0 %v10302_v3, %s9354_s29 }
 0x756   : > { %3993 = vrot.lane.b32.xlu1 %v10368_v2, %s9354_s29 }
 0x757   : > { %3991 = vrot.lane.b32.xlu0 %v10357_v22, %s9354_s29 }
 0x75a   : > { %3997 = vrot.lane.b32.xlu1 %v10389_v14, %s9354_s29 }
 0x75b   : > { %3995 = vrot.lane.b32.xlu0 %v10378_v36, %s9354_s29 }
 0x75e   : > { %4001 = vrot.lane.b32.xlu1 %v10411_v30, %s9354_s29 }
 0x75f   : > { %3999 = vrot.lane.b32.xlu0 %v10400_v17, %s9354_s29 }
 0x762   : > { %4005 = vrot.lane.b32.xlu1 %v10433_v53, %s9354_s29 }
 0x763   : > { %4003 = vrot.lane.b32.xlu0 %v10422_v47, %s9354_s29 }
 0x766   : > { %4009 = vrot.lane.b32.xlu1 %v10455_v7, %s9354_s29 }
 0x767   : > { %4007 = vrot.lane.b32.xlu0 %v10444_v62, %s9354_s29  ;;  %s13620_s29 = smov 8  }
 0x7a0   : > { %v3486_v23 = vpop.xlane.xlu1 %3485 }
 0x7a1   : > { %9054 = vrcp.f32 %v3486_v23 }
 0x7a2   : > { %v3483_v21 = vpop.xlane.xlu0 %3482 }
 0x7a3   : > { %9056 = vrcp.f32 %v3483_v21 }
 0x7a6   : > { %v3492_v13 = vpop.xlane.xlu1 %3491 }
 0x7a7   : > { %9058 = vrcp.f32 %v3492_v13 }
 0x7aa   : > { %v3498_v49 = vpop.xlane.xlu1 %3497  ;;  %v3489_v58 = vpop.xlane.xlu0 %3488 }
 0x7ab   : > { %9060 = vrcp.f32 %v3489_v58  ;;  %v13508_v58 = vld [vmem:[#allocation19_spill] sm:$0xff] }
 0x7ac   : > { %9062 = vrcp.f32 %v3498_v49 }
 0x7ae   : > { %v3504_v8 = vpop.xlane.xlu1 %3503  ;;  %v3495_v46 = vpop.xlane.xlu0 %3494 }
 0x7af   : > { %v9055_v9 = vpop.eup %9054  ;;  %9064 = vrcp.f32 %v3495_v46 }
 0x7b0   : > { %v9057_v37 = vpop.eup %9056  ;;  %v3546_v44 = vmul.f32 %v9055_v9, %v11264_v11  ;;  %9066 = vrcp.f32 %v3504_v8 }
 0x7b1   : > { %v3545_v59 = vmul.f32 %v9057_v37, %v11270_v48 }
 0x7b2   : > { %v3510_v32 = vpop.xlane.xlu1 %3509  ;;  %v3501_v7 = vpop.xlane.xlu0 %3500 }
 0x7b3   : > { %8555 = vmatprep.mubr.msk.f32.mxu1 %vm2465_vm4, %v3545_v59  ;;  %9068 = vrcp.f32 %v3501_v7 }
 0x7b4   : > { %8556 = vmatmul.mubr.msk.f32.vlgmr.msra.gmra.mxu1 %vm2465_vm4, %v3546_v44  ;;  %9070 = vrcp.f32 %v3510_v32  ;;  %v9059_v48 = vpop.eup %9058 }
 0x7b5   : > { %8612 = vmatpush3.msra.mxu1 %v10843_v34  ;;  %v3548_v34 = vmul.f32 %v9059_v48, %v11277_v12 }
 0x7b6   : > { %v3516_v23 = vpop.xlane.xlu1 %3515  ;;  %v3507_v21 = vpop.xlane.xlu0 %3506  ;;  %8613 = vmatprep.subr.mxu1 %v10849_v50 }
 0x7b7   : > { %8614 = vmatpush3.msra.mxu1 %v10849_v50  ;;  %9072 = vrcp.f32 %v3507_v21  ;;  %v11377_v50 = vld [vmem:[%s13437_s25 + $0x18] sm:$0xff] }
 0x7b8   : > { %8615 = vmatprep.subr.mxu1 %v10856_v35  ;;  %v9061_v11 = vpop.eup %9060  ;;  %9074 = vrcp.f32 %v3516_v23 }
 0x7b9   : > { %8616 = vmatpush3.msra.mxu1 %v10856_v35  ;;  %v3547_v49 = vmul.f32 %v9061_v11, %v11285_v10  ;;  %v9063_v8 = vpop.eup %9062 }
 0x7ba   : > { %v3522_v13 = vpop.xlane.xlu1 %3521  ;;  %v3513_v7 = vpop.xlane.xlu0 %3512  ;;  %8617 = vmatprep.subr.mxu1 %v13508_v58  ;;  %v3550_v9 = vmul.f32 %v9063_v8, %v11282_v38 }
 0x7bb   : > { %8618 = vmatpush3.msra.mxu1 %v13508_v58  ;;  %9076 = vrcp.f32 %v3513_v7  ;;  %8558 = vmatprep.mubr.msk.f32.mxu1 %vm2465_vm4, %v3547_v49 }
 0x7bc   : > { %8669 = vmatprep.subr.mxu1 %v11377_v50  ;;  %v9065_v35 = vpop.eup %9064  ;;  %8559 = vmatmul.mubr.msk.f32.gmra.mxu1 %vm2465_vm4, %v3548_v34  ;;  %9078 = vrcp.f32 %v3522_v13 }
 0x7bd   : > { %v3549_v12 = vmul.f32 %v9065_v35, %v11296_v28  ;;  %v9067_v37 = vpop.eup %9066 }
 0x7be   : > { %v3528_v10 = vpop.xlane.xlu1 %3527  ;;  %v3519_v46 = vpop.xlane.xlu0 %3518  ;;  %v3552_v21 = vmul.f32 %v9067_v37, %v11292_v52 }
 0x7bf   : > { %9080 = vrcp.f32 %v3519_v46  ;;  %8561 = vmatprep.mubr.msk.f32.mxu1 %vm2465_vm4, %v3549_v12 }
 0x7c0   : > { %v9069_v59 = vpop.eup %9068  ;;  %8562 = vmatmul.mubr.msk.f32.gmra.mxu1 %vm2465_vm4, %v3550_v9  ;;  %9082 = vrcp.f32 %v3528_v10 }
 0x7c1   : > { %v3551_v23 = vmul.f32 %v9069_v59, %v11306_v0  ;;  %v9071_v28 = vpop.eup %9070 }
 0x7c2   : > { %v11385_v44 = vpop.permute.xlu1 %3981  ;;  %v3525_v32 = vpop.xlane.xlu0 %3524  ;;  %v3554_v7 = vmul.f32 %v9071_v28, %v11303_v45 }
 0x7c3   : > { %9084 = vrcp.f32 %v3525_v32  ;;  %8564 = vmatprep.mubr.msk.f32.mxu1 %vm2465_vm4, %v3551_v23  ;;  %v4028_v10 = vsel %vm2189_vm1, %v11385_v44, %v10894_v4 }
 0x7c4   : > { %v9073_v38 = vpop.eup %9072  ;;  %8565 = vmatmul.mubr.msk.f32.gmra.mxu1 %vm2465_vm4, %v3552_v21  ;;  %v4044_v23 = vsel %vm2206_vm2, %v4028_v10, %v10178_v39 }
 0x7c5   : > { %v3553_v13 = vmul.f32 %v9073_v38, %v11314_v40  ;;  %v9075_v49 = vpop.eup %9074 }
 0x7c6   : > { %v11391_v48 = vpop.permute.xlu1 %3983  ;;  %v11393_v11 = vpop.permute.xlu0 %3979  ;;  %v3556_v40 = vmul.f32 %v9075_v49, %v11312_v24 }
 0x7c7   : > { %8567 = vmatprep.mubr.msk.f32.mxu1 %vm2465_vm4, %v3553_v13  ;;  %v4027_v8 = vsel %vm2189_vm1, %v11393_v11, %v10909_v1  ;;  %v4029_v37 = vsel %vm2189_vm1, %v11391_v48, %v10915_v5 }
 0x7c8   : > { %v9077_v0 = vpop.eup %9076  ;;  %8568 = vmatmul.mubr.msk.f32.gmra.mxu1 %vm2465_vm4, %v3554_v7  ;;  %v4043_v46 = vsel %vm2206_vm2, %v4027_v8, %v10187_v56  ;;  %v4045_v28 = vsel %vm2206_vm2, %v4029_v37, %v10234_v57 }
 0x7c9   : > { %v3555_v34 = vmul.f32 %v9077_v0, %v11323_v55  ;;  %v9079_v35 = vpop.eup %9078  ;;  %v4059_v21 = vsel %vm2223_vm3, %v4043_v46, %v10469_v18  ;;  %v13511_v0 = vld [vmem:[#allocation34_spill] sm:$0xff] }
 0x7ca   : > { %v11399_v52 = vpop.permute.xlu1 %3985  ;;  %v11401_v58 = vpop.permute.xlu0 %3987  ;;  %v3558_v59 = vmul.f32 %v9079_v35, %v11320_v29  ;;  %v4075_v49 = vmul.f32 %v4059_v21, %v10198_v16  ;;  %v11491_v21 = vld [vmem:[%s13437_s25 + $0x10] sm:$0xff] }
 0x7cb   : > { %8570 = vmatprep.mubr.msk.f32.mxu1 %vm2465_vm4, %v3555_v34  ;;  %v4030_v29 = vsel %vm2189_vm1, %v11399_v52, %v10926_v41  ;;  %v4031_v7 = vsel %vm2189_vm1, %v11401_v58, %v10924_v43  ;;  %v4061_v34 = vsel %vm2223_vm3, %v4045_v28, %v13511_v0  ;;  %13515 = vst [vmem:[#allocation18_spill] sm:$0xff] %v11491_v21  ;;  %v11506_v0 = vld [vmem:[%s13437_s25 + $0x8] sm:$0xff] }
 0x7cc   : > { %v9081_v45 = vpop.eup %9080  ;;  %8571 = vmatmul.mubr.msk.f32.gmra.mxu1 %vm2465_vm4, %v3556_v40  ;;  %v4046_v8 = vsel %vm2206_vm2, %v4030_v29, %v10266_v61  ;;  %v4047_v40 = vsel %vm2206_vm2, %v4031_v7, %v10302_v3  ;;  %v13517_v29 = vld [vmem:[#allocation22_spill] sm:$0xff]  ;;  %13519 = vst [vmem:[#allocation19_spill] sm:$0xff] %v11506_v0 }
 0x7cd   : > { %v3557_v9 = vmul.f32 %v9081_v45, %v11332_v63  ;;  %v9083_v24 = vpop.eup %9082  ;;  %v4062_v10 = vsel %vm2223_vm3, %v4046_v8, %v10493_v42  ;;  %v13520_v8 = vld [vmem:[#allocation60_spill] sm:$0xff] }
 0x7ce   : > { %v11415_v55 = vpop.permute.xlu1 %3989  ;;  %v11417_v12 = vpop.permute.xlu0 %3991  ;;  %v3560_v18 = vmul.f32 %v9083_v24, %v11330_v54  ;;  %v4063_v24 = vsel %vm2223_vm3, %v4047_v40, %v10506_v31 }
 0x7cf   : > { %8573 = vmatprep.mubr.msk.f32.mxu1 %vm2465_vm4, %v3557_v9  ;;  %v4032_v54 = vsel %vm2189_vm1, %v11415_v55, %v10940_v51  ;;  %v4033_v45 = vsel %vm2189_vm1, %v11417_v12, %v10936_v19  ;;  %v4077_v9 = vmul.f32 %v4061_v34, %v10219_v27  ;;  %v4079_v7 = vmul.f32 %v4063_v24, %v13517_v29  ;;  %v11525_v24 = vld [vmem:[%s13437_s25] sm:$0xff] }
 0x7d0   : > { %v9085_v32 = vpop.eup %9084  ;;  %8574 = vmatmul.mubr.msk.f32.gmra.mxu1 %vm2465_vm4, %v3558_v59  ;;  %v4048_v37 = vsel %vm2206_vm2, %v4032_v54, %v10340_v26  ;;  %v4049_v59 = vsel %vm2206_vm2, %v4033_v45, %v10357_v22 }
 0x7d1   : > { %v3559_v63 = vmul.f32 %v9085_v32, %v11338_v20  ;;  %v4060_v20 = vsel %vm2223_vm3, %v4044_v23, %v10467_v60  ;;  %v4078_v23 = vmul.f32 %v4062_v10, %v10211_v33  ;;  %v13523_v10 = vld [vmem:[#allocation21_spill] sm:$0xff] }
 0x7d2   : > { %v11436_v38 = vpop.permute.xlu1 %3993  ;;  %v11438_v13 = vpop.permute.xlu0 %3995  ;;  %v4076_v35 = vmul.f32 %v4060_v20, %v10185_v25 }
 0x7d3   : > { %13509 = vst [vmem:[#allocation12_spill] sm:$0xff] %v11436_v38  ;;  %13510 = vst [vmem:[#allocation11_spill] sm:$0xff] %v11438_v13  ;;  %8576 = vmatprep.mubr.msk.f32.mxu1 %vm2465_vm4, %v3559_v63  ;;  %v4034_v32 = vsel %vm2189_vm1, %v11436_v38, %v10962_v6  ;;  %v4035_v42 = vsel %vm2189_vm1, %v11438_v13, %v10953_v15  ;;  %v13516_v63 = vld [vmem:[#allocation35_spill] sm:$0xff] }
 0x7d4   : > { %8577 = vmatmul.mubr.msk.f32.gmra.mxu1 %vm2465_vm4, %v3560_v18  ;;  %v4064_v28 = vsel %vm2223_vm3, %v4048_v37, %v13516_v63  ;;  %v13518_v18 = vld [vmem:[#allocation36_spill] sm:$0xff]  ;;  %v4051_v34 = vsel %vm2206_vm2, %v4035_v42, %v10378_v36  ;;  %13524 = vst [vmem:[#allocation35_spill] sm:$0xff] %v11525_v24  ;;  %v13525_v37 = vld [vmem:[#allocation38_spill] sm:$0xff] }
 0x7d5   : > { %8619 = vmatprep.mubr.msk.f32.mxu1 %vm732_vm0, %v4075_v49  ;;  %v4065_v20 = vsel %vm2223_vm3, %v4049_v59, %v13518_v18  ;;  %v4050_v49 = vsel %vm2206_vm2, %v4034_v32, %v10368_v2  ;;  %v13526_v32 = vld [vmem:[#allocation24_spill] sm:$0xff]  ;;  %v9319_v18 = vld [vmem:[%s13435_s5] sm:$0xf] }
 0x7d6   : > { %v11459_v60 = vpop.permute.xlu1 %3997  ;;  %v11467_v46 = vpop.permute.xlu0 %3999  ;;  %v4066_v59 = vsel %vm2223_vm3, %v4050_v49, %v13525_v37  ;;  %v4081_v42 = vmul.f32 %v4065_v20, %v13526_v32  ;;  %v13529_v49 = vld [vmem:[#allocation61_spill] sm:$0xff] }
 0x7d7   : > { %13512 = vst [vmem:[#allocation14_spill] sm:$0xff] %v11459_v60  ;;  %13513 = vst [vmem:[#allocation13_spill] sm:$0xff] %v11467_v46  ;;  %v4036_v40 = vsel %vm2189_vm1, %v11459_v60, %v13520_v8 }
 0x7d8   : > { %8620 = vmatmul.mubr.msk.f32.vlgmr.msra.gmra.mxu1 %vm732_vm0, %v4076_v35  ;;  %v13522_v35 = vld [vmem:[#allocation59_spill] sm:$0xff] }
 0x7d9   : > { %8622 = vmatprep.mubr.msk.f32.mxu1 %vm732_vm0, %v4077_v9  ;;  %8670 = vmatpush3.msra.mxu1 %v11377_v50  ;;  %v4037_v45 = vsel %vm2189_vm1, %v11467_v46, %v13522_v35  ;;  %v4080_v9 = vmul.f32 %v4064_v28, %v13523_v10  ;;  %v4052_v28 = vsel %vm2206_vm2, %v4036_v40, %v10389_v14  ;;  %v13530_v40 = vld [vmem:[#allocation37_spill] sm:$0xff]  ;;  %v13532_v35 = vld [vmem:[#allocation42_spill] sm:$0xff] }
 0x7da   : > { %v11485_v31 = vpop.permute.xlu1 %4001  ;;  %8671 = vmatprep.subr.mxu1 %v11491_v21  ;;  %v11514_v54 = vpop.permute.xlu0 %4003  ;;  %v4053_v20 = vsel %vm2206_vm2, %v4037_v45, %v10400_v17  ;;  %v4068_v8 = vsel %vm2223_vm3, %v4052_v28, %v13532_v35  ;;  %v13535_v45 = vld [vmem:[#allocation44_spill] sm:$0xff]  ;;  %v13537_v35 = vld [vmem:[#allocation41_spill] sm:$0xff] }
 0x7db   : > { %13514 = vst [vmem:[#allocation16_spill] sm:$0xff] %v11485_v31  ;;  %8672 = vmatpush3.msra.mxu1 %v11491_v21  ;;  %13521 = vst [vmem:[#allocation34_spill] sm:$0xff] %v11514_v54  ;;  %v4039_v37 = vsel %vm2189_vm1, %v11514_v54, %v13530_v40  ;;  %v4069_v10 = vsel %vm2223_vm3, %v4053_v20, %v13535_v45  ;;  %v13536_v40 = vld [vmem:[#allocation39_spill] sm:$0xff]  ;;  %v13539_v20 = vld [vmem:[#allocation25_spill] sm:$0xff] }
 0x7dc   : > { %8623 = vmatmul.mubr.msk.f32.gmra.mxu1 %vm732_vm0, %v4078_v23  ;;  %8673 = vmatprep.subr.mxu1 %v11506_v0  ;;  %v13527_v23 = vld [vmem:[#allocation40_spill] sm:$0xff]  ;;  %v4084_v45 = vmul.f32 %v4068_v8, %v13539_v20 }
 0x7dd   : > { %8625 = vmatprep.mubr.msk.f32.mxu1 %vm732_vm0, %v4079_v7  ;;  %8674 = vmatpush3.msra.mxu1 %v11506_v0  ;;  %v4067_v63 = vsel %vm2223_vm3, %v4051_v34, %v13527_v23  ;;  %v4038_v34 = vsel %vm2189_vm1, %v11485_v31, %v13529_v49 }
 0x7de   : > { %8675 = vmatprep.subr.mxu1 %v11525_v24  ;;  %v11536_v7 = vpop.permute.xlu1 %4005  ;;  %v11555_v32 = vpop.permute.xlu0 %4007  ;;  %v4054_v49 = vsel %vm2206_vm2, %v4038_v34, %v10411_v30  ;;  %v13540_v34 = vld [vmem:[#allocation46_spill] sm:$0xff] }
 0x7df   : > { %8676 = vmatpush3.msra.mxu1 %v11525_v24  ;;  %13528 = vst [vmem:[#allocation36_spill] sm:$0xff] %v11536_v7  ;;  %13533 = vst [vmem:[#allocation38_spill] sm:$0xff] %v11555_v32  ;;  %v13534_v24 = vld [vmem:[#allocation26_spill] sm:$0xff] }
 0x7e0   : > { %8626 = vmatmul.mubr.msk.f32.gmra.mxu1 %vm732_vm0, %v4080_v9  ;;  %8733 = vmatprep.subr.msk.mxu1 %vm2690_vm5, %v9319_v18  ;;  %v13531_v9 = vld [vmem:[#allocation23_spill] sm:$0xff]  ;;  %v4083_v46 = vmul.f32 %v4067_v63, %v13534_v24  ;;  %v4041_v63 = vsel %vm2189_vm1, %v11555_v32, %v13537_v35  ;;  %v13541_v24 = vld [vmem:[#allocation28_spill] sm:$0xff] }
 0x7e1   : > { %8628 = vmatprep.mubr.msk.f32.mxu1 %vm732_vm0, %v4081_v42  ;;  %v4082_v23 = vmul.f32 %v4066_v59, %v13531_v9  ;;  %v4055_v42 = vsel %vm2206_vm2, %v4039_v37, %v10422_v47  ;;  %v4040_v59 = vsel %vm2189_vm1, %v11536_v7, %v13536_v40  ;;  %v4085_v54 = vmul.f32 %v4069_v10, %v13541_v24  ;;  %v13542_v37 = vld [vmem:[#allocation48_spill] sm:$0xff]  ;;  %v13543_v35 = vld [vmem:[#allocation43_spill] sm:$0xff]  ;;  %v13545_v10 = vld [vmem:[#allocation50_spill] sm:$0xff] }
 0x7e2   : > { %v11572_v28 = vpop.permute.xlu1 %4009  ;;  %v4071_v9 = vsel %vm2223_vm3, %v4055_v42, %v13542_v37  ;;  %v4056_v40 = vsel %vm2206_vm2, %v4040_v59, %v10433_v53  ;;  %v13546_v42 = vld [vmem:[#allocation30_spill] sm:$0xff]  ;;  %v13547_v32 = vld [vmem:[#allocation52_spill] sm:$0xff] }
 0x7e3   : > { %13538 = vst [vmem:[#allocation40_spill] sm:$0xff] %v11572_v28  ;;  %v4042_v8 = vsel %vm2189_vm1, %v11572_v28, %v13543_v35  ;;  %v4072_v24 = vsel %vm2223_vm3, %v4056_v40, %v13545_v10  ;;  %v4087_v37 = vmul.f32 %v4071_v9, %v13546_v42  ;;  %v13552_v40 = vld [vmem:[#allocation31_spill] sm:$0xff] }
 0x7e4   : > { %8629 = vmatmul.mubr.msk.f32.gmra.mxu1 %vm732_vm0, %v4082_v23  ;;  %v4070_v23 = vsel %vm2223_vm3, %v4054_v49, %v13540_v34  ;;  %v13544_v49 = vld [vmem:[#allocation27_spill] sm:$0xff] }
 0x7e5   : > { %8631 = vmatprep.mubr.msk.f32.mxu1 %vm732_vm0, %v4083_v46  ;;  %v4057_v46 = vsel %vm2206_vm2, %v4041_v63, %v10444_v62  ;;  %v4086_v34 = vmul.f32 %v4070_v23, %v13544_v49  ;;  %v13549_v63 = vld [vmem:[#allocation29_spill] sm:$0xff]  ;;  %v13551_v49 = vld [vmem:[#allocation32_spill] sm:$0xff]  ;;  %v13554_v10 = vld [vmem:[#allocation47_spill] sm:$0xff] }
 0x7e6   : > { %v4073_v59 = vsel %vm2223_vm3, %v4057_v46, %v13547_v32  ;;  %v4088_v35 = vmul.f32 %v4072_v24, %v13549_v63  ;;  %v11615_v24 = vld [vmem:[%s13397_s0 + $0x18] sm:$0xff] }
 0x7e7   : > { %v4089_v28 = vmul.f32 %v4073_v59, %v13551_v49 }
 0x7e8   : > { %8632 = vmatmul.mubr.msk.f32.gmra.mxu1 %vm732_vm0, %v4084_v45  ;;  %v13548_v45 = vld [vmem:[#allocation33_spill] sm:$0xff] }
 0x7e9   : > { %8634 = vmatprep.mubr.msk.f32.mxu1 %vm732_vm0, %v4085_v54  ;;  %v4058_v20 = vsel %vm2206_vm2, %v4042_v8, %v13548_v45  ;;  %v13550_v54 = vld [vmem:[#allocation54_spill] sm:$0xff]  ;;  %v13553_v8 = vld [vmem:[#allocation45_spill] sm:$0xff] }
 0x7ea   : > { %v4074_v23 = vsel %vm2223_vm3, %v4058_v20, %v13550_v54  ;;  %v13555_v20 = vld [vmem:[#allocation49_spill] sm:$0xff]  ;;  %v13556_v54 = vld [vmem:[#allocation51_spill] sm:$0xff] }
 0x7eb   : > { %v4090_v32 = vmul.f32 %v4074_v23, %v13552_v40  ;;  %v13559_v40 = vld [vmem:[#allocation4_spill] sm:$0xff] }
 0x7ec   : > { %8635 = vmatmul.mubr.msk.f32.gmra.mxu1 %vm732_vm0, %v4086_v34 }
 0x7ed   : > { %8637 = vmatprep.mubr.msk.f32.mxu1 %vm732_vm0, %v4087_v37 }
 0x7f0   : > { %8638 = vmatmul.mubr.msk.f32.gmra.mxu1 %vm732_vm0, %v4088_v35 }
 0x7f1   : > { %8640 = vmatprep.mubr.msk.f32.mxu1 %vm732_vm0, %v4089_v28 }
 0x7f4   : > { %8641 = vmatmul.mubr.msk.f32.gmra.mxu1 %vm732_vm0, %v4090_v32 }
 0x874   : > { %v8557_v9 = vpop.f32.mrf.mxu1 }
 0x875   : > { %v3755_v37 = vmul.f32 %v8557_v9, %v13554_v10 }
 0x876   : > { %v3675_v46 = vpop.f32.mrf.mxu1 }
 0x877   : > { %v3754_v34 = vmul.f32 %v3675_v46, %v13553_v8 }
 0x879   : > { %8587 = vmatprep.mubr.msk.f32.mxu0 %vm732_vm0, %v3754_v34  ;;  %v13558_v34 = vld [vmem:[#allocation55_spill] sm:$0xff] }
 0x87a   : > { %8588 = vmatmul.mubr.msk.f32.vlgmr.msra.gmra.mxu0 %vm732_vm0, %v3755_v37 }
 0x87b   : > { %8644 = vmatpush3.msk.msra.mxu0 %vm2690_vm5, %v9319_v18  ;;  %v13557_v18 = vld [vmem:[#allocation53_spill] sm:$0xff] }
 0x87c   : > { %8701 = vmatprep.subr.mxu0 %v11615_v24  ;;  %v8560_v35 = vpop.f32.mrf.mxu1 }
 0x87d   : > { %v3757_v23 = vmul.f32 %v8560_v35, %v13556_v54 }
 0x87e   : > { %v3685_v28 = vpop.f32.mrf.mxu1 }
 0x87f   : > { %v3756_v59 = vmul.f32 %v3685_v28, %v13555_v20  ;;  %v13560_v20 = vld [vmem:[#allocation3_spill] sm:$0xff] }
 0x880   : > { %v8563_v32 = vpop.f32.mrf.mxu1 }
 0x881   : > { %8590 = vmatprep.mubr.msk.f32.mxu0 %vm732_vm0, %v3756_v59  ;;  %v3759_v37 = vmul.f32 %v8563_v32, %v13558_v34 }
 0x882   : > { %v3695_v9 = vpop.f32.mrf.mxu1  ;;  %8591 = vmatmul.mubr.msk.f32.gmra.mxu0 %vm732_vm0, %v3757_v23  ;;  %v13561_v23 = vld [vmem:[#allocation6_spill] sm:$0xff] }
 0x883   : > { %v3758_v46 = vmul.f32 %v3695_v9, %v13557_v18  ;;  %v13562_v18 = vld [vmem:[#allocation5_spill] sm:$0xff] }
 0x884   : > { %v8566_v10 = vpop.f32.mrf.mxu1 }
 0x885   : > { %8593 = vmatprep.mubr.msk.f32.mxu0 %vm732_vm0, %v3758_v46  ;;  %v3761_v35 = vmul.f32 %v8566_v10, %v13560_v20 }
 0x886   : > { %v3705_v8 = vpop.f32.mrf.mxu1  ;;  %8594 = vmatmul.mubr.msk.f32.gmra.mxu0 %vm732_vm0, %v3759_v37  ;;  %v13563_v37 = vld [vmem:[#allocation8_spill] sm:$0xff] }
 0x887   : > { %v3760_v28 = vmul.f32 %v3705_v8, %v13559_v40  ;;  %v13564_v40 = vld [vmem:[#allocation7_spill] sm:$0xff] }
 0x888   : > { %v8569_v54 = vpop.f32.mrf.mxu1 }
 0x889   : > { %8596 = vmatprep.mubr.msk.f32.mxu0 %vm732_vm0, %v3760_v28  ;;  %v3763_v32 = vmul.f32 %v8569_v54, %v13562_v18 }
 0x88a   : > { %v3715_v59 = vpop.f32.mrf.mxu1  ;;  %8597 = vmatmul.mubr.msk.f32.gmra.mxu0 %vm732_vm0, %v3761_v35  ;;  %v13565_v35 = vld [vmem:[#allocation10_spill] sm:$0xff] }
 0x88b   : > { %v3762_v9 = vmul.f32 %v3715_v59, %v13561_v23  ;;  %v13566_v23 = vld [vmem:[#allocation15_spill] sm:$0xff] }
 0x88c   : > { %v8572_v34 = vpop.f32.mrf.mxu1 }
 0x88d   : > { %8599 = vmatprep.mubr.msk.f32.mxu0 %vm732_vm0, %v3762_v9  ;;  %v3765_v10 = vmul.f32 %v8572_v34, %v13564_v40 }
 0x88e   : > { %v3725_v46 = vpop.f32.mrf.mxu1  ;;  %8600 = vmatmul.mubr.msk.f32.gmra.mxu0 %vm732_vm0, %v3763_v32  ;;  %v13567_v32 = vld [vmem:[#allocation9_spill] sm:$0xff] }
 0x88f   : > { %v3764_v8 = vmul.f32 %v3725_v46, %v13563_v37  ;;  %v13568_v37 = vld [vmem:[#allocation17_spill] sm:$0xff] }
 0x890   : > { %v8575_v20 = vpop.f32.mrf.mxu1 }
 0x891   : > { %8602 = vmatprep.mubr.msk.f32.mxu0 %vm732_vm0, %v3764_v8  ;;  %v3767_v54 = vmul.f32 %v8575_v20, %v13566_v23 }
 0x892   : > { %v3735_v28 = vpop.f32.mrf.mxu1  ;;  %8603 = vmatmul.mubr.msk.f32.gmra.mxu0 %vm732_vm0, %v3765_v10 }
 0x893   : > { %v3766_v59 = vmul.f32 %v3735_v28, %v13565_v35 }
 0x894   : > { %v8578_v18 = vpop.f32.mrf.mxu1 }
 0x895   : > { %8605 = vmatprep.mubr.msk.f32.mxu0 %vm732_vm0, %v3766_v59  ;;  %v3769_v34 = vmul.f32 %v8578_v18, %v13568_v37 }
 0x896   : > { %v3745_v9 = vpop.f32.mrf.mxu1  ;;  %8606 = vmatmul.mubr.msk.f32.gmra.mxu0 %vm732_vm0, %v3767_v54 }
 0x897   : > { %v3768_v46 = vmul.f32 %v3745_v9, %v13567_v32 }
 0x898   : > { %v8621_v40 = vpop.f32.mrf.mxu1 }
 0x899   : > { %v11644_v49 = vmul.f32 0.35355338, %v8621_v40  ;;  %8608 = vmatprep.mubr.msk.f32.mxu0 %vm732_vm0, %v3768_v46 }
 0x89a   : > { %8609 = vmatmul.mubr.msk.f32.gmra.mxu0 %vm732_vm0, %v3769_v34  ;;  %v4205_v8 = vpop.f32.mrf.mxu1 }
 0x89b   : > { %v11648_v10 = vmul.f32 0.35355338, %v4205_v8  ;;  %v4303_v20 = vsel %vm2465_vm4, %v11644_v49, -inf }
 0x89c   : > { %4304 = vmax.xlane.f32.xlu1 %v4303_v20  ;;  %v8624_v28 = vpop.f32.mrf.mxu1 }
 0x89d   : > { %v11652_v59 = vmul.f32 0.35355338, %v8624_v28  ;;  %v4300_v18 = vsel %vm2465_vm4, %v11648_v10, -inf }
 0x89e   : > { %4301 = vmax.xlane.f32.xlu0 %v4300_v18  ;;  %v4215_v40 = vpop.f32.mrf.mxu1 }
 0x89f   : > { %v11656_v9 = vmul.f32 0.35355338, %v4215_v40  ;;  %v4309_v34 = vsel %vm2465_vm4, %v11652_v59, -inf }
 0x8a0   : > { %v8627_v54 = vpop.f32.mrf.mxu1 }
 0x8a1   : > { %v11658_v46 = vmul.f32 0.35355338, %v8627_v54  ;;  %v4306_v18 = vsel %vm2465_vm4, %v11656_v9, -inf }
 0x8a2   : > { %4310 = vmax.xlane.f32.xlu0 %v4309_v34  ;;  %v4225_v8 = vpop.f32.mrf.mxu1 }
 0x8a3   : > { %v4315_v20 = vsel %vm2465_vm4, %v11658_v46, -inf  ;;  %v11664_v37 = vmul.f32 0.35355338, %v4225_v8 }
 0x8a4   : > { %4316 = vmax.xlane.f32.xlu1 %v4315_v20  ;;  %v8630_v28 = vpop.f32.mrf.mxu1 }
 0x8a5   : > { %v11666_v32 = vmul.f32 0.35355338, %v8630_v28  ;;  %v4312_v8 = vsel %vm2465_vm4, %v11664_v37, -inf }
 0x8a6   : > { %4307 = vmax.xlane.f32.xlu0 %v4306_v18  ;;  %v4235_v40 = vpop.f32.mrf.mxu1 }
 0x8a7   : > { %v4321_v54 = vsel %vm2465_vm4, %v11666_v32, -inf  ;;  %v11672_v23 = vmul.f32 0.35355338, %v4235_v40 }
 0x8a8   : > { %4322 = vmax.xlane.f32.xlu1 %v4321_v54  ;;  %v8633_v34 = vpop.f32.mrf.mxu1 }
 0x8a9   : > { %v11674_v35 = vmul.f32 0.35355338, %v8633_v34  ;;  %v4318_v40 = vsel %vm2465_vm4, %v11672_v23, -inf }
 0x8aa   : > { %4313 = vmax.xlane.f32.xlu0 %v4312_v8  ;;  %v4245_v20 = vpop.f32.mrf.mxu1 }
 0x8ab   : > { %v4327_v28 = vsel %vm2465_vm4, %v11674_v35, -inf  ;;  %v11680_v63 = vmul.f32 0.35355338, %v4245_v20 }
 0x8ac   : > { %4328 = vmax.xlane.f32.xlu1 %v4327_v28  ;;  %v8636_v18 = vpop.f32.mrf.mxu1 }
 0x8ad   : > { %v11682_v42 = vmul.f32 0.35355338, %v8636_v18  ;;  %v4324_v20 = vsel %vm2465_vm4, %v11680_v63, -inf }
 0x8ae   : > { %4319 = vmax.xlane.f32.xlu0 %v4318_v40  ;;  %v4255_v54 = vpop.f32.mrf.mxu1 }
 0x8af   : > { %v4333_v34 = vsel %vm2465_vm4, %v11682_v42, -inf  ;;  %v11688_v7 = vmul.f32 0.35355338, %v4255_v54 }
 0x8b0   : > { %4334 = vmax.xlane.f32.xlu1 %v4333_v34  ;;  %v8639_v8 = vpop.f32.mrf.mxu1 }
 0x8b1   : > { %v11690_v31 = vmul.f32 0.35355338, %v8639_v8  ;;  %v4330_v54 = vsel %vm2465_vm4, %v11688_v7, -inf }
 0x8b2   : > { %4325 = vmax.xlane.f32.xlu0 %v4324_v20  ;;  %v4265_v28 = vpop.f32.mrf.mxu1 }
 0x8b3   : > { %v4339_v18 = vsel %vm2465_vm4, %v11690_v31, -inf  ;;  %v11696_v60 = vmul.f32 0.35355338, %v4265_v28 }
 0x8b4   : > { %4340 = vmax.xlane.f32.xlu1 %v4339_v18  ;;  %v8642_v40 = vpop.f32.mrf.mxu1 }
 0x8b5   : > { %v11698_v15 = vmul.f32 0.35355338, %v8642_v40  ;;  %v4336_v0 = vsel %vm2465_vm4, %v11696_v60, -inf }
 0x8b6   : > { %4331 = vmax.xlane.f32.xlu0 %v4330_v54  ;;  %v4275_v34 = vpop.f32.mrf.mxu1 }
 0x8b7   : > { %v4345_v8 = vsel %vm2465_vm4, %v11698_v15, -inf  ;;  %v11704_v20 = vmul.f32 0.35355338, %v4275_v34 }
 0x8b8   : > { %4346 = vmax.xlane.f32.xlu1 %v4345_v8 }
 0x8b9   : > { %v4342_v28 = vsel %vm2465_vm4, %v11704_v20, -inf }
 0x8ba   : > { %4337 = vmax.xlane.f32.xlu0 %v4336_v0 }
 0x8be   : > { %4343 = vmax.xlane.f32.xlu0 %v4342_v28 }
 0x925   : > { %v4305_v18 = vpop.xlane.xlu1 %4304 }
 0x926   : > { %v4349_v40 = vsub.f32 %v11644_v49, %v4305_v18 }
 0x927   : > { %v4302_v6 = vpop.xlane.xlu0 %4301 }
 0x928   : > { %v4366_v54 = vmul.f32 1.442695, %v4349_v40  ;;  %v4348_v29 = vsub.f32 %v11648_v10, %v4302_v6 }
 0x92a   : > { %9086 = vpow2.f32 %v4366_v54  ;;  %v4364_v21 = vmul.f32 1.442695, %v4348_v29 }
 0x92b   : > { %v4311_v8 = vpop.xlane.xlu0 %4310 }
 0x92c   : > { %9088 = vpow2.f32 %v4364_v21  ;;  %v4351_v34 = vsub.f32 %v11652_v59, %v4311_v8 }
 0x92d   : > { %v4317_v13 = vpop.xlane.xlu1 %4316 }
 0x92e   : > { %v4370_v33 = vmul.f32 1.442695, %v4351_v34  ;;  %v4353_v0 = vsub.f32 %v11658_v46, %v4317_v13 }
 0x92f   : > { %v4308_v38 = vpop.xlane.xlu0 %4307 }
 0x930   : > { %9090 = vpow2.f32 %v4370_v33  ;;  %v4374_v28 = vmul.f32 1.442695, %v4353_v0  ;;  %v4350_v19 = vsub.f32 %v11656_v9, %v4308_v38 }
 0x931   : > { %v4323_v49 = vpop.xlane.xlu1 %4322 }
 0x932   : > { %9092 = vpow2.f32 %v4374_v28  ;;  %v4368_v18 = vmul.f32 1.442695, %v4350_v19  ;;  %v4355_v6 = vsub.f32 %v11666_v32, %v4323_v49 }
 0x933   : > { %v4314_v10 = vpop.xlane.xlu0 %4313 }
 0x934   : > { %9094 = vpow2.f32 %v4368_v18  ;;  %v4378_v29 = vmul.f32 1.442695, %v4355_v6  ;;  %v4352_v21 = vsub.f32 %v11664_v37, %v4314_v10 }
 0x935   : > { %v4329_v59 = vpop.xlane.xlu1 %4328 }
 0x936   : > { %9096 = vpow2.f32 %v4378_v29  ;;  %v4372_v40 = vmul.f32 1.442695, %v4352_v21  ;;  %v4357_v13 = vsub.f32 %v11674_v35, %v4329_v59 }
 0x937   : > { %v11718_v46 = vpop.eup %9086  ;;  %v4320_v33 = vpop.xlane.xlu0 %4319 }
 0x938   : > { %9098 = vpow2.f32 %v4372_v40  ;;  %v4382_v38 = vmul.f32 1.442695, %v4357_v13  ;;  %v4354_v9 = vsub.f32 %v11672_v23, %v4320_v33  ;;  %v4399_v19 = vsel %vm2465_vm4, %v11718_v46, 0.0 }
 0x939   : > { %v11723_v32 = vpop.eup %9088  ;;  %v4335_v54 = vpop.xlane.xlu1 %4334  ;;  %4400 = vadd.xlane.f32.xlu1 %v4399_v19 }
 0x93a   : > { %v8589_v37 = vpop.f32.mrf.mxu0  ;;  %9100 = vpow2.f32 %v4382_v38  ;;  %v4376_v8 = vmul.f32 1.442695, %v4354_v9  ;;  %v4359_v34 = vsub.f32 %v11682_v42, %v4335_v54  ;;  %v4396_v35 = vsel %vm2465_vm4, %v11723_v32, 0.0 }
 0x93b   : > { %3964 = vst.msk [vmem:[#allocation2 + $0x28] sm:$0xff] %vm2189_vm1, %v8589_v37  ;;  %4397 = vadd.xlane.f32.xlu0 %v4396_v35  ;;  %v4326_v0 = vpop.xlane.xlu0 %4325 }
 0x93c   : > { %v3884_v23 = vpop.f32.mrf.mxu0  ;;  %9102 = vpow2.f32 %v4376_v8  ;;  %v4386_v28 = vmul.f32 1.442695, %v4359_v34  ;;  %v4356_v49 = vsub.f32 %v11680_v63, %v4326_v0 }
 0x93d   : > { %3963 = vst.msk [vmem:[#allocation2 + $0x8] sm:$0xff] %vm2189_vm1, %v3884_v23  ;;  %v11731_v18 = vpop.eup %9090  ;;  %v4341_v6 = vpop.xlane.xlu1 %4340 }
 0x93e   : > { %9104 = vpow2.f32 %v4386_v28  ;;  %v4380_v10 = vmul.f32 1.442695, %v4356_v49  ;;  %v4361_v42 = vsub.f32 %v11690_v31, %v4341_v6  ;;  %v4405_v29 = vsel %vm2465_vm4, %v11731_v18, 0.0 }
 0x93f   : > { %v11736_v21 = vpop.eup %9092  ;;  %4406 = vadd.xlane.f32.xlu1 %v4405_v29  ;;  %v4332_v59 = vpop.xlane.xlu0 %4331 }
 0x940   : > { %9106 = vpow2.f32 %v4380_v10  ;;  %v4390_v40 = vmul.f32 1.442695, %v4361_v42  ;;  %v4358_v63 = vsub.f32 %v11688_v7, %v4332_v59  ;;  %v4411_v38 = vsel %vm2465_vm4, %v11736_v21, 0.0 }
 0x941   : > { %v11739_v13 = vpop.eup %9094  ;;  %v4347_v33 = vpop.xlane.xlu1 %4346 }
 0x942   : > { %9108 = vpow2.f32 %v4390_v40  ;;  %v4384_v9 = vmul.f32 1.442695, %v4358_v63  ;;  %v4363_v31 = vsub.f32 %v11698_v15, %v4347_v33  ;;  %v8592_v19 = vpop.f32.mrf.mxu0  ;;  %v4402_v54 = vsel %vm2465_vm4, %v11739_v13, 0.0 }
 0x943   : > { %v11746_v37 = vpop.eup %9096  ;;  %3966 = vst.msk [vmem:[#allocation2 + $0x68] sm:$0xff] %vm2189_vm1, %v8592_v19  ;;  %4412 = vadd.xlane.f32.xlu1 %v4411_v38  ;;  %4403 = vadd.xlane.f32.xlu0 %v4402_v54  ;;  %v4338_v7 = vpop.xlane.xlu0 %4337 }
 0x944   : > { %9110 = vpow2.f32 %v4384_v9  ;;  %v4394_v8 = vmul.f32 1.442695, %v4363_v31  ;;  %v4360_v34 = vsub.f32 %v11696_v60, %v4338_v7  ;;  %v3894_v35 = vpop.f32.mrf.mxu0  ;;  %v4417_v28 = vsel %vm2465_vm4, %v11746_v37, 0.0 }
 0x945   : > { %v11750_v0 = vpop.eup %9098  ;;  %3965 = vst.msk [vmem:[#allocation2 + $0x48] sm:$0xff] %vm2189_vm1, %v3894_v35 }
 0x946   : > { %9112 = vpow2.f32 %v4394_v8  ;;  %v4388_v15 = vmul.f32 1.442695, %v4360_v34  ;;  %v8595_v23 = vpop.f32.mrf.mxu0  ;;  %v4408_v49 = vsel %vm2465_vm4, %v11750_v0, 0.0 }
 0x947   : > { %v11757_v6 = vpop.eup %9100  ;;  %3968 = vst.msk [vmem:[#allocation2 + $0xa8] sm:$0xff] %vm2189_vm1, %v8595_v23  ;;  %4418 = vadd.xlane.f32.xlu1 %v4417_v28  ;;  %4409 = vadd.xlane.f32.xlu0 %v4408_v49  ;;  %v4344_v60 = vpop.xlane.xlu0 %4343 }
 0x948   : > { %9114 = vpow2.f32 %v4388_v15  ;;  %v4362_v10 = vsub.f32 %v11704_v20, %v4344_v60  ;;  %v3904_v42 = vpop.f32.mrf.mxu0  ;;  %v4423_v63 = vsel %vm2465_vm4, %v11757_v6, 0.0 }
 0x949   : > { %v11761_v29 = vpop.eup %9102  ;;  %3967 = vst.msk [vmem:[#allocation2 + $0x88] sm:$0xff] %vm2189_vm1, %v3904_v42 }
 0x94a   : > { %v4392_v59 = vmul.f32 1.442695, %v4362_v10  ;;  %v8598_v40 = vpop.f32.mrf.mxu0  ;;  %v4414_v33 = vsel %vm2465_vm4, %v11761_v29, 0.0 }
 0x94b   : > { %v11768_v38 = vpop.eup %9104  ;;  %3970 = vst.msk [vmem:[#allocation2 + $0xe8] sm:$0xff] %vm2189_vm1, %v8598_v40  ;;  %4424 = vadd.xlane.f32.xlu1 %v4423_v63  ;;  %4415 = vadd.xlane.f32.xlu0 %v4414_v33 }
 0x94c   : > { %9116 = vpow2.f32 %v4392_v59  ;;  %v3914_v20 = vpop.f32.mrf.mxu0  ;;  %v4429_v19 = vsel %vm2465_vm4, %v11768_v38, 0.0 }
 0x94d   : > { %v11771_v9 = vpop.eup %9106  ;;  %3969 = vst.msk [vmem:[#allocation2 + $0xc8] sm:$0xff] %vm2189_vm1, %v3914_v20 }
 0x94e   : > { %v8601_v31 = vpop.f32.mrf.mxu0  ;;  %v4420_v54 = vsel %vm2465_vm4, %v11771_v9, 0.0 }
 0x94f   : > { %v11778_v7 = vpop.eup %9108  ;;  %3972 = vst.msk [vmem:[#allocation2 + $0x128] sm:$0xff] %vm2189_vm1, %v8601_v31  ;;  %4430 = vadd.xlane.f32.xlu1 %v4429_v19  ;;  %4421 = vadd.xlane.f32.xlu0 %v4420_v54 }
 0x950   : > { %v3924_v8 = vpop.f32.mrf.mxu0  ;;  %v4435_v15 = vsel %vm2465_vm4, %v11778_v7, 0.0 }
 0x951   : > { %v11781_v34 = vpop.eup %9110  ;;  %3971 = vst.msk [vmem:[#allocation2 + $0x108] sm:$0xff] %vm2189_vm1, %v3924_v8 }
 0x952   : > { %v8604_v35 = vpop.f32.mrf.mxu0  ;;  %v4426_v23 = vsel %vm2465_vm4, %v11781_v34, 0.0 }
 0x953   : > { %v11788_v28 = vpop.eup %9112  ;;  %3974 = vst.msk [vmem:[#allocation2 + $0x168] sm:$0xff] %vm2189_vm1, %v8604_v35  ;;  %4436 = vadd.xlane.f32.xlu1 %v4435_v15  ;;  %4427 = vadd.xlane.f32.xlu0 %v4426_v23 }
 0x954   : > { %v3934_v49 = vpop.f32.mrf.mxu0  ;;  %v4441_v42 = vsel %vm2465_vm4, %v11788_v28, 0.0 }
 0x955   : > { %v11791_v60 = vpop.eup %9114  ;;  %3973 = vst.msk [vmem:[#allocation2 + $0x148] sm:$0xff] %vm2189_vm1, %v3934_v49 }
 0x956   : > { %v8607_v10 = vpop.f32.mrf.mxu0  ;;  %v4432_v59 = vsel %vm2465_vm4, %v11791_v60, 0.0 }
 0x957   : > { %3976 = vst.msk [vmem:[#allocation2 + $0x1a8] sm:$0xff] %vm2189_vm1, %v8607_v10  ;;  %4442 = vadd.xlane.f32.xlu1 %v4441_v42  ;;  %4433 = vadd.xlane.f32.xlu0 %v4432_v59 }
 0x958   : > { %v3944_v40 = vpop.f32.mrf.mxu0 }
 0x959   : > { %v11799_v63 = vpop.eup %9116  ;;  %3975 = vst.msk [vmem:[#allocation2 + $0x188] sm:$0xff] %vm2189_vm1, %v3944_v40 }
 0x95a   : > { %v8610_v33 = vpop.f32.mrf.mxu0  ;;  %v4438_v20 = vsel %vm2465_vm4, %v11799_v63, 0.0 }
 0x95b   : > { %3978 = vst.msk [vmem:[#allocation2 + $0x1e8] sm:$0xff] %vm2189_vm1, %v8610_v33  ;;  %4439 = vadd.xlane.f32.xlu0 %v4438_v20 }
 0x95c   : > { %v3954_v31 = vpop.f32.mrf.mxu0 }
 0x95d   : > { %3977 = vst.msk [vmem:[#allocation2 + $0x1c8] sm:$0xff] %vm2189_vm1, %v3954_v31 }
 0x968   : > { %4896 = vrot.lane.b32.xlu1 %v10178_v39, %s9355_s3 }
 0x96c   : > { %4898 = vrot.lane.b32.xlu1 %v10234_v57, %s9355_s3 }
 0x970   : > { %4900 = vrot.lane.b32.xlu1 %v10266_v61, %s9355_s3 }
 0x971   : > { %4894 = vrot.lane.b32.xlu0 %v10187_v56, %s9355_s3 }
 0x974   : > { %4904 = vrot.lane.b32.xlu1 %v10340_v26, %s9355_s3 }
 0x975   : > { %4902 = vrot.lane.b32.xlu0 %v10302_v3, %s9355_s3 }
 0x978   : > { %4908 = vrot.lane.b32.xlu1 %v10368_v2, %s9355_s3 }
 0x979   : > { %4906 = vrot.lane.b32.xlu0 %v10357_v22, %s9355_s3 }
 0x97c   : > { %4912 = vrot.lane.b32.xlu1 %v10389_v14, %s9355_s3 }
 0x97d   : > { %4910 = vrot.lane.b32.xlu0 %v10378_v36, %s9355_s3 }
 0x980   : > { %4916 = vrot.lane.b32.xlu1 %v10411_v30, %s9355_s3 }
 0x981   : > { %4914 = vrot.lane.b32.xlu0 %v10400_v17, %s9355_s3 }
 0x984   : > { %4920 = vrot.lane.b32.xlu1 %v10433_v53, %s9355_s3 }
 0x985   : > { %4918 = vrot.lane.b32.xlu0 %v10422_v47, %s9355_s3 }
 0x988   : > { %4924 = vrot.lane.b32.xlu1 %v13548_v45, %s9355_s3 }
 0x989   : > { %4922 = vrot.lane.b32.xlu0 %v10444_v62, %s9355_s3 }
 0x9c2   : > { %v4401_v19 = vpop.xlane.xlu1 %4400 }
 0x9c3   : > { %9118 = vrcp.f32 %v4401_v19 }
 0x9c4   : > { %v4398_v54 = vpop.xlane.xlu0 %4397 }
 0x9c5   : > { %9120 = vrcp.f32 %v4398_v54  ;;  %v9321_v54 = vld [vmem:[%s13397_s0 + $0x10] sm:$0xff] }
 0x9c8   : > { %v4407_v8 = vpop.xlane.xlu1 %4406 }
 0x9c9   : > { %9122 = vrcp.f32 %v4407_v8 }
 0x9cc   : > { %v4413_v35 = vpop.xlane.xlu1 %4412  ;;  %v4404_v15 = vpop.xlane.xlu0 %4403 }
 0x9cd   : > { %9124 = vrcp.f32 %v4404_v15 }
 0x9ce   : > { %9126 = vrcp.f32 %v4413_v35 }
 0x9d0   : > { %v4419_v23 = vpop.xlane.xlu1 %4418  ;;  %v4410_v49 = vpop.xlane.xlu0 %4409 }
 0x9d1   : > { %v9119_v10 = vpop.eup %9118  ;;  %9128 = vrcp.f32 %v4410_v49 }
 0x9d2   : > { %v9121_v42 = vpop.eup %9120  ;;  %v4461_v40 = vmul.f32 %v9119_v10, %v11718_v46  ;;  %9130 = vrcp.f32 %v4419_v23  ;;  %v9323_v23 = vld [vmem:[%s13397_s0] sm:$0xff] }
 0x9d3   : > { %v4460_v59 = vmul.f32 %v9121_v42, %v11723_v32  ;;  %v9322_v32 = vld [vmem:[%s13397_s0 + $0x8] sm:$0xff]  ;;  %s13622_s0 = smov 24  }
 0x9d4   : > { %v4425_v33 = vpop.xlane.xlu1 %4424  ;;  %v4416_v20 = vpop.xlane.xlu0 %4415 }
 0x9d5   : > { %8645 = vmatprep.mubr.msk.f32.mxu0 %vm2465_vm4, %v4460_v59  ;;  %9132 = vrcp.f32 %v4416_v20 }
 0x9d6   : > { %8646 = vmatmul.mubr.msk.f32.vlgmr.msra.gmra.mxu0 %vm2465_vm4, %v4461_v40  ;;  %9134 = vrcp.f32 %v4425_v33  ;;  %v9123_v46 = vpop.eup %9122 }
 0x9d7   : > { %8702 = vmatpush3.msra.mxu0 %v11615_v24  ;;  %v4463_v49 = vmul.f32 %v9123_v46, %v11731_v18 }
 0x9d8   : > { %v4431_v31 = vpop.xlane.xlu1 %4430  ;;  %v4422_v19 = vpop.xlane.xlu0 %4421  ;;  %8703 = vmatprep.subr.mxu0 %v9321_v54 }
 0x9d9   : > { %8704 = vmatpush3.msra.mxu0 %v9321_v54  ;;  %9136 = vrcp.f32 %v4422_v19 }
 0x9da   : > { %8705 = vmatprep.subr.mxu0 %v9322_v32  ;;  %v9125_v8 = vpop.eup %9124  ;;  %9138 = vrcp.f32 %v4431_v31 }
 0x9db   : > { %8706 = vmatpush3.msra.mxu0 %v9322_v32  ;;  %v4462_v15 = vmul.f32 %v9125_v8, %v11739_v13  ;;  %v9127_v10 = vpop.eup %9126 }
 0x9dc   : > { %v4437_v35 = vpop.xlane.xlu1 %4436  ;;  %v4428_v24 = vpop.xlane.xlu0 %4427  ;;  %8707 = vmatprep.subr.mxu0 %v9323_v23  ;;  %v4465_v33 = vmul.f32 %v9127_v10, %v11736_v21 }
 0x9dd   : > { %8708 = vmatpush3.msra.mxu0 %v9323_v23  ;;  %9140 = vrcp.f32 %v4428_v24  ;;  %8648 = vmatprep.mubr.msk.f32.mxu0 %vm2465_vm4, %v4462_v15 }
 0x9de   : > { %8759 = vmatprep.subr.mxu0 %v11377_v50  ;;  %v9129_v42 = vpop.eup %9128  ;;  %8649 = vmatmul.mubr.msk.f32.gmra.mxu0 %vm2465_vm4, %v4463_v49  ;;  %9142 = vrcp.f32 %v4437_v35 }
 0x9df   : > { %v4464_v40 = vmul.f32 %v9129_v42, %v11750_v0  ;;  %v9131_v20 = vpop.eup %9130 }
 0x9e0   : > { %v4443_v59 = vpop.xlane.xlu1 %4442  ;;  %v4434_v13 = vpop.xlane.xlu0 %4433  ;;  %v4467_v54 = vmul.f32 %v9131_v20, %v11746_v37 }
 0x9e1   : > { %9144 = vrcp.f32 %v4434_v13  ;;  %8651 = vmatprep.mubr.msk.f32.mxu0 %vm2465_vm4, %v4464_v40 }
 0x9e2   : > { %v9133_v18 = vpop.eup %9132  ;;  %8652 = vmatmul.mubr.msk.f32.gmra.mxu0 %vm2465_vm4, %v4465_v33  ;;  %9146 = vrcp.f32 %v4443_v59 }
 0x9e3   : > { %v4466_v19 = vmul.f32 %v9133_v18, %v11761_v29  ;;  %v9135_v46 = vpop.eup %9134 }
 0x9e4   : > { %v4897_v31 = vpop.permute.xlu1 %4896  ;;  %v4440_v50 = vpop.xlane.xlu0 %4439  ;;  %v4469_v35 = vmul.f32 %v9135_v46, %v11757_v6  ;;  %v13569_v46 = vld [vmem:[#allocation56_spill] sm:$0xff] }
 0x9e5   : > { %9148 = vrcp.f32 %v4440_v50  ;;  %8654 = vmatprep.mubr.msk.f32.mxu0 %vm2465_vm4, %v4466_v19  ;;  %v4943_v6 = vsel %vm2189_vm1, %v4897_v31, %v11385_v44 }
 0x9e6   : > { %v9137_v0 = vpop.eup %9136  ;;  %8655 = vmatmul.mubr.msk.f32.gmra.mxu0 %vm2465_vm4, %v4467_v54  ;;  %v4959_v18 = vsel %vm2206_vm2, %v4943_v6, %v10894_v4 }
 0x9e7   : > { %v4468_v8 = vmul.f32 %v9137_v0, %v11771_v9  ;;  %v9139_v24 = vpop.eup %9138  ;;  %v13570_v0 = vld [vmem:[#allocation12_spill] sm:$0xff] }
 0x9e8   : > { %v4899_v21 = vpop.permute.xlu1 %4898  ;;  %v4895_v32 = vpop.permute.xlu0 %4894  ;;  %v4471_v10 = vmul.f32 %v9139_v24, %v11768_v38 }
 0x9e9   : > { %8657 = vmatprep.mubr.msk.f32.mxu0 %vm2465_vm4, %v4468_v8  ;;  %v4942_v49 = vsel %vm2189_vm1, %v4895_v32, %v11393_v11  ;;  %v4944_v11 = vsel %vm2189_vm1, %v4899_v21, %v11391_v48  ;;  %v13572_v21 = vld [vmem:[#allocation11_spill] sm:$0xff]  ;;  %v13573_v8 = vld [vmem:[#allocation18_spill] sm:$0xff] }
 0x9ea   : > { %v9141_v15 = vpop.eup %9140  ;;  %8658 = vmatmul.mubr.msk.f32.gmra.mxu0 %vm2465_vm4, %v4469_v35  ;;  %v4958_v59 = vsel %vm2206_vm2, %v4942_v49, %v10909_v1  ;;  %v13574_v35 = vld [vmem:[#allocation22_spill] sm:$0xff]  ;;  %v13576_v49 = vld [vmem:[#allocation19_spill] sm:$0xff] }
 0x9eb   : > { %v4470_v23 = vmul.f32 %v9141_v15, %v11781_v34  ;;  %v9143_v42 = vpop.eup %9142  ;;  %v4974_v44 = vsel %vm2223_vm3, %v4958_v59, %v10187_v56  ;;  %v4975_v56 = vsel %vm2223_vm3, %v4959_v18, %v10178_v39  ;;  %v13583_v18 = vld [vmem:[#allocation60_spill] sm:$0xff] }
 0x9ec   : > { %v4901_v29 = vpop.permute.xlu1 %4900  ;;  %v4903_v37 = vpop.permute.xlu0 %4902  ;;  %v4473_v38 = vmul.f32 %v9143_v42, %v11778_v7  ;;  %v4991_v39 = vmul.f32 %v4975_v56, %v10185_v25 }
 0x9ed   : > { %8660 = vmatprep.mubr.msk.f32.mxu0 %vm2465_vm4, %v4470_v23  ;;  %v4945_v48 = vsel %vm2189_vm1, %v4901_v29, %v11399_v52  ;;  %v4946_v50 = vsel %vm2189_vm1, %v4903_v37, %v11401_v58  ;;  %v13575_v37 = vld [vmem:[#allocation58_spill] sm:$0xff] }
 0x9ee   : > { %v9145_v9 = vpop.eup %9144  ;;  %8661 = vmatmul.mubr.msk.f32.gmra.mxu0 %vm2465_vm4, %v4471_v10  ;;  %v4961_v52 = vsel %vm2206_vm2, %v4945_v48, %v10926_v41  ;;  %v4962_v58 = vsel %vm2206_vm2, %v4946_v50, %v10924_v43  ;;  %v13577_v10 = vld [vmem:[#allocation57_spill] sm:$0xff] }
 0x9ef   : > { %v4472_v34 = vmul.f32 %v9145_v9, %v11791_v60  ;;  %v9147_v33 = vpop.eup %9146  ;;  %v4960_v60 = vsel %vm2206_vm2, %v4944_v11, %v10915_v5  ;;  %v4977_v41 = vsel %vm2223_vm3, %v4961_v52, %v10266_v61  ;;  %v4978_v43 = vsel %vm2223_vm3, %v4962_v58, %v10302_v3  ;;  %v13571_v61 = vld [vmem:[#allocation20_spill] sm:$0xff]  ;;  %v13578_v9 = vld [vmem:[#allocation14_spill] sm:$0xff] }
 0x9f0   : > { %v4905_v13 = vpop.permute.xlu1 %4904  ;;  %v4907_v40 = vpop.permute.xlu0 %4906  ;;  %v4475_v4 = vmul.f32 %v9147_v33, %v11788_v28  ;;  %v4976_v5 = vsel %vm2223_vm3, %v4960_v60, %v10234_v57  ;;  %v4993_v3 = vmul.f32 %v4977_v41, %v13571_v61  ;;  %v4994_v24 = vmul.f32 %v4978_v43, %v13574_v35  ;;  %v13582_v33 = vld [vmem:[#allocation24_spill] sm:$0xff]  ;;  %v13584_v60 = vld [vmem:[#allocation59_spill] sm:$0xff] }
 0x9f1   : > { %8663 = vmatprep.mubr.msk.f32.mxu0 %vm2465_vm4, %v4472_v34  ;;  %v4947_v19 = vsel %vm2189_vm1, %v4905_v13, %v11415_v55  ;;  %v4992_v57 = vmul.f32 %v4976_v5, %v10219_v27  ;;  %v9324_v27 = vld [vmem:[%s13437_s25 + $0x18] sm:$0xff]  ;;  %v13580_v13 = vld [vmem:[#allocation13_spill] sm:$0xff]  ;;  %v13581_v34 = vld [vmem:[#allocation35_spill] sm:$0xff] }
 0x9f2   : > { %v9149_v20 = vpop.eup %9148  ;;  %8664 = vmatmul.mubr.msk.f32.gmra.mxu0 %vm2465_vm4, %v4473_v38  ;;  %v4963_v55 = vsel %vm2206_vm2, %v4947_v19, %v10940_v51  ;;  %v13589_v19 = vld [vmem:[#allocation61_spill] sm:$0xff] }
 0x9f3   : > { %v4474_v1 = vmul.f32 %v9149_v20, %v11799_v63  ;;  %v4990_v63 = vmul.f32 %v4974_v44, %v10198_v16  ;;  %v4948_v16 = vsel %vm2189_vm1, %v4907_v40, %v11417_v12  ;;  %v4979_v15 = vsel %vm2223_vm3, %v4963_v55, %v10340_v26  ;;  %v13579_v26 = vld [vmem:[#allocation21_spill] sm:$0xff] }
 0x9f4   : > { %v4909_v7 = vpop.permute.xlu1 %4908  ;;  %v4911_v31 = vpop.permute.xlu0 %4910  ;;  %v4964_v25 = vsel %vm2206_vm2, %v4948_v16, %v13569_v46 }
 0x9f5   : > { %8666 = vmatprep.mubr.msk.f32.mxu0 %vm2465_vm4, %v4474_v1  ;;  %v4949_v12 = vsel %vm2189_vm1, %v4909_v7, %v13570_v0  ;;  %v4950_v51 = vsel %vm2189_vm1, %v4911_v31, %v13572_v21  ;;  %v4980_v29 = vsel %vm2223_vm3, %v4964_v25, %v10357_v22  ;;  %v4995_v22 = vmul.f32 %v4979_v15, %v13579_v26  ;;  %v13585_v7 = vld [vmem:[#allocation16_spill] sm:$0xff]  ;;  %v13604_v26 = vld [vmem:[#allocation45_spill] sm:$0xff] }
 0x9f6   : > { %8667 = vmatmul.mubr.msk.f32.gmra.mxu0 %vm2465_vm4, %v4475_v4  ;;  %v4965_v23 = vsel %vm2206_vm2, %v4949_v12, %v13575_v37  ;;  %v4966_v42 = vsel %vm2206_vm2, %v4950_v51, %v13577_v10  ;;  %v4996_v11 = vmul.f32 %v4980_v29, %v13582_v33  ;;  %v13587_v4 = vld [vmem:[#allocation34_spill] sm:$0xff]  ;;  %v13597_v51 = vld [vmem:[#allocation40_spill] sm:$0xff]  ;;  %v13600_v29 = vld [vmem:[#allocation43_spill] sm:$0xff] }
 0x9f7   : > { %8709 = vmatprep.mubr.msk.f32.mxu0 %vm732_vm0, %v4990_v63  ;;  %v4981_v38 = vsel %vm2223_vm3, %v4965_v23, %v10368_v2  ;;  %v4982_v20 = vsel %vm2223_vm3, %v4966_v42, %v10378_v36  ;;  %v13586_v2 = vld [vmem:[#allocation23_spill] sm:$0xff]  ;;  %v13588_v36 = vld [vmem:[#allocation26_spill] sm:$0xff]  ;;  %v13601_v23 = vld [vmem:[#allocation29_spill] sm:$0xff] }
 0x9f8   : > { %v4913_v28 = vpop.permute.xlu1 %4912  ;;  %v4915_v54 = vpop.permute.xlu0 %4914  ;;  %v4997_v50 = vmul.f32 %v4981_v38, %v13586_v2  ;;  %v4998_v63 = vmul.f32 %v4982_v20, %v13588_v36  ;;  %v13602_v10 = vld [vmem:[#allocation32_spill] sm:$0xff]  ;;  %v13607_v20 = vld [vmem:[#allocation51_spill] sm:$0xff] }
 0x9f9   : > { %v4951_v6 = vsel %vm2189_vm1, %v4913_v28, %v13578_v9  ;;  %v4952_v40 = vsel %vm2189_vm1, %v4915_v54, %v13580_v13  ;;  %v13592_v54 = vld [vmem:[#allocation25_spill] sm:$0xff]  ;;  %v13605_v13 = vld [vmem:[#allocation47_spill] sm:$0xff] }
 0x9fa   : > { %8710 = vmatmul.mubr.msk.f32.vlgmr.msra.gmra.mxu0 %vm732_vm0, %v4991_v39  ;;  %v4967_v44 = vsel %vm2206_vm2, %v4951_v6, %v13583_v18  ;;  %v4968_v48 = vsel %vm2206_vm2, %v4952_v40, %v13584_v60  ;;  %v13590_v39 = vld [vmem:[#allocation37_spill] sm:$0xff]  ;;  %v13611_v36 = vld [vmem:[#allocation3_spill] sm:$0xff] }
 0x9fb   : > { %8712 = vmatprep.mubr.msk.f32.mxu0 %vm732_vm0, %v4992_v57  ;;  %8760 = vmatpush3.msra.mxu0 %v9324_v27  ;;  %v4983_v5 = vsel %vm2223_vm3, %v4967_v44, %v10389_v14  ;;  %v4984_v58 = vsel %vm2223_vm3, %v4968_v48, %v10400_v17  ;;  %v13591_v57 = vld [vmem:[#allocation36_spill] sm:$0xff]  ;;  %v13593_v14 = vld [vmem:[#allocation38_spill] sm:$0xff]  ;;  %v13595_v27 = vld [vmem:[#allocation39_spill] sm:$0xff] }
 0x9fc   : > { %v4917_v32 = vpop.permute.xlu1 %4916  ;;  %8761 = vmatprep.subr.mxu0 %v13573_v8  ;;  %v4919_v59 = vpop.permute.xlu0 %4918  ;;  %v4999_v43 = vmul.f32 %v4983_v5, %v13592_v54  ;;  %v13594_v17 = vld [vmem:[#allocation28_spill] sm:$0xff]  ;;  %v13608_v60 = vld [vmem:[#allocation53_spill] sm:$0xff] }
 0x9fd   : > { %8762 = vmatpush3.msra.mxu0 %v13573_v8  ;;  %v4953_v31 = vsel %vm2189_vm1, %v4917_v32, %v13585_v7  ;;  %v4954_v56 = vsel %vm2189_vm1, %v4919_v59, %v13587_v4  ;;  %v5000_v25 = vmul.f32 %v4984_v58, %v13594_v17  ;;  %v13598_v8 = vld [vmem:[#allocation27_spill] sm:$0xff]  ;;  %v13610_v4 = vld [vmem:[#allocation4_spill] sm:$0xff]  ;;  %v13612_v58 = vld [vmem:[#allocation6_spill] sm:$0xff] }
 0x9fe   : > { %8713 = vmatmul.mubr.msk.f32.gmra.mxu0 %vm732_vm0, %v4993_v3  ;;  %8763 = vmatprep.subr.mxu0 %v13576_v49  ;;  %v4969_v28 = vsel %vm2206_vm2, %v4953_v31, %v13589_v19  ;;  %v4970_v16 = vsel %vm2206_vm2, %v4954_v56, %v13590_v39  ;;  %v13596_v3 = vld [vmem:[#allocation41_spill] sm:$0xff]  ;;  %v13609_v7 = vld [vmem:[#allocation55_spill] sm:$0xff]  ;;  %v13616_v17 = vld [vmem:[#allocation10_spill] sm:$0xff] }
 0x9ff   : > { %8715 = vmatprep.mubr.msk.f32.mxu0 %vm732_vm0, %v4994_v24  ;;  %8764 = vmatpush3.msra.mxu0 %v13576_v49  ;;  %v4985_v0 = vsel %vm2223_vm3, %v4969_v28, %v10411_v30  ;;  %v4986_v12 = vsel %vm2223_vm3, %v4970_v16, %v10422_v47  ;;  %v13599_v24 = vld [vmem:[#allocation30_spill] sm:$0xff]  ;;  %v13613_v28 = vld [vmem:[#allocation5_spill] sm:$0xff] }
 0xa00   : > { %8765 = vmatprep.subr.mxu0 %v13581_v34  ;;  %v4921_v1 = vpop.permute.xlu1 %4920  ;;  %v4923_v52 = vpop.permute.xlu0 %4922  ;;  %v5001_v35 = vmul.f32 %v4985_v0, %v13598_v8  ;;  %v5002_v30 = vmul.f32 %v4986_v12, %v13599_v24  ;;  %v13617_v0 = vld [vmem:[#allocation15_spill] sm:$0xff] }
 0xa01   : > { %8766 = vmatpush3.msra.mxu0 %v13581_v34  ;;  %v4955_v41 = vsel %vm2189_vm1, %v4921_v1, %v13591_v57  ;;  %v4956_v55 = vsel %vm2189_vm1, %v4923_v52, %v13593_v14 }
 0xa02   : > { %8716 = vmatmul.mubr.msk.f32.gmra.mxu0 %vm732_vm0, %v4995_v22  ;;  %v4971_v61 = vsel %vm2206_vm2, %v4955_v41, %v13595_v27  ;;  %v4972_v21 = vsel %vm2206_vm2, %v4956_v55, %v13596_v3  ;;  %v13614_v41 = vld [vmem:[#allocation8_spill] sm:$0xff]  ;;  %v13618_v3 = vld [vmem:[#allocation9_spill] sm:$0xff] }
 0xa03   : > { %8718 = vmatprep.mubr.msk.f32.mxu0 %vm732_vm0, %v4996_v11  ;;  %v4987_v47 = vsel %vm2223_vm3, %v4971_v61, %v10433_v53  ;;  %v4988_v15 = vsel %vm2223_vm3, %v4972_v21, %v10444_v62  ;;  %v13603_v53 = vld [vmem:[#allocation31_spill] sm:$0xff]  ;;  %v13606_v11 = vld [vmem:[#allocation49_spill] sm:$0xff] }
 0xa04   : > { %v4925_v46 = vpop.permute.xlu1 %4924  ;;  %v5003_v49 = vmul.f32 %v4987_v47, %v13601_v23  ;;  %v5004_v42 = vmul.f32 %v4988_v15, %v13602_v10 }
 0xa05   : > { %v4957_v32 = vsel %vm2189_vm1, %v4925_v46, %v13597_v51  ;;  %v13619_v51 = vld [vmem:[#allocation17_spill] sm:$0xff] }
 0xa06   : > { %8719 = vmatmul.mubr.msk.f32.gmra.mxu0 %vm732_vm0, %v4997_v50  ;;  %v4973_v37 = vsel %vm2206_vm2, %v4957_v32, %v13600_v29 }
 0xa07   : > { %8721 = vmatprep.mubr.msk.f32.mxu0 %vm732_vm0, %v4998_v63  ;;  %v4989_v9 = vsel %vm2223_vm3, %v4973_v37, %v13548_v45  ;;  %v9325_v45 = vld [vmem:[%s13435_s5] sm:$0xf] }
 0xa08   : > { %v5005_v62 = vmul.f32 %v4989_v9, %v13603_v53 }
 0xa0a   : > { %8722 = vmatmul.mubr.msk.f32.gmra.mxu0 %vm732_vm0, %v4999_v43  ;;  %v13615_v43 = vld [vmem:[#allocation7_spill] sm:$0xff] }
 0xa0b   : > { %8724 = vmatprep.mubr.msk.f32.mxu0 %vm732_vm0, %v5000_v25 }
 0xa0e   : > { %8725 = vmatmul.mubr.msk.f32.gmra.mxu0 %vm732_vm0, %v5001_v35 }
 0xa0f   : > { %8727 = vmatprep.mubr.msk.f32.mxu0 %vm732_vm0, %v5002_v30 }
 0xa12   : > { %8728 = vmatmul.mubr.msk.f32.gmra.mxu0 %vm732_vm0, %v5003_v49 }
 0xa13   : > { %8730 = vmatprep.mubr.msk.f32.mxu0 %vm732_vm0, %v5004_v42 }
 0xa16   : > { %8731 = vmatmul.mubr.msk.f32.gmra.mxu0 %vm732_vm0, %v5005_v62 }
 0xa96   : > { %v8647_v6 = vpop.f32.mrf.mxu0 }
 0xa97   : > { %v4670_v40 = vmul.f32 %v8647_v6, %v13605_v13 }
 0xa98   : > { %v4590_v59 = vpop.f32.mrf.mxu0 }
 0xa99   : > { %v4669_v22 = vmul.f32 %v4590_v59, %v13604_v26 }
 0xa9b   : > { %8677 = vmatprep.mubr.msk.f32.mxu1 %vm732_vm0, %v4669_v22 }
 0xa9c   : > { %8678 = vmatmul.mubr.msk.f32.vlgmr.msra.gmra.mxu1 %vm732_vm0, %v4670_v40 }
 0xa9d   : > { %8734 = vmatpush3.msk.msra.mxu1 %vm2690_vm5, %v9325_v45 }
 0xa9e   : > { %v8650_v34 = vpop.f32.mrf.mxu0 }
 0xa9f   : > { %v4672_v18 = vmul.f32 %v8650_v34, %v13607_v20 }
 0xaa0   : > { %v4600_v33 = vpop.f32.mrf.mxu0 }
 0xaa1   : > { %v4671_v38 = vmul.f32 %v4600_v33, %v13606_v11 }
 0xaa2   : > { %v8653_v44 = vpop.f32.mrf.mxu0 }
 0xaa3   : > { %8680 = vmatprep.mubr.msk.f32.mxu1 %vm732_vm0, %v4671_v38  ;;  %v4674_v31 = vmul.f32 %v8653_v44, %v13609_v7 }
 0xaa4   : > { %v4610_v1 = vpop.f32.mrf.mxu0  ;;  %8681 = vmatmul.mubr.msk.f32.gmra.mxu1 %vm732_vm0, %v4672_v18 }
 0xaa5   : > { %v4673_v48 = vmul.f32 %v4610_v1, %v13608_v60 }
 0xaa6   : > { %v8656_v2 = vpop.f32.mrf.mxu0 }
 0xaa7   : > { %8683 = vmatprep.mubr.msk.f32.mxu1 %vm732_vm0, %v4673_v48  ;;  %v4676_v63 = vmul.f32 %v8656_v2, %v13611_v36 }
 0xaa8   : > { %v4620_v50 = vpop.f32.mrf.mxu0  ;;  %8684 = vmatmul.mubr.msk.f32.gmra.mxu1 %vm732_vm0, %v4674_v31 }
 0xaa9   : > { %v4675_v56 = vmul.f32 %v4620_v50, %v13610_v4 }
 0xaaa   : > { %v8659_v5 = vpop.f32.mrf.mxu0 }
 0xaab   : > { %8686 = vmatprep.mubr.msk.f32.mxu1 %vm732_vm0, %v4675_v56  ;;  %v4678_v39 = vmul.f32 %v8659_v5, %v13613_v28 }
 0xaac   : > { %v4630_v52 = vpop.f32.mrf.mxu0  ;;  %8687 = vmatmul.mubr.msk.f32.gmra.mxu1 %vm732_vm0, %v4676_v63 }
 0xaad   : > { %v4677_v19 = vmul.f32 %v4630_v52, %v13612_v58 }
 0xaae   : > { %v8662_v16 = vpop.f32.mrf.mxu0 }
 0xaaf   : > { %8689 = vmatprep.mubr.msk.f32.mxu1 %vm732_vm0, %v4677_v19  ;;  %v4680_v14 = vmul.f32 %v8662_v16, %v13615_v43 }
 0xab0   : > { %v4640_v57 = vpop.f32.mrf.mxu0  ;;  %8690 = vmatmul.mubr.msk.f32.gmra.mxu1 %vm732_vm0, %v4678_v39 }
 0xab1   : > { %v4679_v54 = vmul.f32 %v4640_v57, %v13614_v41 }
 0xab2   : > { %v8665_v55 = vpop.f32.mrf.mxu0 }
 0xab3   : > { %8692 = vmatprep.mubr.msk.f32.mxu1 %vm732_vm0, %v4679_v54  ;;  %v4682_v12 = vmul.f32 %v8665_v55, %v13617_v0 }
 0xab4   : > { %v4650_v46 = vpop.f32.mrf.mxu0  ;;  %8693 = vmatmul.mubr.msk.f32.gmra.mxu1 %vm732_vm0, %v4680_v14 }
 0xab5   : > { %v4681_v25 = vmul.f32 %v4650_v46, %v13616_v17 }
 0xab6   : > { %v8668_v27 = vpop.f32.mrf.mxu0 }
 0xab7   : > { %8695 = vmatprep.mubr.msk.f32.mxu1 %vm732_vm0, %v4681_v25  ;;  %v4684_v32 = vmul.f32 %v8668_v27, %v13619_v51 }
 0xab8   : > { %v4660_v61 = vpop.f32.mrf.mxu0  ;;  %8696 = vmatmul.mubr.msk.f32.gmra.mxu1 %vm732_vm0, %v4682_v12 }
 0xab9   : > { %v4683_v21 = vmul.f32 %v4660_v61, %v13618_v3 }
 0xaba   : > { %v8711_v8 = vpop.f32.mrf.mxu0 }
 0xabb   : > { %v12036_v35 = vmul.f32 0.35355338, %v8711_v8  ;;  %8698 = vmatprep.mubr.msk.f32.mxu1 %vm732_vm0, %v4683_v21 }
 0xabc   : > { %8699 = vmatmul.mubr.msk.f32.gmra.mxu1 %vm732_vm0, %v4684_v32  ;;  %v5120_v24 = vpop.f32.mrf.mxu0 }
 0xabd   : > { %v12040_v30 = vmul.f32 0.35355338, %v5120_v24  ;;  %v5218_v47 = vsel %vm2465_vm4, %v12036_v35, -inf }
 0xabe   : > { %5219 = vmax.xlane.f32.xlu1 %v5218_v47  ;;  %v8714_v15 = vpop.f32.mrf.mxu0 }
 0xabf   : > { %v12044_v29 = vmul.f32 0.35355338, %v8714_v15  ;;  %v5215_v37 = vsel %vm2465_vm4, %v12040_v30, -inf }
 0xac0   : > { %5216 = vmax.xlane.f32.xlu0 %v5215_v37  ;;  %v5130_v23 = vpop.f32.mrf.mxu0 }
 0xac1   : > { %v12048_v10 = vmul.f32 0.35355338, %v5130_v23  ;;  %v5224_v9 = vsel %vm2465_vm4, %v12044_v29, -inf }
 0xac2   : > { %v8717_v49 = vpop.f32.mrf.mxu0 }
 0xac3   : > { %v12050_v42 = vmul.f32 0.35355338, %v8717_v49  ;;  %v5221_v40 = vsel %vm2465_vm4, %v12048_v10, -inf }
 0xac4   : > { %5225 = vmax.xlane.f32.xlu0 %v5224_v9  ;;  %v5140_v53 = vpop.f32.mrf.mxu0 }
 0xac5   : > { %v5230_v62 = vsel %vm2465_vm4, %v12050_v42, -inf  ;;  %v12056_v59 = vmul.f32 0.35355338, %v5140_v53 }
 0xac6   : > { %5231 = vmax.xlane.f32.xlu1 %v5230_v62  ;;  %v8720_v6 = vpop.f32.mrf.mxu0 }
 0xac7   : > { %v12058_v22 = vmul.f32 0.35355338, %v8720_v6  ;;  %v5227_v44 = vsel %vm2465_vm4, %v12056_v59, -inf }
 0xac8   : > { %5222 = vmax.xlane.f32.xlu0 %v5221_v40  ;;  %v5150_v45 = vpop.f32.mrf.mxu0 }
 0xac9   : > { %v5236_v34 = vsel %vm2465_vm4, %v12058_v22, -inf  ;;  %v12064_v38 = vmul.f32 0.35355338, %v5150_v45 }
 0xaca   : > { %5237 = vmax.xlane.f32.xlu1 %v5236_v34  ;;  %v8723_v33 = vpop.f32.mrf.mxu0 }
 0xacb   : > { %v12066_v18 = vmul.f32 0.35355338, %v8723_v33  ;;  %v5233_v56 = vsel %vm2465_vm4, %v12064_v38, -inf }
 0xacc   : > { %5228 = vmax.xlane.f32.xlu0 %v5227_v44  ;;  %v5160_v1 = vpop.f32.mrf.mxu0 }
 0xacd   : > { %v5242_v48 = vsel %vm2465_vm4, %v12066_v18, -inf  ;;  %v12072_v2 = vmul.f32 0.35355338, %v5160_v1 }
 0xace   : > { %5243 = vmax.xlane.f32.xlu1 %v5242_v48  ;;  %v8726_v31 = vpop.f32.mrf.mxu0 }
 0xacf   : > { %v12074_v50 = vmul.f32 0.35355338, %v8726_v31  ;;  %v5239_v16 = vsel %vm2465_vm4, %v12072_v2, -inf }
 0xad0   : > { %5234 = vmax.xlane.f32.xlu0 %v5233_v56  ;;  %v5170_v63 = vpop.f32.mrf.mxu0 }
 0xad1   : > { %v5248_v5 = vsel %vm2465_vm4, %v12074_v50, -inf  ;;  %v12080_v19 = vmul.f32 0.35355338, %v5170_v63 }
 0xad2   : > { %5249 = vmax.xlane.f32.xlu1 %v5248_v5  ;;  %v8729_v52 = vpop.f32.mrf.mxu0 }
 0xad3   : > { %v12082_v39 = vmul.f32 0.35355338, %v8729_v52  ;;  %v5245_v25 = vsel %vm2465_vm4, %v12080_v19, -inf }
 0xad4   : > { %5240 = vmax.xlane.f32.xlu0 %v5239_v16  ;;  %v5180_v57 = vpop.f32.mrf.mxu0 }
 0xad5   : > { %v5254_v54 = vsel %vm2465_vm4, %v12082_v39, -inf  ;;  %v12088_v55 = vmul.f32 0.35355338, %v5180_v57 }
 0xad6   : > { %5255 = vmax.xlane.f32.xlu1 %v5254_v54  ;;  %v8732_v14 = vpop.f32.mrf.mxu0 }
 0xad7   : > { %v12090_v46 = vmul.f32 0.35355338, %v8732_v14  ;;  %v5251_v21 = vsel %vm2465_vm4, %v12088_v55, -inf }
 0xad8   : > { %5246 = vmax.xlane.f32.xlu0 %v5245_v25  ;;  %v5190_v12 = vpop.f32.mrf.mxu0 }
 0xad9   : > { %v5260_v27 = vsel %vm2465_vm4, %v12090_v46, -inf  ;;  %v12096_v61 = vmul.f32 0.35355338, %v5190_v12 }
 0xada   : > { %5261 = vmax.xlane.f32.xlu1 %v5260_v27 }
 0xadb   : > { %v5257_v32 = vsel %vm2465_vm4, %v12096_v61, -inf }
 0xadc   : > { %5252 = vmax.xlane.f32.xlu0 %v5251_v21 }
 0xae0   : > { %5258 = vmax.xlane.f32.xlu0 %v5257_v32 }
 0xb47   : > { %v5220_v8 = vpop.xlane.xlu1 %5219 }
 0xb48   : > { %v5264_v24 = vsub.f32 %v12036_v35, %v5220_v8 }
 0xb49   : > { %v5217_v47 = vpop.xlane.xlu0 %5216 }
 0xb4a   : > { %v5281_v15 = vmul.f32 1.442695, %v5264_v24  ;;  %v5263_v37 = vsub.f32 %v12040_v30, %v5217_v47 }
 0xb4c   : > { %9150 = vpow2.f32 %v5281_v15  ;;  %v5279_v23 = vmul.f32 1.442695, %v5263_v37 }
 0xb4d   : > { %v5226_v49 = vpop.xlane.xlu0 %5225 }
 0xb4e   : > { %9152 = vpow2.f32 %v5279_v23  ;;  %v5266_v9 = vsub.f32 %v12044_v29, %v5226_v49 }
 0xb4f   : > { %v5232_v53 = vpop.xlane.xlu1 %5231 }
 0xb50   : > { %v5285_v62 = vmul.f32 1.442695, %v5266_v9  ;;  %v5268_v6 = vsub.f32 %v12050_v42, %v5232_v53 }
 0xb51   : > { %v5223_v40 = vpop.xlane.xlu0 %5222 }
 0xb52   : > { %9154 = vpow2.f32 %v5285_v62  ;;  %v5289_v45 = vmul.f32 1.442695, %v5268_v6  ;;  %v5265_v34 = vsub.f32 %v12048_v10, %v5223_v40 }
 0xb53   : > { %v5238_v35 = vpop.xlane.xlu1 %5237 }
 0xb54   : > { %9156 = vpow2.f32 %v5289_v45  ;;  %v5283_v33 = vmul.f32 1.442695, %v5265_v34  ;;  %v5270_v30 = vsub.f32 %v12058_v22, %v5238_v35 }
 0xb55   : > { %v5229_v44 = vpop.xlane.xlu0 %5228 }
 0xb56   : > { %9158 = vpow2.f32 %v5283_v33  ;;  %v5293_v1 = vmul.f32 1.442695, %v5270_v30  ;;  %v5267_v48 = vsub.f32 %v12056_v59, %v5229_v44 }
 0xb57   : > { %v5244_v29 = vpop.xlane.xlu1 %5243 }
 0xb58   : > { %9160 = vpow2.f32 %v5293_v1  ;;  %v5287_v31 = vmul.f32 1.442695, %v5267_v48  ;;  %v5272_v42 = vsub.f32 %v12066_v18, %v5244_v29 }
 0xb59   : > { %v12110_v56 = vpop.eup %9150  ;;  %v5235_v63 = vpop.xlane.xlu0 %5234 }
 0xb5a   : > { %9162 = vpow2.f32 %v5287_v31  ;;  %v5297_v10 = vmul.f32 1.442695, %v5272_v42  ;;  %v5269_v5 = vsub.f32 %v12064_v38, %v5235_v63  ;;  %v5314_v22 = vsel %vm2465_vm4, %v12110_v56, 0.0 }
 0xb5b   : > { %v12115_v52 = vpop.eup %9152  ;;  %v5250_v16 = vpop.xlane.xlu1 %5249  ;;  %5315 = vadd.xlane.f32.xlu1 %v5314_v22 }
 0xb5c   : > { %v8679_v59 = vpop.f32.mrf.mxu1  ;;  %9164 = vpow2.f32 %v5297_v10  ;;  %v5291_v57 = vmul.f32 1.442695, %v5269_v5  ;;  %v5274_v54 = vsub.f32 %v12074_v50, %v5250_v16  ;;  %v5311_v18 = vsel %vm2465_vm4, %v12115_v52, 0.0 }
 0xb5d   : > { %4879 = vst.msk [vmem:[#allocation2 + $0x30] sm:$0xff] %vm2189_vm1, %v8679_v59  ;;  %5312 = vadd.xlane.f32.xlu0 %v5311_v18  ;;  %v5241_v14 = vpop.xlane.xlu0 %5240 }
 0xb5e   : > { %v4799_v38 = vpop.f32.mrf.mxu1  ;;  %9166 = vpow2.f32 %v5291_v57  ;;  %v5301_v25 = vmul.f32 1.442695, %v5274_v54  ;;  %v5271_v12 = vsub.f32 %v12072_v2, %v5241_v14 }
 0xb5f   : > { %4878 = vst.msk [vmem:[#allocation2 + $0x10] sm:$0xff] %vm2189_vm1, %v4799_v38  ;;  %v12123_v27 = vpop.eup %9154  ;;  %v5256_v21 = vpop.xlane.xlu1 %5255 }
 0xb60   : > { %9168 = vpow2.f32 %v5301_v25  ;;  %v5295_v32 = vmul.f32 1.442695, %v5271_v12  ;;  %v5276_v50 = vsub.f32 %v12082_v39, %v5256_v21  ;;  %v5320_v8 = vsel %vm2465_vm4, %v12123_v27, 0.0 }
 0xb61   : > { %v12128_v24 = vpop.eup %9156  ;;  %5321 = vadd.xlane.f32.xlu1 %v5320_v8  ;;  %v5247_v47 = vpop.xlane.xlu0 %5246 }
 0xb62   : > { %9170 = vpow2.f32 %v5295_v32  ;;  %v5305_v15 = vmul.f32 1.442695, %v5276_v50  ;;  %v5273_v2 = vsub.f32 %v12080_v19, %v5247_v47  ;;  %v5326_v49 = vsel %vm2465_vm4, %v12128_v24, 0.0 }
 0xb63   : > { %v12131_v37 = vpop.eup %9158  ;;  %v5262_v23 = vpop.xlane.xlu1 %5261 }
 0xb64   : > { %9172 = vpow2.f32 %v5305_v15  ;;  %v5299_v9 = vmul.f32 1.442695, %v5273_v2  ;;  %v5278_v39 = vsub.f32 %v12090_v46, %v5262_v23  ;;  %v8682_v53 = vpop.f32.mrf.mxu1  ;;  %v5317_v62 = vsel %vm2465_vm4, %v12131_v37, 0.0 }
 0xb65   : > { %v12138_v6 = vpop.eup %9160  ;;  %4881 = vst.msk [vmem:[#allocation2 + $0x70] sm:$0xff] %vm2189_vm1, %v8682_v53  ;;  %5327 = vadd.xlane.f32.xlu1 %v5326_v49  ;;  %5318 = vadd.xlane.f32.xlu0 %v5317_v62  ;;  %v5253_v19 = vpop.xlane.xlu0 %5252 }
 0xb66   : > { %9174 = vpow2.f32 %v5299_v9  ;;  %v5309_v40 = vmul.f32 1.442695, %v5278_v39  ;;  %v5275_v45 = vsub.f32 %v12088_v55, %v5253_v19  ;;  %v4809_v34 = vpop.f32.mrf.mxu1  ;;  %v5332_v30 = vsel %vm2465_vm4, %v12138_v6, 0.0 }
 0xb67   : > { %v12142_v35 = vpop.eup %9162  ;;  %4880 = vst.msk [vmem:[#allocation2 + $0x50] sm:$0xff] %vm2189_vm1, %v4809_v34 }
 0xb68   : > { %9176 = vpow2.f32 %v5309_v40  ;;  %v5303_v46 = vmul.f32 1.442695, %v5275_v45  ;;  %v8685_v33 = vpop.f32.mrf.mxu1  ;;  %v5323_v44 = vsel %vm2465_vm4, %v12142_v35, 0.0 }
 0xb69   : > { %v12149_v1 = vpop.eup %9164  ;;  %4883 = vst.msk [vmem:[#allocation2 + $0xb0] sm:$0xff] %vm2189_vm1, %v8685_v33  ;;  %5333 = vadd.xlane.f32.xlu1 %v5332_v30  ;;  %5324 = vadd.xlane.f32.xlu0 %v5323_v44  ;;  %v5259_v55 = vpop.xlane.xlu0 %5258 }
 0xb6a   : > { %9178 = vpow2.f32 %v5303_v46  ;;  %v5277_v48 = vsub.f32 %v12096_v61, %v5259_v55  ;;  %v4819_v29 = vpop.f32.mrf.mxu1  ;;  %v5338_v10 = vsel %vm2465_vm4, %v12149_v1, 0.0 }
 0xb6b   : > { %v12153_v31 = vpop.eup %9166  ;;  %4882 = vst.msk [vmem:[#allocation2 + $0x90] sm:$0xff] %vm2189_vm1, %v4819_v29 }
 0xb6c   : > { %v5307_v42 = vmul.f32 1.442695, %v5277_v48  ;;  %v8688_v63 = vpop.f32.mrf.mxu1  ;;  %v5329_v5 = vsel %vm2465_vm4, %v12153_v31, 0.0 }
 0xb6d   : > { %v12160_v22 = vpop.eup %9168  ;;  %4885 = vst.msk [vmem:[#allocation2 + $0xf0] sm:$0xff] %vm2189_vm1, %v8688_v63  ;;  %5339 = vadd.xlane.f32.xlu1 %v5338_v10  ;;  %5330 = vadd.xlane.f32.xlu0 %v5329_v5 }
 0xb6e   : > { %9180 = vpow2.f32 %v5307_v42  ;;  %v4829_v61 = vpop.f32.mrf.mxu1  ;;  %v5344_v57 = vsel %vm2465_vm4, %v12160_v22, 0.0 }
 0xb6f   : > { %v12163_v16 = vpop.eup %9170  ;;  %4884 = vst.msk [vmem:[#allocation2 + $0xd0] sm:$0xff] %vm2189_vm1, %v4829_v61 }
 0xb70   : > { %v8691_v59 = vpop.f32.mrf.mxu1  ;;  %v5335_v54 = vsel %vm2465_vm4, %v12163_v16, 0.0 }
 0xb71   : > { %v12170_v18 = vpop.eup %9172  ;;  %4887 = vst.msk [vmem:[#allocation2 + $0x130] sm:$0xff] %vm2189_vm1, %v8691_v59  ;;  %5345 = vadd.xlane.f32.xlu1 %v5344_v57  ;;  %5336 = vadd.xlane.f32.xlu0 %v5335_v54 }
 0xb72   : > { %v4839_v14 = vpop.f32.mrf.mxu1  ;;  %v5350_v12 = vsel %vm2465_vm4, %v12170_v18, 0.0 }
 0xb73   : > { %v12173_v38 = vpop.eup %9174  ;;  %4886 = vst.msk [vmem:[#allocation2 + $0x110] sm:$0xff] %vm2189_vm1, %v4839_v14 }
 0xb74   : > { %v8694_v25 = vpop.f32.mrf.mxu1  ;;  %v5341_v21 = vsel %vm2465_vm4, %v12173_v38, 0.0 }
 0xb75   : > { %v12180_v32 = vpop.eup %9176  ;;  %4889 = vst.msk [vmem:[#allocation2 + $0x170] sm:$0xff] %vm2189_vm1, %v8694_v25  ;;  %5351 = vadd.xlane.f32.xlu1 %v5350_v12  ;;  %5342 = vadd.xlane.f32.xlu0 %v5341_v21 }
 0xb76   : > { %v4849_v50 = vpop.f32.mrf.mxu1  ;;  %v5356_v15 = vsel %vm2465_vm4, %v12180_v32, 0.0 }
 0xb77   : > { %v12183_v8 = vpop.eup %9178  ;;  %4888 = vst.msk [vmem:[#allocation2 + $0x150] sm:$0xff] %vm2189_vm1, %v4849_v50 }
 0xb78   : > { %v8697_v47 = vpop.f32.mrf.mxu1  ;;  %v5347_v2 = vsel %vm2465_vm4, %v12183_v8, 0.0 }
 0xb79   : > { %4891 = vst.msk [vmem:[#allocation2 + $0x1b0] sm:$0xff] %vm2189_vm1, %v8697_v47  ;;  %5357 = vadd.xlane.f32.xlu1 %v5356_v15  ;;  %5348 = vadd.xlane.f32.xlu0 %v5347_v2 }
 0xb7a   : > { %v4859_v23 = vpop.f32.mrf.mxu1 }
 0xb7b   : > { %v12191_v49 = vpop.eup %9180  ;;  %4890 = vst.msk [vmem:[#allocation2 + $0x190] sm:$0xff] %vm2189_vm1, %v4859_v23 }
 0xb7c   : > { %v8700_v9 = vpop.f32.mrf.mxu1  ;;  %v5353_v39 = vsel %vm2465_vm4, %v12191_v49, 0.0 }
 0xb7d   : > { %4893 = vst.msk [vmem:[#allocation2 + $0x1f0] sm:$0xff] %vm2189_vm1, %v8700_v9  ;;  %5354 = vadd.xlane.f32.xlu0 %v5353_v39 }
 0xb7e   : > { %v4869_v53 = vpop.f32.mrf.mxu1 }
 0xb7f   : > { %4892 = vst.msk [vmem:[#allocation2 + $0x1d0] sm:$0xff] %vm2189_vm1, %v4869_v53 }
 0xbe4   : > { %v5316_v62 = vpop.xlane.xlu1 %5315 }
 0xbe5   : > { %9182 = vrcp.f32 %v5316_v62 }
 0xbe6   : > { %v5313_v19 = vpop.xlane.xlu0 %5312 }
 0xbe7   : > { %9184 = vrcp.f32 %v5313_v19 }
 0xbea   : > { %v5322_v40 = vpop.xlane.xlu1 %5321 }
 0xbeb   : > { %9186 = vrcp.f32 %v5322_v40 }
 0xbee   : > { %v5328_v45 = vpop.xlane.xlu1 %5327  ;;  %v5319_v34 = vpop.xlane.xlu0 %5318 }
 0xbef   : > { %9188 = vrcp.f32 %v5319_v34 }
 0xbf0   : > { %9190 = vrcp.f32 %v5328_v45 }
 0xbf2   : > { %v5334_v46 = vpop.xlane.xlu1 %5333  ;;  %v5325_v33 = vpop.xlane.xlu0 %5324 }
 0xbf3   : > { %v9183_v30 = vpop.eup %9182  ;;  %9192 = vrcp.f32 %v5325_v33 }
 0xbf4   : > { %v9185_v44 = vpop.eup %9184  ;;  %v5376_v48 = vmul.f32 %v9183_v30, %v12110_v56  ;;  %9194 = vrcp.f32 %v5334_v46 }
 0xbf5   : > { %v5375_v55 = vmul.f32 %v9185_v44, %v12115_v52 }
 0xbf6   : > { %v5340_v29 = vpop.xlane.xlu1 %5339  ;;  %v5331_v42 = vpop.xlane.xlu0 %5330 }
 0xbf7   : > { %8735 = vmatprep.mubr.msk.f32.mxu1 %vm2465_vm4, %v5375_v55  ;;  %9196 = vrcp.f32 %v5331_v42 }
 0xbf8   : > { %8736 = vmatmul.mubr.msk.f32.vlgmr.msra.gmra.mxu1 %vm2465_vm4, %v5376_v48  ;;  %9198 = vrcp.f32 %v5340_v29  ;;  %v9187_v5 = vpop.eup %9186 }
 0xbf9   : > { %v5378_v56 = vmul.f32 %v9187_v5, %v12123_v27 }
 0xbfa   : > { %v5346_v63 = vpop.xlane.xlu1 %5345  ;;  %v5337_v10 = vpop.xlane.xlu0 %5336 }
 0xbfb   : > { %9200 = vrcp.f32 %v5337_v10 }
 0xbfc   : > { %v9189_v61 = vpop.eup %9188  ;;  %9202 = vrcp.f32 %v5346_v63 }
 0xbfd   : > { %v5377_v52 = vmul.f32 %v9189_v61, %v12131_v37  ;;  %v9191_v54 = vpop.eup %9190 }
 0xbfe   : > { %v5352_v59 = vpop.xlane.xlu1 %5351  ;;  %v5343_v57 = vpop.xlane.xlu0 %5342  ;;  %v5380_v50 = vmul.f32 %v9191_v54, %v12128_v24 }
 0xbff   : > { %9204 = vrcp.f32 %v5343_v57  ;;  %8738 = vmatprep.mubr.msk.f32.mxu1 %vm2465_vm4, %v5377_v52 }
 0xc00   : > { %v9193_v14 = vpop.eup %9192  ;;  %8739 = vmatmul.mubr.msk.f32.gmra.mxu1 %vm2465_vm4, %v5378_v56  ;;  %9206 = vrcp.f32 %v5352_v59 }
 0xc01   : > { %v5379_v12 = vmul.f32 %v9193_v14, %v12142_v35  ;;  %v9195_v47 = vpop.eup %9194 }
 0xc02   : > { %v5349_v25 = vpop.xlane.xlu0 %5348  ;;  %v5358_v21 = vpop.xlane.xlu1 %5357  ;;  %v5382_v2 = vmul.f32 %v9195_v47, %v12138_v6 }
 0xc03   : > { %9208 = vrcp.f32 %v5349_v25  ;;  %8741 = vmatprep.mubr.msk.f32.mxu1 %vm2465_vm4, %v5379_v12  ;;  %v6176_v25 = vld [vmem:[%s13210_s15] sm:$0xff] }
 0xc04   : > { %v9197_v37 = vpop.eup %9196  ;;  %8742 = vmatmul.mubr.msk.f32.gmra.mxu1 %vm2465_vm4, %v5380_v50  ;;  %9210 = vrcp.f32 %v5358_v21 }
 0xc05   : > { %v5381_v15 = vmul.f32 %v9197_v37, %v12153_v31  ;;  %v9199_v23 = vpop.eup %9198 }
 0xc06   : > { %v5355_v27 = vpop.xlane.xlu0 %5354  ;;  %v5384_v9 = vmul.f32 %v9199_v23, %v12149_v1 }
 0xc07   : > { %9212 = vrcp.f32 %v5355_v27  ;;  %8744 = vmatprep.mubr.msk.f32.mxu1 %vm2465_vm4, %v5381_v15 }
 0xc08   : > { %v9201_v35 = vpop.eup %9200  ;;  %8745 = vmatmul.mubr.msk.f32.gmra.mxu1 %vm2465_vm4, %v5382_v2 }
 0xc09   : > { %v5383_v24 = vmul.f32 %v9201_v35, %v12163_v16  ;;  %v9203_v39 = vpop.eup %9202 }
 0xc0a   : > { %v5386_v6 = vmul.f32 %v9203_v39, %v12160_v22 }
 0xc0b   : > { %8747 = vmatprep.mubr.msk.f32.mxu1 %vm2465_vm4, %v5383_v24 }
 0xc0c   : > { %v9205_v53 = vpop.eup %9204  ;;  %8748 = vmatmul.mubr.msk.f32.gmra.mxu1 %vm2465_vm4, %v5384_v9 }
 0xc0d   : > { %v5385_v31 = vmul.f32 %v9205_v53, %v12173_v38  ;;  %v9207_v62 = vpop.eup %9206 }
 0xc0e   : > { %v5388_v1 = vmul.f32 %v9207_v62, %v12170_v18 }
 0xc0f   : > { %8750 = vmatprep.mubr.msk.f32.mxu1 %vm2465_vm4, %v5385_v31 }
 0xc10   : > { %v9209_v19 = vpop.eup %9208  ;;  %8751 = vmatmul.mubr.msk.f32.gmra.mxu1 %vm2465_vm4, %v5386_v6 }
 0xc11   : > { %v5387_v16 = vmul.f32 %v9209_v19, %v12183_v8  ;;  %v9211_v40 = vpop.eup %9210 }
 0xc12   : > { %v5390_v22 = vmul.f32 %v9211_v40, %v12180_v32 }
 0xc13   : > { %8753 = vmatprep.mubr.msk.f32.mxu1 %vm2465_vm4, %v5387_v16 }
 0xc14   : > { %v9213_v45 = vpop.eup %9212  ;;  %8754 = vmatmul.mubr.msk.f32.gmra.mxu1 %vm2465_vm4, %v5388_v1 }
 0xc15   : > { %v5389_v38 = vmul.f32 %v9213_v45, %v12191_v49 }
 0xc17   : > { %8756 = vmatprep.mubr.msk.f32.mxu1 %vm2465_vm4, %v5389_v38 }
 0xc18   : > { %8757 = vmatmul.mubr.msk.f32.gmra.mxu1 %vm2465_vm4, %v5390_v22 }
 0xcb8   : > { %v8737_v34 = vpop.f32.mrf.mxu1 }
 0xcb9   : > { %v5585_v33 = vmul.f32 %v8737_v34, %v13605_v13 }
 0xcba   : > { %v5505_v46 = vpop.f32.mrf.mxu1 }
 0xcbb   : > { %v5584_v8 = vmul.f32 %v5505_v46, %v13604_v26 }
 0xcbd   : > { %8767 = vmatprep.mubr.msk.f32.mxu0 %vm732_vm0, %v5584_v8 }
 0xcbe   : > { %8768 = vmatmul.mubr.msk.f32.vlgmr.msra.gmra.mxu0 %vm732_vm0, %v5585_v33 }
 0xcc0   : > { %v8740_v18 = vpop.f32.mrf.mxu1 }
 0xcc1   : > { %v5587_v44 = vmul.f32 %v8740_v18, %v13607_v20 }
 0xcc2   : > { %v5515_v30 = vpop.f32.mrf.mxu1 }
 0xcc3   : > { %v5586_v49 = vmul.f32 %v5515_v30, %v13606_v11 }
 0xcc4   : > { %v8743_v55 = vpop.f32.mrf.mxu1 }
 0xcc5   : > { %8770 = vmatprep.mubr.msk.f32.mxu0 %vm732_vm0, %v5586_v49  ;;  %v5589_v13 = vmul.f32 %v8743_v55, %v13609_v7 }
 0xcc6   : > { %v5525_v32 = vpop.f32.mrf.mxu1  ;;  %8771 = vmatmul.mubr.msk.f32.gmra.mxu0 %vm732_vm0, %v5587_v44 }
 0xcc7   : > { %v5588_v26 = vmul.f32 %v5525_v32, %v13608_v60 }
 0xcc8   : > { %v8746_v48 = vpop.f32.mrf.mxu1 }
 0xcc9   : > { %8773 = vmatprep.mubr.msk.f32.mxu0 %vm732_vm0, %v5588_v26  ;;  %v5591_v20 = vmul.f32 %v8746_v48, %v13611_v36 }
 0xcca   : > { %v5535_v29 = vpop.f32.mrf.mxu1  ;;  %8774 = vmatmul.mubr.msk.f32.gmra.mxu0 %vm732_vm0, %v5589_v13 }
 0xccb   : > { %v5590_v11 = vmul.f32 %v5535_v29, %v13610_v4 }
 0xccc   : > { %v8749_v42 = vpop.f32.mrf.mxu1 }
 0xccd   : > { %8776 = vmatprep.mubr.msk.f32.mxu0 %vm732_vm0, %v5590_v11  ;;  %v5593_v7 = vmul.f32 %v8749_v42, %v13613_v28 }
 0xcce   : > { %v5545_v63 = vpop.f32.mrf.mxu1  ;;  %8777 = vmatmul.mubr.msk.f32.gmra.mxu0 %vm732_vm0, %v5591_v20 }
 0xccf   : > { %v5592_v60 = vmul.f32 %v5545_v63, %v13612_v58 }
 0xcd0   : > { %v8752_v10 = vpop.f32.mrf.mxu1 }
 0xcd1   : > { %8779 = vmatprep.mubr.msk.f32.mxu0 %vm732_vm0, %v5592_v60  ;;  %v5595_v36 = vmul.f32 %v8752_v10, %v13615_v43 }
 0xcd2   : > { %v5555_v5 = vpop.f32.mrf.mxu1  ;;  %8780 = vmatmul.mubr.msk.f32.gmra.mxu0 %vm732_vm0, %v5593_v7 }
 0xcd3   : > { %v5594_v4 = vmul.f32 %v5555_v5, %v13614_v41 }
 0xcd4   : > { %v8755_v61 = vpop.f32.mrf.mxu1 }
 0xcd5   : > { %8782 = vmatprep.mubr.msk.f32.mxu0 %vm732_vm0, %v5594_v4  ;;  %v5597_v28 = vmul.f32 %v8755_v61, %v13617_v0 }
 0xcd6   : > { %v5565_v59 = vpop.f32.mrf.mxu1  ;;  %8783 = vmatmul.mubr.msk.f32.gmra.mxu0 %vm732_vm0, %v5595_v36 }
 0xcd7   : > { %v5596_v58 = vmul.f32 %v5565_v59, %v13616_v17  ;;  %v6179_v17 = vld [vmem:[%s13210_s15 + $0x18] sm:$0xff] }
 0xcd8   : > { %v8758_v57 = vpop.f32.mrf.mxu1  ;;  %8791 = vmatprep.subr.mxu1 %v6179_v17 }
 0xcd9   : > { %8785 = vmatprep.mubr.msk.f32.mxu0 %vm732_vm0, %v5596_v58  ;;  %v5599_v43 = vmul.f32 %v8758_v57, %v13619_v51  ;;  %8792 = vmatpush3.msra.mxu1 %v6179_v17  ;;  %v6177_v51 = vld [vmem:[%s13210_s15 + $0x8] sm:$0xff] }
 0xcda   : > { %v5575_v52 = vpop.f32.mrf.mxu1  ;;  %8786 = vmatmul.mubr.msk.f32.gmra.mxu0 %vm732_vm0, %v5597_v28 }
 0xcdb   : > { %v5598_v41 = vmul.f32 %v5575_v52, %v13618_v3  ;;  %v6178_v3 = vld [vmem:[%s13210_s15 + $0x10] sm:$0xff] }
 0xcdc   : > { %8793 = vmatprep.subr.mxu1 %v6178_v3 }
 0xcdd   : > { %8788 = vmatprep.mubr.msk.f32.mxu0 %vm732_vm0, %v5598_v41  ;;  %8794 = vmatpush3.msra.mxu1 %v6178_v3 }
 0xcde   : > { %8789 = vmatmul.mubr.msk.f32.gmra.mxu0 %vm732_vm0, %v5599_v43  ;;  %8795 = vmatprep.subr.mxu1 %v6177_v51 }
 0xcdf   : > { %8796 = vmatpush3.msra.mxu1 %v6177_v51 }
 0xce0   : > { %8797 = vmatprep.subr.mxu1 %v6176_v25 }
 0xce1   : > { %8798 = vmatpush3.msra.mxu1 %v6176_v25 }
 0xd7e   : > { %v8769_v56 = vpop.f32.mrf.mxu0 }
 0xd7f   : > { %5794 = vst.msk [vmem:[#allocation2 + $0x38] sm:$0xff] %vm2189_vm1, %v8769_v56 }
 0xd80   : > { %v5714_v0 = vpop.f32.mrf.mxu0 }
 0xd81   : > { %5793 = vst.msk [vmem:[#allocation2 + $0x18] sm:$0xff] %vm2189_vm1, %v5714_v0 }
 0xd86   : > { %v5843_v54 = vld [vmem:[#allocation2 + $0x21] ss:$4 sm:$0xff]  ;;  %v8772_v14 = vpop.f32.mrf.mxu0  ;;  %v5875_v50 = vld [vmem:[#allocation2 + $0x22] ss:$4 sm:$0xff]  ;;  %v5907_v15 = vld [vmem:[#allocation2 + $0x23] ss:$4 sm:$0xff] }
 0xd87   : > { %5954 = vrot.lane.b32.xlu1 %v5843_v54, %s13620_s29  ;;  %5796 = vst.msk [vmem:[#allocation2 + $0x78] sm:$0xff] %vm2189_vm1, %v8772_v14 }
 0xd88   : > { %v5841_v12 = vld [vmem:[#allocation2 + $0x1] ss:$4 sm:$0xff]  ;;  %v5724_v21 = vpop.f32.mrf.mxu0  ;;  %v5905_v37 = vld [vmem:[#allocation2 + $0x3] ss:$4 sm:$0xff]  ;;  %v5873_v24 = vld [vmem:[#allocation2 + $0x2] ss:$4 sm:$0xff] }
 0xd89   : > { %5952 = vrot.lane.b32.xlu0 %v5841_v12, %s13620_s29  ;;  %5795 = vst.msk [vmem:[#allocation2 + $0x58] sm:$0xff] %vm2189_vm1, %v5724_v21  ;;  %v5809_v21 = vld [vmem:[#allocation2] ss:$4 sm:$0xff] }
 0xd8a   : > { %v8775_v47 = vpop.f32.mrf.mxu0 }
 0xd8b   : > { %6018 = vrot.lane.b32.xlu1 %v5875_v50, %s13621_s26  ;;  %5798 = vst.msk [vmem:[#allocation2 + $0xb8] sm:$0xff] %vm2189_vm1, %v8775_v47  ;;  %v5811_v47 = vld [vmem:[#allocation2 + $0x20] ss:$4 sm:$0xff] }
 0xd8c   : > { %v5734_v27 = vpop.f32.mrf.mxu0 }
 0xd8d   : > { %6080 = vrot.lane.b32.xlu0 %v5905_v37, %s13622_s0  ;;  %5797 = vst.msk [vmem:[#allocation2 + $0x98] sm:$0xff] %vm2189_vm1, %v5734_v27 }
 0xd8e   : > { %v8778_v2 = vpop.f32.mrf.mxu0  ;;  %v5847_v31 = vld [vmem:[#allocation2 + $0x61] ss:$4 sm:$0xff]  ;;  %v5879_v16 = vld [vmem:[#allocation2 + $0x62] ss:$4 sm:$0xff]  ;;  %v5911_v38 = vld [vmem:[#allocation2 + $0x63] ss:$4 sm:$0xff] }
 0xd8f   : > { %6082 = vrot.lane.b32.xlu1 %v5907_v15, %s13622_s0  ;;  %5800 = vst.msk [vmem:[#allocation2 + $0xf8] sm:$0xff] %vm2189_vm1, %v8778_v2 }
 0xd90   : > { %v5744_v23 = vpop.f32.mrf.mxu0  ;;  %v5845_v35 = vld [vmem:[#allocation2 + $0x41] ss:$4 sm:$0xff]  ;;  %v5877_v53 = vld [vmem:[#allocation2 + $0x42] ss:$4 sm:$0xff]  ;;  %v5909_v19 = vld [vmem:[#allocation2 + $0x43] ss:$4 sm:$0xff] }
 0xd91   : > { %5799 = vst.msk [vmem:[#allocation2 + $0xd8] sm:$0xff] %vm2189_vm1, %v5744_v23  ;;  %5956 = vrot.lane.b32.xlu0 %v5845_v35, %s13620_s29 }
 0xd92   : > { %v8781_v9 = vpop.f32.mrf.mxu0  ;;  %v5851_v8 = vld [vmem:[#allocation2 + $0xa1] ss:$4 sm:$0xff]  ;;  %v5883_v18 = vld [vmem:[#allocation2 + $0xa2] ss:$4 sm:$0xff]  ;;  %v5915_v49 = vld [vmem:[#allocation2 + $0xa3] ss:$4 sm:$0xff] }
 0xd93   : > { %6016 = vrot.lane.b32.xlu1 %v5873_v24, %s13621_s26  ;;  %5802 = vst.msk [vmem:[#allocation2 + $0x138] sm:$0xff] %vm2189_vm1, %v8781_v9 }
 0xd94   : > { %v5754_v39 = vpop.f32.mrf.mxu0  ;;  %v5849_v45 = vld [vmem:[#allocation2 + $0x81] ss:$4 sm:$0xff]  ;;  %v5881_v46 = vld [vmem:[#allocation2 + $0x82] ss:$4 sm:$0xff]  ;;  %v5913_v33 = vld [vmem:[#allocation2 + $0x83] ss:$4 sm:$0xff] }
 0xd95   : > { %5801 = vst.msk [vmem:[#allocation2 + $0x118] sm:$0xff] %vm2189_vm1, %v5754_v39  ;;  %6020 = vrot.lane.b32.xlu0 %v5877_v53, %s13621_s26  ;;  %v5813_v53 = vld [vmem:[#allocation2 + $0x40] ss:$4 sm:$0xff] }
 0xd96   : > { %v8784_v6 = vpop.f32.mrf.mxu0  ;;  %v5855_v55 = vld [vmem:[#allocation2 + $0xe1] ss:$4 sm:$0xff]  ;;  %v5887_v26 = vld [vmem:[#allocation2 + $0xe2] ss:$4 sm:$0xff]  ;;  %v5919_v48 = vld [vmem:[#allocation2 + $0xe3] ss:$4 sm:$0xff] }
 0xd97   : > { %5958 = vrot.lane.b32.xlu1 %v5847_v31, %s13620_s29  ;;  %5804 = vst.msk [vmem:[#allocation2 + $0x178] sm:$0xff] %vm2189_vm1, %v8784_v6 }
 0xd98   : > { %v5764_v62 = vpop.f32.mrf.mxu0  ;;  %v5853_v30 = vld [vmem:[#allocation2 + $0xc1] ss:$4 sm:$0xff]  ;;  %v5885_v44 = vld [vmem:[#allocation2 + $0xc2] ss:$4 sm:$0xff]  ;;  %v5917_v32 = vld [vmem:[#allocation2 + $0xc3] ss:$4 sm:$0xff] }
 0xd99   : > { %5803 = vst.msk [vmem:[#allocation2 + $0x158] sm:$0xff] %vm2189_vm1, %v5764_v62  ;;  %6084 = vrot.lane.b32.xlu0 %v5909_v19, %s13622_s0 }
 0xd9a   : > { %v8787_v40 = vpop.f32.mrf.mxu0  ;;  %v5859_v11 = vld [vmem:[#allocation2 + $0x121] ss:$4 sm:$0xff]  ;;  %v5891_v42 = vld [vmem:[#allocation2 + $0x122] ss:$4 sm:$0xff]  ;;  %v5923_v60 = vld [vmem:[#allocation2 + $0x123] ss:$4 sm:$0xff] }
 0xd9b   : > { %6022 = vrot.lane.b32.xlu1 %v5879_v16, %s13621_s26  ;;  %5806 = vst.msk [vmem:[#allocation2 + $0x1b8] sm:$0xff] %vm2189_vm1, %v8787_v40  ;;  %v5815_v40 = vld [vmem:[#allocation2 + $0x60] ss:$4 sm:$0xff] }
 0xd9c   : > { %v5774_v1 = vpop.f32.mrf.mxu0  ;;  %v5857_v13 = vld [vmem:[#allocation2 + $0x101] ss:$4 sm:$0xff]  ;;  %v5889_v29 = vld [vmem:[#allocation2 + $0x102] ss:$4 sm:$0xff]  ;;  %v5921_v20 = vld [vmem:[#allocation2 + $0x103] ss:$4 sm:$0xff] }
 0xd9d   : > { %5805 = vst.msk [vmem:[#allocation2 + $0x198] sm:$0xff] %vm2189_vm1, %v5774_v1  ;;  %5960 = vrot.lane.b32.xlu0 %v5849_v45, %s13620_s29 }
 0xd9e   : > { %v8790_v22 = vpop.f32.mrf.mxu0  ;;  %v5863_v10 = vld [vmem:[#allocation2 + $0x161] ss:$4 sm:$0xff]  ;;  %v5895_v4 = vld [vmem:[#allocation2 + $0x162] ss:$4 sm:$0xff]  ;;  %v5927_v61 = vld [vmem:[#allocation2 + $0x163] ss:$4 sm:$0xff] }
 0xd9f   : > { %6086 = vrot.lane.b32.xlu1 %v5911_v38, %s13622_s0  ;;  %5808 = vst.msk [vmem:[#allocation2 + $0x1f8] sm:$0xff] %vm2189_vm1, %v8790_v22 }
 0xda0   : > { %v5784_v34 = vpop.f32.mrf.mxu0  ;;  %v5861_v63 = vld [vmem:[#allocation2 + $0x141] ss:$4 sm:$0xff]  ;;  %v5893_v7 = vld [vmem:[#allocation2 + $0x142] ss:$4 sm:$0xff]  ;;  %v5925_v5 = vld [vmem:[#allocation2 + $0x143] ss:$4 sm:$0xff] }
 0xda1   : > { %5807 = vst.msk [vmem:[#allocation2 + $0x1d8] sm:$0xff] %vm2189_vm1, %v5784_v34  ;;  %6024 = vrot.lane.b32.xlu0 %v5881_v46, %s13621_s26 }
 0xda2   : > { %v5867_v58 = vld [vmem:[#allocation2 + $0x1a1] ss:$4 sm:$0xff]  ;;  %v5899_v57 = vld [vmem:[#allocation2 + $0x1a2] ss:$4 sm:$0xff]  ;;  %v5931_v41 = vld [vmem:[#allocation2 + $0x1a3] ss:$4 sm:$0xff] }
 0xda3   : > { %5962 = vrot.lane.b32.xlu1 %v5851_v8, %s13620_s29 }
 0xda4   : > { %v5865_v36 = vld [vmem:[#allocation2 + $0x181] ss:$4 sm:$0xff]  ;;  %v5897_v59 = vld [vmem:[#allocation2 + $0x182] ss:$4 sm:$0xff]  ;;  %v5929_v28 = vld [vmem:[#allocation2 + $0x183] ss:$4 sm:$0xff] }
 0xda5   : > { %6088 = vrot.lane.b32.xlu0 %v5913_v33, %s13622_s0  ;;  %v5817_v33 = vld [vmem:[#allocation2 + $0x80] ss:$4 sm:$0xff] }
 0xda6   : > { %v5871_v56 = vld [vmem:[#allocation2 + $0x1e1] ss:$4 sm:$0xff]  ;;  %v5903_v0 = vld [vmem:[#allocation2 + $0x1e2] ss:$4 sm:$0xff]  ;;  %v5935_v3 = vld [vmem:[#allocation2 + $0x1e3] ss:$4 sm:$0xff] }
 0xda7   : > { %6026 = vrot.lane.b32.xlu1 %v5883_v18, %s13621_s26 }
 0xda8   : > { %v5869_v52 = vld [vmem:[#allocation2 + $0x1c1] ss:$4 sm:$0xff]  ;;  %v5901_v43 = vld [vmem:[#allocation2 + $0x1c2] ss:$4 sm:$0xff]  ;;  %v5933_v17 = vld [vmem:[#allocation2 + $0x1c3] ss:$4 sm:$0xff] }
 0xda9   : > { %5964 = vrot.lane.b32.xlu0 %v5853_v30, %s13620_s29 }
 0xdab   : > { %6090 = vrot.lane.b32.xlu1 %v5915_v49, %s13622_s0 }
 0xdad   : > { %6028 = vrot.lane.b32.xlu0 %v5885_v44, %s13621_s26 }
 0xdaf   : > { %5966 = vrot.lane.b32.xlu1 %v5855_v55, %s13620_s29 }
 0xdb1   : > { %6092 = vrot.lane.b32.xlu0 %v5917_v32, %s13622_s0  ;;  %v5819_v32 = vld [vmem:[#allocation2 + $0xa0] ss:$4 sm:$0xff] }
 0xdb3   : > { %6030 = vrot.lane.b32.xlu1 %v5887_v26, %s13621_s26 }
 0xdb5   : > { %5968 = vrot.lane.b32.xlu0 %v5857_v13, %s13620_s29 }
 0xdb7   : > { %6094 = vrot.lane.b32.xlu1 %v5919_v48, %s13622_s0 }
 0xdb9   : > { %6032 = vrot.lane.b32.xlu0 %v5889_v29, %s13621_s26 }
 0xdbb   : > { %5970 = vrot.lane.b32.xlu1 %v5859_v11, %s13620_s29 }
 0xdbd   : > { %6096 = vrot.lane.b32.xlu0 %v5921_v20, %s13622_s0 }
 0xdbf   : > { %6034 = vrot.lane.b32.xlu1 %v5891_v42, %s13621_s26 }
 0xdc1   : > { %5972 = vrot.lane.b32.xlu0 %v5861_v63, %s13620_s29  ;;  %v5821_v63 = vld [vmem:[#allocation2 + $0xc0] ss:$4 sm:$0xff] }
 0xdc3   : > { %6098 = vrot.lane.b32.xlu1 %v5923_v60, %s13622_s0 }
 0xdc5   : > { %6036 = vrot.lane.b32.xlu0 %v5893_v7, %s13621_s26 }
 0xdc7   : > { %5974 = vrot.lane.b32.xlu1 %v5863_v10, %s13620_s29 }
 0xdc9   : > { %6100 = vrot.lane.b32.xlu0 %v5925_v5, %s13622_s0 }
 0xdcb   : > { %6038 = vrot.lane.b32.xlu1 %v5895_v4, %s13621_s26 }
 0xdcd   : > { %5976 = vrot.lane.b32.xlu0 %v5865_v36, %s13620_s29  ;;  %v5823_v36 = vld [vmem:[#allocation2 + $0xe0] ss:$4 sm:$0xff] }
 0xdcf   : > { %6102 = vrot.lane.b32.xlu1 %v5927_v61, %s13622_s0 }
 0xdd1   : > { %6040 = vrot.lane.b32.xlu0 %v5897_v59, %s13621_s26 }
 0xdd3   : > { %5978 = vrot.lane.b32.xlu1 %v5867_v58, %s13620_s29 }
 0xdd5   : > { %6104 = vrot.lane.b32.xlu0 %v5929_v28, %s13622_s0 }
 0xdd7   : > { %6042 = vrot.lane.b32.xlu1 %v5899_v57, %s13621_s26 }
 0xdd9   : > { %5980 = vrot.lane.b32.xlu0 %v5869_v52, %s13620_s29 }
 0xddb   : > { %6106 = vrot.lane.b32.xlu1 %v5931_v41, %s13622_s0 }
 0xddd   : > { %6044 = vrot.lane.b32.xlu0 %v5901_v43, %s13621_s26  ;;  %v5825_v43 = vld [vmem:[#allocation2 + $0x100] ss:$4 sm:$0xff] }
 0xddf   : > { %5982 = vrot.lane.b32.xlu1 %v5871_v56, %s13620_s29 }
 0xde1   : > { %6108 = vrot.lane.b32.xlu0 %v5933_v17, %s13622_s0 }
 0xde3   : > { %6046 = vrot.lane.b32.xlu1 %v5903_v0, %s13621_s26 }
 0xde7   : > { %6110 = vrot.lane.b32.xlu1 %v5935_v3, %s13622_s0 }
 0xdf9   : > { %v5955_v51 = vpop.permute.xlu1 %5954 }
 0xdfa   : > { %v6129_v15 = vsel %vm2189_vm1, %v5811_v47, %v5955_v51 }
 0xdfb   : > { %v5953_v54 = vpop.permute.xlu0 %5952 }
 0xdfc   : > { %v6128_v37 = vsel %vm2189_vm1, %v5809_v21, %v5953_v54  ;;  %v5827_v54 = vld [vmem:[#allocation2 + $0x120] ss:$4 sm:$0xff] }
 0xdfd   : > { %v6019_v14 = vpop.permute.xlu1 %6018 }
 0xdfe   : > { %v6145_v23 = vsel %vm2206_vm2, %v6129_v15, %v6019_v14 }
 0xdff   : > { %v6081_v25 = vpop.permute.xlu0 %6080 }
 0xe01   : > { %v6083_v12 = vpop.permute.xlu1 %6082 }
 0xe02   : > { %v6161_v24 = vsel %vm2223_vm3, %v6145_v23, %v6083_v12 }
 0xe03   : > { %v5957_v50 = vpop.permute.xlu0 %5956 }
 0xe04   : > { %v6130_v31 = vsel %vm2189_vm1, %v5813_v53, %v5957_v50 }
 0xe05   : > { %v6017_v27 = vpop.permute.xlu1 %6016 }
 0xe06   : > { %v6144_v2 = vsel %vm2206_vm2, %v6128_v37, %v6017_v27  ;;  %v5829_v27 = vld [vmem:[#allocation2 + $0x140] ss:$4 sm:$0xff] }
 0xe07   : > { %v6160_v35 = vsel %vm2223_vm3, %v6144_v2, %v6081_v25  ;;  %v6021_v9 = vpop.permute.xlu0 %6020 }
 0xe08   : > { %8799 = vmatprep.mubr.msk.f32.mxu1 %vm732_vm0, %v6160_v35  ;;  %v6146_v6 = vsel %vm2206_vm2, %v6130_v31, %v6021_v9  ;;  %v5831_v9 = vld [vmem:[#allocation2 + $0x160] ss:$4 sm:$0xff] }
 0xe09   : > { %v5959_v39 = vpop.permute.xlu1 %5958  ;;  %8800 = vmatmul.mubr.msk.f32.vlgmr.msra.gmra.mxu1 %vm732_vm0, %v6161_v24 }
 0xe0a   : > { %v6131_v1 = vsel %vm2189_vm1, %v5815_v40, %v5959_v39  ;;  %v5833_v40 = vld [vmem:[#allocation2 + $0x180] ss:$4 sm:$0xff] }
 0xe0b   : > { %v6085_v62 = vpop.permute.xlu0 %6084 }
 0xe0c   : > { %v6162_v19 = vsel %vm2223_vm3, %v6146_v6, %v6085_v62 }
 0xe0d   : > { %v6023_v16 = vpop.permute.xlu1 %6022  ;;  %8802 = vmatprep.mubr.msk.f32.mxu1 %vm732_vm0, %v6162_v19 }
 0xe0e   : > { %v6147_v38 = vsel %vm2206_vm2, %v6131_v1, %v6023_v16 }
 0xe0f   : > { %v5961_v45 = vpop.permute.xlu0 %5960 }
 0xe10   : > { %v6132_v18 = vsel %vm2189_vm1, %v5817_v33, %v5961_v45 }
 0xe11   : > { %v6087_v22 = vpop.permute.xlu1 %6086 }
 0xe12   : > { %v6163_v34 = vsel %vm2223_vm3, %v6147_v38, %v6087_v22 }
 0xe13   : > { %8803 = vmatmul.mubr.msk.f32.gmra.mxu1 %vm732_vm0, %v6163_v34  ;;  %v6025_v46 = vpop.permute.xlu0 %6024 }
 0xe14   : > { %v6148_v30 = vsel %vm2206_vm2, %v6132_v18, %v6025_v46  ;;  %v5835_v46 = vld [vmem:[#allocation2 + $0x1a0] ss:$4 sm:$0xff] }
 0xe15   : > { %v5963_v8 = vpop.permute.xlu1 %5962 }
 0xe16   : > { %v6133_v26 = vsel %vm2189_vm1, %v5819_v32, %v5963_v8  ;;  %v5837_v32 = vld [vmem:[#allocation2 + $0x1c0] ss:$4 sm:$0xff] }
 0xe17   : > { %v6089_v49 = vpop.permute.xlu0 %6088 }
 0xe18   : > { %v6164_v44 = vsel %vm2223_vm3, %v6148_v30, %v6089_v49 }
 0xe19   : > { %v6027_v55 = vpop.permute.xlu1 %6026  ;;  %8805 = vmatprep.mubr.msk.f32.mxu1 %vm732_vm0, %v6164_v44 }
 0xe1a   : > { %v6149_v48 = vsel %vm2206_vm2, %v6133_v26, %v6027_v55 }
 0xe1b   : > { %v5965_v13 = vpop.permute.xlu0 %5964 }
 0xe1c   : > { %v6134_v60 = vsel %vm2189_vm1, %v5821_v63, %v5965_v13 }
 0xe1d   : > { %v6091_v29 = vpop.permute.xlu1 %6090 }
 0xe1e   : > { %v6165_v11 = vsel %vm2223_vm3, %v6149_v48, %v6091_v29 }
 0xe1f   : > { %8806 = vmatmul.mubr.msk.f32.gmra.mxu1 %vm732_vm0, %v6165_v11  ;;  %v6029_v20 = vpop.permute.xlu0 %6028 }
 0xe20   : > { %v6150_v7 = vsel %vm2206_vm2, %v6134_v60, %v6029_v20  ;;  %v5839_v20 = vld [vmem:[#allocation2 + $0x1e0] ss:$4 sm:$0xff] }
 0xe21   : > { %v5967_v42 = vpop.permute.xlu1 %5966 }
 0xe22   : > { %v6135_v61 = vsel %vm2189_vm1, %v5823_v36, %v5967_v42 }
 0xe23   : > { %v6093_v10 = vpop.permute.xlu0 %6092 }
 0xe24   : > { %v6166_v5 = vsel %vm2223_vm3, %v6150_v7, %v6093_v10  ;;  %v12405_v10 = vld [vmem:[%s13211_s16] ss:$0 sm:$0xff] }
 0xe25   : > { %v6031_v4 = vpop.permute.xlu1 %6030  ;;  %8808 = vmatprep.mubr.msk.f32.mxu1 %vm732_vm0, %v6166_v5 }
 0xe26   : > { %v6151_v58 = vsel %vm2206_vm2, %v6135_v61, %v6031_v4  ;;  %v9326_v61 = vld [vmem:[%s9493_s2 + $0x8] sm:$0xff] }
 0xe27   : > { %v5969_v59 = vpop.permute.xlu0 %5968 }
 0xe28   : > { %v6136_v56 = vsel %vm2189_vm1, %v5825_v43, %v5969_v59 }
 0xe29   : > { %v6095_v28 = vpop.permute.xlu1 %6094 }
 0xe2a   : > { %v6167_v57 = vsel %vm2223_vm3, %v6151_v58, %v6095_v28  ;;  %v9327_v28 = vld [vmem:[%s9493_s2] sm:$0xff] }
 0xe2b   : > { %8809 = vmatmul.mubr.msk.f32.gmra.mxu1 %vm732_vm0, %v6167_v57  ;;  %v6033_v52 = vpop.permute.xlu0 %6032 }
 0xe2c   : > { %v6152_v17 = vsel %vm2206_vm2, %v6136_v56, %v6033_v52 }
 0xe2d   : > { %v5971_v41 = vpop.permute.xlu1 %5970 }
 0xe2e   : > { %v6137_v14 = vsel %vm2189_vm1, %v5827_v54, %v5971_v41  ;;  %v9329_v54 = vld [vmem:[%s9493_s2 + $0x10] sm:$0xff] }
 0xe2f   : > { %v6097_v0 = vpop.permute.xlu0 %6096 }
 0xe30   : > { %v6168_v3 = vsel %vm2223_vm3, %v6152_v17, %v6097_v0  ;;  %v9328_v0 = vld [vmem:[%s9493_s2 + $0x18] sm:$0xff] }
 0xe31   : > { %v6035_v51 = vpop.permute.xlu1 %6034  ;;  %8811 = vmatprep.mubr.msk.f32.mxu1 %vm732_vm0, %v6168_v3 }
 0xe32   : > { %v6153_v12 = vsel %vm2206_vm2, %v6137_v14, %v6035_v51 }
 0xe33   : > { %v5973_v25 = vpop.permute.xlu0 %5972 }
 0xe34   : > { %v6138_v15 = vsel %vm2189_vm1, %v5829_v27, %v5973_v25 }
 0xe35   : > { %v6099_v21 = vpop.permute.xlu1 %6098 }
 0xe36   : > { %v6169_v50 = vsel %vm2223_vm3, %v6153_v12, %v6099_v21 }
 0xe37   : > { %8812 = vmatmul.mubr.msk.f32.gmra.mxu1 %vm732_vm0, %v6169_v50  ;;  %v6037_v47 = vpop.permute.xlu0 %6036 }
 0xe38   : > { %v6154_v2 = vsel %vm2206_vm2, %v6138_v15, %v6037_v47 }
 0xe39   : > { %v5975_v37 = vpop.permute.xlu1 %5974 }
 0xe3a   : > { %v6139_v39 = vsel %vm2189_vm1, %v5831_v9, %v5975_v37  ;;  %v9330_v37 = vld [vmem:[%s9493_s2 + $0x28] sm:$0xff] }
 0xe3b   : > { %v6101_v23 = vpop.permute.xlu0 %6100 }
 0xe3c   : > { %v6170_v35 = vsel %vm2223_vm3, %v6154_v2, %v6101_v23  ;;  %v9331_v2 = vld [vmem:[%s9493_s2 + $0x20] sm:$0xff] }
 0xe3d   : > { %v6039_v24 = vpop.permute.xlu1 %6038  ;;  %8814 = vmatprep.mubr.msk.f32.mxu1 %vm732_vm0, %v6170_v35 }
 0xe3e   : > { %v6155_v31 = vsel %vm2206_vm2, %v6139_v39, %v6039_v24 }
 0xe3f   : > { %v5977_v53 = vpop.permute.xlu0 %5976 }
 0xe40   : > { %v6140_v1 = vsel %vm2189_vm1, %v5833_v40, %v5977_v53 }
 0xe41   : > { %v6103_v6 = vpop.permute.xlu1 %6102 }
 0xe42   : > { %v6171_v62 = vsel %vm2223_vm3, %v6155_v31, %v6103_v6  ;;  %v9332_v31 = vld [vmem:[%s9493_s2 + $0x38] sm:$0xff] }
 0xe43   : > { %8815 = vmatmul.mubr.msk.f32.gmra.mxu1 %vm732_vm0, %v6171_v62  ;;  %v6041_v19 = vpop.permute.xlu0 %6040 }
 0xe44   : > { %v6156_v45 = vsel %vm2206_vm2, %v6140_v1, %v6041_v19  ;;  %v9333_v19 = vld [vmem:[%s9493_s2 + $0x30] sm:$0xff] }
 0xe45   : > { %v5979_v16 = vpop.permute.xlu1 %5978 }
 0xe46   : > { %v6141_v8 = vsel %vm2189_vm1, %v5835_v46, %v5979_v16 }
 0xe47   : > { %v6105_v38 = vpop.permute.xlu0 %6104 }
 0xe48   : > { %v6172_v22 = vsel %vm2223_vm3, %v6156_v45, %v6105_v38 }
 0xe49   : > { %v6043_v34 = vpop.permute.xlu1 %6042  ;;  %8817 = vmatprep.mubr.msk.f32.mxu1 %vm732_vm0, %v6172_v22 }
 0xe4a   : > { %v6157_v18 = vsel %vm2206_vm2, %v6141_v8, %v6043_v34  ;;  %v9334_v34 = vld [vmem:[%s9493_s2 + $0x48] sm:$0xff] }
 0xe4b   : > { %v5981_v33 = vpop.permute.xlu0 %5980 }
 0xe4c   : > { %v6142_v26 = vsel %vm2189_vm1, %v5837_v32, %v5981_v33  ;;  %v9335_v33 = vld [vmem:[%s9493_s2 + $0x40] sm:$0xff] }
 0xe4d   : > { %v6107_v30 = vpop.permute.xlu1 %6106 }
 0xe4e   : > { %v6173_v49 = vsel %vm2223_vm3, %v6157_v18, %v6107_v30 }
 0xe4f   : > { %8818 = vmatmul.mubr.msk.f32.gmra.mxu1 %vm732_vm0, %v6173_v49  ;;  %v6045_v44 = vpop.permute.xlu0 %6044 }
 0xe50   : > { %v6158_v13 = vsel %vm2206_vm2, %v6142_v26, %v6045_v44  ;;  %v9336_v26 = vld [vmem:[%s9493_s2 + $0x58] sm:$0xff] }
 0xe51   : > { %v5983_v55 = vpop.permute.xlu1 %5982 }
 0xe52   : > { %v6143_v42 = vsel %vm2189_vm1, %v5839_v20, %v5983_v55 }
 0xe53   : > { %v6109_v48 = vpop.permute.xlu0 %6108 }
 0xe54   : > { %v6174_v29 = vsel %vm2223_vm3, %v6158_v13, %v6109_v48 }
 0xe55   : > { %v6047_v11 = vpop.permute.xlu1 %6046  ;;  %8820 = vmatprep.mubr.msk.f32.mxu1 %vm732_vm0, %v6174_v29  ;;  %v9337_v29 = vld [vmem:[%s9493_s2 + $0x50] sm:$0xff] }
 0xe56   : > { %v6159_v63 = vsel %vm2206_vm2, %v6143_v42, %v6047_v11 }
 0xe59   : > { %v6111_v60 = vpop.permute.xlu1 %6110 }
 0xe5a   : > { %v6175_v7 = vsel %vm2223_vm3, %v6159_v63, %v6111_v60 }
 0xe5b   : > { %8821 = vmatmul.mubr.msk.f32.gmra.mxu1 %vm732_vm0, %v6175_v7 }
 0xec9   : > { %v8801_v5 = vpop.f32.mrf.mxu1 }
 0xeca   : > { %v6307_v4 = vadd.f32 %v8801_v5, %v12405_v10  ;;  %v9338_v5 = vld [vmem:[%s9493_s2 + $0x68] sm:$0xff] }
 0xecb   : > { %v6301_v36 = vpop.f32.mrf.mxu1 }
 0xecc   : > { %v12409_v59 = vadd.f32 %v9326_v61, %v6307_v4  ;;  %v6302_v58 = vadd.f32 %v12405_v10, %v6301_v36  ;;  %v9339_v61 = vld [vmem:[%s9493_s2 + $0x60] sm:$0xff] }
 0xece   : > { %v12413_v57 = vadd.f32 %v9327_v28, %v6302_v58  ;;  %v6401_v52 = vsel %vm732_vm0, %v12409_v59, 0.0 }
 0xecf   : > { %6402 = vadd.xlane.f32.xlu1 %v6401_v52 }
 0xed0   : > { %v6398_v41 = vsel %vm732_vm0, %v12413_v57, 0.0 }
 0xed1   : > { %6399 = vadd.xlane.f32.xlu0 %v6398_v41 }
 0xed3   : > { %v8804_v43 = vpop.f32.mrf.mxu1 }
 0xed4   : > { %v6317_v56 = vadd.f32 %v8804_v43, %v12405_v10 }
 0xed5   : > { %v6311_v17 = vpop.f32.mrf.mxu1 }
 0xed6   : > { %v12421_v3 = vadd.f32 %v9328_v0, %v6317_v56  ;;  %v6312_v51 = vadd.f32 %v12405_v10, %v6311_v17  ;;  %v9340_v17 = vld [vmem:[%s9493_s2 + $0x78] sm:$0xff] }
 0xed8   : > { %v12425_v14 = vadd.f32 %v9329_v54, %v6312_v51  ;;  %v6407_v25 = vsel %vm732_vm0, %v12421_v3, 0.0  ;;  %v9341_v54 = vld [vmem:[%s9493_s2 + $0x70] sm:$0xff]  ;;  %s13635_s2 = sshll.u32 %s13648_s24, 3 }
 0xed9   : > { %6408 = vadd.xlane.f32.xlu0 %v6407_v25  ;;  %s13142_s3 = scalar_lea.vmem %s13218_s23, %s13635_s2 }
 0xeda   : > { %v6404_v12 = vsel %vm732_vm0, %v12425_v14, 0.0 }
 0xedd   : > { %6405 = vadd.xlane.f32.xlu0 %v6404_v12 }
 0xedf   : > { %v8807_v21 = vpop.f32.mrf.mxu1 }
 0xee0   : > { %v6327_v50 = vadd.f32 %v8807_v21, %v12405_v10 }
 0xee1   : > { %v6321_v47 = vpop.f32.mrf.mxu1 }
 0xee2   : > { %v12433_v27 = vadd.f32 %v9330_v37, %v6327_v50  ;;  %v6322_v15 = vadd.f32 %v12405_v10, %v6321_v47 }
 0xee4   : > { %v12437_v23 = vadd.f32 %v9331_v2, %v6322_v15  ;;  %v6413_v35 = vsel %vm732_vm0, %v12433_v27, 0.0 }
 0xee5   : > { %6414 = vadd.xlane.f32.xlu1 %v6413_v35 }
 0xee6   : > { %13623 = vst [vmem:[#allocation42_spill] sm:$0xff] %v12437_v23  ;;  %v6410_v24 = vsel %vm732_vm0, %v12437_v23, 0.0 }
 0xee7   : > { %6411 = vadd.xlane.f32.xlu0 %v6410_v24 }
 0xeeb   : > { %v8810_v9 = vpop.f32.mrf.mxu1 }
 0xeec   : > { %v6337_v39 = vadd.f32 %v8810_v9, %v12405_v10 }
 0xeed   : > { %v6331_v53 = vpop.f32.mrf.mxu1 }
 0xeee   : > { %v12445_v6 = vadd.f32 %v9332_v31, %v6337_v39  ;;  %v6332_v62 = vadd.f32 %v12405_v10, %v6331_v53 }
 0xef0   : > { %13624 = vst [vmem:[#allocation44_spill] sm:$0xff] %v12445_v6  ;;  %v12449_v16 = vadd.f32 %v9333_v19, %v6332_v62  ;;  %v6419_v40 = vsel %vm732_vm0, %v12445_v6, 0.0 }
 0xef1   : > { %6420 = vadd.xlane.f32.xlu1 %v6419_v40 }
 0xef2   : > { %13625 = vst [vmem:[#allocation46_spill] sm:$0xff] %v12449_v16  ;;  %v6416_v1 = vsel %vm732_vm0, %v12449_v16, 0.0 }
 0xef3   : > { %6417 = vadd.xlane.f32.xlu0 %v6416_v1 }
 0xef7   : > { %v8813_v45 = vpop.f32.mrf.mxu1 }
 0xef8   : > { %v6347_v38 = vadd.f32 %v8813_v45, %v12405_v10 }
 0xef9   : > { %v6341_v22 = vpop.f32.mrf.mxu1 }
 0xefa   : > { %v12457_v46 = vadd.f32 %v9334_v34, %v6347_v38  ;;  %v6342_v8 = vadd.f32 %v12405_v10, %v6341_v22 }
 0xefc   : > { %13626 = vst [vmem:[#allocation48_spill] sm:$0xff] %v12457_v46  ;;  %v12461_v18 = vadd.f32 %v9335_v33, %v6342_v8  ;;  %v6425_v30 = vsel %vm732_vm0, %v12457_v46, 0.0 }
 0xefd   : > { %6426 = vadd.xlane.f32.xlu1 %v6425_v30 }
 0xefe   : > { %13627 = vst [vmem:[#allocation50_spill] sm:$0xff] %v12461_v18  ;;  %v6422_v49 = vsel %vm732_vm0, %v12461_v18, 0.0 }
 0xeff   : > { %6423 = vadd.xlane.f32.xlu0 %v6422_v49 }
 0xf03   : > { %v8816_v44 = vpop.f32.mrf.mxu1 }
 0xf04   : > { %v6357_v55 = vadd.f32 %v8816_v44, %v12405_v10 }
 0xf05   : > { %v6351_v32 = vpop.f32.mrf.mxu1 }
 0xf06   : > { %v12469_v13 = vadd.f32 %v9336_v26, %v6357_v55  ;;  %v6352_v48 = vadd.f32 %v12405_v10, %v6351_v32 }
 0xf08   : > { %13628 = vst [vmem:[#allocation52_spill] sm:$0xff] %v12469_v13  ;;  %v12473_v11 = vadd.f32 %v9337_v29, %v6352_v48  ;;  %v6431_v20 = vsel %vm732_vm0, %v12469_v13, 0.0 }
 0xf09   : > { %6432 = vadd.xlane.f32.xlu1 %v6431_v20 }
 0xf0a   : > { %13629 = vst [vmem:[#allocation33_spill] sm:$0xff] %v12473_v11  ;;  %v6428_v42 = vsel %vm732_vm0, %v12473_v11, 0.0 }
 0xf0b   : > { %6429 = vadd.xlane.f32.xlu0 %v6428_v42 }
 0xf0f   : > { %v8819_v63 = vpop.f32.mrf.mxu1 }
 0xf10   : > { %v6367_v60 = vadd.f32 %v8819_v63, %v12405_v10 }
 0xf11   : > { %v6361_v7 = vpop.f32.mrf.mxu1 }
 0xf12   : > { %v12481_v4 = vadd.f32 %v9338_v5, %v6367_v60  ;;  %v6362_v36 = vadd.f32 %v12405_v10, %v6361_v7  ;;  %v6653_v5 = vld [vmem:[%s13214_s19 + $0x18] sm:$0xff] }
 0xf13   : > { %8823 = vmatprep.subr.mxu0 %v6653_v5 }
 0xf14   : > { %13630 = vst [vmem:[#allocation54_spill] sm:$0xff] %v12481_v4  ;;  %v12485_v58 = vadd.f32 %v9339_v61, %v6362_v36  ;;  %v6437_v28 = vsel %vm732_vm0, %v12481_v4, 0.0  ;;  %8824 = vmatpush3.msra.mxu0 %v6653_v5 }
 0xf15   : > { %6438 = vadd.xlane.f32.xlu1 %v6437_v28  ;;  %v6652_v28 = vld [vmem:[%s13214_s19 + $0x10] sm:$0xff] }
 0xf16   : > { %13631 = vst [vmem:[#allocation56_spill] sm:$0xff] %v12485_v58  ;;  %v6434_v52 = vsel %vm732_vm0, %v12485_v58, 0.0  ;;  %8825 = vmatprep.subr.mxu0 %v6652_v28 }
 0xf17   : > { %6435 = vadd.xlane.f32.xlu0 %v6434_v52  ;;  %8826 = vmatpush3.msra.mxu0 %v6652_v28 }
 0xf1b   : > { %v8822_v41 = vpop.f32.mrf.mxu1 }
 0xf1c   : > { %v6377_v43 = vadd.f32 %v8822_v41, %v12405_v10 }
 0xf1d   : > { %v6371_v56 = vpop.f32.mrf.mxu1 }
 0xf1e   : > { %v12493_v0 = vadd.f32 %v9340_v17, %v6377_v43  ;;  %v6372_v51 = vadd.f32 %v12405_v10, %v6371_v56  ;;  %v6651_v43 = vld [vmem:[%s13214_s19 + $0x8] sm:$0xff]  ;;  %v6650_v17 = vld [vmem:[%s13214_s19] sm:$0xff] }
 0xf1f   : > { %8827 = vmatprep.subr.mxu0 %v6651_v43 }
 0xf20   : > { %13632 = vst [vmem:[#allocation12_spill] sm:$0xff] %v12493_v0  ;;  %v12497_v25 = vadd.f32 %v9341_v54, %v6372_v51  ;;  %v6443_v12 = vsel %vm732_vm0, %v12493_v0, 0.0  ;;  %8828 = vmatpush3.msra.mxu0 %v6651_v43 }
 0xf21   : > { %6444 = vadd.xlane.f32.xlu1 %v6443_v12  ;;  %8829 = vmatprep.subr.mxu0 %v6650_v17 }
 0xf22   : > { %13633 = vst [vmem:[#allocation20_spill] sm:$0xff] %v12497_v25  ;;  %v6440_v21 = vsel %vm732_vm0, %v12497_v25, 0.0  ;;  %8830 = vmatpush3.msra.mxu0 %v6650_v17 }
 0xf23   : > { %6441 = vadd.xlane.f32.xlu0 %v6440_v21 }
 0xf58   : > { %v6403_v50 = vpop.xlane.xlu1 %6402 }
 0xf59   : > { %v6447_v47 = vmul.f32 0.03125, %v6403_v50 }
 0xf5a   : > { %v6400_v37 = vpop.xlane.xlu0 %6399 }
 0xf5b   : > { %v12504_v15 = vsub.f32 %v12409_v59, %v6447_v47  ;;  %v6446_v2 = vmul.f32 0.03125, %v6400_v37 }
 0xf5d   : > { %v12507_v10 = vsub.f32 %v12413_v57, %v6446_v2  ;;  %v6479_v35 = vmul.f32 %v12504_v15, %v12504_v15 }
 0xf5f   : > { %v6497_v24 = vsel %vm732_vm0, %v6479_v35, 0.0  ;;  %v6478_v9 = vmul.f32 %v12507_v10, %v12507_v10 }
 0xf60   : > { %6498 = vadd.xlane.f32.xlu1 %v6497_v24 }
 0xf61   : > { %v6494_v39 = vsel %vm732_vm0, %v6478_v9, 0.0 }
 0xf62   : > { %6495 = vadd.xlane.f32.xlu0 %v6494_v39  ;;  %v6409_v53 = vpop.xlane.xlu0 %6408 }
 0xf63   : > { %v6449_v31 = vmul.f32 0.03125, %v6409_v53 }
 0xf65   : > { %v12516_v62 = vsub.f32 %v12421_v3, %v6449_v31 }
 0xf66   : > { %v6406_v19 = vpop.xlane.xlu0 %6405 }
 0xf67   : > { %v6448_v40 = vmul.f32 0.03125, %v6406_v19  ;;  %v6481_v1 = vmul.f32 %v12516_v62, %v12516_v62 }
 0xf69   : > { %v12521_v45 = vsub.f32 %v12425_v14, %v6448_v40  ;;  %v6503_v38 = vsel %vm732_vm0, %v6481_v1, 0.0 }
 0xf6a   : > { %6504 = vadd.xlane.f32.xlu1 %v6503_v38 }
 0xf6b   : > { %v6480_v22 = vmul.f32 %v12521_v45, %v12521_v45 }
 0xf6d   : > { %v6500_v34 = vsel %vm732_vm0, %v6480_v22, 0.0 }
 0xf6e   : > { %v6415_v8 = vpop.xlane.xlu1 %6414  ;;  %6501 = vadd.xlane.f32.xlu0 %v6500_v34 }
 0xf6f   : > { %v6451_v33 = vmul.f32 0.03125, %v6415_v8 }
 0xf70   : > { %v6412_v30 = vpop.xlane.xlu0 %6411 }
 0xf71   : > { %v12528_v49 = vsub.f32 %v12433_v27, %v6451_v33  ;;  %v6450_v44 = vmul.f32 0.03125, %v6412_v30 }
 0xf73   : > { %v12531_v55 = vsub.f32 %v12437_v23, %v6450_v44  ;;  %v6483_v32 = vmul.f32 %v12528_v49, %v12528_v49 }
 0xf75   : > { %v6509_v26 = vsel %vm732_vm0, %v6483_v32, 0.0  ;;  %v6482_v48 = vmul.f32 %v12531_v55, %v12531_v55 }
 0xf76   : > { %6510 = vadd.xlane.f32.xlu1 %v6509_v26 }
 0xf77   : > { %v6506_v29 = vsel %vm732_vm0, %v6482_v48, 0.0 }
 0xf78   : > { %6507 = vadd.xlane.f32.xlu0 %v6506_v29 }
 0xf7a   : > { %v6421_v20 = vpop.xlane.xlu1 %6420 }
 0xf7b   : > { %v6453_v42 = vmul.f32 0.03125, %v6421_v20 }
 0xf7c   : > { %v6418_v63 = vpop.xlane.xlu0 %6417 }
 0xf7d   : > { %v12540_v60 = vsub.f32 %v12445_v6, %v6453_v42  ;;  %v6452_v7 = vmul.f32 0.03125, %v6418_v63 }
 0xf7f   : > { %v12546_v36 = vsub.f32 %v12449_v16, %v6452_v7  ;;  %v6485_v61 = vmul.f32 %v12540_v60, %v12540_v60 }
 0xf81   : > { %v6515_v52 = vsel %vm732_vm0, %v6485_v61, 0.0  ;;  %v6484_v41 = vmul.f32 %v12546_v36, %v12546_v36 }
 0xf82   : > { %6516 = vadd.xlane.f32.xlu1 %v6515_v52 }
 0xf83   : > { %v6512_v56 = vsel %vm732_vm0, %v6484_v41, 0.0 }
 0xf84   : > { %6513 = vadd.xlane.f32.xlu0 %v6512_v56 }
 0xf86   : > { %v6427_v51 = vpop.xlane.xlu1 %6426 }
 0xf87   : > { %v6455_v54 = vmul.f32 0.03125, %v6427_v51 }
 0xf88   : > { %v6424_v12 = vpop.xlane.xlu0 %6423 }
 0xf89   : > { %v12564_v21 = vsub.f32 %v12457_v46, %v6455_v54  ;;  %v6454_v50 = vmul.f32 0.03125, %v6424_v12 }
 0xf8b   : > { %v12567_v47 = vsub.f32 %v12461_v18, %v6454_v50  ;;  %v6487_v37 = vmul.f32 %v12564_v21, %v12564_v21 }
 0xf8d   : > { %v6521_v2 = vsel %vm732_vm0, %v6487_v37, 0.0  ;;  %v6486_v35 = vmul.f32 %v12567_v47, %v12567_v47 }
 0xf8e   : > { %6522 = vadd.xlane.f32.xlu1 %v6521_v2 }
 0xf8f   : > { %v6518_v24 = vsel %vm732_vm0, %v6486_v35, 0.0 }
 0xf90   : > { %6519 = vadd.xlane.f32.xlu0 %v6518_v24 }
 0xf92   : > { %v6433_v9 = vpop.xlane.xlu1 %6432 }
 0xf93   : > { %v6457_v39 = vmul.f32 0.03125, %v6433_v9 }
 0xf94   : > { %v6430_v53 = vpop.xlane.xlu0 %6429 }
 0xf95   : > { %v12576_v31 = vsub.f32 %v12469_v13, %v6457_v39  ;;  %v6456_v19 = vmul.f32 0.03125, %v6430_v53 }
 0xf97   : > { %v12579_v40 = vsub.f32 %v12473_v11, %v6456_v19  ;;  %v6489_v1 = vmul.f32 %v12576_v31, %v12576_v31 }
 0xf99   : > { %v6527_v38 = vsel %vm732_vm0, %v6489_v1, 0.0  ;;  %v6488_v22 = vmul.f32 %v12579_v40, %v12579_v40 }
 0xf9a   : > { %6528 = vadd.xlane.f32.xlu1 %v6527_v38  ;;  %v12614_v38 = vld [vmem:[%s13212_s17] ss:$0 sm:$0xff] }
 0xf9b   : > { %v6524_v34 = vsel %vm732_vm0, %v6488_v22, 0.0 }
 0xf9c   : > { %6525 = vadd.xlane.f32.xlu0 %v6524_v34 }
 0xf9e   : > { %v6439_v8 = vpop.xlane.xlu1 %6438 }
 0xf9f   : > { %v6459_v33 = vmul.f32 0.03125, %v6439_v8 }
 0xfa0   : > { %v6436_v30 = vpop.xlane.xlu0 %6435 }
 0xfa1   : > { %v12588_v44 = vsub.f32 %v12481_v4, %v6459_v33  ;;  %v6458_v32 = vmul.f32 0.03125, %v6436_v30 }
 0xfa3   : > { %v12591_v26 = vsub.f32 %v12485_v58, %v6458_v32  ;;  %v6491_v48 = vmul.f32 %v12588_v44, %v12588_v44  ;;  %v12622_v32 = vld [vmem:[%s13213_s18] ss:$0 sm:$0xff] }
 0xfa5   : > { %v6533_v29 = vsel %vm732_vm0, %v6491_v48, 0.0  ;;  %v6490_v20 = vmul.f32 %v12591_v26, %v12591_v26 }
 0xfa6   : > { %6534 = vadd.xlane.f32.xlu1 %v6533_v29 }
 0xfa7   : > { %v6530_v42 = vsel %vm732_vm0, %v6490_v20, 0.0 }
 0xfa8   : > { %6531 = vadd.xlane.f32.xlu0 %v6530_v42 }
 0xfaa   : > { %v6445_v63 = vpop.xlane.xlu1 %6444 }
 0xfab   : > { %v6461_v7 = vmul.f32 0.03125, %v6445_v63 }
 0xfac   : > { %v6442_v5 = vpop.xlane.xlu0 %6441 }
 0xfad   : > { %v12600_v61 = vsub.f32 %v12493_v0, %v6461_v7  ;;  %v6460_v28 = vmul.f32 0.03125, %v6442_v5 }
 0xfaf   : > { %v12603_v52 = vsub.f32 %v12497_v25, %v6460_v28  ;;  %v6493_v41 = vmul.f32 %v12600_v61, %v12600_v61 }
 0xfb1   : > { %v6539_v43 = vsel %vm732_vm0, %v6493_v41, 0.0  ;;  %v6492_v56 = vmul.f32 %v12603_v52, %v12603_v52 }
 0xfb2   : > { %6540 = vadd.xlane.f32.xlu1 %v6539_v43 }
 0xfb3   : > { %v6536_v17 = vsel %vm732_vm0, %v6492_v56, 0.0 }
 0xfb4   : > { %6537 = vadd.xlane.f32.xlu0 %v6536_v17 }
 0xfe9   : > { %v6499_v51 = vpop.xlane.xlu1 %6498 }
 0xfea   : > { %v6543_v54 = vmul.f32 0.03125, %v6499_v51 }
 0xfeb   : > { %v6496_v12 = vpop.xlane.xlu0 %6495 }
 0xfec   : > { %v6559_v50 = vadd.f32 1e-05, %v6543_v54  ;;  %v6542_v37 = vmul.f32 0.03125, %v6496_v12 }
 0xfee   : > { %9214 = vrsqrt.f32 %v6559_v50  ;;  %v6558_v2 = vadd.f32 1e-05, %v6542_v37 }
 0xff0   : > { %9216 = vrsqrt.f32 %v6558_v2 }
 0xff3   : > { %v6505_v35 = vpop.xlane.xlu1 %6504 }
 0xff4   : > { %v6545_v24 = vmul.f32 0.03125, %v6505_v35 }
 0xff6   : > { %v6561_v9 = vadd.f32 1e-05, %v6545_v24 }
 0xff7   : > { %v6502_v39 = vpop.xlane.xlu0 %6501 }
 0xff8   : > { %9218 = vrsqrt.f32 %v6561_v9  ;;  %v6544_v53 = vmul.f32 0.03125, %v6502_v39 }
 0xffa   : > { %v6560_v19 = vadd.f32 1e-05, %v6544_v53 }
 0xffb   : > { %v9215_v1 = vpop.eup %9214 }
 0xffc   : > { %v6591_v22 = vmul.f32 %v9215_v1, %v12504_v15  ;;  %9220 = vrsqrt.f32 %v6560_v19 }
 0xffd   : > { %v9217_v34 = vpop.eup %9216 }
 0xffe   : > { %v6590_v8 = vmul.f32 %v9217_v34, %v12507_v10  ;;  %v6613_v33 = vmul.f32 %v12614_v38, %v6591_v22 }
 0xfff   : > { %v6511_v30 = vpop.xlane.xlu1 %6510 }
0x1000   : > { %v6547_v48 = vmul.f32 0.03125, %v6511_v30  ;;  %v6612_v29 = vmul.f32 %v12614_v38, %v6590_v8  ;;  %v6635_v7 = vadd.f32 %v12622_v32, %v6613_v33 }
0x1001   : > { %v6508_v20 = vpop.xlane.xlu0 %6507 }
0x1002   : > { %v6563_v42 = vadd.f32 1e-05, %v6547_v48  ;;  %v6546_v63 = vmul.f32 0.03125, %v6508_v20  ;;  %v6634_v15 = vadd.f32 %v12622_v32, %v6612_v29 }
0x1004   : > { %9222 = vrsqrt.f32 %v6563_v42  ;;  %v6562_v10 = vadd.f32 1e-05, %v6546_v63  ;;  %8831 = vmatprep.mubr.msk.f32.mxu0 %vm732_vm0, %v6634_v15 }
0x1005   : > { %v9219_v5 = vpop.eup %9218  ;;  %8832 = vmatmul.mubr.msk.f32.vlgmr.msra.gmra.mxu0 %vm732_vm0, %v6635_v7 }
0x1006   : > { %9224 = vrsqrt.f32 %v6562_v10  ;;  %v6593_v28 = vmul.f32 %v9219_v5, %v12516_v62 }
0x1008   : > { %v6615_v17 = vmul.f32 %v12614_v38, %v6593_v28 }
0x1009   : > { %v9221_v41 = vpop.eup %9220 }
0x100a   : > { %v6592_v43 = vmul.f32 %v9221_v41, %v12521_v45  ;;  %v6637_v35 = vadd.f32 %v12622_v32, %v6615_v17 }
0x100b   : > { %v6517_v56 = vpop.xlane.xlu1 %6516 }
0x100c   : > { %v6549_v51 = vmul.f32 0.03125, %v6517_v56  ;;  %v6614_v54 = vmul.f32 %v12614_v38, %v6592_v43 }
0x100d   : > { %v6514_v12 = vpop.xlane.xlu0 %6513 }
0x100e   : > { %v6565_v50 = vadd.f32 1e-05, %v6549_v51  ;;  %v6548_v37 = vmul.f32 0.03125, %v6514_v12  ;;  %v6636_v2 = vadd.f32 %v12622_v32, %v6614_v54 }
0x1010   : > { %9226 = vrsqrt.f32 %v6565_v50  ;;  %v6564_v24 = vadd.f32 1e-05, %v6548_v37  ;;  %8834 = vmatprep.mubr.msk.f32.mxu0 %vm732_vm0, %v6636_v2 }
0x1011   : > { %v9223_v62 = vpop.eup %9222  ;;  %8835 = vmatmul.mubr.msk.f32.gmra.mxu0 %vm732_vm0, %v6637_v35 }
0x1012   : > { %v6595_v45 = vmul.f32 %v9223_v62, %v12528_v49  ;;  %9228 = vrsqrt.f32 %v6564_v24 }
0x1013   : > { %v9225_v9 = vpop.eup %9224 }
0x1014   : > { %v6594_v39 = vmul.f32 %v9225_v9, %v12531_v55  ;;  %v6617_v53 = vmul.f32 %v12614_v38, %v6595_v45 }
0x1016   : > { %v6616_v19 = vmul.f32 %v12614_v38, %v6594_v39  ;;  %v6639_v33 = vadd.f32 %v12622_v32, %v6617_v53 }
0x1017   : > { %v6523_v1 = vpop.xlane.xlu1 %6522 }
0x1018   : > { %v6551_v22 = vmul.f32 0.03125, %v6523_v1  ;;  %v6638_v34 = vadd.f32 %v12622_v32, %v6616_v19 }
0x1019   : > { %v6520_v8 = vpop.xlane.xlu0 %6519 }
0x101a   : > { %v6567_v30 = vadd.f32 1e-05, %v6551_v22  ;;  %v6550_v48 = vmul.f32 0.03125, %v6520_v8  ;;  %8837 = vmatprep.mubr.msk.f32.mxu0 %vm732_vm0, %v6638_v34 }
0x101b   : > { %8838 = vmatmul.mubr.msk.f32.gmra.mxu0 %vm732_vm0, %v6639_v33 }
0x101c   : > { %9230 = vrsqrt.f32 %v6567_v30  ;;  %v6566_v49 = vadd.f32 1e-05, %v6550_v48 }
0x101d   : > { %v9227_v55 = vpop.eup %9226 }
0x101e   : > { %v6597_v29 = vmul.f32 %v9227_v55, %v12540_v60  ;;  %9232 = vrsqrt.f32 %v6566_v49 }
0x101f   : > { %v9229_v20 = vpop.eup %9228 }
0x1020   : > { %v6596_v42 = vmul.f32 %v9229_v20, %v12546_v36  ;;  %v6619_v63 = vmul.f32 %v12614_v38, %v6597_v29 }
0x1022   : > { %v6618_v15 = vmul.f32 %v12614_v38, %v6596_v42  ;;  %v6641_v41 = vadd.f32 %v12622_v32, %v6619_v63 }
0x1023   : > { %v6529_v7 = vpop.xlane.xlu1 %6528 }
0x1024   : > { %v6553_v10 = vmul.f32 0.03125, %v6529_v7  ;;  %v6640_v5 = vadd.f32 %v12622_v32, %v6618_v15 }
0x1025   : > { %v6526_v28 = vpop.xlane.xlu0 %6525 }
0x1026   : > { %v6569_v43 = vadd.f32 1e-05, %v6553_v10  ;;  %v6552_v56 = vmul.f32 0.03125, %v6526_v28  ;;  %8840 = vmatprep.mubr.msk.f32.mxu0 %vm732_vm0, %v6640_v5 }
0x1027   : > { %8841 = vmatmul.mubr.msk.f32.gmra.mxu0 %vm732_vm0, %v6641_v41 }
0x1028   : > { %9234 = vrsqrt.f32 %v6569_v43  ;;  %v6568_v60 = vadd.f32 1e-05, %v6552_v56 }
0x1029   : > { %v9231_v36 = vpop.eup %9230 }
0x102a   : > { %v6599_v17 = vmul.f32 %v9231_v36, %v12564_v21  ;;  %9236 = vrsqrt.f32 %v6568_v60  ;;  %v7301_v36 = vld [vmem:[%s13216_s21 + $0x78] sm:$0xff] }
0x102b   : > { %v9233_v51 = vpop.eup %9232  ;;  %8855 = vmatprep.subr.mxu1 %v7301_v36 }
0x102c   : > { %v6598_v54 = vmul.f32 %v9233_v51, %v12567_v47  ;;  %v6621_v12 = vmul.f32 %v12614_v38, %v6599_v17  ;;  %8856 = vmatpush3.msra.mxu1 %v7301_v36  ;;  %v7296_v17 = vld [vmem:[%s13216_s21 + $0x50] sm:$0xff]  ;;  %v7295_v51 = vld [vmem:[%s13216_s21 + $0x48] sm:$0xff] }
0x102e   : > { %v6620_v50 = vmul.f32 %v12614_v38, %v6598_v54  ;;  %v6643_v62 = vadd.f32 %v12622_v32, %v6621_v12  ;;  %v7294_v54 = vld [vmem:[%s13216_s21 + $0x40] sm:$0xff]  ;;  %v7293_v12 = vld [vmem:[%s13216_s21 + $0x38] sm:$0xff] }
0x102f   : > { %v6535_v37 = vpop.xlane.xlu1 %6534 }
0x1030   : > { %v6555_v2 = vmul.f32 0.03125, %v6535_v37  ;;  %v6642_v35 = vadd.f32 %v12622_v32, %v6620_v50  ;;  %v7292_v50 = vld [vmem:[%s13216_s21 + $0x30] sm:$0xff]  ;;  %v7291_v37 = vld [vmem:[%s13216_s21 + $0x28] sm:$0xff] }
0x1031   : > { %v6532_v24 = vpop.xlane.xlu0 %6531 }
0x1032   : > { %v6571_v45 = vadd.f32 1e-05, %v6555_v2  ;;  %v6554_v9 = vmul.f32 0.03125, %v6532_v24  ;;  %8843 = vmatprep.mubr.msk.f32.mxu0 %vm732_vm0, %v6642_v35  ;;  %v7290_v2 = vld [vmem:[%s13216_s21 + $0x20] sm:$0xff]  ;;  %v7289_v35 = vld [vmem:[%s13216_s21 + $0x18] sm:$0xff]  ;;  %v7288_v24 = vld [vmem:[%s13216_s21 + $0x10] sm:$0xff] }
0x1033   : > { %8844 = vmatmul.mubr.msk.f32.gmra.mxu0 %vm732_vm0, %v6643_v62  ;;  %v7287_v62 = vld [vmem:[%s13216_s21 + $0x8] sm:$0xff] }
0x1034   : > { %9238 = vrsqrt.f32 %v6571_v45  ;;  %v6570_v21 = vadd.f32 1e-05, %v6554_v9  ;;  %v7286_v45 = vld [vmem:[%s13216_s21] sm:$0xff] }
0x1035   : > { %v9235_v47 = vpop.eup %9234  ;;  %v12736_v9 = vld [vmem:[%s13215_s20] ss:$0 sm:$0xff] }
0x1036   : > { %v6601_v39 = vmul.f32 %v9235_v47, %v12576_v31  ;;  %9240 = vrsqrt.f32 %v6570_v21 }
0x1037   : > { %v9237_v53 = vpop.eup %9236 }
0x1038   : > { %v6600_v19 = vmul.f32 %v9237_v53, %v12579_v40  ;;  %v6623_v1 = vmul.f32 %v12614_v38, %v6601_v39 }
0x103a   : > { %v6622_v22 = vmul.f32 %v12614_v38, %v6600_v19  ;;  %v6645_v48 = vadd.f32 %v12622_v32, %v6623_v1 }
0x103b   : > { %v6541_v34 = vpop.xlane.xlu1 %6540 }
0x103c   : > { %v6557_v8 = vmul.f32 0.03125, %v6541_v34  ;;  %v6644_v33 = vadd.f32 %v12622_v32, %v6622_v22 }
0x103d   : > { %v6538_v30 = vpop.xlane.xlu0 %6537 }
0x103e   : > { %v6573_v49 = vadd.f32 1e-05, %v6557_v8  ;;  %v6556_v55 = vmul.f32 0.03125, %v6538_v30  ;;  %8846 = vmatprep.mubr.msk.f32.mxu0 %vm732_vm0, %v6644_v33 }
0x103f   : > { %8847 = vmatmul.mubr.msk.f32.gmra.mxu0 %vm732_vm0, %v6645_v48 }
0x1040   : > { %9242 = vrsqrt.f32 %v6573_v49  ;;  %v6572_v31 = vadd.f32 1e-05, %v6556_v55 }
0x1041   : > { %v9239_v40 = vpop.eup %9238 }
0x1042   : > { %v6603_v29 = vmul.f32 %v9239_v40, %v12588_v44  ;;  %9244 = vrsqrt.f32 %v6572_v31 }
0x1043   : > { %v9241_v20 = vpop.eup %9240 }
0x1044   : > { %v6602_v42 = vmul.f32 %v9241_v20, %v12591_v26  ;;  %v6625_v63 = vmul.f32 %v12614_v38, %v6603_v29 }
0x1046   : > { %v6624_v15 = vmul.f32 %v12614_v38, %v6602_v42  ;;  %v6647_v10 = vadd.f32 %v12622_v32, %v6625_v63 }
0x1048   : > { %v6646_v7 = vadd.f32 %v12622_v32, %v6624_v15 }
0x104a   : > { %8849 = vmatprep.mubr.msk.f32.mxu0 %vm732_vm0, %v6646_v7 }
0x104b   : > { %8850 = vmatmul.mubr.msk.f32.gmra.mxu0 %vm732_vm0, %v6647_v10 }
0x104d   : > { %v9243_v5 = vpop.eup %9242 }
0x104e   : > { %v6605_v28 = vmul.f32 %v9243_v5, %v12600_v61  ;;  %v7300_v61 = vld [vmem:[%s13216_s21 + $0x70] sm:$0xff] }
0x104f   : > { %v9245_v44 = vpop.eup %9244  ;;  %8857 = vmatprep.subr.mxu1 %v7300_v61 }
0x1050   : > { %v6604_v41 = vmul.f32 %v9245_v44, %v12603_v52  ;;  %v6627_v26 = vmul.f32 %v12614_v38, %v6605_v28  ;;  %8858 = vmatpush3.msra.mxu1 %v7300_v61  ;;  %v7299_v52 = vld [vmem:[%s13216_s21 + $0x68] sm:$0xff] }
0x1051   : > { %8859 = vmatprep.subr.mxu1 %v7299_v52 }
0x1052   : > { %v6626_v43 = vmul.f32 %v12614_v38, %v6604_v41  ;;  %v6649_v60 = vadd.f32 %v12622_v32, %v6627_v26  ;;  %8860 = vmatpush3.msra.mxu1 %v7299_v52  ;;  %v7298_v38 = vld [vmem:[%s13216_s21 + $0x60] sm:$0xff] }
0x1053   : > { %8861 = vmatprep.subr.mxu1 %v7298_v38 }
0x1054   : > { %v6648_v56 = vadd.f32 %v12622_v32, %v6626_v43  ;;  %8862 = vmatpush3.msra.mxu1 %v7298_v38  ;;  %v7297_v32 = vld [vmem:[%s13216_s21 + $0x58] sm:$0xff] }
0x1055   : > { %8863 = vmatprep.subr.mxu1 %v7297_v32 }
0x1056   : > { %8852 = vmatprep.mubr.msk.f32.mxu0 %vm732_vm0, %v6648_v56  ;;  %8864 = vmatpush3.msra.mxu1 %v7297_v32 }
0x1057   : > { %8853 = vmatmul.mubr.msk.f32.gmra.mxu0 %vm732_vm0, %v6649_v60  ;;  %8865 = vmatprep.subr.mxu1 %v7296_v17 }
0x1058   : > { %8866 = vmatpush3.msra.mxu1 %v7296_v17 }
0x1059   : > { %8867 = vmatprep.subr.mxu1 %v7295_v51 }
0x105a   : > { %8868 = vmatpush3.msra.mxu1 %v7295_v51 }
0x105b   : > { %8869 = vmatprep.subr.mxu1 %v7294_v54 }
0x105c   : > { %8870 = vmatpush3.msra.mxu1 %v7294_v54 }
0x105d   : > { %8871 = vmatprep.subr.mxu1 %v7293_v12 }
0x105e   : > { %8872 = vmatpush3.msra.mxu1 %v7293_v12 }
0x105f   : > { %8873 = vmatprep.subr.mxu1 %v7292_v50 }
0x1060   : > { %8874 = vmatpush3.msra.mxu1 %v7292_v50 }
0x1061   : > { %8875 = vmatprep.subr.mxu1 %v7291_v37 }
0x1062   : > { %8876 = vmatpush3.msra.mxu1 %v7291_v37 }
0x1063   : > { %8877 = vmatprep.subr.mxu1 %v7290_v2 }
0x1064   : > { %8878 = vmatpush3.msra.mxu1 %v7290_v2 }
0x1065   : > { %8879 = vmatprep.subr.mxu1 %v7289_v35 }
0x1066   : > { %8880 = vmatpush3.msra.mxu1 %v7289_v35 }
0x1067   : > { %8881 = vmatprep.subr.mxu1 %v7288_v24 }
0x1068   : > { %8882 = vmatpush3.msra.mxu1 %v7288_v24 }
0x1069   : > { %8883 = vmatprep.subr.mxu1 %v7287_v62 }
0x106a   : > { %8884 = vmatpush3.msra.mxu1 %v7287_v62 }
0x106b   : > { %8885 = vmatprep.subr.mxu1 %v7286_v45 }
0x106c   : > { %8886 = vmatpush3.msra.mxu1 %v7286_v45 }
0x10c5   : > { %v8833_v21 = vpop.f32.mrf.mxu0 }
0x10c6   : > { %v12739_v47 = vadd.f32 %v8833_v21, %v12736_v9 }
0x10c7   : > { %v6775_v39 = vpop.f32.mrf.mxu0 }
0x10c8   : > { %v12742_v53 = vmul.f32 0.70710677, %v12739_v47  ;;  %v12745_v19 = vadd.f32 %v12736_v9, %v6775_v39 }
0x10ca   : > { %v6903_v1 = vand.u32 2147483647, %v12742_v53  ;;  %v12749_v22 = vmul.f32 0.70710677, %v12745_v19  ;;  %vm6871_vm6 = vcmp.ge.f32.partialorder %v12742_v53, 0.0 }
0x10cc   : > { %v6919_v34 = vmul.f32 0.3275911, %v6903_v1  ;;  %v6902_v8 = vand.u32 2147483647, %v12749_v22  ;;  %v7127_v7 = vsub.f32 0.0, %v6903_v1  ;;  %vm6870_vm7 = vcmp.ge.f32.partialorder %v12749_v22, 0.0 }
0x10cd   : > { %v13356_v22 = vmov -1.0  }
0x10ce   : > { %v6935_v33 = vadd.f32 1.0, %v6919_v34  ;;  %v6918_v30 = vmul.f32 0.3275911, %v6902_v8  ;;  %v7126_v44 = vsub.f32 0.0, %v6902_v8  ;;  %v7143_v26 = vmul.f32 %v7127_v7, %v6903_v1 }
0x10d0   : > { %9246 = vrcp.f32 %v6935_v33  ;;  %v6934_v48 = vadd.f32 1.0, %v6918_v30  ;;  %v7142_v38 = vmul.f32 %v7126_v44, %v6902_v8  ;;  %v7160_v17 = vmul.f32 1.442695, %v7143_v26 }
0x10d1   : > { %v8836_v49 = vpop.f32.mrf.mxu0  ;;  %v12813_v44 = vsel %vm6871_vm6, 1.0, %v13356_v22 }
0x10d2   : > { %v12753_v55 = vadd.f32 %v8836_v49, %v12736_v9  ;;  %9248 = vrcp.f32 %v6934_v48  ;;  %v7158_v24 = vmul.f32 1.442695, %v7142_v38 }
0x10d3   : > { %v6785_v31 = vpop.f32.mrf.mxu0 }
0x10d4   : > { %v12756_v40 = vmul.f32 0.70710677, %v12753_v55  ;;  %v12759_v29 = vadd.f32 %v12736_v9, %v6785_v31 }
0x10d6   : > { %v12762_v20 = vand.u32 2147483647, %v12756_v40  ;;  %v12765_v42 = vmul.f32 0.70710677, %v12759_v29  ;;  %vm6873_vm8 = vcmp.ge.f32.partialorder %v12756_v40, 0.0 }
0x10d8   : > { %v6921_v63 = vmul.f32 0.3275911, %v12762_v20  ;;  %v12769_v15 = vand.u32 2147483647, %v12765_v42  ;;  %vm6872_vm9 = vcmp.ge.f32.partialorder %v12765_v42, 0.0 }
0x10d9   : > { %v12852_v40 = vsel %vm6872_vm9, 1.0, %v13356_v22 }
0x10da   : > { %v6937_v10 = vadd.f32 1.0, %v6921_v63  ;;  %v6920_v5 = vmul.f32 0.3275911, %v12769_v15  ;;  %v7129_v63 = vsub.f32 0.0, %v12762_v20 }
0x10db   : > { %v8839_v28 = vpop.f32.mrf.mxu0 }
0x10dc   : > { %9250 = vrcp.f32 %v6937_v10  ;;  %v12773_v43 = vadd.f32 %v8839_v28, %v12736_v9  ;;  %v6936_v60 = vadd.f32 1.0, %v6920_v5  ;;  %v12806_v10 = vmul.f32 0.5, %v12739_v47 }
0x10dd   : > { %v9247_v41 = vpop.eup %9246  ;;  %v6795_v32 = vpop.f32.mrf.mxu0  ;;  %v12809_v5 = vmul.f32 0.5, %v12745_v19  ;;  %v12821_v47 = vmul.f32 0.5, %v12753_v55 }
0x10de   : > { %v6983_v56 = vmul.f32 1.0614054, %v9247_v41  ;;  %v12776_v36 = vmul.f32 0.70710677, %v12773_v43  ;;  %9252 = vrcp.f32 %v6936_v60  ;;  %v12786_v37 = vadd.f32 %v12736_v9, %v6795_v32 }
0x10df   : > { %v12778_v61 = vpop.eup %9248  ;;  %9254 = vpow2.f32 %v7160_v17  ;;  %v7128_v60 = vsub.f32 0.0, %v12769_v15  ;;  %v7145_v32 = vmul.f32 %v7129_v63, %v12762_v20  ;;  %v12838_v20 = vsel %vm6873_vm8, 1.0, %v13356_v22 }
0x10e0   : > { %v6999_v52 = vadd.f32 -1.4531521, %v6983_v56  ;;  %v12781_v51 = vand.u32 2147483647, %v12776_v36  ;;  %v6982_v54 = vmul.f32 1.0614054, %v12778_v61 }
0x10e1   : > { %v12790_v39 = vmul.f32 0.70710677, %v12786_v37  ;;  %vm6875_vm10 = vcmp.ge.f32.partialorder %v12776_v36, 0.0 }
0x10e2   : > { %v7015_v12 = vmul.f32 %v9247_v41, %v6999_v52  ;;  %v6923_v50 = vmul.f32 0.3275911, %v12781_v51  ;;  %v6998_v2 = vadd.f32 -1.4531521, %v6982_v54  ;;  %v12817_v52 = vsel %vm6870_vm7, 1.0, %v13356_v22 }
0x10e3   : > { %v6906_v53 = vand.u32 2147483647, %v12790_v39  ;;  %vm6874_vm11 = vcmp.ge.f32.partialorder %v12790_v39, 0.0 }
0x10e4   : > { %v7031_v35 = vadd.f32 1.4214138, %v7015_v12  ;;  %v6939_v62 = vadd.f32 1.0, %v6923_v50  ;;  %v7014_v45 = vmul.f32 %v12778_v61, %v6998_v2  ;;  %v7131_v2 = vsub.f32 0.0, %v12781_v51 }
0x10e6   : > { %v7047_v21 = vmul.f32 %v9247_v41, %v7031_v35  ;;  %9256 = vrcp.f32 %v6939_v62  ;;  %v7030_v34 = vadd.f32 1.4214138, %v7014_v45  ;;  %v6922_v35 = vmul.f32 0.3275911, %v6906_v53 }
0x10e7   : > { %v8842_v1 = vpop.f32.mrf.mxu0  ;;  %9258 = vpow2.f32 %v7158_v24  ;;  %v7144_v62 = vmul.f32 %v7128_v60, %v12769_v15  ;;  %v7130_v45 = vsub.f32 0.0, %v6906_v53 }
0x10e8   : > { %v7063_v8 = vadd.f32 -0.28449672, %v7047_v21  ;;  %v12793_v33 = vadd.f32 %v8842_v1, %v12736_v9  ;;  %v7046_v48 = vmul.f32 %v12778_v61, %v7030_v34  ;;  %v12841_v1 = vmul.f32 0.5, %v12759_v29 }
0x10e9   : > { %v12795_v30 = vpop.eup %9250  ;;  %v6805_v17 = vpop.f32.mrf.mxu0  ;;  %v7147_v29 = vmul.f32 %v7131_v2, %v12781_v51  ;;  %v6938_v60 = vadd.f32 1.0, %v6922_v35 }
0x10ea   : > { %v7079_v49 = vmul.f32 %v9247_v41, %v7063_v8  ;;  %v6985_v31 = vmul.f32 1.0614054, %v12795_v30  ;;  %v12803_v7 = vmul.f32 0.70710677, %v12793_v33  ;;  %v7062_v28 = vadd.f32 -0.28449672, %v7046_v48 }
0x10eb   : > { %v12830_v12 = vpop.eup %9252  ;;  %v7168_v35 = vmul.f32 1.442695, %v7147_v29  ;;  %v12886_v29 = vmul.f32 0.5, %v12786_v37  ;;  %v12896_v37 = vmul.f32 0.5, %v12793_v33 }
0x10ec   : > { %v7095_v26 = vadd.f32 0.2548296, %v7079_v49  ;;  %v7001_v56 = vadd.f32 -1.4531521, %v6985_v31  ;;  %v12824_v19 = vand.u32 2147483647, %v12803_v7  ;;  %v7078_v54 = vmul.f32 %v12778_v61, %v7062_v28  ;;  %v9255_v8 = vpop.eup %9254 }
0x10ed   : > { %v7164_v49 = vmul.f32 1.442695, %v7145_v32  ;;  %v6984_v31 = vmul.f32 1.0614054, %v12830_v12  ;;  %vm6877_vm12 = vcmp.ge.f32.partialorder %v12803_v7, 0.0 }
0x10ee   : > { %v7017_v38 = vmul.f32 %v12795_v30, %v7001_v56  ;;  %v7111_v50 = vmul.f32 %v9247_v41, %v7095_v26  ;;  %v6925_v55 = vmul.f32 0.3275911, %v12824_v19  ;;  %v7094_v21 = vadd.f32 0.2548296, %v7078_v54 }
0x10ef   : > { %v12844_v41 = vadd.f32 %v12736_v9, %v6805_v17  ;;  %v7162_v56 = vmul.f32 1.442695, %v7144_v62  ;;  %v7000_v2 = vadd.f32 -1.4531521, %v6984_v31 }
0x10f0   : > { %v7033_v24 = vadd.f32 1.4214138, %v7017_v38  ;;  %v6941_v34 = vadd.f32 1.0, %v6925_v55  ;;  %v7110_v15 = vmul.f32 %v12778_v61, %v7094_v21  ;;  %v7191_v63 = vmul.f32 %v9255_v8, %v7111_v50 }
0x10f1   : > { %v7146_v38 = vmul.f32 %v7130_v45, %v6906_v53  ;;  %v12862_v42 = vmul.f32 0.70710677, %v12844_v41  ;;  %v12868_v53 = vmul.f32 0.5, %v12773_v43 }
0x10f2   : > { %v7049_v48 = vmul.f32 %v12795_v30, %v7033_v24  ;;  %9260 = vrcp.f32 %v6941_v34  ;;  %v7207_v55 = vsub.f32 1.0, %v7191_v63  ;;  %v12883_v63 = vsel %vm6875_vm10, 1.0, %v13356_v22 }
0x10f3   : > { %v8845_v28 = vpop.f32.mrf.mxu0  ;;  %v12855_v26 = vpop.eup %9256  ;;  %9262 = vpow2.f32 %v7164_v49  ;;  %v7166_v62 = vmul.f32 1.442695, %v7146_v38  ;;  %v6908_v8 = vand.u32 2147483647, %v12862_v42  ;;  %vm6876_vm13 = vcmp.ge.f32.partialorder %v12862_v42, 0.0 }
0x10f4   : > { %v12858_v32 = vadd.f32 %v8845_v28, %v12736_v9  ;;  %v9259_v61 = vpop.eup %9258  ;;  %v7065_v17 = vadd.f32 -0.28449672, %v7049_v48  ;;  %v6987_v54 = vmul.f32 1.0614054, %v12855_v26  ;;  %9264 = vpow2.f32 %v7162_v56 }
0x10f5   : > { %v7190_v50 = vmul.f32 %v9259_v61, %v7110_v15  ;;  %9266 = vrcp.f32 %v6938_v60  ;;  %v7133_v48 = vsub.f32 0.0, %v12824_v19  ;;  %v7016_v15 = vmul.f32 %v12830_v12, %v7000_v2  ;;  %v6815_v38 = vpop.f32.mrf.mxu0 }
0x10f6   : > { %v12865_v51 = vmul.f32 0.70710677, %v12858_v32  ;;  %v7003_v24 = vadd.f32 -1.4531521, %v6987_v54  ;;  %v7081_v21 = vmul.f32 %v12795_v30, %v7065_v17  ;;  %v7223_v36 = vmul.f32 %v7207_v55, %v12813_v44 }
0x10f7   : > { %v7206_v43 = vsub.f32 1.0, %v7190_v50  ;;  %9268 = vpow2.f32 %v7168_v35  ;;  %v7132_v60 = vsub.f32 0.0, %v6908_v8  ;;  %v12891_v44 = vsel %vm6874_vm11, 1.0, %v13356_v22 }
0x10f8   : > { %v12872_v45 = vand.u32 2147483647, %v12865_v51  ;;  %v7019_v34 = vmul.f32 %v12855_v26, %v7003_v24  ;;  %9270 = vpow2.f32 %v7166_v62  ;;  %v7097_v56 = vadd.f32 0.2548296, %v7081_v21 }
0x10f9   : > { %v7222_v61 = vmul.f32 %v7206_v43, %v12817_v52  ;;  %v7149_v39 = vmul.f32 %v7133_v48, %v12824_v19  ;;  %v7032_v17 = vadd.f32 1.4214138, %v7016_v15  ;;  %v7255_v54 = vadd.f32 1.0, %v7223_v36 }
0x10fa   : > { %v6927_v49 = vmul.f32 0.3275911, %v12872_v45  ;;  %v7035_v31 = vadd.f32 1.4214138, %v7019_v34  ;;  %v12901_v24 = vsel %vm6877_vm12, 1.0, %v13356_v22  ;;  %v7113_v62 = vmul.f32 %v12795_v30, %v7097_v56 }
0x10fb   : > { %v7254_v2 = vadd.f32 1.0, %v7222_v61  ;;  %v6924_v52 = vmul.f32 0.3275911, %v6908_v8  ;;  %v7048_v19 = vmul.f32 %v12830_v12, %v7032_v17  ;;  %v7148_v34 = vmul.f32 %v7132_v60, %v6908_v8 }
0x10fc   : > { %v6943_v28 = vadd.f32 1.0, %v6927_v49  ;;  %v7051_v50 = vmul.f32 %v12855_v26, %v7035_v31  ;;  %v6816_v33 = vadd.f32 %v12736_v9, %v6815_v38  ;;  %v7172_v49 = vmul.f32 1.442695, %v7149_v39 }
0x10fd   : > { %v7270_v43 = vmul.f32 %v7254_v2, %v12809_v5  ;;  %v7271_v31 = vmul.f32 %v7255_v54, %v12806_v10  ;;  %v6940_v8 = vadd.f32 1.0, %v6924_v52  ;;  %v12920_v56 = vmul.f32 0.5, %v12844_v41 }
0x10fe   : > { %9272 = vrcp.f32 %v6943_v28  ;;  %v7067_v28 = vadd.f32 -0.28449672, %v7051_v50  ;;  %v7064_v5 = vadd.f32 -0.28449672, %v7048_v19  ;;  %v7170_v2 = vmul.f32 1.442695, %v7148_v34 }
0x10ff   : > { %v8848_v55 = vpop.f32.mrf.mxu0  ;;  %v12898_v7 = vpop.eup %9260  ;;  %8887 = vmatprep.mubr.f32.mxu1 %v7270_v43  ;;  %v6862_v10 = vmul.f32 0.70710677, %v6816_v33  ;;  %9274 = vpow2.f32 %v7172_v49  ;;  %v12931_v41 = vsel %vm6876_vm13, 1.0, %v13356_v22  ;;  %vm6879_vm14 = vcmp.ge.f32.partialorder %v12865_v51, 0.0 }
0x1100   : > { %v12904_v35 = vadd.f32 %v8848_v55, %v12736_v9  ;;  %v6989_v21 = vmul.f32 1.0614054, %v12898_v7  ;;  %v9263_v36 = vpop.eup %9262  ;;  %8888 = vmatmul.mubr.f32.vlgmr.msra.gmra.mxu1 %v7271_v31  ;;  %v7080_v55 = vmul.f32 %v12830_v12, %v7064_v5  ;;  %v7083_v52 = vmul.f32 %v12855_v26, %v7067_v28 }
0x1101   : > { %v6825_v48 = vpop.f32.mrf.mxu0  ;;  %v9265_v38 = vpop.eup %9264  ;;  %v7193_v39 = vmul.f32 %v9263_v36, %v7113_v62  ;;  %v7135_v62 = vsub.f32 0.0, %v12872_v45  ;;  %9276 = vrcp.f32 %v6940_v8  ;;  %v6910_v31 = vand.u32 2147483647, %v6862_v10 }
0x1102   : > { %v12913_v15 = vmul.f32 0.70710677, %v12904_v35  ;;  %v7005_v61 = vadd.f32 -1.4531521, %v6989_v21  ;;  %v12917_v30 = vadd.f32 %v12736_v9, %v6825_v48  ;;  %v12926_v54 = vpop.eup %9266  ;;  %v7096_v42 = vadd.f32 0.2548296, %v7080_v55 }
0x1103   : > { %v7209_v43 = vsub.f32 1.0, %v7193_v39  ;;  %9278 = vpow2.f32 %v7170_v2  ;;  %v12945_v28 = vmul.f32 0.5, %v12858_v32  ;;  %vm6878_vm15 = vcmp.ge.f32.partialorder %v6862_v10, 0.0 }
0x1104   : > { %v12923_v60 = vand.u32 2147483647, %v12913_v15  ;;  %v7021_v17 = vmul.f32 %v12898_v7, %v7005_v61  ;;  %v12938_v21 = vmul.f32 0.70710677, %v12917_v30  ;;  %v9269_v34 = vpop.eup %9268  ;;  %v7112_v61 = vmul.f32 %v12830_v12, %v7096_v42 }
0x1105   : > { %v12941_v49 = vpop.eup %9270  ;;  %v7099_v8 = vadd.f32 0.2548296, %v7083_v52  ;;  %v12951_v51 = vsel %vm6879_vm14, 1.0, %v13356_v22  ;;  %v7225_v12 = vmul.f32 %v7209_v43, %v12838_v20  ;;  %v12963_v52 = vsel %vm6878_vm15, 1.0, %v13356_v22 }
0x1106   : > { %v6929_v50 = vmul.f32 0.3275911, %v12923_v60  ;;  %v7037_v19 = vadd.f32 1.4214138, %v7021_v17  ;;  %v7151_v17 = vmul.f32 %v7135_v62, %v12872_v45  ;;  %v12955_v39 = vand.u32 2147483647, %v12938_v21 }
0x1107   : > { %v7192_v55 = vmul.f32 %v9265_v38, %v7112_v61  ;;  %v7134_v42 = vsub.f32 0.0, %v6910_v31  ;;  %v7115_v38 = vmul.f32 %v12855_v26, %v7099_v8  ;;  %v6986_v20 = vmul.f32 1.0614054, %v12926_v54 }
0x1108   : > { %v6945_v48 = vadd.f32 1.0, %v6929_v50  ;;  %v7053_v36 = vmul.f32 %v12898_v7, %v7037_v19  ;;  %v6926_v19 = vmul.f32 0.3275911, %v6910_v31  ;;  %v6928_v61 = vmul.f32 0.3275911, %v12955_v39 }
0x1109   : > { %v7208_v25 = vsub.f32 1.0, %v7192_v55  ;;  %v7257_v55 = vadd.f32 1.0, %v7225_v12  ;;  %v7150_v8 = vmul.f32 %v7134_v42, %v6910_v31  ;;  %v7195_v18 = vmul.f32 %v9269_v34, %v7115_v38 }
0x110a   : > { %9280 = vrcp.f32 %v6945_v48  ;;  %v7069_v50 = vadd.f32 -0.28449672, %v7053_v36  ;;  %v12965_v48 = vmul.f32 0.5, %v6816_v33  ;;  %v7176_v33 = vmul.f32 1.442695, %v7151_v17 }
0x110b   : > { %v12948_v5 = vpop.eup %9272  ;;  %v8851_v2 = vpop.f32.mrf.mxu0  ;;  %v7224_v22 = vmul.f32 %v7208_v25, %v12852_v40  ;;  %v6942_v58 = vadd.f32 1.0, %v6926_v19  ;;  %v7002_v25 = vadd.f32 -1.4531521, %v6986_v20  ;;  %v7273_v31 = vmul.f32 %v7257_v55, %v12821_v47 }
0x110c   : > { %v6991_v32 = vmul.f32 1.0614054, %v12948_v5  ;;  %v12959_v10 = vadd.f32 %v8851_v2, %v12736_v9  ;;  %v7085_v43 = vmul.f32 %v12898_v7, %v7069_v50  ;;  %v9275_v13 = vpop.eup %9274  ;;  %v6944_v50 = vadd.f32 1.0, %v6928_v61 }
0x110d   : > { %v6835_v45 = vpop.f32.mrf.mxu0  ;;  %v7256_v4 = vadd.f32 1.0, %v7224_v22  ;;  %9282 = vpow2.f32 %v7176_v33  ;;  %v7174_v34 = vmul.f32 1.442695, %v7150_v8  ;;  %vm6881_vm1 = vcmp.ge.f32.partialorder %v12913_v15, 0.0 }
0x110e   : > { %v7007_v62 = vadd.f32 -1.4531521, %v6991_v32  ;;  %v12968_v36 = vmul.f32 0.70710677, %v12959_v10  ;;  %v12973_v2 = vadd.f32 %v12736_v9, %v6835_v45  ;;  %v7137_v45 = vsub.f32 0.0, %v12923_v60 }
0x110f   : > { %v7101_v40 = vadd.f32 0.2548296, %v7085_v43  ;;  %v7272_v12 = vmul.f32 %v7256_v4, %v12841_v1  ;;  %9284 = vrcp.f32 %v6942_v58  ;;  %v7018_v38 = vmul.f32 %v12926_v54, %v7002_v25 }
0x1110   : > { %v6915_v32 = vand.u32 2147483647, %v12968_v36  ;;  %v7023_v0 = vmul.f32 %v12948_v5, %v7007_v62  ;;  %v12981_v26 = vmul.f32 0.70710677, %v12973_v2  ;;  %v12988_v62 = vpop.eup %9276  ;;  %v7153_v4 = vmul.f32 %v7137_v45, %v12923_v60 }
0x1111   : > { %v12992_v46 = vpop.eup %9278  ;;  %8890 = vmatprep.mubr.f32.mxu1 %v7272_v12  ;;  %v7117_v47 = vmul.f32 %v12898_v7, %v7101_v40  ;;  %v7136_v20 = vsub.f32 0.0, %v12955_v39  ;;  %v7034_v43 = vadd.f32 1.4214138, %v7018_v38  ;;  %v6988_v7 = vmul.f32 1.0614054, %v12988_v62 }
0x1112   : > { %v6931_v11 = vmul.f32 0.3275911, %v6915_v32  ;;  %v12985_v17 = vand.u32 2147483647, %v12981_v26  ;;  %v7039_v42 = vadd.f32 1.4214138, %v7023_v0  ;;  %8891 = vmatmul.mubr.f32.gmra.mxu1 %v7273_v31 }
0x1113   : > { %v7139_v55 = vsub.f32 0.0, %v6915_v32  ;;  %v7050_v45 = vmul.f32 %v12926_v54, %v7034_v43  ;;  %v7180_v40 = vmul.f32 1.442695, %v7153_v4  ;;  %v7152_v31 = vmul.f32 %v7136_v20, %v12955_v39 }
0x1114   : > { %v6947_v19 = vadd.f32 1.0, %v6931_v11  ;;  %v6930_v22 = vmul.f32 0.3275911, %v12985_v17  ;;  %v7211_v11 = vsub.f32 1.0, %v7195_v18  ;;  %v7055_v33 = vmul.f32 %v12948_v5, %v7039_v42 }
0x1115   : > { %v7066_v42 = vadd.f32 -0.28449672, %v7050_v45  ;;  %v7197_v38 = vmul.f32 %v9275_v13, %v7117_v47  ;;  %vm6880_vm2 = vcmp.ge.f32.partialorder %v12938_v21, 0.0  ;;  %vm6883_vm3 = vcmp.ge.f32.partialorder %v12968_v36, 0.0 }
0x1116   : > { %9286 = vrcp.f32 %v6947_v19  ;;  %v6946_v0 = vadd.f32 1.0, %v6930_v22  ;;  %v7227_v25 = vmul.f32 %v7211_v11, %v12883_v63  ;;  %v7155_v63 = vmul.f32 %v7139_v55, %v6915_v32 }
0x1117   : > { %v12996_v61 = vpop.eup %9280  ;;  %9288 = vrcp.f32 %v6944_v50  ;;  %v8854_v58 = vpop.f32.mrf.mxu0  ;;  %v7071_v11 = vadd.f32 -0.28449672, %v7055_v33  ;;  %v7178_v32 = vmul.f32 1.442695, %v7152_v31  ;;  %v7213_v55 = vsub.f32 1.0, %v7197_v38 }
0x1118   : > { %v6993_v1 = vmul.f32 1.0614054, %v12996_v61  ;;  %9290 = vrcp.f32 %v6946_v0  ;;  %v13004_v8 = vadd.f32 %v8854_v58, %v12736_v9  ;;  %v7082_v58 = vmul.f32 %v12926_v54, %v7066_v42 }
0x1119   : > { %v6845_v18 = vpop.f32.mrf.mxu0  ;;  %9292 = vpow2.f32 %v7174_v34  ;;  %v7259_v39 = vadd.f32 1.0, %v7227_v25  ;;  %v7138_v33 = vsub.f32 0.0, %v12985_v17  ;;  %v7184_v25 = vmul.f32 1.442695, %v7155_v63 }
0x111a   : > { %v7009_v60 = vadd.f32 -1.4531521, %v6993_v1  ;;  %v13008_v50 = vadd.f32 %v12736_v9, %v6845_v18  ;;  %v13013_v12 = vmul.f32 0.70710677, %v13004_v8  ;;  %v13634_v9 = vmov -1.0   ;;  %v9283_v43 = vpop.eup %9282 }
0x111b   : > { %v13023_v0 = vsel %vm6881_vm1, 1.0, %v13634_v9  ;;  %v7004_v1 = vadd.f32 -1.4531521, %v6988_v7  ;;  %9294 = vpow2.f32 %v7180_v40  ;;  %v7098_v47 = vadd.f32 0.2548296, %v7082_v58 }
0x111c   : > { %v7025_v19 = vmul.f32 %v12996_v61, %v7009_v60  ;;  %v13018_v22 = vmul.f32 0.70710677, %v13008_v50  ;;  %v13026_v34 = vand.u32 2147483647, %v13013_v12  ;;  %v13037_v45 = vpop.eup %9284  ;;  %v7087_v7 = vmul.f32 %v12948_v5, %v7071_v11 }
0x111d   : > { %v7020_v42 = vmul.f32 %v12988_v62, %v7004_v1  ;;  %v7275_v40 = vmul.f32 %v7259_v39, %v12868_v53  ;;  %v13048_v31 = vsel %vm6880_vm2, 1.0, %v13634_v9  ;;  %v7229_v11 = vmul.f32 %v7213_v55, %v12901_v24 }
0x111e   : > { %v7041_v4 = vadd.f32 1.4214138, %v7025_v19  ;;  %v6933_v20 = vmul.f32 0.3275911, %v13026_v34  ;;  %v13032_v13 = vand.u32 2147483647, %v13018_v22  ;;  %v7114_v19 = vmul.f32 %v12926_v54, %v7098_v47 }
0x111f   : > { %v7154_v1 = vmul.f32 %v7138_v33, %v12985_v17  ;;  %v7036_v53 = vadd.f32 1.4214138, %v7020_v42  ;;  %v6990_v39 = vmul.f32 1.0614054, %v13037_v45  ;;  %v7103_v47 = vadd.f32 0.2548296, %v7087_v7 }
0x1120   : > { %v7057_v15 = vmul.f32 %v12996_v61, %v7041_v4  ;;  %v6949_v18 = vadd.f32 1.0, %v6933_v20  ;;  %v6932_v60 = vmul.f32 0.3275911, %v13032_v13  ;;  %v7194_v54 = vmul.f32 %v12941_v49, %v7114_v19 }
0x1121   : > { %v7141_v33 = vsub.f32 0.0, %v13026_v34  ;;  %vm6882_vm4 = vcmp.ge.f32.partialorder %v12981_v26, 0.0  ;;  %v7249_v26 = vmul.f32 0.5, %v12904_v35  ;;  %vm6885_vm5 = vcmp.ge.f32.partialorder %v13013_v12, 0.0 }
0x1122   : > { %9296 = vrcp.f32 %v6949_v18  ;;  %v6948_v38 = vadd.f32 1.0, %v6932_v60  ;;  %v7073_v20 = vadd.f32 -0.28449672, %v7057_v15  ;;  %v7210_v60 = vsub.f32 1.0, %v7194_v54 }
0x1123   : > { %v13042_v4 = vpop.eup %9286  ;;  %9298 = vpow2.f32 %v7178_v32  ;;  %v7052_v15 = vmul.f32 %v12988_v62, %v7036_v53  ;;  %v7006_v32 = vadd.f32 -1.4531521, %v6990_v39  ;;  %v7182_v54 = vmul.f32 1.442695, %v7154_v1 }
0x1124   : > { %v13050_v58 = vpop.eup %9288  ;;  %v6995_v63 = vmul.f32 1.0614054, %v13042_v4  ;;  %9300 = vpow2.f32 %v7184_v25  ;;  %v7089_v24 = vmul.f32 %v12996_v61, %v7073_v20  ;;  %v7226_v55 = vmul.f32 %v7210_v60, %v12891_v44 }
0x1125   : > { %v13057_v21 = vpop.eup %9290  ;;  %9302 = vrcp.f32 %v6948_v38  ;;  %v6992_v16 = vmul.f32 1.0614054, %v13050_v58  ;;  %v7068_v7 = vadd.f32 -0.28449672, %v7052_v15  ;;  %v7022_v25 = vmul.f32 %v13037_v45, %v7006_v32 }
0x1126   : > { %v7011_v18 = vadd.f32 -1.4531521, %v6995_v63  ;;  %v13061_v49 = vpop.eup %9292  ;;  %v6994_v42 = vmul.f32 1.0614054, %v13057_v21  ;;  %v7119_v38 = vmul.f32 %v12948_v5, %v7103_v47  ;;  %v7258_v53 = vadd.f32 1.0, %v7226_v55 }
0x1127   : > { %v7008_v19 = vadd.f32 -1.4531521, %v6992_v16  ;;  %v7084_v39 = vmul.f32 %v12988_v62, %v7068_v7  ;;  %v7038_v20 = vadd.f32 1.4214138, %v7022_v25  ;;  %v7105_v44 = vadd.f32 0.2548296, %v7089_v24 }
0x1128   : > { %v7027_v17 = vmul.f32 %v13042_v4, %v7011_v18  ;;  %v7010_v6 = vadd.f32 -1.4531521, %v6994_v42  ;;  %v7274_v15 = vmul.f32 %v7258_v53, %v12886_v29  ;;  %v7157_v16 = vmul.f32 %v7141_v33, %v13026_v34  ;;  %v9295_v32 = vpop.eup %9294 }
0x1129   : > { %v7024_v18 = vmul.f32 %v13050_v58, %v7008_v19  ;;  %v7100_v23 = vadd.f32 0.2548296, %v7084_v39  ;;  %v7054_v5 = vmul.f32 %v13037_v45, %v7038_v20  ;;  %9304 = vpow2.f32 %v7182_v54 }
0x112a   : > { %v7043_v63 = vadd.f32 1.4214138, %v7027_v17  ;;  %v7026_v1 = vmul.f32 %v13057_v21, %v7010_v6  ;;  %v7199_v17 = vmul.f32 %v9283_v43, %v7119_v38  ;;  %8893 = vmatprep.mubr.f32.mxu1 %v7274_v15  ;;  %v7140_v7 = vsub.f32 0.0, %v13032_v13 }
0x112b   : > { %v7040_v47 = vadd.f32 1.4214138, %v7024_v18  ;;  %8894 = vmatmul.mubr.f32.gmra.mxu1 %v7275_v40  ;;  %v7116_v24 = vmul.f32 %v12988_v62, %v7100_v23  ;;  %v7070_v25 = vadd.f32 -0.28449672, %v7054_v5  ;;  %v7261_v19 = vadd.f32 1.0, %v7229_v11 }
0x112c   : > { %v7059_v60 = vmul.f32 %v13042_v4, %v7043_v63  ;;  %v7042_v34 = vadd.f32 1.4214138, %v7026_v1  ;;  %v7121_v42 = vmul.f32 %v12996_v61, %v7105_v44  ;;  %v7188_v43 = vmul.f32 1.442695, %v7157_v16 }
0x112d   : > { %v7056_v29 = vmul.f32 %v13050_v58, %v7040_v47  ;;  %v7196_v54 = vmul.f32 %v12992_v46, %v7116_v24  ;;  %v7086_v40 = vmul.f32 %v13037_v45, %v7070_v25  ;;  %v7215_v62 = vsub.f32 1.0, %v7199_v17 }
0x112e   : > { %v7075_v55 = vadd.f32 -0.28449672, %v7059_v60  ;;  %v7156_v39 = vmul.f32 %v7140_v7, %v13032_v13  ;;  %v7058_v20 = vmul.f32 %v13057_v21, %v7042_v34  ;;  %v7201_v15 = vmul.f32 %v9295_v32, %v7121_v42 }
0x112f   : > { %v13080_v33 = vpop.eup %9296  ;;  %v7072_v23 = vadd.f32 -0.28449672, %v7056_v29  ;;  %v7212_v18 = vsub.f32 1.0, %v7196_v54  ;;  %v7102_v44 = vadd.f32 0.2548296, %v7086_v40  ;;  %9306 = vpow2.f32 %v7188_v43 }
0x1130   : > { %v7091_v6 = vmul.f32 %v13042_v4, %v7075_v55  ;;  %v9299_v38 = vpop.eup %9298  ;;  %v6997_v63 = vmul.f32 1.0614054, %v13080_v33  ;;  %v7074_v5 = vadd.f32 -0.28449672, %v7058_v20  ;;  %v7231_v55 = vmul.f32 %v7215_v62, %v12951_v51 }
0x1131   : > { %v9301_v11 = vpop.eup %9300  ;;  %v7088_v60 = vmul.f32 %v13050_v58, %v7072_v23  ;;  %v7228_v47 = vmul.f32 %v7212_v18, %v12931_v41  ;;  %v7118_v1 = vmul.f32 %v13037_v45, %v7102_v44  ;;  %v7186_v7 = vmul.f32 1.442695, %v7156_v39 }
0x1132   : > { %v7107_v53 = vadd.f32 0.2548296, %v7091_v6  ;;  %v7013_v61 = vadd.f32 -1.4531521, %v6997_v63  ;;  %v13092_v46 = vpop.eup %9302  ;;  %v7090_v24 = vmul.f32 %v13057_v21, %v7074_v5  ;;  %v7217_v42 = vsub.f32 1.0, %v7201_v15 }
0x1133   : > { %v7104_v17 = vadd.f32 0.2548296, %v7088_v60  ;;  %v6996_v25 = vmul.f32 1.0614054, %v13092_v46  ;;  %v7260_v32 = vadd.f32 1.0, %v7228_v47  ;;  %v7277_v40 = vmul.f32 %v7261_v19, %v12896_v37 }
0x1134   : > { %v7123_v16 = vmul.f32 %v13042_v4, %v7107_v53  ;;  %v7029_v13 = vmul.f32 %v13080_v33, %v7013_v61  ;;  %v7198_v4 = vmul.f32 %v13061_v49, %v7118_v1  ;;  %v7106_v43 = vadd.f32 0.2548296, %v7090_v24 }
0x1135   : > { %v7120_v34 = vmul.f32 %v13050_v58, %v7104_v17  ;;  %v7012_v41 = vadd.f32 -1.4531521, %v6996_v25  ;;  %v7276_v63 = vmul.f32 %v7260_v32, %v12920_v56  ;;  %9308 = vpow2.f32 %v7186_v7 }
0x1136   : > { %v7045_v29 = vadd.f32 1.4214138, %v7029_v13  ;;  %v7203_v6 = vmul.f32 %v9301_v11, %v7123_v16  ;;  %v7214_v51 = vsub.f32 1.0, %v7198_v4  ;;  %v7122_v23 = vmul.f32 %v13057_v21, %v7106_v43  ;;  %v9305_v49 = vpop.eup %9304 }
0x1137   : > { %v7200_v54 = vmul.f32 %v9299_v38, %v7120_v34  ;;  %v7028_v62 = vmul.f32 %v13092_v46, %v7012_v41  ;;  %v7263_v53 = vadd.f32 1.0, %v7231_v55  ;;  %8896 = vmatprep.mubr.f32.mxu1 %v7276_v63  ;;  %v7233_v11 = vmul.f32 %v7217_v42, %v13023_v0 }
0x1138   : > { %v7061_v45 = vmul.f32 %v13080_v33, %v7045_v29  ;;  %v7230_v39 = vmul.f32 %v7214_v51, %v12963_v52  ;;  %v7219_v61 = vsub.f32 1.0, %v7203_v6  ;;  %8897 = vmatmul.mubr.f32.gmra.mxu1 %v7277_v40  ;;  %v7202_v56 = vmul.f32 %v9305_v49, %v7122_v23 }
0x1139   : > { %v7216_v20 = vsub.f32 1.0, %v7200_v54  ;;  %v7044_v38 = vadd.f32 1.4214138, %v7028_v62  ;;  %v7248_v37 = vmul.f32 0.5, %v12917_v30  ;;  %v6899_v44 = vsel %vm6883_vm3, 1.0, %v13634_v9 }
0x113a   : > { %v7077_v58 = vadd.f32 -0.28449672, %v7061_v45  ;;  %v7262_v21 = vadd.f32 1.0, %v7230_v39  ;;  %v6898_v52 = vsel %vm6882_vm4, 1.0, %v13634_v9  ;;  %v7218_v0 = vsub.f32 1.0, %v7202_v56 }
0x113b   : > { %v7232_v18 = vmul.f32 %v7216_v20, %v13048_v31  ;;  %v7060_v60 = vmul.f32 %v13092_v46, %v7044_v38  ;;  %v7279_v15 = vmul.f32 %v7263_v53, %v12945_v28  ;;  %v7265_v13 = vadd.f32 1.0, %v7233_v11 }
0x113c   : > { %v7093_v19 = vmul.f32 %v13080_v33, %v7077_v58  ;;  %v7278_v30 = vmul.f32 %v7262_v21, %v12965_v48  ;;  %v7235_v47 = vmul.f32 %v7219_v61, %v6899_v44  ;;  %v7234_v31 = vmul.f32 %v7218_v0, %v6898_v52  ;;  %v9307_v17 = vpop.eup %9306  ;;  %v13636_v21 = vld [vmem:[#allocation42_spill] sm:$0xff] }
0x113d   : > { %v7264_v5 = vadd.f32 1.0, %v7232_v18  ;;  %v7076_v1 = vadd.f32 -0.28449672, %v7060_v60  ;;  %v7250_v7 = vmul.f32 0.5, %v12973_v2  ;;  %v7281_v48 = vmul.f32 %v7265_v13, %v7249_v26  ;;  %v13639_v13 = vld [vmem:[#allocation48_spill] sm:$0xff] }
0x113e   : > { %v7109_v16 = vadd.f32 0.2548296, %v7093_v19  ;;  %8899 = vmatprep.mubr.f32.mxu1 %v7278_v30  ;;  %v7266_v24 = vadd.f32 1.0, %v7234_v31  ;;  %v7267_v29 = vadd.f32 1.0, %v7235_v47  ;;  %v6901_v6 = vsel %vm6885_vm5, 1.0, %v13634_v9 }
0x113f   : > { %v7280_v55 = vmul.f32 %v7264_v5, %v7248_v37  ;;  %8900 = vmatmul.mubr.f32.gmra.mxu1 %v7279_v15  ;;  %v7092_v28 = vmul.f32 %v13092_v46, %v7076_v1  ;;  %vm6884_vm6 = vcmp.ge.f32.partialorder %v13018_v22, 0.0  ;;  %v7868_v22 = vld [vmem:[%s13217_s22] ss:$0 sm:$0xff]  ;;  %v13638_v15 = vld [vmem:[#allocation46_spill] sm:$0xff] }
0x1140   : > { %v7125_v36 = vmul.f32 %v13080_v33, %v7109_v16  ;;  %v7282_v32 = vmul.f32 %v7266_v24, %v7250_v7  ;;  %v7251_v33 = vmul.f32 0.5, %v12959_v10  ;;  %v6900_v12 = vsel %vm6884_vm6, 1.0, %v13634_v9  ;;  %v13641_v7 = vld [vmem:[#allocation52_spill] sm:$0xff] }
0x1141   : > { %8902 = vmatprep.mubr.f32.mxu1 %v7280_v55  ;;  %v7108_v4 = vadd.f32 0.2548296, %v7092_v28  ;;  %v7252_v10 = vmul.f32 0.5, %v13008_v50 }
0x1142   : > { %v7205_v25 = vmul.f32 %v9307_v17, %v7125_v36  ;;  %v9309_v42 = vpop.eup %9308  ;;  %v7283_v2 = vmul.f32 %v7267_v29, %v7251_v33  ;;  %v13640_v17 = vld [vmem:[#allocation50_spill] sm:$0xff] }
0x1143   : > { %8903 = vmatmul.mubr.f32.gmra.mxu1 %v7281_v48  ;;  %v7124_v35 = vmul.f32 %v13092_v46, %v7108_v4  ;;  %v7253_v46 = vmul.f32 0.5, %v13004_v8  ;;  %v13642_v48 = vld [vmem:[#allocation33_spill] sm:$0xff] }
0x1144   : > { %v7221_v34 = vsub.f32 1.0, %v7205_v25  ;;  %8905 = vmatprep.mubr.f32.mxu1 %v7282_v32 }
0x1145   : > { %v7204_v43 = vmul.f32 %v9309_v42, %v7124_v35  ;;  %v13644_v42 = vld [vmem:[#allocation56_spill] sm:$0xff] }
0x1146   : > { %v7237_v41 = vmul.f32 %v7221_v34, %v6901_v6  ;;  %v13643_v34 = vld [vmem:[#allocation54_spill] sm:$0xff] }
0x1147   : > { %8906 = vmatmul.mubr.f32.gmra.mxu1 %v7283_v2  ;;  %v7220_v45 = vsub.f32 1.0, %v7204_v43 }
0x1148   : > { %v7269_v51 = vadd.f32 1.0, %v7237_v41 }
0x1149   : > { %v7236_v63 = vmul.f32 %v7220_v45, %v6900_v12  ;;  %v13645_v45 = vld [vmem:[#allocation12_spill] sm:$0xff] }
0x114a   : > { %v7285_v23 = vmul.f32 %v7269_v51, %v7253_v46  ;;  %v13646_v51 = vld [vmem:[#allocation20_spill] sm:$0xff] }
0x114b   : > { %v7268_v54 = vadd.f32 1.0, %v7236_v63 }
0x114d   : > { %v7284_v40 = vmul.f32 %v7268_v54, %v7252_v10 }
0x114f   : > { %8908 = vmatprep.mubr.f32.mxu1 %v7284_v40 }
0x1150   : > { %8909 = vmatmul.mubr.f32.gmra.mxu1 %v7285_v23 }
0x11c0   : > { %v8889_v62 = vpop.f32.mrf.mxu1 }
0x11c1   : > { %v7381_v49 = vadd.f32 %v8889_v62, %v7868_v22 }
0x11c2   : > { %v7375_v8 = vpop.f32.mrf.mxu1 }
0x11c3   : > { %v7455_v50 = vadd.f32 %v7381_v49, %v12409_v59  ;;  %v7376_v9 = vadd.f32 %v7868_v22, %v7375_v8 }
0x11c5   : > { %7471 = vst.msk [vmem:[%s13142_s3 + $0x8] sm:$0xff] %vm732_vm0, %v7455_v50  ;;  %v7454_v53 = vadd.f32 %v7376_v9, %v12413_v57 }
0x11c7   : > { %7470 = vst.msk [vmem:[%s13142_s3] sm:$0xff] %vm732_vm0, %v7454_v53 }
0x11d2   : > { %v8892_v58 = vpop.f32.mrf.mxu1 }
0x11d3   : > { %v7391_v39 = vadd.f32 %v8892_v58, %v7868_v22 }
0x11d4   : > { %v7385_v20 = vpop.f32.mrf.mxu1 }
0x11d5   : > { %v7457_v11 = vadd.f32 %v7391_v39, %v12421_v3  ;;  %v7386_v61 = vadd.f32 %v7868_v22, %v7385_v20 }
0x11d7   : > { %7473 = vst.msk [vmem:[%s13142_s3 + $0x18] sm:$0xff] %vm732_vm0, %v7457_v11  ;;  %v7456_v59 = vadd.f32 %v7386_v61, %v12425_v14  ;;  %v13637_v14 = vld [vmem:[#allocation44_spill] sm:$0xff] }
0x11d9   : > { %7472 = vst.msk [vmem:[%s13142_s3 + $0x10] sm:$0xff] %vm732_vm0, %v7456_v59 }
0x11eb   : > { %v8895_v56 = vpop.f32.mrf.mxu1 }
0x11ec   : > { %v7401_v38 = vadd.f32 %v8895_v56, %v7868_v22 }
0x11ed   : > { %v7395_v57 = vpop.f32.mrf.mxu1 }
0x11ee   : > { %v7459_v37 = vadd.f32 %v7401_v38, %v12433_v27  ;;  %v7396_v19 = vadd.f32 %v7868_v22, %v7395_v57 }
0x11f0   : > { %7475 = vst.msk [vmem:[%s13142_s3 + $0x28] sm:$0xff] %vm732_vm0, %v7459_v37  ;;  %v7458_v18 = vadd.f32 %v7396_v19, %v13636_v21 }
0x11f2   : > { %7474 = vst.msk [vmem:[%s13142_s3 + $0x20] sm:$0xff] %vm732_vm0, %v7458_v18 }
0x11f8   : > { %v8898_v3 = vpop.f32.mrf.mxu1 }
0x11f9   : > { %v7411_v44 = vadd.f32 %v8898_v3, %v7868_v22 }
0x11fa   : > { %v7405_v52 = vpop.f32.mrf.mxu1 }
0x11fb   : > { %v7461_v0 = vadd.f32 %v7411_v44, %v13637_v14  ;;  %v7406_v60 = vadd.f32 %v7868_v22, %v7405_v52 }
0x11fd   : > { %7477 = vst.msk [vmem:[%s13142_s3 + $0x38] sm:$0xff] %vm732_vm0, %v7461_v0  ;;  %v7460_v16 = vadd.f32 %v7406_v60, %v13638_v15 }
0x11ff   : > { %v8901_v27 = vpop.f32.mrf.mxu1  ;;  %7476 = vst.msk [vmem:[%s13142_s3 + $0x30] sm:$0xff] %vm732_vm0, %v7460_v16 }
0x1200   : > { %v7421_v30 = vadd.f32 %v8901_v27, %v7868_v22 }
0x1201   : > { %v7415_v5 = vpop.f32.mrf.mxu1 }
0x1202   : > { %v7463_v47 = vadd.f32 %v7421_v30, %v13639_v13  ;;  %v7416_v31 = vadd.f32 %v7868_v22, %v7415_v5 }
0x1203   : > { %v8904_v1 = vpop.f32.mrf.mxu1 }
0x1204   : > { %7479 = vst.msk [vmem:[%s13142_s3 + $0x48] sm:$0xff] %vm732_vm0, %v7463_v47  ;;  %v7462_v36 = vadd.f32 %v7416_v31, %v13640_v17  ;;  %v7431_v55 = vadd.f32 %v8904_v1, %v7868_v22 }
0x1205   : > { %v7425_v26 = vpop.f32.mrf.mxu1 }
0x1206   : > { %7478 = vst.msk [vmem:[%s13142_s3 + $0x40] sm:$0xff] %vm732_vm0, %v7462_v36  ;;  %v7465_v24 = vadd.f32 %v7431_v55, %v13641_v7  ;;  %v7426_v28 = vadd.f32 %v7868_v22, %v7425_v26 }
0x1207   : > { %v8907_v25 = vpop.f32.mrf.mxu1 }
0x1208   : > { %7481 = vst.msk [vmem:[%s13142_s3 + $0x58] sm:$0xff] %vm732_vm0, %v7465_v24  ;;  %v7464_v29 = vadd.f32 %v7426_v28, %v13642_v48  ;;  %v7441_v32 = vadd.f32 %v8907_v25, %v7868_v22 }
0x1209   : > { %v7435_v4 = vpop.f32.mrf.mxu1 }
0x120a   : > { %7480 = vst.msk [vmem:[%s13142_s3 + $0x50] sm:$0xff] %vm732_vm0, %v7464_v29  ;;  %v7467_v33 = vadd.f32 %v7441_v32, %v13643_v34  ;;  %v7436_v35 = vadd.f32 %v7868_v22, %v7435_v4 }
0x120c   : > { %7483 = vst.msk [vmem:[%s13142_s3 + $0x68] sm:$0xff] %vm732_vm0, %v7467_v33  ;;  %v7466_v2 = vadd.f32 %v7436_v35, %v13644_v42 }
0x120e   : > { %7482 = vst.msk [vmem:[%s13142_s3 + $0x60] sm:$0xff] %vm732_vm0, %v7466_v2 }
0x1210   : > { %v8910_v6 = vpop.f32.mrf.mxu1 }
0x1211   : > { %v7451_v43 = vadd.f32 %v8910_v6, %v7868_v22 }
0x1212   : > { %v7445_v41 = vpop.f32.mrf.mxu1 }
0x1213   : > { %v7469_v12 = vadd.f32 %v7451_v43, %v13645_v45  ;;  %v7446_v63 = vadd.f32 %v7868_v22, %v7445_v41 }
0x1215   : > { %7485 = vst.msk [vmem:[%s13142_s3 + $0x78] sm:$0xff] %vm732_vm0, %v7469_v12  ;;  %v7468_v10 = vadd.f32 %v7446_v63, %v13646_v51 }
0x1217   : > { %7484 = vst.msk [vmem:[%s13142_s3 + $0x70] sm:$0xff] %vm732_vm0, %v7468_v10 }
0x1218 PF: > { %s33_s4 = sadd.s32 1, %s9348_s4  }
0x1219   : > { %p30_p4 = scmp.ge.s32.totalorder %s33_s4, 4  }
0x121b   :  { %32 = sbr.rel (!%p30_p4) target bundleno = 9 (0x9), region = 205 }

</bundles_post_ra>
